<compile_context>
chip_gen: v7x
topology: tpu7x:2x2x1
jax: 0.10.0
libtpu: 0.0.40
codegen_flags: <defaults>
</compile_context>

<pallas_src>
import functools

import jax
import jax.numpy as jnp
from jax import lax
from jax.experimental import pallas as pl
from jax.experimental.pallas import tpu as pltpu

BN_EPS = 1e-5
L2_EPS = 1e-12


# ----------------------------------------------------------------------------
# helpers
# ----------------------------------------------------------------------------
def _choose_row_tile(m, cap=512):
    """Largest row tile <= cap that divides m (keeps BN stats exact; no padded rows)."""
    for t in (cap, 512, 256, 128, 64, 32, 16, 8):
        if t <= m and m % t == 0:
            return t
    return m


def _full_spec(shape):
    """Whole-array VMEM-resident block (weights / per-channel vectors)."""
    nd = len(shape)
    return pl.BlockSpec(shape, lambda i, _nd=nd: (0,) * _nd)


def _compiler_params(semantics):
    return pltpu.CompilerParams(dimension_semantics=semantics)


def _fold_bn(ssum, ssq, gamma, beta, n):
    """Fold training-mode BN batch stats + affine into per-channel scale/shift."""
    mean = ssum / n                                        # (1, C)
    var = jnp.maximum(ssq / n - mean * mean, 0.0)          # one-pass E[y^2]-E[y]^2
    scale = gamma * lax.rsqrt(var + BN_EPS)
    shift = beta - mean * scale
    return scale, shift


# ----------------------------------------------------------------------------
# Pallas kernels
# ----------------------------------------------------------------------------
def _agg1_kernel(f1_ref, f2_ref, f3_ref, f4_ref, w_ref, y_ref, ssum_ref, ssq_ref):
    """y1 = [f1|f2|f3|f4] @ W_agg1 (concat never materialized) + batch stats of y1."""
    y = jnp.dot(f1_ref[...], w_ref[0], preferred_element_type=jnp.float32)
    y = y + jnp.dot(f2_ref[...], w_ref[1], preferred_element_type=jnp.float32)
    y = y + jnp.dot(f3_ref[...], w_ref[2], preferred_element_type=jnp.float32)
    y = y + jnp.dot(f4_ref[...], w_ref[3], preferred_element_type=jnp.float32)
    y_ref[...] = y

    @pl.when(pl.program_id(0) == 0)
    def _():
        ssum_ref[...] = jnp.zeros_like(ssum_ref)
        ssq_ref[...] = jnp.zeros_like(ssq_ref)

    ssum_ref[...] += jnp.sum(y, axis=0, keepdims=True)
    ssq_ref[...] += jnp.sum(y * y, axis=0, keepdims=True)


def _bn_relu_mm_kernel(y_ref, sc_ref, sh_ref, w_ref, z_ref, ssum_ref, ssq_ref):
    """z = relu(y*scale + shift) @ W   (+ batch stats of z)."""
    h = jnp.maximum(y_ref[...] * sc_ref[...] + sh_ref[...], 0.0)
    z = jnp.dot(h.astype(jnp.bfloat16), w_ref[...], preferred_element_type=jnp.float32)
    z_ref[...] = z

    @pl.when(pl.program_id(0) == 0)
    def _():
        ssum_ref[...] = jnp.zeros_like(ssum_ref)
        ssq_ref[...] = jnp.zeros_like(ssq_ref)

    ssum_ref[...] += jnp.sum(z, axis=0, keepdims=True)
    ssq_ref[...] += jnp.sum(z * z, axis=0, keepdims=True)


def _bn_relu_mm_keep_kernel(y_ref, sc_ref, sh_ref, w_ref,
                            h_ref, z_ref, ssum_ref, ssq_ref):
    """Same as above but also emits the BN+ReLU activation (hd_feature)."""
    h = jnp.maximum(y_ref[...] * sc_ref[...] + sh_ref[...], 0.0)
    h_ref[...] = h
    z = jnp.dot(h.astype(jnp.bfloat16), w_ref[...], preferred_element_type=jnp.float32)
    z_ref[...] = z

    @pl.when(pl.program_id(0) == 0)
    def _():
        ssum_ref[...] = jnp.zeros_like(ssum_ref)
        ssq_ref[...] = jnp.zeros_like(ssq_ref)

    ssum_ref[...] += jnp.sum(z, axis=0, keepdims=True)
    ssq_ref[...] += jnp.sum(z * z, axis=0, keepdims=True)


def _flag_kernel(y_ref, sc_ref, sh_ref, w_ref, b_ref, o_ref):
    """flags = relu(y*scale + shift) @ blockdiag(Wz2,Wxy2,Wline2) + b  -> (tm, 8)."""
    f = jnp.maximum(y_ref[...] * sc_ref[...] + sh_ref[...], 0.0)
    o_ref[...] = (jnp.dot(f.astype(jnp.bfloat16), w_ref[...],
                          preferred_element_type=jnp.float32) + b_ref[...])


def _l2norm_kernel(x_ref, o_ref):
    x = x_ref[...]
    ssq = jnp.sum(x * x, axis=-1, keepdims=True)
    o_ref[...] = x * lax.rsqrt(ssq + L2_EPS)


# ----------------------------------------------------------------------------
# Pallas wrappers
# ----------------------------------------------------------------------------
def hd_descriptor_and_flags(feats, params, M):
    """feats: 4 x (M, 256) bf16.  Returns hd_feature (M, 256) f32, flags (M, 8) f32."""
    tm = _choose_row_tile(M)
    grid = (M // tm,)
    arb = _compiler_params(("arbitrary",))   # stats accumulate across row tiles
    par = _compiler_params(("parallel",))    # independent row tiles (megacore on v7x)

    def rows(c):
        return pl.BlockSpec((tm, c), lambda i: (i, 0))

    # pass 1: y1 = concat(feats) @ W_agg1 (four accumulated dots) + stats(y1)
    y1, s1, q1 = pl.pallas_call(
        _agg1_kernel,
        grid=grid,
        in_specs=[rows(256)] * 4 + [_full_spec((4, 256, 512))],
        out_specs=(rows(512), _full_spec((1, 512)), _full_spec((1, 512))),
        out_shape=(jax.ShapeDtypeStruct((M, 512), jnp.float32),
                   jax.ShapeDtypeStruct((1, 512), jnp.float32),
                   jax.ShapeDtypeStruct((1, 512), jnp.float32)),
        compiler_params=arb,
    )(*feats, params["w_agg1"])
    sc1, sh1 = _fold_bn(s1, q1, params["g_agg1"], params["be_agg1"], M)

    # pass 2: y2 = relu(bn1(y1)) @ W_agg2 + stats(y2)
    y2, s2, q2 = pl.pallas_call(
        _bn_relu_mm_kernel,
        grid=grid,
        in_specs=[rows(512), _full_spec((1, 512)), _full_spec((1, 512)),
                  _full_spec((512, 256))],
        out_specs=(rows(256), _full_spec((1, 256)), _full_spec((1, 256))),
        out_shape=(jax.ShapeDtypeStruct((M, 256), jnp.float32),
                   jax.ShapeDtypeStruct((1, 256), jnp.float32),
                   jax.ShapeDtypeStruct((1, 256), jnp.float32)),
        compiler_params=arb,
    )(y1, sc1, sh1, params["w_agg2"])
    sc2, sh2 = _fold_bn(s2, q2, params["g_agg2"], params["be_agg2"], M)

    # pass 3: hd = relu(bn2(y2)); y3 = hd @ [Wz1|Wxy1|Wline1] (fused 384-wide) + stats(y3)
    hd, y3, s3, q3 = pl.pallas_call(
        _bn_relu_mm_keep_kernel,
        grid=grid,
        in_specs=[rows(256), _full_spec((1, 256)), _full_spec((1, 256)),
                  _full_spec((256, 384))],
        out_specs=(rows(256), rows(384), _full_spec((1, 384)), _full_spec((1, 384))),
        out_shape=(jax.ShapeDtypeStruct((M, 256), jnp.float32),
                   jax.ShapeDtypeStruct((M, 384), jnp.float32),
                   jax.ShapeDtypeStruct((1, 384), jnp.float32),
                   jax.ShapeDtypeStruct((1, 384), jnp.float32)),
        compiler_params=arb,
    )(y2, sc2, sh2, params["w_flag1"])
    sc3, sh3 = _fold_bn(s3, q3, params["g_flag1"], params["be_flag1"], M)

    # pass 4: flags = relu(bn3(y3)) @ blockdiag(Wz2,Wxy2,Wline2) + b  -> lane-packed (M, 8)
    flags = pl.pallas_call(
        _flag_kernel,
        grid=grid,
        in_specs=[rows(384), _full_spec((1, 384)), _full_spec((1, 384)),
                  _full_spec((384, 8)), _full_spec((1, 8))],
        out_specs=rows(8),
        out_shape=jax.ShapeDtypeStruct((M, 8), jnp.float32),
        compiler_params=par,
    )(y3, sc3, sh3, params["w_flag2"], params["b_flag2"])

    return hd, flags


def l2_normalize_rows(x):
    """Row-wise L2 normalization (rsqrt + eps), tiled over rows."""
    M, C = x.shape
    tm = _choose_row_tile(M)
    return pl.pallas_call(
        _l2norm_kernel,
        grid=(M // tm,),
        in_specs=[pl.BlockSpec((tm, C), lambda i: (i, 0))],
        out_specs=pl.BlockSpec((tm, C), lambda i: (i, 0)),
        out_shape=jax.ShapeDtypeStruct((M, C), jnp.float32),
        compiler_params=_compiler_params(("parallel",)),
    )(x)


# ----------------------------------------------------------------------------
# Parameters
# ----------------------------------------------------------------------------
def init_hd_params(key):
    ks = jax.random.split(key, 4)
    s = 0.05
    # Conv biases that precede training-mode BN are dropped (cancel under mean-sub).
    w_agg1 = (jax.random.normal(ks[0], (1024, 512), jnp.float32) * s)
    w_agg1 = w_agg1.reshape(4, 256, 512).astype(jnp.bfloat16)
    g_agg1 = jnp.ones((1, 512), jnp.float32)
    be_agg1 = jnp.zeros((1, 512), jnp.float32)

    w_agg2 = (jax.random.normal(ks[1], (512, 256), jnp.float32) * s).astype(jnp.bfloat16)
    g_agg2 = jnp.ones((1, 256), jnp.float32)
    be_agg2 = jnp.zeros((1, 256), jnp.float32)

    # three 256->128 flag heads fused along the output (lane) axis -> (256, 384)
    wf1 = jax.random.normal(ks[2], (3, 256, 128), jnp.float32) * s
    w_flag1 = jnp.concatenate([wf1[0], wf1[1], wf1[2]], axis=1).astype(jnp.bfloat16)
    g_flag1 = jnp.ones((1, 384), jnp.float32)
    be_flag1 = jnp.zeros((1, 384), jnp.float32)

    # three 128->2 heads as one block-diagonal (384, 8); cols 0:2 z, 2:4 xy, 4:6 line, 6:8 pad
    wf2 = jax.random.normal(ks[3], (3, 128, 2), jnp.float32) * s
    w_flag2 = jnp.zeros((384, 8), jnp.float32)
    for i in range(3):
        w_flag2 = w_flag2.at[i * 128:(i + 1) * 128, 2 * i:2 * i + 2].set(wf2[i])
    w_flag2 = w_flag2.astype(jnp.bfloat16)
    b_flag2 = jnp.zeros((1, 8), jnp.float32)

    return dict(w_agg1=w_agg1, g_agg1=g_agg1, be_agg1=be_agg1,
                w_agg2=w_agg2, g_agg2=g_agg2, be_agg2=be_agg2,
                w_flag1=w_flag1, g_flag1=g_flag1, be_flag1=be_flag1,
                w_flag2=w_flag2, b_flag2=b_flag2)


# ----------------------------------------------------------------------------
# Plain-JAX glue / stubs for submodules whose definitions are not provided.
# ----------------------------------------------------------------------------
def _bn_relu_ref(y, gamma, beta):
    """Training-mode BatchNorm1d + ReLU (plain JAX, used only inside stubs)."""
    mean = jnp.mean(y, axis=0, keepdims=True)
    var = jnp.maximum(jnp.mean(y * y, axis=0, keepdims=True) - mean * mean, 0.0)
    return jnp.maximum((y - mean) * lax.rsqrt(var + BN_EPS) * gamma + beta, 0.0)


def backbone_stub(point_clouds, key, n_seed):
    # TODO(synk): Pointnet2Backbone (FPS / ball-query set abstraction) source not
    # provided; deterministic stub producing fp2_xyz / fp2_features / fp2_inds.
    B = point_clouds.shape[0]
    w = jax.random.normal(key, (3, 256), jnp.float32) * 0.5
    xyz = point_clouds[:, :n_seed, :3]                                # (B, Ns, 3)
    feats = jnp.tanh(xyz @ w)                                         # (B, Ns, 256)
    inds = jnp.broadcast_to(jnp.arange(n_seed, dtype=jnp.int32), (B, n_seed))
    return xyz, feats, inds


def init_vote_params(key):
    ks = jax.random.split(key, 3)
    s = 0.05
    return dict(
        w1=jax.random.normal(ks[0], (256, 256), jnp.float32) * s,
        g1=jnp.ones((256,), jnp.float32), be1=jnp.zeros((256,), jnp.float32),
        w2=jax.random.normal(ks[1], (256, 256), jnp.float32) * s,
        g2=jnp.ones((256,), jnp.float32), be2=jnp.zeros((256,), jnp.float32),
        w3=jax.random.normal(ks[2], (256, 259), jnp.float32) * s,
        b3=jnp.zeros((259,), jnp.float32),
    )


def voting_module(seed_xyz, seed_feat_flat, p):
    # TODO(synk): VotingModule source not provided; standard VoteNet voting MLP
    # (vote_factor=1) implemented in plain JAX (biases before BN dropped).
    B, Ns, _ = seed_xyz.shape
    net = _bn_relu_ref(seed_feat_flat @ p["w1"], p["g1"], p["be1"])
    net = _bn_relu_ref(net @ p["w2"], p["g2"], p["be2"])
    net = net @ p["w3"] + p["b3"]                                     # (M, 3 + 256)
    offset = net[:, :3].reshape(B, Ns, 3)
    residual = net[:, 3:]
    return seed_xyz + offset, seed_feat_flat + residual, offset, residual


# ----------------------------------------------------------------------------
# Forward
# ----------------------------------------------------------------------------
@functools.partial(jax.jit, static_argnames=("n_seed",))
def hdnet_forward(point_clouds, key_backbone, key_hd, key_vote, n_seed=128):
    B = point_clouds.shape[0]
    M = B * n_seed
    end_points = {}

    # --- 4 backbones (stubbed) ------------------------------------------------
    bb_keys = jax.random.split(key_backbone, 4)
    xyz, feats1, inds = backbone_stub(point_clouds, bb_keys[0], n_seed)
    _, feats2, _ = backbone_stub(point_clouds, bb_keys[1], n_seed)
    _, feats3, _ = backbone_stub(point_clouds, bb_keys[2], n_seed)
    _, feats4, _ = backbone_stub(point_clouds, bb_keys[3], n_seed)

    end_points["seed_inds"] = inds
    end_points["seed_xyz"] = xyz                                      # (B, Ns, 3)
    end_points["seed_features"] = jnp.transpose(feats1, (0, 2, 1))    # (B, 256, Ns)

    # Pass the four feature slabs separately (concat never materialized), in bf16.
    feats = [f.reshape(M, 256).astype(jnp.bfloat16)
             for f in (feats1, feats2, feats3, feats4)]

    # --- HD descriptor + fused flag heads (Pallas, tiled over M) --------------
    hd_params = init_hd_params(key_hd)
    hd_flat, flags = hd_descriptor_and_flags(feats, hd_params, M)     # (M,256), (M,8)

    hd_bnc = hd_flat.reshape(B, n_seed, 256)
    end_points["hd_feature"] = jnp.transpose(hd_bnc, (0, 2, 1))       # (B, 256, Ns)
    flags_b = flags.reshape(B, n_seed, 8)
    end_points["pred_flag_z"] = jnp.transpose(flags_b[..., 0:2], (0, 2, 1))     # (B, 2, Ns)
    end_points["pred_flag_xy"] = jnp.transpose(flags_b[..., 2:4], (0, 2, 1))    # (B, 2, Ns)
    end_points["pred_flag_line"] = jnp.transpose(flags_b[..., 4:6], (0, 2, 1))  # (B, 2, Ns)

    # --- 4 voting modules (plain JAX stubs) + one batched Pallas L2-norm pass --
    vote_keys = jax.random.split(key_vote, 4)
    names = [("vote_xyz", "vote_features"),
             ("vote_z", "vote_z_feature"),
             ("vote_xy", "vote_xy_feature"),
             ("vote_line", "vote_line_feature")]
    v_xyzs, v_feats = [], []
    for k in vote_keys:
        vp = init_vote_params(k)
        v_xyz, v_feat_flat, _, _ = voting_module(xyz, hd_flat, vp)
        v_xyzs.append(v_xyz)
        v_feats.append(v_feat_flat)

    v_feat_all = l2_normalize_rows(jnp.concatenate(v_feats, axis=0))  # (4*M, 256)
    for idx, (xyz_name, feat_name) in enumerate(names):
        vf = v_feat_all[idx * M:(idx + 1) * M]
        end_points[xyz_name] = v_xyzs[idx]                            # (B, Ns, 3)
        end_points[feat_name] = jnp.transpose(vf.reshape(B, n_seed, 256), (0, 2, 1))

    # TODO(synk): PrimitiveModule (pnet_z/xy/line) and ProposalModuleRefine
    # (pnet_final) sources are not provided; their compute is not reproduced.
    return end_points


if __name__ == "__main__":
    key = jax.random.PRNGKey(0)
    k_pc, k_bb, k_hd, k_vote = jax.random.split(key, 4)

    B, N_PTS, N_SEED = 2, 1024, 128
    point_clouds = jax.random.normal(k_pc, (B, N_PTS, 3), jnp.float32)

    end_points = hdnet_forward(point_clouds, k_bb, k_hd, k_vote, n_seed=N_SEED)
    jax.block_until_ready(end_points)

    # light sanity checks on shapes / finiteness
    assert end_points["hd_feature"].shape == (B, 256, N_SEED)
    assert end_points["pred_flag_z"].shape == (B, 2, N_SEED)
    assert end_points["pred_flag_xy"].shape == (B, 2, N_SEED)
    assert end_points["pred_flag_line"].shape == (B, 2, N_SEED)
    assert end_points["vote_features"].shape == (B, 256, N_SEED)
    assert bool(jnp.all(jnp.isfinite(end_points["hd_feature"])))
    assert bool(jnp.all(jnp.isfinite(end_points["pred_flag_z"])))
    assert bool(jnp.all(jnp.isfinite(end_points["vote_features"])))
    # L2 norm check: every vote-feature column vector should have unit norm
    vn = jnp.linalg.norm(end_points["vote_features"], axis=1)
    assert bool(jnp.all(jnp.abs(vn - 1.0) < 1e-2))

    print("KERNEL_OK")
</pallas_src>

<mosaic_0001>
module attributes {stable_mosaic.version = 11 : i64} {
  func.func @_agg1_kernel(%arg0: i32, %arg1: memref<256x256xbf16, #tpu.memory_space<vmem>>, %arg2: memref<256x256xbf16, #tpu.memory_space<vmem>>, %arg3: memref<256x256xbf16, #tpu.memory_space<vmem>>, %arg4: memref<256x256xbf16, #tpu.memory_space<vmem>>, %arg5: memref<4x256x512xbf16, #tpu.memory_space<vmem>>, %arg6: memref<256x512xf32, #tpu.memory_space<vmem>>, %arg7: memref<1x512xf32, #tpu.memory_space<vmem>>, %arg8: memref<1x512xf32, #tpu.memory_space<vmem>>) attributes {dimension_semantics = [#tpu.dimension_semantics<arbitrary>], iteration_bounds = array<i64: 1>, scalar_prefetch = 0 : i64, scratch_operands = 0 : i64, tpu.core_type = #tpu.core_type<tc>, window_params = [{transform_indices = @transform_0, window_bounds = array<i64: 256, 256>}, {transform_indices = @transform_1, window_bounds = array<i64: 256, 256>}, {transform_indices = @transform_2, window_bounds = array<i64: 256, 256>}, {transform_indices = @transform_3, window_bounds = array<i64: 256, 256>}, {pipeline_mode = #tpu.pipeline_mode<synchronous>, transform_indices = @transform_4, window_bounds = array<i64: 4, 256, 512>}, {transform_indices = @transform_5, window_bounds = array<i64: 256, 512>}, {pipeline_mode = #tpu.pipeline_mode<synchronous>, transform_indices = @transform_6, window_bounds = array<i64: 1, 512>}, {pipeline_mode = #tpu.pipeline_mode<synchronous>, transform_indices = @transform_7, window_bounds = array<i64: 1, 512>}]} {
    %c0 = arith.constant 0 : index
    %c0_0 = arith.constant 0 : index
    %0 = vector.load %arg1[%c0, %c0_0] : memref<256x256xbf16, #tpu.memory_space<vmem>>, vector<256x256xbf16>
    %c0_1 = arith.constant 0 : index
    %c0_2 = arith.constant 0 : index
    %c0_3 = arith.constant 0 : index
    %1 = vector.load %arg5[%c0_1, %c0_2, %c0_3] : memref<4x256x512xbf16, #tpu.memory_space<vmem>>, vector<1x256x512xbf16>
    %2 = vector.shape_cast %1 : vector<1x256x512xbf16> to vector<256x512xbf16>
    %cst = arith.constant dense<0.000000e+00> : vector<256x512xf32>
    %3 = tpu.matmul %0, %2, %cst {dimension_numbers = #tpu.dot_dimension_numbers<[1], [0], [0], [1], [0, 0, 1, 1], [], []>} : vector<256x256xbf16>, vector<256x512xbf16>, vector<256x512xf32> -> vector<256x512xf32>
    %c0_4 = arith.constant 0 : index
    %c0_5 = arith.constant 0 : index
    %4 = vector.load %arg2[%c0_4, %c0_5] : memref<256x256xbf16, #tpu.memory_space<vmem>>, vector<256x256xbf16>
    %c1 = arith.constant 1 : index
    %c0_6 = arith.constant 0 : index
    %c0_7 = arith.constant 0 : index
    %5 = vector.load %arg5[%c1, %c0_6, %c0_7] : memref<4x256x512xbf16, #tpu.memory_space<vmem>>, vector<1x256x512xbf16>
    %6 = vector.shape_cast %5 : vector<1x256x512xbf16> to vector<256x512xbf16>
    %cst_8 = arith.constant dense<0.000000e+00> : vector<256x512xf32>
    %7 = tpu.matmul %4, %6, %cst_8 {dimension_numbers = #tpu.dot_dimension_numbers<[1], [0], [0], [1], [0, 0, 1, 1], [], []>} : vector<256x256xbf16>, vector<256x512xbf16>, vector<256x512xf32> -> vector<256x512xf32>
    %8 = arith.addf %3, %7 : vector<256x512xf32>
    %c0_9 = arith.constant 0 : index
    %c0_10 = arith.constant 0 : index
    %9 = vector.load %arg3[%c0_9, %c0_10] : memref<256x256xbf16, #tpu.memory_space<vmem>>, vector<256x256xbf16>
    %c2 = arith.constant 2 : index
    %c0_11 = arith.constant 0 : index
    %c0_12 = arith.constant 0 : index
    %10 = vector.load %arg5[%c2, %c0_11, %c0_12] : memref<4x256x512xbf16, #tpu.memory_space<vmem>>, vector<1x256x512xbf16>
    %11 = vector.shape_cast %10 : vector<1x256x512xbf16> to vector<256x512xbf16>
    %cst_13 = arith.constant dense<0.000000e+00> : vector<256x512xf32>
    %12 = tpu.matmul %9, %11, %cst_13 {dimension_numbers = #tpu.dot_dimension_numbers<[1], [0], [0], [1], [0, 0, 1, 1], [], []>} : vector<256x256xbf16>, vector<256x512xbf16>, vector<256x512xf32> -> vector<256x512xf32>
    %13 = arith.addf %8, %12 : vector<256x512xf32>
    %c0_14 = arith.constant 0 : index
    %c0_15 = arith.constant 0 : index
    %14 = vector.load %arg4[%c0_14, %c0_15] : memref<256x256xbf16, #tpu.memory_space<vmem>>, vector<256x256xbf16>
    %c3 = arith.constant 3 : index
    %c0_16 = arith.constant 0 : index
    %c0_17 = arith.constant 0 : index
    %15 = vector.load %arg5[%c3, %c0_16, %c0_17] : memref<4x256x512xbf16, #tpu.memory_space<vmem>>, vector<1x256x512xbf16>
    %16 = vector.shape_cast %15 : vector<1x256x512xbf16> to vector<256x512xbf16>
    %cst_18 = arith.constant dense<0.000000e+00> : vector<256x512xf32>
    %17 = tpu.matmul %14, %16, %cst_18 {dimension_numbers = #tpu.dot_dimension_numbers<[1], [0], [0], [1], [0, 0, 1, 1], [], []>} : vector<256x256xbf16>, vector<256x512xbf16>, vector<256x512xf32> -> vector<256x512xf32>
    %18 = arith.addf %13, %17 : vector<256x512xf32>
    %c0_19 = arith.constant 0 : index
    %c0_20 = arith.constant 0 : index
    %19 = vector.load %arg6[%c0_19, %c0_20] : memref<256x512xf32, #tpu.memory_space<vmem>>, vector<256x512xf32>
    tpu.vector_store %arg6[%c0_19, %c0_20], %18 {strides = array<i32>} : memref<256x512xf32, #tpu.memory_space<vmem>>, vector<256x512xf32>,
    %c0_i32 = arith.constant 0 : i32
    %20 = arith.cmpi eq, %arg0, %c0_i32 : i32
    %21 = arith.extui %20 : i1 to i32
    %c0_i32_21 = arith.constant 0 : i32
    %22 = arith.cmpi ne, %21, %c0_i32_21 : i32
    scf.if %22 {
      %cst_32 = arith.constant 0.000000e+00 : f32
      %34 = vector.broadcast %cst_32 : f32 to vector<1x512xf32>
      %c0_33 = arith.constant 0 : index
      %c0_34 = arith.constant 0 : index
      %35 = vector.load %arg7[%c0_33, %c0_34] : memref<1x512xf32, #tpu.memory_space<vmem>>, vector<1x512xf32>
      tpu.vector_store %arg7[%c0_33, %c0_34], %34 {strides = array<i32>} : memref<1x512xf32, #tpu.memory_space<vmem>>, vector<1x512xf32>,
      %cst_35 = arith.constant 0.000000e+00 : f32
      %36 = vector.broadcast %cst_35 : f32 to vector<1x512xf32>
      %c0_36 = arith.constant 0 : index
      %c0_37 = arith.constant 0 : index
      %37 = vector.load %arg8[%c0_36, %c0_37] : memref<1x512xf32, #tpu.memory_space<vmem>>, vector<1x512xf32>
      tpu.vector_store %arg8[%c0_36, %c0_37], %36 {strides = array<i32>} : memref<1x512xf32, #tpu.memory_space<vmem>>, vector<1x512xf32>,
    } else {
    }
    %c0_22 = arith.constant 0 : index
    %c0_23 = arith.constant 0 : index
    %23 = vector.load %arg7[%c0_22, %c0_23] : memref<1x512xf32, #tpu.memory_space<vmem>>, vector<1x512xf32>
    %cst_24 = arith.constant dense<0.000000e+00> : vector<512xf32>
    %24 = vector.multi_reduction <add>, %18, %cst_24 [0] : vector<256x512xf32> to vector<512xf32>
    %25 = vector.shape_cast %24 : vector<512xf32> to vector<1x512xf32>
    %26 = arith.addf %23, %25 : vector<1x512xf32>
    %c0_25 = arith.constant 0 : index
    %c0_26 = arith.constant 0 : index
    %27 = vector.load %arg7[%c0_25, %c0_26] : memref<1x512xf32, #tpu.memory_space<vmem>>, vector<1x512xf32>
    tpu.vector_store %arg7[%c0_25, %c0_26], %26 {strides = array<i32>} : memref<1x512xf32, #tpu.memory_space<vmem>>, vector<1x512xf32>,
    %c0_27 = arith.constant 0 : index
    %c0_28 = arith.constant 0 : index
    %28 = vector.load %arg8[%c0_27, %c0_28] : memref<1x512xf32, #tpu.memory_space<vmem>>, vector<1x512xf32>
    %29 = arith.mulf %18, %18 : vector<256x512xf32>
    %cst_29 = arith.constant dense<0.000000e+00> : vector<512xf32>
    %30 = vector.multi_reduction <add>, %29, %cst_29 [0] : vector<256x512xf32> to vector<512xf32>
    %31 = vector.shape_cast %30 : vector<512xf32> to vector<1x512xf32>
    %32 = arith.addf %28, %31 : vector<1x512xf32>
    %c0_30 = arith.constant 0 : index
    %c0_31 = arith.constant 0 : index
    %33 = vector.load %arg8[%c0_30, %c0_31] : memref<1x512xf32, #tpu.memory_space<vmem>>, vector<1x512xf32>
    tpu.vector_store %arg8[%c0_30, %c0_31], %32 {strides = array<i32>} : memref<1x512xf32, #tpu.memory_space<vmem>>, vector<1x512xf32>,
    return
  }
  func.func @transform_0(%arg0: i32) -> (i32, i32) {
    %c0_i32 = arith.constant 0 : i32
    %c0_i32_0 = arith.constant 0 : i32
    return %arg0, %c0_i32 : i32, i32
  }
  func.func @transform_1(%arg0: i32) -> (i32, i32) {
    %c0_i32 = arith.constant 0 : i32
    %c0_i32_0 = arith.constant 0 : i32
    return %arg0, %c0_i32 : i32, i32
  }
  func.func @transform_2(%arg0: i32) -> (i32, i32) {
    %c0_i32 = arith.constant 0 : i32
    %c0_i32_0 = arith.constant 0 : i32
    return %arg0, %c0_i32 : i32, i32
  }
  func.func @transform_3(%arg0: i32) -> (i32, i32) {
    %c0_i32 = arith.constant 0 : i32
    %c0_i32_0 = arith.constant 0 : i32
    return %arg0, %c0_i32 : i32, i32
  }
  func.func @transform_4(%arg0: i32) -> (i32, i32, i32) {
    %c0_i32 = arith.constant 0 : i32
    %c0_i32_0 = arith.constant 0 : i32
    %c0_i32_1 = arith.constant 0 : i32
    %c0_i32_2 = arith.constant 0 : i32
    return %c0_i32, %c0_i32_0, %c0_i32_1 : i32, i32, i32
  }
  func.func @transform_5(%arg0: i32) -> (i32, i32) {
    %c0_i32 = arith.constant 0 : i32
    %c0_i32_0 = arith.constant 0 : i32
    return %arg0, %c0_i32 : i32, i32
  }
  func.func @transform_6(%arg0: i32) -> (i32, i32) {
    %c0_i32 = arith.constant 0 : i32
    %c0_i32_0 = arith.constant 0 : i32
    %c0_i32_1 = arith.constant 0 : i32
    return %c0_i32, %c0_i32_0 : i32, i32
  }
  func.func @transform_7(%arg0: i32) -> (i32, i32) {
    %c0_i32 = arith.constant 0 : i32
    %c0_i32_0 = arith.constant 0 : i32
    %c0_i32_1 = arith.constant 0 : i32
    return %c0_i32, %c0_i32_0 : i32, i32
  }
}

module attributes {stable_mosaic.version = 11 : i64} {
  func.func @_bn_relu_mm_kernel(%arg0: i32, %arg1: memref<256x512xf32, #tpu.memory_space<vmem>>, %arg2: memref<1x512xf32, #tpu.memory_space<vmem>>, %arg3: memref<1x512xf32, #tpu.memory_space<vmem>>, %arg4: memref<512x256xbf16, #tpu.memory_space<vmem>>, %arg5: memref<256x256xf32, #tpu.memory_space<vmem>>, %arg6: memref<1x256xf32, #tpu.memory_space<vmem>>, %arg7: memref<1x256xf32, #tpu.memory_space<vmem>>) attributes {dimension_semantics = [#tpu.dimension_semantics<arbitrary>], iteration_bounds = array<i64: 1>, scalar_prefetch = 0 : i64, scratch_operands = 0 : i64, tpu.core_type = #tpu.core_type<tc>, window_params = [{transform_indices = @transform_0, window_bounds = array<i64: 256, 512>}, {pipeline_mode = #tpu.pipeline_mode<synchronous>, transform_indices = @transform_1, window_bounds = array<i64: 1, 512>}, {pipeline_mode = #tpu.pipeline_mode<synchronous>, transform_indices = @transform_2, window_bounds = array<i64: 1, 512>}, {pipeline_mode = #tpu.pipeline_mode<synchronous>, transform_indices = @transform_3, window_bounds = array<i64: 512, 256>}, {transform_indices = @transform_4, window_bounds = array<i64: 256, 256>}, {pipeline_mode = #tpu.pipeline_mode<synchronous>, transform_indices = @transform_5, window_bounds = array<i64: 1, 256>}, {pipeline_mode = #tpu.pipeline_mode<synchronous>, transform_indices = @transform_6, window_bounds = array<i64: 1, 256>}]} {
    %c0 = arith.constant 0 : index
    %c0_0 = arith.constant 0 : index
    %0 = vector.load %arg1[%c0, %c0_0] : memref<256x512xf32, #tpu.memory_space<vmem>>, vector<256x512xf32>
    %c0_1 = arith.constant 0 : index
    %c0_2 = arith.constant 0 : index
    %1 = vector.load %arg2[%c0_1, %c0_2] : memref<1x512xf32, #tpu.memory_space<vmem>>, vector<1x512xf32>
    %2 = vector.broadcast %1 : vector<1x512xf32> to vector<256x512xf32>
    %3 = arith.mulf %0, %2 : vector<256x512xf32>
    %c0_3 = arith.constant 0 : index
    %c0_4 = arith.constant 0 : index
    %4 = vector.load %arg3[%c0_3, %c0_4] : memref<1x512xf32, #tpu.memory_space<vmem>>, vector<1x512xf32>
    %5 = vector.broadcast %4 : vector<1x512xf32> to vector<256x512xf32>
    %6 = arith.addf %3, %5 : vector<256x512xf32>
    %cst = arith.constant 0.000000e+00 : f32
    %7 = vector.broadcast %cst : f32 to vector<256x512xf32>
    %8 = arith.maximumf %6, %7 : vector<256x512xf32>
    %9 = arith.truncf %8 : vector<256x512xf32> to vector<256x512xbf16>
    %c0_5 = arith.constant 0 : index
    %c0_6 = arith.constant 0 : index
    %10 = vector.load %arg4[%c0_5, %c0_6] : memref<512x256xbf16, #tpu.memory_space<vmem>>, vector<512x256xbf16>
    %cst_7 = arith.constant dense<0.000000e+00> : vector<256x256xf32>
    %11 = tpu.matmul %9, %10, %cst_7 {dimension_numbers = #tpu.dot_dimension_numbers<[1], [0], [0], [1], [0, 0, 1, 1], [], []>} : vector<256x512xbf16>, vector<512x256xbf16>, vector<256x256xf32> -> vector<256x256xf32>
    %c0_8 = arith.constant 0 : index
    %c0_9 = arith.constant 0 : index
    %12 = vector.load %arg5[%c0_8, %c0_9] : memref<256x256xf32, #tpu.memory_space<vmem>>, vector<256x256xf32>
    tpu.vector_store %arg5[%c0_8, %c0_9], %11 {strides = array<i32>} : memref<256x256xf32, #tpu.memory_space<vmem>>, vector<256x256xf32>,
    %c0_i32 = arith.constant 0 : i32
    %13 = arith.cmpi eq, %arg0, %c0_i32 : i32
    %14 = arith.extui %13 : i1 to i32
    %c0_i32_10 = arith.constant 0 : i32
    %15 = arith.cmpi ne, %14, %c0_i32_10 : i32
    scf.if %15 {
      %cst_21 = arith.constant 0.000000e+00 : f32
      %27 = vector.broadcast %cst_21 : f32 to vector<1x256xf32>
      %c0_22 = arith.constant 0 : index
      %c0_23 = arith.constant 0 : index
      %28 = vector.load %arg6[%c0_22, %c0_23] : memref<1x256xf32, #tpu.memory_space<vmem>>, vector<1x256xf32>
      tpu.vector_store %arg6[%c0_22, %c0_23], %27 {strides = array<i32>} : memref<1x256xf32, #tpu.memory_space<vmem>>, vector<1x256xf32>,
      %cst_24 = arith.constant 0.000000e+00 : f32
      %29 = vector.broadcast %cst_24 : f32 to vector<1x256xf32>
      %c0_25 = arith.constant 0 : index
      %c0_26 = arith.constant 0 : index
      %30 = vector.load %arg7[%c0_25, %c0_26] : memref<1x256xf32, #tpu.memory_space<vmem>>, vector<1x256xf32>
      tpu.vector_store %arg7[%c0_25, %c0_26], %29 {strides = array<i32>} : memref<1x256xf32, #tpu.memory_space<vmem>>, vector<1x256xf32>,
    } else {
    }
    %c0_11 = arith.constant 0 : index
    %c0_12 = arith.constant 0 : index
    %16 = vector.load %arg6[%c0_11, %c0_12] : memref<1x256xf32, #tpu.memory_space<vmem>>, vector<1x256xf32>
    %cst_13 = arith.constant dense<0.000000e+00> : vector<256xf32>
    %17 = vector.multi_reduction <add>, %11, %cst_13 [0] : vector<256x256xf32> to vector<256xf32>
    %18 = vector.shape_cast %17 : vector<256xf32> to vector<1x256xf32>
    %19 = arith.addf %16, %18 : vector<1x256xf32>
    %c0_14 = arith.constant 0 : index
    %c0_15 = arith.constant 0 : index
    %20 = vector.load %arg6[%c0_14, %c0_15] : memref<1x256xf32, #tpu.memory_space<vmem>>, vector<1x256xf32>
    tpu.vector_store %arg6[%c0_14, %c0_15], %19 {strides = array<i32>} : memref<1x256xf32, #tpu.memory_space<vmem>>, vector<1x256xf32>,
    %c0_16 = arith.constant 0 : index
    %c0_17 = arith.constant 0 : index
    %21 = vector.load %arg7[%c0_16, %c0_17] : memref<1x256xf32, #tpu.memory_space<vmem>>, vector<1x256xf32>
    %22 = arith.mulf %11, %11 : vector<256x256xf32>
    %cst_18 = arith.constant dense<0.000000e+00> : vector<256xf32>
    %23 = vector.multi_reduction <add>, %22, %cst_18 [0] : vector<256x256xf32> to vector<256xf32>
    %24 = vector.shape_cast %23 : vector<256xf32> to vector<1x256xf32>
    %25 = arith.addf %21, %24 : vector<1x256xf32>
    %c0_19 = arith.constant 0 : index
    %c0_20 = arith.constant 0 : index
    %26 = vector.load %arg7[%c0_19, %c0_20] : memref<1x256xf32, #tpu.memory_space<vmem>>, vector<1x256xf32>
    tpu.vector_store %arg7[%c0_19, %c0_20], %25 {strides = array<i32>} : memref<1x256xf32, #tpu.memory_space<vmem>>, vector<1x256xf32>,
    return
  }
  func.func @transform_0(%arg0: i32) -> (i32, i32) {
    %c0_i32 = arith.constant 0 : i32
    %c0_i32_0 = arith.constant 0 : i32
    return %arg0, %c0_i32 : i32, i32
  }
  func.func @transform_1(%arg0: i32) -> (i32, i32) {
    %c0_i32 = arith.constant 0 : i32
    %c0_i32_0 = arith.constant 0 : i32
    %c0_i32_1 = arith.constant 0 : i32
    return %c0_i32, %c0_i32_0 : i32, i32
  }
  func.func @transform_2(%arg0: i32) -> (i32, i32) {
    %c0_i32 = arith.constant 0 : i32
    %c0_i32_0 = arith.constant 0 : i32
    %c0_i32_1 = arith.constant 0 : i32
    return %c0_i32, %c0_i32_0 : i32, i32
  }
  func.func @transform_3(%arg0: i32) -> (i32, i32) {
    %c0_i32 = arith.constant 0 : i32
    %c0_i32_0 = arith.constant 0 : i32
    %c0_i32_1 = arith.constant 0 : i32
    return %c0_i32, %c0_i32_0 : i32, i32
  }
  func.func @transform_4(%arg0: i32) -> (i32, i32) {
    %c0_i32 = arith.constant 0 : i32
    %c0_i32_0 = arith.constant 0 : i32
    return %arg0, %c0_i32 : i32, i32
  }
  func.func @transform_5(%arg0: i32) -> (i32, i32) {
    %c0_i32 = arith.constant 0 : i32
    %c0_i32_0 = arith.constant 0 : i32
    %c0_i32_1 = arith.constant 0 : i32
    return %c0_i32, %c0_i32_0 : i32, i32
  }
  func.func @transform_6(%arg0: i32) -> (i32, i32) {
    %c0_i32 = arith.constant 0 : i32
    %c0_i32_0 = arith.constant 0 : i32
    %c0_i32_1 = arith.constant 0 : i32
    return %c0_i32, %c0_i32_0 : i32, i32
  }
}

module attributes {stable_mosaic.version = 11 : i64} {
  func.func @_bn_relu_mm_keep_kernel(%arg0: i32, %arg1: memref<256x256xf32, #tpu.memory_space<vmem>>, %arg2: memref<1x256xf32, #tpu.memory_space<vmem>>, %arg3: memref<1x256xf32, #tpu.memory_space<vmem>>, %arg4: memref<256x384xbf16, #tpu.memory_space<vmem>>, %arg5: memref<256x256xf32, #tpu.memory_space<vmem>>, %arg6: memref<256x384xf32, #tpu.memory_space<vmem>>, %arg7: memref<1x384xf32, #tpu.memory_space<vmem>>, %arg8: memref<1x384xf32, #tpu.memory_space<vmem>>) attributes {dimension_semantics = [#tpu.dimension_semantics<arbitrary>], iteration_bounds = array<i64: 1>, scalar_prefetch = 0 : i64, scratch_operands = 0 : i64, tpu.core_type = #tpu.core_type<tc>, window_params = [{transform_indices = @transform_0, window_bounds = array<i64: 256, 256>}, {pipeline_mode = #tpu.pipeline_mode<synchronous>, transform_indices = @transform_1, window_bounds = array<i64: 1, 256>}, {pipeline_mode = #tpu.pipeline_mode<synchronous>, transform_indices = @transform_2, window_bounds = array<i64: 1, 256>}, {pipeline_mode = #tpu.pipeline_mode<synchronous>, transform_indices = @transform_3, window_bounds = array<i64: 256, 384>}, {transform_indices = @transform_4, window_bounds = array<i64: 256, 256>}, {transform_indices = @transform_5, window_bounds = array<i64: 256, 384>}, {pipeline_mode = #tpu.pipeline_mode<synchronous>, transform_indices = @transform_6, window_bounds = array<i64: 1, 384>}, {pipeline_mode = #tpu.pipeline_mode<synchronous>, transform_indices = @transform_7, window_bounds = array<i64: 1, 384>}]} {
    %c0 = arith.constant 0 : index
    %c0_0 = arith.constant 0 : index
    %0 = vector.load %arg1[%c0, %c0_0] : memref<256x256xf32, #tpu.memory_space<vmem>>, vector<256x256xf32>
    %c0_1 = arith.constant 0 : index
    %c0_2 = arith.constant 0 : index
    %1 = vector.load %arg2[%c0_1, %c0_2] : memref<1x256xf32, #tpu.memory_space<vmem>>, vector<1x256xf32>
    %2 = vector.broadcast %1 : vector<1x256xf32> to vector<256x256xf32>
    %3 = arith.mulf %0, %2 : vector<256x256xf32>
    %c0_3 = arith.constant 0 : index
    %c0_4 = arith.constant 0 : index
    %4 = vector.load %arg3[%c0_3, %c0_4] : memref<1x256xf32, #tpu.memory_space<vmem>>, vector<1x256xf32>
    %5 = vector.broadcast %4 : vector<1x256xf32> to vector<256x256xf32>
    %6 = arith.addf %3, %5 : vector<256x256xf32>
    %cst = arith.constant 0.000000e+00 : f32
    %7 = vector.broadcast %cst : f32 to vector<256x256xf32>
    %8 = arith.maximumf %6, %7 : vector<256x256xf32>
    %c0_5 = arith.constant 0 : index
    %c0_6 = arith.constant 0 : index
    %9 = vector.load %arg5[%c0_5, %c0_6] : memref<256x256xf32, #tpu.memory_space<vmem>>, vector<256x256xf32>
    tpu.vector_store %arg5[%c0_5, %c0_6], %8 {strides = array<i32>} : memref<256x256xf32, #tpu.memory_space<vmem>>, vector<256x256xf32>,
    %10 = arith.truncf %8 : vector<256x256xf32> to vector<256x256xbf16>
    %c0_7 = arith.constant 0 : index
    %c0_8 = arith.constant 0 : index
    %11 = vector.load %arg4[%c0_7, %c0_8] : memref<256x384xbf16, #tpu.memory_space<vmem>>, vector<256x384xbf16>
    %cst_9 = arith.constant dense<0.000000e+00> : vector<256x384xf32>
    %12 = tpu.matmul %10, %11, %cst_9 {dimension_numbers = #tpu.dot_dimension_numbers<[1], [0], [0], [1], [0, 0, 1, 1], [], []>} : vector<256x256xbf16>, vector<256x384xbf16>, vector<256x384xf32> -> vector<256x384xf32>
    %c0_10 = arith.constant 0 : index
    %c0_11 = arith.constant 0 : index
    %13 = vector.load %arg6[%c0_10, %c0_11] : memref<256x384xf32, #tpu.memory_space<vmem>>, vector<256x384xf32>
    tpu.vector_store %arg6[%c0_10, %c0_11], %12 {strides = array<i32>} : memref<256x384xf32, #tpu.memory_space<vmem>>, vector<256x384xf32>,
    %c0_i32 = arith.constant 0 : i32
    %14 = arith.cmpi eq, %arg0, %c0_i32 : i32
    %15 = arith.extui %14 : i1 to i32
    %c0_i32_12 = arith.constant 0 : i32
    %16 = arith.cmpi ne, %15, %c0_i32_12 : i32
    scf.if %16 {
      %cst_23 = arith.constant 0.000000e+00 : f32
      %28 = vector.broadcast %cst_23 : f32 to vector<1x384xf32>
      %c0_24 = arith.constant 0 : index
      %c0_25 = arith.constant 0 : index
      %29 = vector.load %arg7[%c0_24, %c0_25] : memref<1x384xf32, #tpu.memory_space<vmem>>, vector<1x384xf32>
      tpu.vector_store %arg7[%c0_24, %c0_25], %28 {strides = array<i32>} : memref<1x384xf32, #tpu.memory_space<vmem>>, vector<1x384xf32>,
      %cst_26 = arith.constant 0.000000e+00 : f32
      %30 = vector.broadcast %cst_26 : f32 to vector<1x384xf32>
      %c0_27 = arith.constant 0 : index
      %c0_28 = arith.constant 0 : index
      %31 = vector.load %arg8[%c0_27, %c0_28] : memref<1x384xf32, #tpu.memory_space<vmem>>, vector<1x384xf32>
      tpu.vector_store %arg8[%c0_27, %c0_28], %30 {strides = array<i32>} : memref<1x384xf32, #tpu.memory_space<vmem>>, vector<1x384xf32>,
    } else {
    }
    %c0_13 = arith.constant 0 : index
    %c0_14 = arith.constant 0 : index
    %17 = vector.load %arg7[%c0_13, %c0_14] : memref<1x384xf32, #tpu.memory_space<vmem>>, vector<1x384xf32>
    %cst_15 = arith.constant dense<0.000000e+00> : vector<384xf32>
    %18 = vector.multi_reduction <add>, %12, %cst_15 [0] : vector<256x384xf32> to vector<384xf32>
    %19 = vector.shape_cast %18 : vector<384xf32> to vector<1x384xf32>
    %20 = arith.addf %17, %19 : vector<1x384xf32>
    %c0_16 = arith.constant 0 : index
    %c0_17 = arith.constant 0 : index
    %21 = vector.load %arg7[%c0_16, %c0_17] : memref<1x384xf32, #tpu.memory_space<vmem>>, vector<1x384xf32>
    tpu.vector_store %arg7[%c0_16, %c0_17], %20 {strides = array<i32>} : memref<1x384xf32, #tpu.memory_space<vmem>>, vector<1x384xf32>,
    %c0_18 = arith.constant 0 : index
    %c0_19 = arith.constant 0 : index
    %22 = vector.load %arg8[%c0_18, %c0_19] : memref<1x384xf32, #tpu.memory_space<vmem>>, vector<1x384xf32>
    %23 = arith.mulf %12, %12 : vector<256x384xf32>
    %cst_20 = arith.constant dense<0.000000e+00> : vector<384xf32>
    %24 = vector.multi_reduction <add>, %23, %cst_20 [0] : vector<256x384xf32> to vector<384xf32>
    %25 = vector.shape_cast %24 : vector<384xf32> to vector<1x384xf32>
    %26 = arith.addf %22, %25 : vector<1x384xf32>
    %c0_21 = arith.constant 0 : index
    %c0_22 = arith.constant 0 : index
    %27 = vector.load %arg8[%c0_21, %c0_22] : memref<1x384xf32, #tpu.memory_space<vmem>>, vector<1x384xf32>
    tpu.vector_store %arg8[%c0_21, %c0_22], %26 {strides = array<i32>} : memref<1x384xf32, #tpu.memory_space<vmem>>, vector<1x384xf32>,
    return
  }
  func.func @transform_0(%arg0: i32) -> (i32, i32) {
    %c0_i32 = arith.constant 0 : i32
    %c0_i32_0 = arith.constant 0 : i32
    return %arg0, %c0_i32 : i32, i32
  }
  func.func @transform_1(%arg0: i32) -> (i32, i32) {
    %c0_i32 = arith.constant 0 : i32
    %c0_i32_0 = arith.constant 0 : i32
    %c0_i32_1 = arith.constant 0 : i32
    return %c0_i32, %c0_i32_0 : i32, i32
  }
  func.func @transform_2(%arg0: i32) -> (i32, i32) {
    %c0_i32 = arith.constant 0 : i32
    %c0_i32_0 = arith.constant 0 : i32
    %c0_i32_1 = arith.constant 0 : i32
    return %c0_i32, %c0_i32_0 : i32, i32
  }
  func.func @transform_3(%arg0: i32) -> (i32, i32) {
    %c0_i32 = arith.constant 0 : i32
    %c0_i32_0 = arith.constant 0 : i32
    %c0_i32_1 = arith.constant 0 : i32
    return %c0_i32, %c0_i32_0 : i32, i32
  }
  func.func @transform_4(%arg0: i32) -> (i32, i32) {
    %c0_i32 = arith.constant 0 : i32
    %c0_i32_0 = arith.constant 0 : i32
    return %arg0, %c0_i32 : i32, i32
  }
  func.func @transform_5(%arg0: i32) -> (i32, i32) {
    %c0_i32 = arith.constant 0 : i32
    %c0_i32_0 = arith.constant 0 : i32
    return %arg0, %c0_i32 : i32, i32
  }
  func.func @transform_6(%arg0: i32) -> (i32, i32) {
    %c0_i32 = arith.constant 0 : i32
    %c0_i32_0 = arith.constant 0 : i32
    %c0_i32_1 = arith.constant 0 : i32
    return %c0_i32, %c0_i32_0 : i32, i32
  }
  func.func @transform_7(%arg0: i32) -> (i32, i32) {
    %c0_i32 = arith.constant 0 : i32
    %c0_i32_0 = arith.constant 0 : i32
    %c0_i32_1 = arith.constant 0 : i32
    return %c0_i32, %c0_i32_0 : i32, i32
  }
}

module attributes {stable_mosaic.version = 11 : i64} {
  func.func @_flag_kernel(%arg0: i32, %arg1: memref<256x384xf32, #tpu.memory_space<vmem>>, %arg2: memref<1x384xf32, #tpu.memory_space<vmem>>, %arg3: memref<1x384xf32, #tpu.memory_space<vmem>>, %arg4: memref<384x8xbf16, #tpu.memory_space<vmem>>, %arg5: memref<1x8xf32, #tpu.memory_space<vmem>>, %arg6: memref<256x8xf32, #tpu.memory_space<vmem>>) attributes {dimension_semantics = [#tpu.dimension_semantics<parallel>], iteration_bounds = array<i64: 1>, scalar_prefetch = 0 : i64, scratch_operands = 0 : i64, tpu.core_type = #tpu.core_type<tc>, window_params = [{transform_indices = @transform_0, window_bounds = array<i64: 256, 384>}, {pipeline_mode = #tpu.pipeline_mode<synchronous>, transform_indices = @transform_1, window_bounds = array<i64: 1, 384>}, {pipeline_mode = #tpu.pipeline_mode<synchronous>, transform_indices = @transform_2, window_bounds = array<i64: 1, 384>}, {pipeline_mode = #tpu.pipeline_mode<synchronous>, transform_indices = @transform_3, window_bounds = array<i64: 384, 8>}, {pipeline_mode = #tpu.pipeline_mode<synchronous>, transform_indices = @transform_4, window_bounds = array<i64: 1, 8>}, {transform_indices = @transform_5, window_bounds = array<i64: 256, 8>}]} {
    %c0 = arith.constant 0 : index
    %c0_0 = arith.constant 0 : index
    %0 = vector.load %arg1[%c0, %c0_0] : memref<256x384xf32, #tpu.memory_space<vmem>>, vector<256x384xf32>
    %c0_1 = arith.constant 0 : index
    %c0_2 = arith.constant 0 : index
    %1 = vector.load %arg2[%c0_1, %c0_2] : memref<1x384xf32, #tpu.memory_space<vmem>>, vector<1x384xf32>
    %2 = vector.broadcast %1 : vector<1x384xf32> to vector<256x384xf32>
    %3 = arith.mulf %0, %2 : vector<256x384xf32>
    %c0_3 = arith.constant 0 : index
    %c0_4 = arith.constant 0 : index
    %4 = vector.load %arg3[%c0_3, %c0_4] : memref<1x384xf32, #tpu.memory_space<vmem>>, vector<1x384xf32>
    %5 = vector.broadcast %4 : vector<1x384xf32> to vector<256x384xf32>
    %6 = arith.addf %3, %5 : vector<256x384xf32>
    %cst = arith.constant 0.000000e+00 : f32
    %7 = vector.broadcast %cst : f32 to vector<256x384xf32>
    %8 = arith.maximumf %6, %7 : vector<256x384xf32>
    %9 = arith.truncf %8 : vector<256x384xf32> to vector<256x384xbf16>
    %c0_5 = arith.constant 0 : index
    %c0_6 = arith.constant 0 : index
    %10 = vector.load %arg4[%c0_5, %c0_6] : memref<384x8xbf16, #tpu.memory_space<vmem>>, vector<384x8xbf16>
    %cst_7 = arith.constant dense<0.000000e+00> : vector<256x8xf32>
    %11 = tpu.matmul %9, %10, %cst_7 {dimension_numbers = #tpu.dot_dimension_numbers<[1], [0], [0], [1], [0, 0, 1, 1], [], []>} : vector<256x384xbf16>, vector<384x8xbf16>, vector<256x8xf32> -> vector<256x8xf32>
    %c0_8 = arith.constant 0 : index
    %c0_9 = arith.constant 0 : index
    %12 = vector.load %arg5[%c0_8, %c0_9] : memref<1x8xf32, #tpu.memory_space<vmem>>, vector<1x8xf32>
    %13 = vector.broadcast %12 : vector<1x8xf32> to vector<256x8xf32>
    %14 = arith.addf %11, %13 : vector<256x8xf32>
    %c0_10 = arith.constant 0 : index
    %c0_11 = arith.constant 0 : index
    %15 = vector.load %arg6[%c0_10, %c0_11] : memref<256x8xf32, #tpu.memory_space<vmem>>, vector<256x8xf32>
    tpu.vector_store %arg6[%c0_10, %c0_11], %14 {strides = array<i32>} : memref<256x8xf32, #tpu.memory_space<vmem>>, vector<256x8xf32>,
    return
  }
  func.func @transform_0(%arg0: i32) -> (i32, i32) {
    %c0_i32 = arith.constant 0 : i32
    %c0_i32_0 = arith.constant 0 : i32
    return %arg0, %c0_i32 : i32, i32
  }
  func.func @transform_1(%arg0: i32) -> (i32, i32) {
    %c0_i32 = arith.constant 0 : i32
    %c0_i32_0 = arith.constant 0 : i32
    %c0_i32_1 = arith.constant 0 : i32
    return %c0_i32, %c0_i32_0 : i32, i32
  }
  func.func @transform_2(%arg0: i32) -> (i32, i32) {
    %c0_i32 = arith.constant 0 : i32
    %c0_i32_0 = arith.constant 0 : i32
    %c0_i32_1 = arith.constant 0 : i32
    return %c0_i32, %c0_i32_0 : i32, i32
  }
  func.func @transform_3(%arg0: i32) -> (i32, i32) {
    %c0_i32 = arith.constant 0 : i32
    %c0_i32_0 = arith.constant 0 : i32
    %c0_i32_1 = arith.constant 0 : i32
    return %c0_i32, %c0_i32_0 : i32, i32
  }
  func.func @transform_4(%arg0: i32) -> (i32, i32) {
    %c0_i32 = arith.constant 0 : i32
    %c0_i32_0 = arith.constant 0 : i32
    %c0_i32_1 = arith.constant 0 : i32
    return %c0_i32, %c0_i32_0 : i32, i32
  }
  func.func @transform_5(%arg0: i32) -> (i32, i32) {
    %c0_i32 = arith.constant 0 : i32
    %c0_i32_0 = arith.constant 0 : i32
    return %arg0, %c0_i32 : i32, i32
  }
}

module attributes {stable_mosaic.version = 11 : i64} {
  func.func @_l2norm_kernel(%arg0: i32, %arg1: memref<512x256xf32, #tpu.memory_space<vmem>>, %arg2: memref<512x256xf32, #tpu.memory_space<vmem>>) attributes {dimension_semantics = [#tpu.dimension_semantics<parallel>], iteration_bounds = array<i64: 2>, scalar_prefetch = 0 : i64, scratch_operands = 0 : i64, tpu.core_type = #tpu.core_type<tc>, window_params = [{transform_indices = @transform_0, window_bounds = array<i64: 512, 256>}, {transform_indices = @transform_1, window_bounds = array<i64: 512, 256>}]} {
    %c0 = arith.constant 0 : index
    %c0_0 = arith.constant 0 : index
    %0 = vector.load %arg1[%c0, %c0_0] : memref<512x256xf32, #tpu.memory_space<vmem>>, vector<512x256xf32>
    %1 = arith.mulf %0, %0 : vector<512x256xf32>
    %cst = arith.constant dense<0.000000e+00> : vector<512xf32>
    %2 = vector.multi_reduction <add>, %1, %cst [1] : vector<512x256xf32> to vector<512xf32>
    %3 = vector.shape_cast %2 : vector<512xf32> to vector<512x1xf32>
    %cst_1 = arith.constant 9.99999996E-13 : f32
    %4 = vector.broadcast %cst_1 : f32 to vector<512x1xf32>
    %5 = arith.addf %3, %4 : vector<512x1xf32>
    %6 = math.rsqrt %5 : vector<512x1xf32>
    %7 = vector.broadcast %6 : vector<512x1xf32> to vector<512x256xf32>
    %8 = arith.mulf %0, %7 : vector<512x256xf32>
    %c0_2 = arith.constant 0 : index
    %c0_3 = arith.constant 0 : index
    %9 = vector.load %arg2[%c0_2, %c0_3] : memref<512x256xf32, #tpu.memory_space<vmem>>, vector<512x256xf32>
    tpu.vector_store %arg2[%c0_2, %c0_3], %8 {strides = array<i32>} : memref<512x256xf32, #tpu.memory_space<vmem>>, vector<512x256xf32>,
    return
  }
  func.func @transform_0(%arg0: i32) -> (i32, i32) {
    %c0_i32 = arith.constant 0 : i32
    %c0_i32_0 = arith.constant 0 : i32
    return %arg0, %c0_i32 : i32, i32
  }
  func.func @transform_1(%arg0: i32) -> (i32, i32) {
    %c0_i32 = arith.constant 0 : i32
    %c0_i32_0 = arith.constant 0 : i32
    return %arg0, %c0_i32 : i32, i32
  }
}

</mosaic_0001>

<bundles_post_ra>
// kernel: hdnet_forward.5
= control target key start
LH: loop header
LB: loop body
LE: loop exit
PB: predicated region body
PF: predicated region fallthrough
CT: control target
= control target key end

     0   :  { %s7928_s4 = inlined_call_operand.vmem [shape: bf16[4,256,512], index: 4, kind: input, shape index: {}]   ;;  %s7929_s1 = inlined_call_operand.vmem [shape: bf16[256,256], index: 1, kind: input, shape index: {}]   ;;  %s7930_s0 = inlined_call_operand.vmem [shape: bf16[256,256], index: 0, kind: input, shape index: {}]   ;;  %s7931_s2 = inlined_call_operand.vmem [shape: bf16[256,256], index: 2, kind: input, shape index: {}]   ;;  %s7932_s3 = inlined_call_operand.vmem [shape: bf16[256,256], index: 3, kind: input, shape index: {}]   ;;  %s7933_s5 = inlined_call_operand.vmem [shape: f32[256,512], index: 5, kind: output, shape index: {0}]   ;;  %s7934_s6 = inlined_call_operand.vmem [shape: f32[1,512], index: 6, kind: output, shape index: {1}]   ;;  %s7935_s7 = inlined_call_operand.vmem [shape: f32[1,512], index: 7, kind: output, shape index: {2}]  }
   0x1   :  { %v5734_v0 = vld [vmem:[%s7928_s4 + $0x204] ss:$16 sps:$4 sm:$0xff]   ;;  %v5736_v1 = vld [vmem:[%s7928_s4 + $0x20c] ss:$16 sps:$4 sm:$0xff]   ;;  %v5738_v2 = vld [vmem:[%s7928_s4 + $0x200] ss:$16 sps:$4 sm:$0xff]  }
   0x2   :  { %696 = vmatprep.subr.bf16.mxu0 %v5734_v0  ;;  %v5739_v3 = vld [vmem:[%s7928_s4 + $0x208] ss:$16 sps:$4 sm:$0xff]   ;;  %889 = vmatprep.subr.bf16.mxu1 %v5736_v1  ;;  %v5740_v4 = vld [vmem:[%s7928_s4 + $0x224] ss:$16 sps:$4 sm:$0xff]   ;;  %v5742_v5 = vld [vmem:[%s7928_s4 + $0x22c] ss:$16 sps:$4 sm:$0xff]  }
   0x3   :  { %697 = vmatpush1.bf16.msra.mxu0 %v5738_v2  ;;  %890 = vmatpush1.bf16.msra.mxu1 %v5739_v3  ;;  %v5744_v6 = vld [vmem:[%s7928_s4 + $0x220] ss:$16 sps:$4 sm:$0xff]   ;;  %v5745_v7 = vld [vmem:[%s7928_s4 + $0x228] ss:$16 sps:$4 sm:$0xff]   ;;  %v5746_v8 = vld [vmem:[%s7928_s4 + $0x244] ss:$16 sps:$4 sm:$0xff]  }
   0x4   :  { %698 = vmatprep.subr.bf16.mxu0 %v5740_v4  ;;  %891 = vmatprep.subr.bf16.mxu1 %v5742_v5  ;;  %v5748_v9 = vld [vmem:[%s7928_s4 + $0x24c] ss:$16 sps:$4 sm:$0xff]   ;;  %v5750_v10 = vld [vmem:[%s7928_s4 + $0x240] ss:$16 sps:$4 sm:$0xff]   ;;  %v5751_v11 = vld [vmem:[%s7928_s4 + $0x248] ss:$16 sps:$4 sm:$0xff]  }
   0x5   :  { %v5752_v12 = vld [vmem:[%s7928_s4 + $0x264] ss:$16 sps:$4 sm:$0xff]   ;;  %v5754_v13 = vld [vmem:[%s7928_s4 + $0x26c] ss:$16 sps:$4 sm:$0xff]   ;;  %v5756_v14 = vld [vmem:[%s7928_s4 + $0x260] ss:$16 sps:$4 sm:$0xff]  }
   0x6   :  { %v5757_v15 = vld [vmem:[%s7928_s4 + $0x268] ss:$16 sps:$4 sm:$0xff]   ;;  %v5758_v16 = vld [vmem:[%s7928_s4 + $0x284] ss:$16 sps:$4 sm:$0xff]   ;;  %v5760_v17 = vld [vmem:[%s7928_s4 + $0x28c] ss:$16 sps:$4 sm:$0xff]  }
   0x7   :  { %699 = vmatpush1.bf16.msra.mxu0 %v5744_v6  ;;  %892 = vmatpush1.bf16.msra.mxu1 %v5745_v7  ;;  %v5762_v18 = vld [vmem:[%s7928_s4 + $0x280] ss:$16 sps:$4 sm:$0xff]   ;;  %v5763_v19 = vld [vmem:[%s7928_s4 + $0x288] ss:$16 sps:$4 sm:$0xff]   ;;  %v5764_v20 = vld [vmem:[%s7928_s4 + $0x2a4] ss:$16 sps:$4 sm:$0xff]  }
   0x8   :  { %700 = vmatprep.subr.bf16.mxu0 %v5746_v8  ;;  %893 = vmatprep.subr.bf16.mxu1 %v5748_v9  ;;  %v5766_v21 = vld [vmem:[%s7928_s4 + $0x2ac] ss:$16 sps:$4 sm:$0xff]   ;;  %v5768_v22 = vld [vmem:[%s7928_s4 + $0x2a0] ss:$16 sps:$4 sm:$0xff]   ;;  %v5769_v23 = vld [vmem:[%s7928_s4 + $0x2a8] ss:$16 sps:$4 sm:$0xff]  }
   0x9   :  { %v5770_v24 = vld [vmem:[%s7928_s4 + $0x2c4] ss:$16 sps:$4 sm:$0xff]   ;;  %v5772_v25 = vld [vmem:[%s7928_s4 + $0x2cc] ss:$16 sps:$4 sm:$0xff]   ;;  %v5774_v26 = vld [vmem:[%s7928_s4 + $0x2c0] ss:$16 sps:$4 sm:$0xff]  }
   0xa   :  { %v5775_v27 = vld [vmem:[%s7928_s4 + $0x2c8] ss:$16 sps:$4 sm:$0xff]   ;;  %v5776_v28 = vld [vmem:[%s7928_s4 + $0x2e4] ss:$16 sps:$4 sm:$0xff]   ;;  %v5778_v29 = vld [vmem:[%s7928_s4 + $0x2ec] ss:$16 sps:$4 sm:$0xff]  }
   0xb   :  { %701 = vmatpush1.bf16.msra.mxu0 %v5750_v10  ;;  %894 = vmatpush1.bf16.msra.mxu1 %v5751_v11  ;;  %v5780_v30 = vld [vmem:[%s7928_s4 + $0x2e0] ss:$16 sps:$4 sm:$0xff]   ;;  %v5781_v31 = vld [vmem:[%s7928_s4 + $0x2e8] ss:$16 sps:$4 sm:$0xff]   ;;  %v5782_v32 = vld [vmem:[%s7928_s4 + $0x304] ss:$16 sps:$4 sm:$0xff]  }
   0xc   :  { %702 = vmatprep.subr.bf16.mxu0 %v5752_v12  ;;  %895 = vmatprep.subr.bf16.mxu1 %v5754_v13  ;;  %v5784_v33 = vld [vmem:[%s7928_s4 + $0x30c] ss:$16 sps:$4 sm:$0xff]   ;;  %v5786_v34 = vld [vmem:[%s7928_s4 + $0x300] ss:$16 sps:$4 sm:$0xff]   ;;  %v5787_v35 = vld [vmem:[%s7928_s4 + $0x308] ss:$16 sps:$4 sm:$0xff]  }
   0xd   :  { %v5788_v36 = vld [vmem:[%s7928_s4 + $0x324] ss:$16 sps:$4 sm:$0xff]   ;;  %v5790_v37 = vld [vmem:[%s7928_s4 + $0x32c] ss:$16 sps:$4 sm:$0xff]   ;;  %v5792_v38 = vld [vmem:[%s7928_s4 + $0x320] ss:$16 sps:$4 sm:$0xff]  }
   0xe   :  { %v5793_v39 = vld [vmem:[%s7928_s4 + $0x328] ss:$16 sps:$4 sm:$0xff]   ;;  %v5794_v40 = vld [vmem:[%s7928_s4 + $0x344] ss:$16 sps:$4 sm:$0xff]   ;;  %v5796_v41 = vld [vmem:[%s7928_s4 + $0x34c] ss:$16 sps:$4 sm:$0xff]  }
   0xf   :  { %703 = vmatpush1.bf16.msra.mxu0 %v5756_v14  ;;  %896 = vmatpush1.bf16.msra.mxu1 %v5757_v15  ;;  %v5798_v42 = vld [vmem:[%s7928_s4 + $0x340] ss:$16 sps:$4 sm:$0xff]   ;;  %v5799_v43 = vld [vmem:[%s7928_s4 + $0x348] ss:$16 sps:$4 sm:$0xff]   ;;  %v5800_v44 = vld [vmem:[%s7928_s4 + $0x364] ss:$16 sps:$4 sm:$0xff]  }
  0x10   :  { %704 = vmatprep.subr.bf16.mxu0 %v5758_v16  ;;  %897 = vmatprep.subr.bf16.mxu1 %v5760_v17  ;;  %v5802_v45 = vld [vmem:[%s7928_s4 + $0x36c] ss:$16 sps:$4 sm:$0xff]   ;;  %v5804_v46 = vld [vmem:[%s7928_s4 + $0x360] ss:$16 sps:$4 sm:$0xff]   ;;  %v5805_v47 = vld [vmem:[%s7928_s4 + $0x368] ss:$16 sps:$4 sm:$0xff]  }
  0x11   :  { %v5832_v48 = vld [vmem:[%s7929_s1 + $0x4] ss:$8 sps:$4 sm:$0xff]   ;;  %v5810_v51 = vld [vmem:[%s7928_s4 + $0x380] ss:$16 sps:$4 sm:$0xff]   ;;  %v5811_v52 = vld [vmem:[%s7928_s4 + $0x388] ss:$16 sps:$4 sm:$0xff]  }
  0x12   :  { %v5806_v49 = vld [vmem:[%s7928_s4 + $0x384] ss:$16 sps:$4 sm:$0xff]   ;;  %v5808_v50 = vld [vmem:[%s7928_s4 + $0x38c] ss:$16 sps:$4 sm:$0xff]   ;;  %728 = vmatprep.mubr.bf16.mxu0 %v5832_v48  ;;  %921 = vmatprep.mubr.bf16.mxu1 %v5832_v48  ;;  %v5816_v55 = vld [vmem:[%s7928_s4 + $0x3a0] ss:$16 sps:$4 sm:$0xff]  }
  0x13   :  { %705 = vmatpush1.bf16.msra.mxu0 %v5762_v18  ;;  %898 = vmatpush1.bf16.msra.mxu1 %v5763_v19  ;;  %v5812_v53 = vld [vmem:[%s7928_s4 + $0x3a4] ss:$16 sps:$4 sm:$0xff]   ;;  %v5814_v54 = vld [vmem:[%s7928_s4 + $0x3ac] ss:$16 sps:$4 sm:$0xff]   ;;  %v5817_v56 = vld [vmem:[%s7928_s4 + $0x3a8] ss:$16 sps:$4 sm:$0xff]  }
  0x14   :  { %706 = vmatprep.subr.bf16.mxu0 %v5764_v20  ;;  %899 = vmatprep.subr.bf16.mxu1 %v5766_v21  ;;  %v5818_v57 = vld [vmem:[%s7928_s4 + $0x3c4] ss:$16 sps:$4 sm:$0xff]   ;;  %v5820_v58 = vld [vmem:[%s7928_s4 + $0x3cc] ss:$16 sps:$4 sm:$0xff]   ;;  %v5822_v59 = vld [vmem:[%s7928_s4 + $0x3c0] ss:$16 sps:$4 sm:$0xff]  }
  0x15   :  { %v5823_v60 = vld [vmem:[%s7928_s4 + $0x3c8] ss:$16 sps:$4 sm:$0xff]   ;;  %v5824_v61 = vld [vmem:[%s7928_s4 + $0x3e4] ss:$16 sps:$4 sm:$0xff]   ;;  %v5826_v62 = vld [vmem:[%s7928_s4 + $0x3ec] ss:$16 sps:$4 sm:$0xff]  }
  0x16   :  { %v5828_v63 = vld [vmem:[%s7928_s4 + $0x3e0] ss:$16 sps:$4 sm:$0xff]   ;;  %v5829_v0 = vld [vmem:[%s7928_s4 + $0x3e8] ss:$16 sps:$4 sm:$0xff]   ;;  %v5835_v1 = vld [vmem:[%s7928_s4 + $0x4] ss:$16 sps:$4 sm:$0xff]  }
  0x17   :  { %707 = vmatpush1.bf16.msra.mxu0 %v5768_v22  ;;  %900 = vmatpush1.bf16.msra.mxu1 %v5769_v23  ;;  %v5838_v2 = vld [vmem:[%s7928_s4 + $0xc] ss:$16 sps:$4 sm:$0xff]   ;;  %v5830_v3 = vld [vmem:[%s7929_s1] ss:$8 sps:$4 sm:$0xff]   ;;  %v5844_v7 = vld [vmem:[%s7928_s4 + $0x24] ss:$16 sps:$4 sm:$0xff]  }
  0x18   :  { %708 = vmatprep.subr.bf16.mxu0 %v5770_v24  ;;  %901 = vmatprep.subr.bf16.mxu1 %v5772_v25  ;;  %v5833_v4 = vld [vmem:[%s7928_s4] ss:$16 sps:$4 sm:$0xff]   ;;  %v5836_v5 = vld [vmem:[%s7928_s4 + $0x8] ss:$16 sps:$4 sm:$0xff]   ;;  %v5839_v6 = vld [vmem:[%s7929_s1 + $0x14] ss:$8 sps:$4 sm:$0xff]  }
  0x19   :  { %v5847_v8 = vld [vmem:[%s7928_s4 + $0x2c] ss:$16 sps:$4 sm:$0xff]   ;;  %v5842_v9 = vld [vmem:[%s7928_s4 + $0x20] ss:$16 sps:$4 sm:$0xff]   ;;  %v5845_v10 = vld [vmem:[%s7928_s4 + $0x28] ss:$16 sps:$4 sm:$0xff]  }
  0x1a   :  { %v5853_v11 = vld [vmem:[%s7928_s4 + $0x44] ss:$16 sps:$4 sm:$0xff]   ;;  %v5856_v12 = vld [vmem:[%s7928_s4 + $0x4c] ss:$16 sps:$4 sm:$0xff]   ;;  %v5841_v13 = vld [vmem:[%s7929_s1 + $0x10] ss:$8 sps:$4 sm:$0xff]  }
  0x1b   :  { %709 = vmatpush1.bf16.msra.mxu0 %v5774_v26  ;;  %902 = vmatpush1.bf16.msra.mxu1 %v5775_v27  ;;  %v5848_v14 = vld [vmem:[%s7929_s1 + $0x24] ss:$8 sps:$4 sm:$0xff]   ;;  %v5851_v15 = vld [vmem:[%s7928_s4 + $0x40] ss:$16 sps:$4 sm:$0xff]   ;;  %v5854_v16 = vld [vmem:[%s7928_s4 + $0x48] ss:$16 sps:$4 sm:$0xff]  }
  0x1c   :  { %710 = vmatprep.subr.bf16.mxu0 %v5776_v28  ;;  %903 = vmatprep.subr.bf16.mxu1 %v5778_v29  ;;  %v5862_v17 = vld [vmem:[%s7928_s4 + $0x64] ss:$16 sps:$4 sm:$0xff]   ;;  %v5865_v18 = vld [vmem:[%s7928_s4 + $0x6c] ss:$16 sps:$4 sm:$0xff]   ;;  %v5860_v19 = vld [vmem:[%s7928_s4 + $0x60] ss:$16 sps:$4 sm:$0xff]  }
  0x1d   :  { %v5863_v20 = vld [vmem:[%s7928_s4 + $0x68] ss:$16 sps:$4 sm:$0xff]   ;;  %v5871_v21 = vld [vmem:[%s7928_s4 + $0x84] ss:$16 sps:$4 sm:$0xff]   ;;  %v5874_v22 = vld [vmem:[%s7928_s4 + $0x8c] ss:$16 sps:$4 sm:$0xff]  }
  0x1e   :  { %v5850_v23 = vld [vmem:[%s7929_s1 + $0x20] ss:$8 sps:$4 sm:$0xff]   ;;  %v5857_v24 = vld [vmem:[%s7929_s1 + $0x34] ss:$8 sps:$4 sm:$0xff]  }
  0x1f   :  { %711 = vmatpush1.bf16.msra.mxu0 %v5780_v30  ;;  %904 = vmatpush1.bf16.msra.mxu1 %v5781_v31  ;;  %v5869_v25 = vld [vmem:[%s7928_s4 + $0x80] ss:$16 sps:$4 sm:$0xff]   ;;  %v5872_v26 = vld [vmem:[%s7928_s4 + $0x88] ss:$16 sps:$4 sm:$0xff]   ;;  %v5880_v27 = vld [vmem:[%s7928_s4 + $0xa4] ss:$16 sps:$4 sm:$0xff]  }
  0x20   :  { %712 = vmatprep.subr.bf16.mxu0 %v5782_v32  ;;  %905 = vmatprep.subr.bf16.mxu1 %v5784_v33  ;;  %v5883_v28 = vld [vmem:[%s7928_s4 + $0xac] ss:$16 sps:$4 sm:$0xff]   ;;  %v5878_v29 = vld [vmem:[%s7928_s4 + $0xa0] ss:$16 sps:$4 sm:$0xff]   ;;  %v5881_v30 = vld [vmem:[%s7928_s4 + $0xa8] ss:$16 sps:$4 sm:$0xff]  }
  0x21   :  { %v5889_v31 = vld [vmem:[%s7928_s4 + $0xc4] ss:$16 sps:$4 sm:$0xff]   ;;  %v5892_v32 = vld [vmem:[%s7928_s4 + $0xcc] ss:$16 sps:$4 sm:$0xff]   ;;  %v5859_v33 = vld [vmem:[%s7929_s1 + $0x30] ss:$8 sps:$4 sm:$0xff]  }
  0x22   :  { %v5919_v48 = vld [vmem:[%s7928_s4 + $0x12c] ss:$16 sps:$4 sm:$0xff]  }
  0x23   :  { %713 = vmatpush1.bf16.msra.mxu0 %v5786_v34  ;;  %906 = vmatpush1.bf16.msra.mxu1 %v5787_v35  ;;  %v5866_v34 = vld [vmem:[%s7929_s1 + $0x44] ss:$8 sps:$4 sm:$0xff]   ;;  %v5887_v35 = vld [vmem:[%s7928_s4 + $0xc0] ss:$16 sps:$4 sm:$0xff]  }
  0x24   :  { %714 = vmatprep.subr.bf16.mxu0 %v5788_v36  ;;  %907 = vmatprep.subr.bf16.mxu1 %v5790_v37  ;;  %v5890_v36 = vld [vmem:[%s7928_s4 + $0xc8] ss:$16 sps:$4 sm:$0xff]   ;;  %v5898_v37 = vld [vmem:[%s7928_s4 + $0xe4] ss:$16 sps:$4 sm:$0xff]  }
  0x27   :  { %715 = vmatpush1.bf16.msra.mxu0 %v5792_v38  ;;  %908 = vmatpush1.bf16.msra.mxu1 %v5793_v39  ;;  %v5901_v38 = vld [vmem:[%s7928_s4 + $0xec] ss:$16 sps:$4 sm:$0xff]   ;;  %v5896_v39 = vld [vmem:[%s7928_s4 + $0xe0] ss:$16 sps:$4 sm:$0xff]  }
  0x28   :  { %716 = vmatprep.subr.bf16.mxu0 %v5794_v40  ;;  %909 = vmatprep.subr.bf16.mxu1 %v5796_v41  ;;  %v5899_v40 = vld [vmem:[%s7928_s4 + $0xe8] ss:$16 sps:$4 sm:$0xff]   ;;  %v5907_v41 = vld [vmem:[%s7928_s4 + $0x104] ss:$16 sps:$4 sm:$0xff]  }
  0x2b   :  { %717 = vmatpush1.bf16.msra.mxu0 %v5798_v42  ;;  %910 = vmatpush1.bf16.msra.mxu1 %v5799_v43  ;;  %v5910_v42 = vld [vmem:[%s7928_s4 + $0x10c] ss:$16 sps:$4 sm:$0xff]   ;;  %v5868_v43 = vld [vmem:[%s7929_s1 + $0x40] ss:$8 sps:$4 sm:$0xff]  }
  0x2c   :  { %718 = vmatprep.subr.bf16.mxu0 %v5800_v44  ;;  %911 = vmatprep.subr.bf16.mxu1 %v5802_v45  ;;  %v5875_v44 = vld [vmem:[%s7929_s1 + $0x54] ss:$8 sps:$4 sm:$0xff]   ;;  %v5905_v45 = vld [vmem:[%s7928_s4 + $0x100] ss:$16 sps:$4 sm:$0xff]  }
  0x2f   :  { %719 = vmatpush1.bf16.msra.mxu0 %v5804_v46  ;;  %912 = vmatpush1.bf16.msra.mxu1 %v5805_v47  ;;  %v5908_v46 = vld [vmem:[%s7928_s4 + $0x108] ss:$16 sps:$4 sm:$0xff]   ;;  %v5916_v47 = vld [vmem:[%s7928_s4 + $0x124] ss:$16 sps:$4 sm:$0xff]  }
  0x30   :  { %720 = vmatprep.subr.bf16.mxu0 %v5806_v49  ;;  %913 = vmatprep.subr.bf16.mxu1 %v5808_v50  ;;  %v5914_v49 = vld [vmem:[%s7928_s4 + $0x120] ss:$16 sps:$4 sm:$0xff]   ;;  %v5917_v50 = vld [vmem:[%s7928_s4 + $0x128] ss:$16 sps:$4 sm:$0xff]  }
  0x33   :  { %721 = vmatpush1.bf16.msra.mxu0 %v5810_v51  ;;  %914 = vmatpush1.bf16.msra.mxu1 %v5811_v52  ;;  %v5925_v51 = vld [vmem:[%s7928_s4 + $0x144] ss:$16 sps:$4 sm:$0xff]   ;;  %v5928_v52 = vld [vmem:[%s7928_s4 + $0x14c] ss:$16 sps:$4 sm:$0xff]  }
  0x34   :  { %722 = vmatprep.subr.bf16.mxu0 %v5812_v53  ;;  %915 = vmatprep.subr.bf16.mxu1 %v5814_v54  ;;  %v5877_v53 = vld [vmem:[%s7929_s1 + $0x50] ss:$8 sps:$4 sm:$0xff]   ;;  %v5884_v54 = vld [vmem:[%s7929_s1 + $0x64] ss:$8 sps:$4 sm:$0xff]  }
  0x37   :  { %723 = vmatpush1.bf16.msra.mxu0 %v5816_v55  ;;  %916 = vmatpush1.bf16.msra.mxu1 %v5817_v56  ;;  %v5923_v55 = vld [vmem:[%s7928_s4 + $0x140] ss:$16 sps:$4 sm:$0xff]   ;;  %v5926_v56 = vld [vmem:[%s7928_s4 + $0x148] ss:$16 sps:$4 sm:$0xff]  }
  0x38   :  { %724 = vmatprep.subr.bf16.mxu0 %v5818_v57  ;;  %917 = vmatprep.subr.bf16.mxu1 %v5820_v58  ;;  %v5934_v57 = vld [vmem:[%s7928_s4 + $0x164] ss:$16 sps:$4 sm:$0xff]   ;;  %v5937_v58 = vld [vmem:[%s7928_s4 + $0x16c] ss:$16 sps:$4 sm:$0xff]  }
  0x3b   :  { %725 = vmatpush1.bf16.msra.mxu0 %v5822_v59  ;;  %918 = vmatpush1.bf16.msra.mxu1 %v5823_v60  ;;  %v5932_v59 = vld [vmem:[%s7928_s4 + $0x160] ss:$16 sps:$4 sm:$0xff]   ;;  %v5935_v60 = vld [vmem:[%s7928_s4 + $0x168] ss:$16 sps:$4 sm:$0xff]  }
  0x3c   :  { %726 = vmatprep.subr.bf16.mxu0 %v5824_v61  ;;  %919 = vmatprep.subr.bf16.mxu1 %v5826_v62  ;;  %v5943_v61 = vld [vmem:[%s7928_s4 + $0x184] ss:$16 sps:$4 sm:$0xff]   ;;  %v5946_v62 = vld [vmem:[%s7928_s4 + $0x18c] ss:$16 sps:$4 sm:$0xff]  }
  0x3f   :  { %727 = vmatpush1.bf16.msra.mxu0 %v5828_v63  ;;  %920 = vmatpush1.bf16.msra.mxu1 %v5829_v0  ;;  %v5886_v63 = vld [vmem:[%s7929_s1 + $0x60] ss:$8 sps:$4 sm:$0xff]   ;;  %v5893_v0 = vld [vmem:[%s7929_s1 + $0x74] ss:$8 sps:$4 sm:$0xff]  }
  0x40   :  { %1562 = vmatprep.subr.bf16.mxu0 %v5835_v1  ;;  %1755 = vmatprep.subr.bf16.mxu1 %v5838_v2  ;;  %v5941_v1 = vld [vmem:[%s7928_s4 + $0x180] ss:$16 sps:$4 sm:$0xff]   ;;  %v5944_v2 = vld [vmem:[%s7928_s4 + $0x188] ss:$16 sps:$4 sm:$0xff]  }
  0x42   :  { %729 = vmatmul.mubr.bf16.vlgmr.msra.gmra.mrb[0].mxu0 %v5830_v3  ;;  %922 = vmatmul.mubr.bf16.vlgmr.msra.gmra.mrb[0].mxu1 %v5830_v3  ;;  %v5952_v3 = vld [vmem:[%s7928_s4 + $0x1a4] ss:$16 sps:$4 sm:$0xff]  }
  0x43   :  { %1563 = vmatpush1.bf16.msra.mxu0 %v5833_v4  ;;  %1756 = vmatpush1.bf16.msra.mxu1 %v5836_v5  ;;  %v5955_v4 = vld [vmem:[%s7928_s4 + $0x1ac] ss:$16 sps:$4 sm:$0xff]   ;;  %v5950_v5 = vld [vmem:[%s7928_s4 + $0x1a0] ss:$16 sps:$4 sm:$0xff]  }
  0x44   :  { %738 = vmatprep.mubr.bf16.mxu0 %v5839_v6  ;;  %931 = vmatprep.mubr.bf16.mxu1 %v5839_v6  ;;  %v5953_v6 = vld [vmem:[%s7928_s4 + $0x1a8] ss:$16 sps:$4 sm:$0xff]  }
  0x45   :  { %1564 = vmatprep.subr.bf16.mxu0 %v5844_v7  ;;  %1757 = vmatprep.subr.bf16.mxu1 %v5847_v8  ;;  %v5961_v7 = vld [vmem:[%s7928_s4 + $0x1c4] ss:$16 sps:$4 sm:$0xff]   ;;  %v5964_v8 = vld [vmem:[%s7928_s4 + $0x1cc] ss:$16 sps:$4 sm:$0xff]  }
  0x47   :  { %1565 = vmatpush1.bf16.msra.mxu0 %v5842_v9  ;;  %1758 = vmatpush1.bf16.msra.mxu1 %v5845_v10  ;;  %v5895_v9 = vld [vmem:[%s7929_s1 + $0x70] ss:$8 sps:$4 sm:$0xff]   ;;  %v5902_v10 = vld [vmem:[%s7929_s1 + $0x84] ss:$8 sps:$4 sm:$0xff]  }
  0x48   :  { %1566 = vmatprep.subr.bf16.mxu0 %v5853_v11  ;;  %1759 = vmatprep.subr.bf16.mxu1 %v5856_v12  ;;  %v5959_v11 = vld [vmem:[%s7928_s4 + $0x1c0] ss:$16 sps:$4 sm:$0xff]   ;;  %v5962_v12 = vld [vmem:[%s7928_s4 + $0x1c8] ss:$16 sps:$4 sm:$0xff]  }
  0x4a   :  { %739 = vmatmul.mubr.bf16.gmra.mrb[4].mxu0 %v5841_v13  ;;  %932 = vmatmul.mubr.bf16.gmra.mrb[4].mxu1 %v5841_v13  ;;  %v5970_v13 = vld [vmem:[%s7928_s4 + $0x1e4] ss:$16 sps:$4 sm:$0xff]  }
  0x4b   :  { %748 = vmatprep.mubr.bf16.mxu0 %v5848_v14  ;;  %941 = vmatprep.mubr.bf16.mxu1 %v5848_v14  ;;  %v5973_v14 = vld [vmem:[%s7928_s4 + $0x1ec] ss:$16 sps:$4 sm:$0xff]  }
  0x4c   :  { %1567 = vmatpush1.bf16.msra.mxu0 %v5851_v15  ;;  %1760 = vmatpush1.bf16.msra.mxu1 %v5854_v16  ;;  %v5968_v15 = vld [vmem:[%s7928_s4 + $0x1e0] ss:$16 sps:$4 sm:$0xff]   ;;  %v5971_v16 = vld [vmem:[%s7928_s4 + $0x1e8] ss:$16 sps:$4 sm:$0xff]  }
  0x4d   :  { %1568 = vmatprep.subr.bf16.mxu0 %v5862_v17  ;;  %1761 = vmatprep.subr.bf16.mxu1 %v5865_v18  ;;  %v5979_v17 = vld [vmem:[%s7928_s4 + $0x404] ss:$16 sps:$4 sm:$0xff]   ;;  %v5982_v18 = vld [vmem:[%s7928_s4 + $0x40c] ss:$16 sps:$4 sm:$0xff]  }
  0x50   :  { %1569 = vmatpush1.bf16.msra.mxu0 %v5860_v19  ;;  %1762 = vmatpush1.bf16.msra.mxu1 %v5863_v20  ;;  %v5904_v19 = vld [vmem:[%s7929_s1 + $0x80] ss:$8 sps:$4 sm:$0xff]   ;;  %v5911_v20 = vld [vmem:[%s7929_s1 + $0x94] ss:$8 sps:$4 sm:$0xff]  }
  0x51   :  { %1570 = vmatprep.subr.bf16.mxu0 %v5871_v21  ;;  %1763 = vmatprep.subr.bf16.mxu1 %v5874_v22  ;;  %v5913_v21 = vld [vmem:[%s7929_s1 + $0x90] ss:$8 sps:$4 sm:$0xff]   ;;  %v5920_v22 = vld [vmem:[%s7929_s1 + $0xa4] ss:$8 sps:$4 sm:$0xff]  }
  0x52   :  { %749 = vmatmul.mubr.bf16.gmra.mrb[8].mxu0 %v5850_v23  ;;  %942 = vmatmul.mubr.bf16.gmra.mrb[8].mxu1 %v5850_v23  ;;  %v5922_v23 = vld [vmem:[%s7929_s1 + $0xa0] ss:$8 sps:$4 sm:$0xff]  }
  0x53   :  { %758 = vmatprep.mubr.bf16.mxu0 %v5857_v24  ;;  %951 = vmatprep.mubr.bf16.mxu1 %v5857_v24  ;;  %v5929_v24 = vld [vmem:[%s7929_s1 + $0xb4] ss:$8 sps:$4 sm:$0xff]  }
  0x54   :  { %1571 = vmatpush1.bf16.msra.mxu0 %v5869_v25  ;;  %1764 = vmatpush1.bf16.msra.mxu1 %v5872_v26  ;;  %v5931_v25 = vld [vmem:[%s7929_s1 + $0xb0] ss:$8 sps:$4 sm:$0xff]   ;;  %v5938_v26 = vld [vmem:[%s7929_s1 + $0xc4] ss:$8 sps:$4 sm:$0xff]  }
  0x55   :  { %1572 = vmatprep.subr.bf16.mxu0 %v5880_v27  ;;  %1765 = vmatprep.subr.bf16.mxu1 %v5883_v28  ;;  %v5940_v27 = vld [vmem:[%s7929_s1 + $0xc0] ss:$8 sps:$4 sm:$0xff]   ;;  %v5947_v28 = vld [vmem:[%s7929_s1 + $0xd4] ss:$8 sps:$4 sm:$0xff]  }
  0x58   :  { %1573 = vmatpush1.bf16.msra.mxu0 %v5878_v29  ;;  %1766 = vmatpush1.bf16.msra.mxu1 %v5881_v30  ;;  %v5949_v29 = vld [vmem:[%s7929_s1 + $0xd0] ss:$8 sps:$4 sm:$0xff]   ;;  %v5956_v30 = vld [vmem:[%s7929_s1 + $0xe4] ss:$8 sps:$4 sm:$0xff]  }
  0x59   :  { %1574 = vmatprep.subr.bf16.mxu0 %v5889_v31  ;;  %1767 = vmatprep.subr.bf16.mxu1 %v5892_v32  ;;  %v5958_v31 = vld [vmem:[%s7929_s1 + $0xe0] ss:$8 sps:$4 sm:$0xff]   ;;  %v5965_v32 = vld [vmem:[%s7929_s1 + $0xf4] ss:$8 sps:$4 sm:$0xff]  }
  0x5a   :  { %759 = vmatmul.mubr.bf16.gmra.mrb[12].mxu0 %v5859_v33  ;;  %952 = vmatmul.mubr.bf16.gmra.mrb[12].mxu1 %v5859_v33  ;;  %v5967_v33 = vld [vmem:[%s7929_s1 + $0xf0] ss:$8 sps:$4 sm:$0xff]  }
  0x5b   :  { %768 = vmatprep.mubr.bf16.mxu0 %v5866_v34  ;;  %961 = vmatprep.mubr.bf16.mxu1 %v5866_v34  ;;  %v5976_v34 = vld [vmem:[%s7930_s0 + $0x4] ss:$8 sps:$4 sm:$0xff]  }
  0x5c   :  { %1575 = vmatpush1.bf16.msra.mxu0 %v5887_v35  ;;  %1768 = vmatpush1.bf16.msra.mxu1 %v5890_v36  ;;  %v5974_v35 = vld [vmem:[%s7930_s0] ss:$8 sps:$4 sm:$0xff]  }
  0x5d   :  { %1576 = vmatprep.subr.bf16.mxu0 %v5898_v37  ;;  %1769 = vmatprep.subr.bf16.mxu1 %v5901_v38  ;;  %v5977_v36 = vld [vmem:[%s7928_s4 + $0x400] ss:$16 sps:$4 sm:$0xff]   ;;  %v5980_v37 = vld [vmem:[%s7928_s4 + $0x408] ss:$16 sps:$4 sm:$0xff]   ;;  %v5983_v38 = vld [vmem:[%s7930_s0 + $0x14] ss:$8 sps:$4 sm:$0xff]  }
  0x60   :  { %1577 = vmatpush1.bf16.msra.mxu0 %v5896_v39  ;;  %1770 = vmatpush1.bf16.msra.mxu1 %v5899_v40  ;;  %v5988_v39 = vld [vmem:[%s7928_s4 + $0x424] ss:$16 sps:$4 sm:$0xff]   ;;  %v5991_v40 = vld [vmem:[%s7928_s4 + $0x42c] ss:$16 sps:$4 sm:$0xff]  }
  0x61   :  { %1578 = vmatprep.subr.bf16.mxu0 %v5907_v41  ;;  %1771 = vmatprep.subr.bf16.mxu1 %v5910_v42  ;;  %v5986_v41 = vld [vmem:[%s7928_s4 + $0x420] ss:$16 sps:$4 sm:$0xff]   ;;  %v5989_v42 = vld [vmem:[%s7928_s4 + $0x428] ss:$16 sps:$4 sm:$0xff]  }
  0x62   :  { %769 = vmatmul.mubr.bf16.gmra.mrb[16].mxu0 %v5868_v43  ;;  %962 = vmatmul.mubr.bf16.gmra.mrb[16].mxu1 %v5868_v43  ;;  %v5997_v43 = vld [vmem:[%s7928_s4 + $0x444] ss:$16 sps:$4 sm:$0xff]  }
  0x63   :  { %778 = vmatprep.mubr.bf16.mxu0 %v5875_v44  ;;  %971 = vmatprep.mubr.bf16.mxu1 %v5875_v44  ;;  %v5985_v44 = vld [vmem:[%s7930_s0 + $0x10] ss:$8 sps:$4 sm:$0xff]  }
  0x64   :  { %1579 = vmatpush1.bf16.msra.mxu0 %v5905_v45  ;;  %1772 = vmatpush1.bf16.msra.mxu1 %v5908_v46  ;;  %v6000_v45 = vld [vmem:[%s7928_s4 + $0x44c] ss:$16 sps:$4 sm:$0xff]  }
  0x65   :  { %1580 = vmatprep.subr.bf16.mxu0 %v5916_v47  ;;  %1773 = vmatprep.subr.bf16.mxu1 %v5919_v48  ;;  %v5992_v46 = vld [vmem:[%s7930_s0 + $0x24] ss:$8 sps:$4 sm:$0xff]   ;;  %v5995_v47 = vld [vmem:[%s7928_s4 + $0x440] ss:$16 sps:$4 sm:$0xff]   ;;  %v5998_v48 = vld [vmem:[%s7928_s4 + $0x448] ss:$16 sps:$4 sm:$0xff]  }
  0x68   :  { %1581 = vmatpush1.bf16.msra.mxu0 %v5914_v49  ;;  %1774 = vmatpush1.bf16.msra.mxu1 %v5917_v50  ;;  %v6006_v49 = vld [vmem:[%s7928_s4 + $0x464] ss:$16 sps:$4 sm:$0xff]   ;;  %v6009_v50 = vld [vmem:[%s7928_s4 + $0x46c] ss:$16 sps:$4 sm:$0xff]  }
  0x69   :  { %1582 = vmatprep.subr.bf16.mxu0 %v5925_v51  ;;  %1775 = vmatprep.subr.bf16.mxu1 %v5928_v52  ;;  %v6004_v51 = vld [vmem:[%s7928_s4 + $0x460] ss:$16 sps:$4 sm:$0xff]   ;;  %v6007_v52 = vld [vmem:[%s7928_s4 + $0x468] ss:$16 sps:$4 sm:$0xff]  }
  0x6a   :  { %779 = vmatmul.mubr.bf16.gmra.mrb[20].mxu0 %v5877_v53  ;;  %972 = vmatmul.mubr.bf16.gmra.mrb[20].mxu1 %v5877_v53  ;;  %v6015_v53 = vld [vmem:[%s7928_s4 + $0x484] ss:$16 sps:$4 sm:$0xff]  }
  0x6b   :  { %788 = vmatprep.mubr.bf16.mxu0 %v5884_v54  ;;  %981 = vmatprep.mubr.bf16.mxu1 %v5884_v54  ;;  %v6018_v54 = vld [vmem:[%s7928_s4 + $0x48c] ss:$16 sps:$4 sm:$0xff]  }
  0x6c   :  { %1583 = vmatpush1.bf16.msra.mxu0 %v5923_v55  ;;  %1776 = vmatpush1.bf16.msra.mxu1 %v5926_v56  ;;  %v5994_v55 = vld [vmem:[%s7930_s0 + $0x20] ss:$8 sps:$4 sm:$0xff]   ;;  %v6001_v56 = vld [vmem:[%s7930_s0 + $0x34] ss:$8 sps:$4 sm:$0xff]  }
  0x6d   :  { %1584 = vmatprep.subr.bf16.mxu0 %v5934_v57  ;;  %1777 = vmatprep.subr.bf16.mxu1 %v5937_v58  ;;  %v6013_v57 = vld [vmem:[%s7928_s4 + $0x480] ss:$16 sps:$4 sm:$0xff]   ;;  %v6016_v58 = vld [vmem:[%s7928_s4 + $0x488] ss:$16 sps:$4 sm:$0xff]  }
  0x70   :  { %1585 = vmatpush1.bf16.msra.mxu0 %v5932_v59  ;;  %1778 = vmatpush1.bf16.msra.mxu1 %v5935_v60  ;;  %v6024_v59 = vld [vmem:[%s7928_s4 + $0x4a4] ss:$16 sps:$4 sm:$0xff]   ;;  %v6027_v60 = vld [vmem:[%s7928_s4 + $0x4ac] ss:$16 sps:$4 sm:$0xff]  }
  0x71   :  { %1586 = vmatprep.subr.bf16.mxu0 %v5943_v61  ;;  %1779 = vmatprep.subr.bf16.mxu1 %v5946_v62  ;;  %v6022_v61 = vld [vmem:[%s7928_s4 + $0x4a0] ss:$16 sps:$4 sm:$0xff]   ;;  %v6025_v62 = vld [vmem:[%s7928_s4 + $0x4a8] ss:$16 sps:$4 sm:$0xff]  }
  0x72   :  { %789 = vmatmul.mubr.bf16.gmra.mrb[24].mxu0 %v5886_v63  ;;  %982 = vmatmul.mubr.bf16.gmra.mrb[24].mxu1 %v5886_v63  ;;  %v6033_v63 = vld [vmem:[%s7928_s4 + $0x4c4] ss:$16 sps:$4 sm:$0xff]  }
  0x73   :  { %798 = vmatprep.mubr.bf16.mxu0 %v5893_v0  ;;  %991 = vmatprep.mubr.bf16.mxu1 %v5893_v0  ;;  %v6036_v0 = vld [vmem:[%s7928_s4 + $0x4cc] ss:$16 sps:$4 sm:$0xff]  }
  0x74   :  { %1587 = vmatpush1.bf16.msra.mxu0 %v5941_v1  ;;  %1780 = vmatpush1.bf16.msra.mxu1 %v5944_v2  ;;  %v6003_v1 = vld [vmem:[%s7930_s0 + $0x30] ss:$8 sps:$4 sm:$0xff]   ;;  %v6010_v2 = vld [vmem:[%s7930_s0 + $0x44] ss:$8 sps:$4 sm:$0xff]  }
  0x75   :  { %1588 = vmatprep.subr.bf16.mxu0 %v5952_v3  ;;  %1781 = vmatprep.subr.bf16.mxu1 %v5955_v4  ;;  %v6031_v3 = vld [vmem:[%s7928_s4 + $0x4c0] ss:$16 sps:$4 sm:$0xff]   ;;  %v6034_v4 = vld [vmem:[%s7928_s4 + $0x4c8] ss:$16 sps:$4 sm:$0xff]  }
  0x78   :  { %1589 = vmatpush1.bf16.msra.mxu0 %v5950_v5  ;;  %1782 = vmatpush1.bf16.msra.mxu1 %v5953_v6  ;;  %v6042_v5 = vld [vmem:[%s7928_s4 + $0x4e4] ss:$16 sps:$4 sm:$0xff]   ;;  %v6045_v6 = vld [vmem:[%s7928_s4 + $0x4ec] ss:$16 sps:$4 sm:$0xff]  }
  0x79   :  { %1590 = vmatprep.subr.bf16.mxu0 %v5961_v7  ;;  %1783 = vmatprep.subr.bf16.mxu1 %v5964_v8  ;;  %v6040_v7 = vld [vmem:[%s7928_s4 + $0x4e0] ss:$16 sps:$4 sm:$0xff]   ;;  %v6043_v8 = vld [vmem:[%s7928_s4 + $0x4e8] ss:$16 sps:$4 sm:$0xff]  }
  0x7a   :  { %799 = vmatmul.mubr.bf16.gmra.mrb[28].mxu0 %v5895_v9  ;;  %992 = vmatmul.mubr.bf16.gmra.mrb[28].mxu1 %v5895_v9  ;;  %v6051_v9 = vld [vmem:[%s7928_s4 + $0x504] ss:$16 sps:$4 sm:$0xff]  }
  0x7b   :  { %808 = vmatprep.mubr.bf16.mxu0 %v5902_v10  ;;  %1001 = vmatprep.mubr.bf16.mxu1 %v5902_v10  ;;  %v6054_v10 = vld [vmem:[%s7928_s4 + $0x50c] ss:$16 sps:$4 sm:$0xff]  }
  0x7c   :  { %1591 = vmatpush1.bf16.msra.mxu0 %v5959_v11  ;;  %1784 = vmatpush1.bf16.msra.mxu1 %v5962_v12  ;;  %v6012_v11 = vld [vmem:[%s7930_s0 + $0x40] ss:$8 sps:$4 sm:$0xff]   ;;  %v6019_v12 = vld [vmem:[%s7930_s0 + $0x54] ss:$8 sps:$4 sm:$0xff]  }
  0x7d   :  { %1592 = vmatprep.subr.bf16.mxu0 %v5970_v13  ;;  %1785 = vmatprep.subr.bf16.mxu1 %v5973_v14  ;;  %v6049_v13 = vld [vmem:[%s7928_s4 + $0x500] ss:$16 sps:$4 sm:$0xff]   ;;  %v6052_v14 = vld [vmem:[%s7928_s4 + $0x508] ss:$16 sps:$4 sm:$0xff]  }
  0x80   :  { %1593 = vmatpush1.bf16.msra.mxu0 %v5968_v15  ;;  %1786 = vmatpush1.bf16.msra.mxu1 %v5971_v16  ;;  %v6060_v15 = vld [vmem:[%s7928_s4 + $0x524] ss:$16 sps:$4 sm:$0xff]   ;;  %v6063_v16 = vld [vmem:[%s7928_s4 + $0x52c] ss:$16 sps:$4 sm:$0xff]  }
  0x81   :  { %2525 = vmatprep.subr.bf16.mxu0 %v5979_v17  ;;  %2718 = vmatprep.subr.bf16.mxu1 %v5982_v18  ;;  %v6058_v17 = vld [vmem:[%s7928_s4 + $0x520] ss:$16 sps:$4 sm:$0xff]   ;;  %v6061_v18 = vld [vmem:[%s7928_s4 + $0x528] ss:$16 sps:$4 sm:$0xff]  }
  0x82   :  { %809 = vmatmul.mubr.bf16.gmra.mrb[32].mxu0 %v5904_v19  ;;  %1002 = vmatmul.mubr.bf16.gmra.mrb[32].mxu1 %v5904_v19  ;;  %v6069_v19 = vld [vmem:[%s7928_s4 + $0x544] ss:$16 sps:$4 sm:$0xff]  }
  0x83   :  { %818 = vmatprep.mubr.bf16.mxu0 %v5911_v20  ;;  %1011 = vmatprep.mubr.bf16.mxu1 %v5911_v20  ;;  %v6072_v20 = vld [vmem:[%s7928_s4 + $0x54c] ss:$16 sps:$4 sm:$0xff]  }
  0x8a   :  { %819 = vmatmul.mubr.bf16.gmra.mrb[36].mxu0 %v5913_v21  ;;  %1012 = vmatmul.mubr.bf16.gmra.mrb[36].mxu1 %v5913_v21  ;;  %v6021_v21 = vld [vmem:[%s7930_s0 + $0x50] ss:$8 sps:$4 sm:$0xff]  }
  0x8b   :  { %828 = vmatprep.mubr.bf16.mxu0 %v5920_v22  ;;  %1021 = vmatprep.mubr.bf16.mxu1 %v5920_v22  ;;  %v6028_v22 = vld [vmem:[%s7930_s0 + $0x64] ss:$8 sps:$4 sm:$0xff]  }
  0x92   :  { %829 = vmatmul.mubr.bf16.gmra.mrb[40].mxu0 %v5922_v23  ;;  %1022 = vmatmul.mubr.bf16.gmra.mrb[40].mxu1 %v5922_v23  ;;  %v6067_v23 = vld [vmem:[%s7928_s4 + $0x540] ss:$16 sps:$4 sm:$0xff]  }
  0x93   :  { %838 = vmatprep.mubr.bf16.mxu0 %v5929_v24  ;;  %1031 = vmatprep.mubr.bf16.mxu1 %v5929_v24  ;;  %v6070_v24 = vld [vmem:[%s7928_s4 + $0x548] ss:$16 sps:$4 sm:$0xff]  }
  0x9a   :  { %839 = vmatmul.mubr.bf16.gmra.mrb[44].mxu0 %v5931_v25  ;;  %1032 = vmatmul.mubr.bf16.gmra.mrb[44].mxu1 %v5931_v25  ;;  %v6078_v25 = vld [vmem:[%s7928_s4 + $0x564] ss:$16 sps:$4 sm:$0xff]  }
  0x9b   :  { %848 = vmatprep.mubr.bf16.mxu0 %v5938_v26  ;;  %1041 = vmatprep.mubr.bf16.mxu1 %v5938_v26  ;;  %v6081_v26 = vld [vmem:[%s7928_s4 + $0x56c] ss:$16 sps:$4 sm:$0xff]  }
  0xa2   :  { %849 = vmatmul.mubr.bf16.gmra.mrb[48].mxu0 %v5940_v27  ;;  %1042 = vmatmul.mubr.bf16.gmra.mrb[48].mxu1 %v5940_v27  ;;  %v6076_v27 = vld [vmem:[%s7928_s4 + $0x560] ss:$16 sps:$4 sm:$0xff]  }
  0xa3   :  { %858 = vmatprep.mubr.bf16.mxu0 %v5947_v28  ;;  %1051 = vmatprep.mubr.bf16.mxu1 %v5947_v28  ;;  %v6079_v28 = vld [vmem:[%s7928_s4 + $0x568] ss:$16 sps:$4 sm:$0xff]  }
  0xaa   :  { %859 = vmatmul.mubr.bf16.gmra.mrb[52].mxu0 %v5949_v29  ;;  %1052 = vmatmul.mubr.bf16.gmra.mrb[52].mxu1 %v5949_v29  ;;  %v6087_v29 = vld [vmem:[%s7928_s4 + $0x584] ss:$16 sps:$4 sm:$0xff]  }
  0xab   :  { %868 = vmatprep.mubr.bf16.mxu0 %v5956_v30  ;;  %1061 = vmatprep.mubr.bf16.mxu1 %v5956_v30  ;;  %v6090_v30 = vld [vmem:[%s7928_s4 + $0x58c] ss:$16 sps:$4 sm:$0xff]  }
  0xb2   :  { %869 = vmatmul.mubr.bf16.gmra.mrb[56].mxu0 %v5958_v31  ;;  %1062 = vmatmul.mubr.bf16.gmra.mrb[56].mxu1 %v5958_v31  ;;  %v6030_v31 = vld [vmem:[%s7930_s0 + $0x60] ss:$8 sps:$4 sm:$0xff]  }
  0xb3   :  { %878 = vmatprep.mubr.bf16.mxu0 %v5965_v32  ;;  %1071 = vmatprep.mubr.bf16.mxu1 %v5965_v32  ;;  %v6037_v32 = vld [vmem:[%s7930_s0 + $0x74] ss:$8 sps:$4 sm:$0xff]  }
  0xba   :  { %879 = vmatmul.mubr.bf16.gmra.mrb[60].mxu0 %v5967_v33  ;;  %1072 = vmatmul.mubr.bf16.gmra.mrb[60].mxu1 %v5967_v33  ;;  %v6085_v33 = vld [vmem:[%s7928_s4 + $0x580] ss:$16 sps:$4 sm:$0xff]  }
  0xbb   :  { %1594 = vmatprep.mubr.bf16.mxu0 %v5976_v34  ;;  %1787 = vmatprep.mubr.bf16.mxu1 %v5976_v34  ;;  %v6088_v34 = vld [vmem:[%s7928_s4 + $0x588] ss:$16 sps:$4 sm:$0xff]  }
  0xc2   :  { %1595 = vmatmul.mubr.bf16.vlgmr.msra.gmra.mrb[0].mxu0 %v5974_v35  ;;  %1788 = vmatmul.mubr.bf16.vlgmr.msra.gmra.mrb[0].mxu1 %v5974_v35  ;;  %v6096_v35 = vld [vmem:[%s7928_s4 + $0x5a4] ss:$16 sps:$4 sm:$0xff]  }
  0xc3   :  { %2526 = vmatpush1.bf16.msra.mxu0 %v5977_v36  ;;  %2719 = vmatpush1.bf16.msra.mxu1 %v5980_v37  ;;  %v6099_v36 = vld [vmem:[%s7928_s4 + $0x5ac] ss:$16 sps:$4 sm:$0xff]   ;;  %v6094_v37 = vld [vmem:[%s7928_s4 + $0x5a0] ss:$16 sps:$4 sm:$0xff]  }
  0xc4   :  { %1604 = vmatprep.mubr.bf16.mxu0 %v5983_v38  ;;  %1797 = vmatprep.mubr.bf16.mxu1 %v5983_v38  ;;  %v6097_v38 = vld [vmem:[%s7928_s4 + $0x5a8] ss:$16 sps:$4 sm:$0xff]  }
  0xc5   :  { %2527 = vmatprep.subr.bf16.mxu0 %v5988_v39  ;;  %2720 = vmatprep.subr.bf16.mxu1 %v5991_v40  ;;  %v6105_v39 = vld [vmem:[%s7928_s4 + $0x5c4] ss:$16 sps:$4 sm:$0xff]   ;;  %v6108_v40 = vld [vmem:[%s7928_s4 + $0x5cc] ss:$16 sps:$4 sm:$0xff]  }
  0xc7   :  { %2528 = vmatpush1.bf16.msra.mxu0 %v5986_v41  ;;  %2721 = vmatpush1.bf16.msra.mxu1 %v5989_v42  ;;  %v6039_v41 = vld [vmem:[%s7930_s0 + $0x70] ss:$8 sps:$4 sm:$0xff]   ;;  %v6046_v42 = vld [vmem:[%s7930_s0 + $0x84] ss:$8 sps:$4 sm:$0xff]  }
  0xc8   :  { %2529 = vmatprep.subr.bf16.mxu0 %v5997_v43  ;;  %2722 = vmatprep.subr.bf16.mxu1 %v6000_v45  ;;  %v6103_v43 = vld [vmem:[%s7928_s4 + $0x5c0] ss:$16 sps:$4 sm:$0xff]   ;;  %v6114_v45 = vld [vmem:[%s7928_s4 + $0x5e4] ss:$16 sps:$4 sm:$0xff]  }
  0xca   :  { %1605 = vmatmul.mubr.bf16.gmra.mrb[4].mxu0 %v5985_v44  ;;  %1798 = vmatmul.mubr.bf16.gmra.mrb[4].mxu1 %v5985_v44  ;;  %v6106_v44 = vld [vmem:[%s7928_s4 + $0x5c8] ss:$16 sps:$4 sm:$0xff]  }
  0xcb   :  { %1614 = vmatprep.mubr.bf16.mxu0 %v5992_v46  ;;  %1807 = vmatprep.mubr.bf16.mxu1 %v5992_v46  ;;  %v6117_v46 = vld [vmem:[%s7928_s4 + $0x5ec] ss:$16 sps:$4 sm:$0xff]  }
  0xcc   :  { %2530 = vmatpush1.bf16.msra.mxu0 %v5995_v47  ;;  %2723 = vmatpush1.bf16.msra.mxu1 %v5998_v48  ;;  %v6112_v47 = vld [vmem:[%s7928_s4 + $0x5e0] ss:$16 sps:$4 sm:$0xff]   ;;  %v6115_v48 = vld [vmem:[%s7928_s4 + $0x5e8] ss:$16 sps:$4 sm:$0xff]  }
  0xcd   :  { %2531 = vmatprep.subr.bf16.mxu0 %v6006_v49  ;;  %2724 = vmatprep.subr.bf16.mxu1 %v6009_v50  ;;  %v6123_v49 = vld [vmem:[%s7928_s4 + $0x604] ss:$16 sps:$4 sm:$0xff]   ;;  %v6126_v50 = vld [vmem:[%s7928_s4 + $0x60c] ss:$16 sps:$4 sm:$0xff]  }
  0xd0   :  { %2532 = vmatpush1.bf16.msra.mxu0 %v6004_v51  ;;  %2725 = vmatpush1.bf16.msra.mxu1 %v6007_v52  ;;  %v6048_v51 = vld [vmem:[%s7930_s0 + $0x80] ss:$8 sps:$4 sm:$0xff]   ;;  %v6055_v52 = vld [vmem:[%s7930_s0 + $0x94] ss:$8 sps:$4 sm:$0xff]  }
  0xd1   :  { %2533 = vmatprep.subr.bf16.mxu0 %v6015_v53  ;;  %2726 = vmatprep.subr.bf16.mxu1 %v6018_v54  ;;  %v6057_v53 = vld [vmem:[%s7930_s0 + $0x90] ss:$8 sps:$4 sm:$0xff]   ;;  %v6064_v54 = vld [vmem:[%s7930_s0 + $0xa4] ss:$8 sps:$4 sm:$0xff]  }
  0xd2   :  { %1615 = vmatmul.mubr.bf16.gmra.mrb[8].mxu0 %v5994_v55  ;;  %1808 = vmatmul.mubr.bf16.gmra.mrb[8].mxu1 %v5994_v55  ;;  %v6066_v55 = vld [vmem:[%s7930_s0 + $0xa0] ss:$8 sps:$4 sm:$0xff]  }
  0xd3   :  { %1624 = vmatprep.mubr.bf16.mxu0 %v6001_v56  ;;  %1817 = vmatprep.mubr.bf16.mxu1 %v6001_v56  ;;  %v6073_v56 = vld [vmem:[%s7930_s0 + $0xb4] ss:$8 sps:$4 sm:$0xff]  }
  0xd4   :  { %2534 = vmatpush1.bf16.msra.mxu0 %v6013_v57  ;;  %2727 = vmatpush1.bf16.msra.mxu1 %v6016_v58  ;;  %v6075_v57 = vld [vmem:[%s7930_s0 + $0xb0] ss:$8 sps:$4 sm:$0xff]   ;;  %v6082_v58 = vld [vmem:[%s7930_s0 + $0xc4] ss:$8 sps:$4 sm:$0xff]  }
  0xd5   :  { %2535 = vmatprep.subr.bf16.mxu0 %v6024_v59  ;;  %2728 = vmatprep.subr.bf16.mxu1 %v6027_v60  ;;  %v6084_v59 = vld [vmem:[%s7930_s0 + $0xc0] ss:$8 sps:$4 sm:$0xff]   ;;  %v6091_v60 = vld [vmem:[%s7930_s0 + $0xd4] ss:$8 sps:$4 sm:$0xff]  }
  0xd8   :  { %2536 = vmatpush1.bf16.msra.mxu0 %v6022_v61  ;;  %2729 = vmatpush1.bf16.msra.mxu1 %v6025_v62  ;;  %v6093_v61 = vld [vmem:[%s7930_s0 + $0xd0] ss:$8 sps:$4 sm:$0xff]   ;;  %v6100_v62 = vld [vmem:[%s7930_s0 + $0xe4] ss:$8 sps:$4 sm:$0xff]  }
  0xd9   :  { %2537 = vmatprep.subr.bf16.mxu0 %v6033_v63  ;;  %2730 = vmatprep.subr.bf16.mxu1 %v6036_v0  ;;  %v6102_v63 = vld [vmem:[%s7930_s0 + $0xe0] ss:$8 sps:$4 sm:$0xff]   ;;  %v6109_v0 = vld [vmem:[%s7930_s0 + $0xf4] ss:$8 sps:$4 sm:$0xff]  }
  0xda   :  { %1625 = vmatmul.mubr.bf16.gmra.mrb[12].mxu0 %v6003_v1  ;;  %1818 = vmatmul.mubr.bf16.gmra.mrb[12].mxu1 %v6003_v1  ;;  %v6111_v1 = vld [vmem:[%s7930_s0 + $0xf0] ss:$8 sps:$4 sm:$0xff]  }
  0xdb   :  { %1634 = vmatprep.mubr.bf16.mxu0 %v6010_v2  ;;  %1827 = vmatprep.mubr.bf16.mxu1 %v6010_v2  ;;  %v6120_v2 = vld [vmem:[%s7931_s2 + $0x4] ss:$8 sps:$4 sm:$0xff]  }
  0xdc   :  { %2538 = vmatpush1.bf16.msra.mxu0 %v6031_v3  ;;  %2731 = vmatpush1.bf16.msra.mxu1 %v6034_v4  ;;  %v6118_v3 = vld [vmem:[%s7931_s2] ss:$8 sps:$4 sm:$0xff]  }
  0xdd   :  { %2539 = vmatprep.subr.bf16.mxu0 %v6042_v5  ;;  %2732 = vmatprep.subr.bf16.mxu1 %v6045_v6  ;;  %v6121_v4 = vld [vmem:[%s7928_s4 + $0x600] ss:$16 sps:$4 sm:$0xff]   ;;  %v6124_v5 = vld [vmem:[%s7928_s4 + $0x608] ss:$16 sps:$4 sm:$0xff]   ;;  %v6127_v6 = vld [vmem:[%s7931_s2 + $0x14] ss:$8 sps:$4 sm:$0xff]  }
  0xe0   :  { %2540 = vmatpush1.bf16.msra.mxu0 %v6040_v7  ;;  %2733 = vmatpush1.bf16.msra.mxu1 %v6043_v8  ;;  %v6132_v7 = vld [vmem:[%s7928_s4 + $0x624] ss:$16 sps:$4 sm:$0xff]   ;;  %v6135_v8 = vld [vmem:[%s7928_s4 + $0x62c] ss:$16 sps:$4 sm:$0xff]  }
  0xe1   :  { %2541 = vmatprep.subr.bf16.mxu0 %v6051_v9  ;;  %2734 = vmatprep.subr.bf16.mxu1 %v6054_v10  ;;  %v6130_v9 = vld [vmem:[%s7928_s4 + $0x620] ss:$16 sps:$4 sm:$0xff]   ;;  %v6133_v10 = vld [vmem:[%s7928_s4 + $0x628] ss:$16 sps:$4 sm:$0xff]  }
  0xe2   :  { %1635 = vmatmul.mubr.bf16.gmra.mrb[16].mxu0 %v6012_v11  ;;  %1828 = vmatmul.mubr.bf16.gmra.mrb[16].mxu1 %v6012_v11  ;;  %v6141_v11 = vld [vmem:[%s7928_s4 + $0x644] ss:$16 sps:$4 sm:$0xff]  }
  0xe3   :  { %1644 = vmatprep.mubr.bf16.mxu0 %v6019_v12  ;;  %1837 = vmatprep.mubr.bf16.mxu1 %v6019_v12  ;;  %v6144_v12 = vld [vmem:[%s7928_s4 + $0x64c] ss:$16 sps:$4 sm:$0xff]  }
  0xe4   :  { %2542 = vmatpush1.bf16.msra.mxu0 %v6049_v13  ;;  %2735 = vmatpush1.bf16.msra.mxu1 %v6052_v14  ;;  %v6129_v13 = vld [vmem:[%s7931_s2 + $0x10] ss:$8 sps:$4 sm:$0xff]   ;;  %v6136_v14 = vld [vmem:[%s7931_s2 + $0x24] ss:$8 sps:$4 sm:$0xff]  }
  0xe5   :  { %2543 = vmatprep.subr.bf16.mxu0 %v6060_v15  ;;  %2736 = vmatprep.subr.bf16.mxu1 %v6063_v16  ;;  %v6139_v15 = vld [vmem:[%s7928_s4 + $0x640] ss:$16 sps:$4 sm:$0xff]   ;;  %v6142_v16 = vld [vmem:[%s7928_s4 + $0x648] ss:$16 sps:$4 sm:$0xff]  }
  0xe8   :  { %2544 = vmatpush1.bf16.msra.mxu0 %v6058_v17  ;;  %2737 = vmatpush1.bf16.msra.mxu1 %v6061_v18  ;;  %v6150_v17 = vld [vmem:[%s7928_s4 + $0x664] ss:$16 sps:$4 sm:$0xff]   ;;  %v6153_v18 = vld [vmem:[%s7928_s4 + $0x66c] ss:$16 sps:$4 sm:$0xff]  }
  0xe9   :  { %2545 = vmatprep.subr.bf16.mxu0 %v6069_v19  ;;  %2738 = vmatprep.subr.bf16.mxu1 %v6072_v20  ;;  %v6148_v19 = vld [vmem:[%s7928_s4 + $0x660] ss:$16 sps:$4 sm:$0xff]   ;;  %v6151_v20 = vld [vmem:[%s7928_s4 + $0x668] ss:$16 sps:$4 sm:$0xff]  }
  0xea   :  { %1645 = vmatmul.mubr.bf16.gmra.mrb[20].mxu0 %v6021_v21  ;;  %1838 = vmatmul.mubr.bf16.gmra.mrb[20].mxu1 %v6021_v21  ;;  %v6159_v21 = vld [vmem:[%s7928_s4 + $0x684] ss:$16 sps:$4 sm:$0xff]  }
  0xeb   :  { %1654 = vmatprep.mubr.bf16.mxu0 %v6028_v22  ;;  %1847 = vmatprep.mubr.bf16.mxu1 %v6028_v22  ;;  %v6162_v22 = vld [vmem:[%s7928_s4 + $0x68c] ss:$16 sps:$4 sm:$0xff]  }
  0xec   :  { %2546 = vmatpush1.bf16.msra.mxu0 %v6067_v23  ;;  %2739 = vmatpush1.bf16.msra.mxu1 %v6070_v24  ;;  %v6138_v23 = vld [vmem:[%s7931_s2 + $0x20] ss:$8 sps:$4 sm:$0xff]   ;;  %v6145_v24 = vld [vmem:[%s7931_s2 + $0x34] ss:$8 sps:$4 sm:$0xff]  }
  0xed   :  { %2547 = vmatprep.subr.bf16.mxu0 %v6078_v25  ;;  %2740 = vmatprep.subr.bf16.mxu1 %v6081_v26  ;;  %v6157_v25 = vld [vmem:[%s7928_s4 + $0x680] ss:$16 sps:$4 sm:$0xff]   ;;  %v6160_v26 = vld [vmem:[%s7928_s4 + $0x688] ss:$16 sps:$4 sm:$0xff]  }
  0xf0   :  { %2548 = vmatpush1.bf16.msra.mxu0 %v6076_v27  ;;  %2741 = vmatpush1.bf16.msra.mxu1 %v6079_v28  ;;  %v6168_v27 = vld [vmem:[%s7928_s4 + $0x6a4] ss:$16 sps:$4 sm:$0xff]   ;;  %v6171_v28 = vld [vmem:[%s7928_s4 + $0x6ac] ss:$16 sps:$4 sm:$0xff]  }
  0xf1   :  { %2549 = vmatprep.subr.bf16.mxu0 %v6087_v29  ;;  %2742 = vmatprep.subr.bf16.mxu1 %v6090_v30  ;;  %v6166_v29 = vld [vmem:[%s7928_s4 + $0x6a0] ss:$16 sps:$4 sm:$0xff]   ;;  %v6169_v30 = vld [vmem:[%s7928_s4 + $0x6a8] ss:$16 sps:$4 sm:$0xff]  }
  0xf2   :  { %1655 = vmatmul.mubr.bf16.gmra.mrb[24].mxu0 %v6030_v31  ;;  %1848 = vmatmul.mubr.bf16.gmra.mrb[24].mxu1 %v6030_v31  ;;  %v6177_v31 = vld [vmem:[%s7928_s4 + $0x6c4] ss:$16 sps:$4 sm:$0xff]  }
  0xf3   :  { %1664 = vmatprep.mubr.bf16.mxu0 %v6037_v32  ;;  %1857 = vmatprep.mubr.bf16.mxu1 %v6037_v32  ;;  %v6180_v32 = vld [vmem:[%s7928_s4 + $0x6cc] ss:$16 sps:$4 sm:$0xff]  }
  0xf4   :  { %2550 = vmatpush1.bf16.msra.mxu0 %v6085_v33  ;;  %2743 = vmatpush1.bf16.msra.mxu1 %v6088_v34  ;;  %v6147_v33 = vld [vmem:[%s7931_s2 + $0x30] ss:$8 sps:$4 sm:$0xff]   ;;  %v6154_v34 = vld [vmem:[%s7931_s2 + $0x44] ss:$8 sps:$4 sm:$0xff]  }
  0xf5   :  { %2551 = vmatprep.subr.bf16.mxu0 %v6096_v35  ;;  %2744 = vmatprep.subr.bf16.mxu1 %v6099_v36  ;;  %v6175_v35 = vld [vmem:[%s7928_s4 + $0x6c0] ss:$16 sps:$4 sm:$0xff]   ;;  %v6178_v36 = vld [vmem:[%s7928_s4 + $0x6c8] ss:$16 sps:$4 sm:$0xff]  }
  0xf8   :  { %2552 = vmatpush1.bf16.msra.mxu0 %v6094_v37  ;;  %2745 = vmatpush1.bf16.msra.mxu1 %v6097_v38  ;;  %v6186_v37 = vld [vmem:[%s7928_s4 + $0x6e4] ss:$16 sps:$4 sm:$0xff]   ;;  %v6189_v38 = vld [vmem:[%s7928_s4 + $0x6ec] ss:$16 sps:$4 sm:$0xff]  }
  0xf9   :  { %2553 = vmatprep.subr.bf16.mxu0 %v6105_v39  ;;  %2746 = vmatprep.subr.bf16.mxu1 %v6108_v40  ;;  %v6184_v39 = vld [vmem:[%s7928_s4 + $0x6e0] ss:$16 sps:$4 sm:$0xff]   ;;  %v6187_v40 = vld [vmem:[%s7928_s4 + $0x6e8] ss:$16 sps:$4 sm:$0xff]  }
  0xfa   :  { %1665 = vmatmul.mubr.bf16.gmra.mrb[28].mxu0 %v6039_v41  ;;  %1858 = vmatmul.mubr.bf16.gmra.mrb[28].mxu1 %v6039_v41  ;;  %v6195_v41 = vld [vmem:[%s7928_s4 + $0x704] ss:$16 sps:$4 sm:$0xff]  }
  0xfb   :  { %1674 = vmatprep.mubr.bf16.mxu0 %v6046_v42  ;;  %1867 = vmatprep.mubr.bf16.mxu1 %v6046_v42  ;;  %v6198_v42 = vld [vmem:[%s7928_s4 + $0x70c] ss:$16 sps:$4 sm:$0xff]  }
  0xfc   :  { %2554 = vmatpush1.bf16.msra.mxu0 %v6103_v43  ;;  %2747 = vmatpush1.bf16.msra.mxu1 %v6106_v44  ;;  %v6156_v43 = vld [vmem:[%s7931_s2 + $0x40] ss:$8 sps:$4 sm:$0xff]   ;;  %v6163_v44 = vld [vmem:[%s7931_s2 + $0x54] ss:$8 sps:$4 sm:$0xff]  }
  0xfd   :  { %2555 = vmatprep.subr.bf16.mxu0 %v6114_v45  ;;  %2748 = vmatprep.subr.bf16.mxu1 %v6117_v46  ;;  %v6193_v45 = vld [vmem:[%s7928_s4 + $0x700] ss:$16 sps:$4 sm:$0xff]   ;;  %v6196_v46 = vld [vmem:[%s7928_s4 + $0x708] ss:$16 sps:$4 sm:$0xff]  }
 0x100   :  { %2556 = vmatpush1.bf16.msra.mxu0 %v6112_v47  ;;  %2749 = vmatpush1.bf16.msra.mxu1 %v6115_v48  ;;  %v6204_v47 = vld [vmem:[%s7928_s4 + $0x724] ss:$16 sps:$4 sm:$0xff]   ;;  %v6207_v48 = vld [vmem:[%s7928_s4 + $0x72c] ss:$16 sps:$4 sm:$0xff]  }
 0x101   :  { %3616 = vmatprep.subr.bf16.mxu0 %v6123_v49  ;;  %3809 = vmatprep.subr.bf16.mxu1 %v6126_v50  ;;  %v6202_v49 = vld [vmem:[%s7928_s4 + $0x720] ss:$16 sps:$4 sm:$0xff]   ;;  %v6205_v50 = vld [vmem:[%s7928_s4 + $0x728] ss:$16 sps:$4 sm:$0xff]  }
 0x102   :  { %1675 = vmatmul.mubr.bf16.gmra.mrb[32].mxu0 %v6048_v51  ;;  %1868 = vmatmul.mubr.bf16.gmra.mrb[32].mxu1 %v6048_v51  ;;  %v6213_v51 = vld [vmem:[%s7928_s4 + $0x744] ss:$16 sps:$4 sm:$0xff]  }
 0x103   :  { %1684 = vmatprep.mubr.bf16.mxu0 %v6055_v52  ;;  %1877 = vmatprep.mubr.bf16.mxu1 %v6055_v52  ;;  %v6216_v52 = vld [vmem:[%s7928_s4 + $0x74c] ss:$16 sps:$4 sm:$0xff]  }
 0x10a   :  { %1685 = vmatmul.mubr.bf16.gmra.mrb[36].mxu0 %v6057_v53  ;;  %1878 = vmatmul.mubr.bf16.gmra.mrb[36].mxu1 %v6057_v53  ;;  %v6165_v53 = vld [vmem:[%s7931_s2 + $0x50] ss:$8 sps:$4 sm:$0xff]  }
 0x10b   :  { %1694 = vmatprep.mubr.bf16.mxu0 %v6064_v54  ;;  %1887 = vmatprep.mubr.bf16.mxu1 %v6064_v54  ;;  %v6172_v54 = vld [vmem:[%s7931_s2 + $0x64] ss:$8 sps:$4 sm:$0xff]  }
 0x112   :  { %1695 = vmatmul.mubr.bf16.gmra.mrb[40].mxu0 %v6066_v55  ;;  %1888 = vmatmul.mubr.bf16.gmra.mrb[40].mxu1 %v6066_v55  ;;  %v6211_v55 = vld [vmem:[%s7928_s4 + $0x740] ss:$16 sps:$4 sm:$0xff]  }
 0x113   :  { %1704 = vmatprep.mubr.bf16.mxu0 %v6073_v56  ;;  %1897 = vmatprep.mubr.bf16.mxu1 %v6073_v56  ;;  %v6214_v56 = vld [vmem:[%s7928_s4 + $0x748] ss:$16 sps:$4 sm:$0xff]  }
 0x11a   :  { %1705 = vmatmul.mubr.bf16.gmra.mrb[44].mxu0 %v6075_v57  ;;  %1898 = vmatmul.mubr.bf16.gmra.mrb[44].mxu1 %v6075_v57  ;;  %v6222_v57 = vld [vmem:[%s7928_s4 + $0x764] ss:$16 sps:$4 sm:$0xff]  }
 0x11b   :  { %1714 = vmatprep.mubr.bf16.mxu0 %v6082_v58  ;;  %1907 = vmatprep.mubr.bf16.mxu1 %v6082_v58  ;;  %v6225_v58 = vld [vmem:[%s7928_s4 + $0x76c] ss:$16 sps:$4 sm:$0xff]  }
 0x122   :  { %1715 = vmatmul.mubr.bf16.gmra.mrb[48].mxu0 %v6084_v59  ;;  %1908 = vmatmul.mubr.bf16.gmra.mrb[48].mxu1 %v6084_v59  ;;  %v6220_v59 = vld [vmem:[%s7928_s4 + $0x760] ss:$16 sps:$4 sm:$0xff]  }
 0x123   :  { %1724 = vmatprep.mubr.bf16.mxu0 %v6091_v60  ;;  %1917 = vmatprep.mubr.bf16.mxu1 %v6091_v60  ;;  %v6223_v60 = vld [vmem:[%s7928_s4 + $0x768] ss:$16 sps:$4 sm:$0xff]  }
 0x12a   :  { %1725 = vmatmul.mubr.bf16.gmra.mrb[52].mxu0 %v6093_v61  ;;  %1918 = vmatmul.mubr.bf16.gmra.mrb[52].mxu1 %v6093_v61  ;;  %v6231_v61 = vld [vmem:[%s7928_s4 + $0x784] ss:$16 sps:$4 sm:$0xff]  }
 0x12b   :  { %1734 = vmatprep.mubr.bf16.mxu0 %v6100_v62  ;;  %1927 = vmatprep.mubr.bf16.mxu1 %v6100_v62  ;;  %v6234_v62 = vld [vmem:[%s7928_s4 + $0x78c] ss:$16 sps:$4 sm:$0xff]  }
 0x132   :  { %1735 = vmatmul.mubr.bf16.gmra.mrb[56].mxu0 %v6102_v63  ;;  %1928 = vmatmul.mubr.bf16.gmra.mrb[56].mxu1 %v6102_v63  ;;  %v6174_v63 = vld [vmem:[%s7931_s2 + $0x60] ss:$8 sps:$4 sm:$0xff]  }
 0x133   :  { %1744 = vmatprep.mubr.bf16.mxu0 %v6109_v0  ;;  %1937 = vmatprep.mubr.bf16.mxu1 %v6109_v0  ;;  %v6181_v0 = vld [vmem:[%s7931_s2 + $0x74] ss:$8 sps:$4 sm:$0xff]  }
 0x13a   :  { %1745 = vmatmul.mubr.bf16.gmra.mrb[60].mxu0 %v6111_v1  ;;  %1938 = vmatmul.mubr.bf16.gmra.mrb[60].mxu1 %v6111_v1  ;;  %v6229_v1 = vld [vmem:[%s7928_s4 + $0x780] ss:$16 sps:$4 sm:$0xff]  }
 0x13b   :  { %2557 = vmatprep.mubr.bf16.mxu0 %v6120_v2  ;;  %2750 = vmatprep.mubr.bf16.mxu1 %v6120_v2  ;;  %v6232_v2 = vld [vmem:[%s7928_s4 + $0x788] ss:$16 sps:$4 sm:$0xff]  }
 0x142   :  { %2558 = vmatmul.mubr.bf16.vlgmr.msra.gmra.mrb[0].mxu0 %v6118_v3  ;;  %2751 = vmatmul.mubr.bf16.vlgmr.msra.gmra.mrb[0].mxu1 %v6118_v3  ;;  %v6240_v3 = vld [vmem:[%s7928_s4 + $0x7a4] ss:$16 sps:$4 sm:$0xff]  }
 0x143   :  { %3617 = vmatpush1.bf16.msra.mxu0 %v6121_v4  ;;  %3810 = vmatpush1.bf16.msra.mxu1 %v6124_v5  ;;  %v6243_v4 = vld [vmem:[%s7928_s4 + $0x7ac] ss:$16 sps:$4 sm:$0xff]   ;;  %v6238_v5 = vld [vmem:[%s7928_s4 + $0x7a0] ss:$16 sps:$4 sm:$0xff]  }
 0x144   :  { %2567 = vmatprep.mubr.bf16.mxu0 %v6127_v6  ;;  %2760 = vmatprep.mubr.bf16.mxu1 %v6127_v6  ;;  %v6241_v6 = vld [vmem:[%s7928_s4 + $0x7a8] ss:$16 sps:$4 sm:$0xff]  }
 0x145   :  { %3618 = vmatprep.subr.bf16.mxu0 %v6132_v7  ;;  %3811 = vmatprep.subr.bf16.mxu1 %v6135_v8  ;;  %v6249_v7 = vld [vmem:[%s7928_s4 + $0x7c4] ss:$16 sps:$4 sm:$0xff]   ;;  %v6252_v8 = vld [vmem:[%s7928_s4 + $0x7cc] ss:$16 sps:$4 sm:$0xff]  }
 0x147   :  { %3619 = vmatpush1.bf16.msra.mxu0 %v6130_v9  ;;  %3812 = vmatpush1.bf16.msra.mxu1 %v6133_v10  ;;  %v6183_v9 = vld [vmem:[%s7931_s2 + $0x70] ss:$8 sps:$4 sm:$0xff]   ;;  %v6190_v10 = vld [vmem:[%s7931_s2 + $0x84] ss:$8 sps:$4 sm:$0xff]  }
 0x148   :  { %3620 = vmatprep.subr.bf16.mxu0 %v6141_v11  ;;  %3813 = vmatprep.subr.bf16.mxu1 %v6144_v12  ;;  %v6247_v11 = vld [vmem:[%s7928_s4 + $0x7c0] ss:$16 sps:$4 sm:$0xff]   ;;  %v6250_v12 = vld [vmem:[%s7928_s4 + $0x7c8] ss:$16 sps:$4 sm:$0xff]  }
 0x14a   :  { %2568 = vmatmul.mubr.bf16.gmra.mrb[4].mxu0 %v6129_v13  ;;  %2761 = vmatmul.mubr.bf16.gmra.mrb[4].mxu1 %v6129_v13  ;;  %v6258_v13 = vld [vmem:[%s7928_s4 + $0x7e4] ss:$16 sps:$4 sm:$0xff]  }
 0x14b   :  { %2577 = vmatprep.mubr.bf16.mxu0 %v6136_v14  ;;  %2770 = vmatprep.mubr.bf16.mxu1 %v6136_v14  ;;  %v6261_v14 = vld [vmem:[%s7928_s4 + $0x7ec] ss:$16 sps:$4 sm:$0xff]  }
 0x14c   :  { %3621 = vmatpush1.bf16.msra.mxu0 %v6139_v15  ;;  %3814 = vmatpush1.bf16.msra.mxu1 %v6142_v16  ;;  %v6256_v15 = vld [vmem:[%s7928_s4 + $0x7e0] ss:$16 sps:$4 sm:$0xff]   ;;  %v6259_v16 = vld [vmem:[%s7928_s4 + $0x7e8] ss:$16 sps:$4 sm:$0xff]  }
 0x14d   :  { %3622 = vmatprep.subr.bf16.mxu0 %v6150_v17  ;;  %3815 = vmatprep.subr.bf16.mxu1 %v6153_v18  ;;  %v6192_v17 = vld [vmem:[%s7931_s2 + $0x80] ss:$8 sps:$4 sm:$0xff]   ;;  %v6199_v18 = vld [vmem:[%s7931_s2 + $0x94] ss:$8 sps:$4 sm:$0xff]  }
 0x150   :  { %3623 = vmatpush1.bf16.msra.mxu0 %v6148_v19  ;;  %3816 = vmatpush1.bf16.msra.mxu1 %v6151_v20  ;;  %v6201_v19 = vld [vmem:[%s7931_s2 + $0x90] ss:$8 sps:$4 sm:$0xff]   ;;  %v6208_v20 = vld [vmem:[%s7931_s2 + $0xa4] ss:$8 sps:$4 sm:$0xff]  }
 0x151   :  { %3624 = vmatprep.subr.bf16.mxu0 %v6159_v21  ;;  %3817 = vmatprep.subr.bf16.mxu1 %v6162_v22  ;;  %v6210_v21 = vld [vmem:[%s7931_s2 + $0xa0] ss:$8 sps:$4 sm:$0xff]   ;;  %v6217_v22 = vld [vmem:[%s7931_s2 + $0xb4] ss:$8 sps:$4 sm:$0xff]  }
 0x152   :  { %2578 = vmatmul.mubr.bf16.gmra.mrb[8].mxu0 %v6138_v23  ;;  %2771 = vmatmul.mubr.bf16.gmra.mrb[8].mxu1 %v6138_v23  ;;  %v6219_v23 = vld [vmem:[%s7931_s2 + $0xb0] ss:$8 sps:$4 sm:$0xff]  }
 0x153   :  { %2587 = vmatprep.mubr.bf16.mxu0 %v6145_v24  ;;  %2780 = vmatprep.mubr.bf16.mxu1 %v6145_v24  ;;  %v6226_v24 = vld [vmem:[%s7931_s2 + $0xc4] ss:$8 sps:$4 sm:$0xff]  }
 0x154   :  { %3625 = vmatpush1.bf16.msra.mxu0 %v6157_v25  ;;  %3818 = vmatpush1.bf16.msra.mxu1 %v6160_v26  ;;  %v6228_v25 = vld [vmem:[%s7931_s2 + $0xc0] ss:$8 sps:$4 sm:$0xff]   ;;  %v6235_v26 = vld [vmem:[%s7931_s2 + $0xd4] ss:$8 sps:$4 sm:$0xff]  }
 0x155   :  { %3626 = vmatprep.subr.bf16.mxu0 %v6168_v27  ;;  %3819 = vmatprep.subr.bf16.mxu1 %v6171_v28  ;;  %v6237_v27 = vld [vmem:[%s7931_s2 + $0xd0] ss:$8 sps:$4 sm:$0xff]   ;;  %v6244_v28 = vld [vmem:[%s7931_s2 + $0xe4] ss:$8 sps:$4 sm:$0xff]  }
 0x158   :  { %3627 = vmatpush1.bf16.msra.mxu0 %v6166_v29  ;;  %3820 = vmatpush1.bf16.msra.mxu1 %v6169_v30  ;;  %v6246_v29 = vld [vmem:[%s7931_s2 + $0xe0] ss:$8 sps:$4 sm:$0xff]   ;;  %v6253_v30 = vld [vmem:[%s7931_s2 + $0xf4] ss:$8 sps:$4 sm:$0xff]  }
 0x159   :  { %3628 = vmatprep.subr.bf16.mxu0 %v6177_v31  ;;  %3821 = vmatprep.subr.bf16.mxu1 %v6180_v32  ;;  %v6255_v31 = vld [vmem:[%s7931_s2 + $0xf0] ss:$8 sps:$4 sm:$0xff]   ;;  %v6264_v32 = vld [vmem:[%s7932_s3 + $0x4] ss:$8 sps:$4 sm:$0xff]  }
 0x15a   :  { %2588 = vmatmul.mubr.bf16.gmra.mrb[12].mxu0 %v6147_v33  ;;  %2781 = vmatmul.mubr.bf16.gmra.mrb[12].mxu1 %v6147_v33  ;;  %v6262_v33 = vld [vmem:[%s7932_s3] ss:$8 sps:$4 sm:$0xff]  }
 0x15b   :  { %2597 = vmatprep.mubr.bf16.mxu0 %v6154_v34  ;;  %2790 = vmatprep.mubr.bf16.mxu1 %v6154_v34  ;;  %v6265_v34 = vld [vmem:[%s7932_s3 + $0x14] ss:$8 sps:$4 sm:$0xff]  }
 0x15c   :  { %3629 = vmatpush1.bf16.msra.mxu0 %v6175_v35  ;;  %3822 = vmatpush1.bf16.msra.mxu1 %v6178_v36  ;;  %v6267_v35 = vld [vmem:[%s7932_s3 + $0x10] ss:$8 sps:$4 sm:$0xff]   ;;  %v6268_v36 = vld [vmem:[%s7932_s3 + $0x24] ss:$8 sps:$4 sm:$0xff]  }
 0x15d   :  { %3630 = vmatprep.subr.bf16.mxu0 %v6186_v37  ;;  %3823 = vmatprep.subr.bf16.mxu1 %v6189_v38  ;;  %v6270_v37 = vld [vmem:[%s7932_s3 + $0x20] ss:$8 sps:$4 sm:$0xff]   ;;  %v6271_v38 = vld [vmem:[%s7932_s3 + $0x34] ss:$8 sps:$4 sm:$0xff]  }
 0x160   :  { %3631 = vmatpush1.bf16.msra.mxu0 %v6184_v39  ;;  %3824 = vmatpush1.bf16.msra.mxu1 %v6187_v40  ;;  %v6273_v39 = vld [vmem:[%s7932_s3 + $0x30] ss:$8 sps:$4 sm:$0xff]   ;;  %v6274_v40 = vld [vmem:[%s7932_s3 + $0x44] ss:$8 sps:$4 sm:$0xff]  }
 0x161   :  { %3632 = vmatprep.subr.bf16.mxu0 %v6195_v41  ;;  %3825 = vmatprep.subr.bf16.mxu1 %v6198_v42  ;;  %v6276_v41 = vld [vmem:[%s7932_s3 + $0x40] ss:$8 sps:$4 sm:$0xff]   ;;  %v6277_v42 = vld [vmem:[%s7932_s3 + $0x54] ss:$8 sps:$4 sm:$0xff]  }
 0x162   :  { %2598 = vmatmul.mubr.bf16.gmra.mrb[16].mxu0 %v6156_v43  ;;  %2791 = vmatmul.mubr.bf16.gmra.mrb[16].mxu1 %v6156_v43  ;;  %v6279_v43 = vld [vmem:[%s7932_s3 + $0x50] ss:$8 sps:$4 sm:$0xff]  }
 0x163   :  { %2607 = vmatprep.mubr.bf16.mxu0 %v6163_v44  ;;  %2800 = vmatprep.mubr.bf16.mxu1 %v6163_v44  ;;  %v6280_v44 = vld [vmem:[%s7932_s3 + $0x64] ss:$8 sps:$4 sm:$0xff]  }
 0x164   :  { %3633 = vmatpush1.bf16.msra.mxu0 %v6193_v45  ;;  %3826 = vmatpush1.bf16.msra.mxu1 %v6196_v46  ;;  %v6282_v45 = vld [vmem:[%s7932_s3 + $0x60] ss:$8 sps:$4 sm:$0xff]   ;;  %v6283_v46 = vld [vmem:[%s7932_s3 + $0x74] ss:$8 sps:$4 sm:$0xff]  }
 0x165   :  { %3634 = vmatprep.subr.bf16.mxu0 %v6204_v47  ;;  %3827 = vmatprep.subr.bf16.mxu1 %v6207_v48  ;;  %v6285_v47 = vld [vmem:[%s7932_s3 + $0x70] ss:$8 sps:$4 sm:$0xff]   ;;  %v6286_v48 = vld [vmem:[%s7932_s3 + $0x84] ss:$8 sps:$4 sm:$0xff]  }
 0x168   :  { %3635 = vmatpush1.bf16.msra.mxu0 %v6202_v49  ;;  %3828 = vmatpush1.bf16.msra.mxu1 %v6205_v50  ;;  %v6288_v49 = vld [vmem:[%s7932_s3 + $0x80] ss:$8 sps:$4 sm:$0xff]   ;;  %v6289_v50 = vld [vmem:[%s7932_s3 + $0x94] ss:$8 sps:$4 sm:$0xff]  }
 0x169   :  { %3636 = vmatprep.subr.bf16.mxu0 %v6213_v51  ;;  %3829 = vmatprep.subr.bf16.mxu1 %v6216_v52  ;;  %v6291_v51 = vld [vmem:[%s7932_s3 + $0x90] ss:$8 sps:$4 sm:$0xff]   ;;  %v6292_v52 = vld [vmem:[%s7932_s3 + $0xa4] ss:$8 sps:$4 sm:$0xff]  }
 0x16a   :  { %2608 = vmatmul.mubr.bf16.gmra.mrb[20].mxu0 %v6165_v53  ;;  %2801 = vmatmul.mubr.bf16.gmra.mrb[20].mxu1 %v6165_v53  ;;  %v6294_v53 = vld [vmem:[%s7932_s3 + $0xa0] ss:$8 sps:$4 sm:$0xff]  }
 0x16b   :  { %2617 = vmatprep.mubr.bf16.mxu0 %v6172_v54  ;;  %2810 = vmatprep.mubr.bf16.mxu1 %v6172_v54  ;;  %v6295_v54 = vld [vmem:[%s7932_s3 + $0xb4] ss:$8 sps:$4 sm:$0xff]  }
 0x16c   :  { %3637 = vmatpush1.bf16.msra.mxu0 %v6211_v55  ;;  %3830 = vmatpush1.bf16.msra.mxu1 %v6214_v56  ;;  %v6297_v55 = vld [vmem:[%s7932_s3 + $0xb0] ss:$8 sps:$4 sm:$0xff]   ;;  %v6298_v56 = vld [vmem:[%s7932_s3 + $0xc4] ss:$8 sps:$4 sm:$0xff]  }
 0x16d   :  { %3638 = vmatprep.subr.bf16.mxu0 %v6222_v57  ;;  %3831 = vmatprep.subr.bf16.mxu1 %v6225_v58  ;;  %v6300_v57 = vld [vmem:[%s7932_s3 + $0xc0] ss:$8 sps:$4 sm:$0xff]   ;;  %v6301_v58 = vld [vmem:[%s7932_s3 + $0xd4] ss:$8 sps:$4 sm:$0xff]  }
 0x170   :  { %3639 = vmatpush1.bf16.msra.mxu0 %v6220_v59  ;;  %3832 = vmatpush1.bf16.msra.mxu1 %v6223_v60  ;;  %v6303_v59 = vld [vmem:[%s7932_s3 + $0xd0] ss:$8 sps:$4 sm:$0xff]   ;;  %v6304_v60 = vld [vmem:[%s7932_s3 + $0xe4] ss:$8 sps:$4 sm:$0xff]  }
 0x171   :  { %3640 = vmatprep.subr.bf16.mxu0 %v6231_v61  ;;  %3833 = vmatprep.subr.bf16.mxu1 %v6234_v62  ;;  %v6306_v61 = vld [vmem:[%s7932_s3 + $0xe0] ss:$8 sps:$4 sm:$0xff]   ;;  %v6307_v62 = vld [vmem:[%s7932_s3 + $0xf4] ss:$8 sps:$4 sm:$0xff]  }
 0x172   :  { %2618 = vmatmul.mubr.bf16.gmra.mrb[24].mxu0 %v6174_v63  ;;  %2811 = vmatmul.mubr.bf16.gmra.mrb[24].mxu1 %v6174_v63  ;;  %v6309_v63 = vld [vmem:[%s7932_s3 + $0xf0] ss:$8 sps:$4 sm:$0xff]  }
 0x173   :  { %2627 = vmatprep.mubr.bf16.mxu0 %v6181_v0  ;;  %2820 = vmatprep.mubr.bf16.mxu1 %v6181_v0 }
 0x174   :  { %3641 = vmatpush1.bf16.msra.mxu0 %v6229_v1  ;;  %3834 = vmatpush1.bf16.msra.mxu1 %v6232_v2 }
 0x175   :  { %3642 = vmatprep.subr.bf16.mxu0 %v6240_v3  ;;  %3835 = vmatprep.subr.bf16.mxu1 %v6243_v4 }
 0x178   :  { %3643 = vmatpush1.bf16.msra.mxu0 %v6238_v5  ;;  %3836 = vmatpush1.bf16.msra.mxu1 %v6241_v6 }
 0x179   :  { %3644 = vmatprep.subr.bf16.mxu0 %v6249_v7  ;;  %3837 = vmatprep.subr.bf16.mxu1 %v6252_v8 }
 0x17a   :  { %2628 = vmatmul.mubr.bf16.gmra.mrb[28].mxu0 %v6183_v9  ;;  %2821 = vmatmul.mubr.bf16.gmra.mrb[28].mxu1 %v6183_v9 }
 0x17b   :  { %2637 = vmatprep.mubr.bf16.mxu0 %v6190_v10  ;;  %2830 = vmatprep.mubr.bf16.mxu1 %v6190_v10 }
 0x17c   :  { %3645 = vmatpush1.bf16.msra.mxu0 %v6247_v11  ;;  %3838 = vmatpush1.bf16.msra.mxu1 %v6250_v12 }
 0x17d   :  { %3646 = vmatprep.subr.bf16.mxu0 %v6258_v13  ;;  %3839 = vmatprep.subr.bf16.mxu1 %v6261_v14 }
 0x180   :  { %3647 = vmatpush1.bf16.msra.mxu0 %v6256_v15  ;;  %3840 = vmatpush1.bf16.msra.mxu1 %v6259_v16 }
 0x182   :  { %2638 = vmatmul.mubr.bf16.gmra.mrb[32].mxu0 %v6192_v17  ;;  %2831 = vmatmul.mubr.bf16.gmra.mrb[32].mxu1 %v6192_v17 }
 0x183   :  { %2647 = vmatprep.mubr.bf16.mxu0 %v6199_v18  ;;  %2840 = vmatprep.mubr.bf16.mxu1 %v6199_v18 }
 0x18a   :  { %2648 = vmatmul.mubr.bf16.gmra.mrb[36].mxu0 %v6201_v19  ;;  %2841 = vmatmul.mubr.bf16.gmra.mrb[36].mxu1 %v6201_v19 }
 0x18b   :  { %2657 = vmatprep.mubr.bf16.mxu0 %v6208_v20  ;;  %2850 = vmatprep.mubr.bf16.mxu1 %v6208_v20 }
 0x192   :  { %2658 = vmatmul.mubr.bf16.gmra.mrb[40].mxu0 %v6210_v21  ;;  %2851 = vmatmul.mubr.bf16.gmra.mrb[40].mxu1 %v6210_v21 }
 0x193   :  { %2667 = vmatprep.mubr.bf16.mxu0 %v6217_v22  ;;  %2860 = vmatprep.mubr.bf16.mxu1 %v6217_v22 }
 0x19a   :  { %2668 = vmatmul.mubr.bf16.gmra.mrb[44].mxu0 %v6219_v23  ;;  %2861 = vmatmul.mubr.bf16.gmra.mrb[44].mxu1 %v6219_v23 }
 0x19b   :  { %2677 = vmatprep.mubr.bf16.mxu0 %v6226_v24  ;;  %2870 = vmatprep.mubr.bf16.mxu1 %v6226_v24 }
 0x1a2   :  { %2678 = vmatmul.mubr.bf16.gmra.mrb[48].mxu0 %v6228_v25  ;;  %2871 = vmatmul.mubr.bf16.gmra.mrb[48].mxu1 %v6228_v25 }
 0x1a3   :  { %2687 = vmatprep.mubr.bf16.mxu0 %v6235_v26  ;;  %2880 = vmatprep.mubr.bf16.mxu1 %v6235_v26  ;;  %v4262_v26 = vlaneseq }
 0x1a5   :  { %vm7553_vm0 = vcmp.lt.s32.totalorder %v4262_v26, 512 }
 0x1aa   :  { %2688 = vmatmul.mubr.bf16.gmra.mrb[52].mxu0 %v6237_v27  ;;  %2881 = vmatmul.mubr.bf16.gmra.mrb[52].mxu1 %v6237_v27 }
 0x1ab   :  { %2697 = vmatprep.mubr.bf16.mxu0 %v6244_v28  ;;  %2890 = vmatprep.mubr.bf16.mxu1 %v6244_v28 }
 0x1b2   :  { %2698 = vmatmul.mubr.bf16.gmra.mrb[56].mxu0 %v6246_v29  ;;  %2891 = vmatmul.mubr.bf16.gmra.mrb[56].mxu1 %v6246_v29 }
 0x1b3   :  { %2707 = vmatprep.mubr.bf16.mxu0 %v6253_v30  ;;  %2900 = vmatprep.mubr.bf16.mxu1 %v6253_v30 }
 0x1ba   :  { %2708 = vmatmul.mubr.bf16.gmra.mrb[60].mxu0 %v6255_v31  ;;  %2901 = vmatmul.mubr.bf16.gmra.mrb[60].mxu1 %v6255_v31 }
 0x1bb   :  { %3648 = vmatprep.mubr.bf16.mxu0 %v6264_v32  ;;  %3841 = vmatprep.mubr.bf16.mxu1 %v6264_v32 }
 0x1c2   :  { %3649 = vmatmul.mubr.bf16.vlgmr.msra.gmra.mrb[0].mxu0 %v6262_v33  ;;  %3842 = vmatmul.mubr.bf16.vlgmr.msra.gmra.mrb[0].mxu1 %v6262_v33 }
 0x1c3   :  { %3658 = vmatprep.mubr.bf16.mxu0 %v6265_v34  ;;  %3851 = vmatprep.mubr.bf16.mxu1 %v6265_v34 }
 0x1ca   :  { %3659 = vmatmul.mubr.bf16.gmra.mrb[4].mxu0 %v6267_v35  ;;  %3852 = vmatmul.mubr.bf16.gmra.mrb[4].mxu1 %v6267_v35 }
 0x1cb   :  { %3668 = vmatprep.mubr.bf16.mxu0 %v6268_v36  ;;  %3861 = vmatprep.mubr.bf16.mxu1 %v6268_v36 }
 0x1d2   :  { %3669 = vmatmul.mubr.bf16.gmra.mrb[8].mxu0 %v6270_v37  ;;  %3862 = vmatmul.mubr.bf16.gmra.mrb[8].mxu1 %v6270_v37 }
 0x1d3   :  { %3678 = vmatprep.mubr.bf16.mxu0 %v6271_v38  ;;  %3871 = vmatprep.mubr.bf16.mxu1 %v6271_v38 }
 0x1da   :  { %3679 = vmatmul.mubr.bf16.gmra.mrb[12].mxu0 %v6273_v39  ;;  %3872 = vmatmul.mubr.bf16.gmra.mrb[12].mxu1 %v6273_v39 }
 0x1db   :  { %3688 = vmatprep.mubr.bf16.mxu0 %v6274_v40  ;;  %3881 = vmatprep.mubr.bf16.mxu1 %v6274_v40 }
 0x1e2   :  { %3689 = vmatmul.mubr.bf16.gmra.mrb[16].mxu0 %v6276_v41  ;;  %3882 = vmatmul.mubr.bf16.gmra.mrb[16].mxu1 %v6276_v41 }
 0x1e3   :  { %3698 = vmatprep.mubr.bf16.mxu0 %v6277_v42  ;;  %3891 = vmatprep.mubr.bf16.mxu1 %v6277_v42 }
 0x1ea   :  { %3699 = vmatmul.mubr.bf16.gmra.mrb[20].mxu0 %v6279_v43  ;;  %3892 = vmatmul.mubr.bf16.gmra.mrb[20].mxu1 %v6279_v43 }
 0x1eb   :  { %3708 = vmatprep.mubr.bf16.mxu0 %v6280_v44  ;;  %3901 = vmatprep.mubr.bf16.mxu1 %v6280_v44 }
 0x1f2   :  { %3709 = vmatmul.mubr.bf16.gmra.mrb[24].mxu0 %v6282_v45  ;;  %3902 = vmatmul.mubr.bf16.gmra.mrb[24].mxu1 %v6282_v45 }
 0x1f3   :  { %3718 = vmatprep.mubr.bf16.mxu0 %v6283_v46  ;;  %3911 = vmatprep.mubr.bf16.mxu1 %v6283_v46 }
 0x1fa   :  { %3719 = vmatmul.mubr.bf16.gmra.mrb[28].mxu0 %v6285_v47  ;;  %3912 = vmatmul.mubr.bf16.gmra.mrb[28].mxu1 %v6285_v47 }
 0x1fb   :  { %3728 = vmatprep.mubr.bf16.mxu0 %v6286_v48  ;;  %3921 = vmatprep.mubr.bf16.mxu1 %v6286_v48 }
 0x202   :  { %3729 = vmatmul.mubr.bf16.gmra.mrb[32].mxu0 %v6288_v49  ;;  %3922 = vmatmul.mubr.bf16.gmra.mrb[32].mxu1 %v6288_v49 }
 0x203   :  { %3738 = vmatprep.mubr.bf16.mxu0 %v6289_v50  ;;  %3931 = vmatprep.mubr.bf16.mxu1 %v6289_v50 }
 0x20a   :  { %3739 = vmatmul.mubr.bf16.gmra.mrb[36].mxu0 %v6291_v51  ;;  %3932 = vmatmul.mubr.bf16.gmra.mrb[36].mxu1 %v6291_v51 }
 0x20b   :  { %3748 = vmatprep.mubr.bf16.mxu0 %v6292_v52  ;;  %3941 = vmatprep.mubr.bf16.mxu1 %v6292_v52 }
 0x212   :  { %3749 = vmatmul.mubr.bf16.gmra.mrb[40].mxu0 %v6294_v53  ;;  %3942 = vmatmul.mubr.bf16.gmra.mrb[40].mxu1 %v6294_v53 }
 0x213   :  { %3758 = vmatprep.mubr.bf16.mxu0 %v6295_v54  ;;  %3951 = vmatprep.mubr.bf16.mxu1 %v6295_v54 }
 0x21a   :  { %3759 = vmatmul.mubr.bf16.gmra.mrb[44].mxu0 %v6297_v55  ;;  %3952 = vmatmul.mubr.bf16.gmra.mrb[44].mxu1 %v6297_v55 }
 0x21b   :  { %3768 = vmatprep.mubr.bf16.mxu0 %v6298_v56  ;;  %3961 = vmatprep.mubr.bf16.mxu1 %v6298_v56 }
 0x222   :  { %3769 = vmatmul.mubr.bf16.gmra.mrb[48].mxu0 %v6300_v57  ;;  %3962 = vmatmul.mubr.bf16.gmra.mrb[48].mxu1 %v6300_v57 }
 0x223   :  { %3778 = vmatprep.mubr.bf16.mxu0 %v6301_v58  ;;  %3971 = vmatprep.mubr.bf16.mxu1 %v6301_v58 }
 0x22a   :  { %3779 = vmatmul.mubr.bf16.gmra.mrb[52].mxu0 %v6303_v59  ;;  %3972 = vmatmul.mubr.bf16.gmra.mrb[52].mxu1 %v6303_v59 }
 0x22b   :  { %3788 = vmatprep.mubr.bf16.mxu0 %v6304_v60  ;;  %3981 = vmatprep.mubr.bf16.mxu1 %v6304_v60  ;;  %v6310_v60 = vmov 0.0  }
 0x22c   :  { %4266 = vst.msk [vmem:[%s7934_s6] sm:$0xf] %vm7553_vm0, %v6310_v60  ;;  %4267 = vst.msk [vmem:[%s7935_s7] sm:$0xf] %vm7553_vm0, %v6310_v60 }
 0x232   :  { %3789 = vmatmul.mubr.bf16.gmra.mrb[56].mxu0 %v6306_v61  ;;  %3982 = vmatmul.mubr.bf16.gmra.mrb[56].mxu1 %v6306_v61 }
 0x233   :  { %3798 = vmatprep.mubr.bf16.mxu0 %v6307_v62  ;;  %3991 = vmatprep.mubr.bf16.mxu1 %v6307_v62 }
 0x23a   :  { %3799 = vmatmul.mubr.bf16.gmra.mrb[60].mxu0 %v6309_v63  ;;  %3992 = vmatmul.mubr.bf16.gmra.mrb[60].mxu1 %v6309_v63 }
 0x295   :  { %v3650_v0 = vpop.f32.mrb[0].mxu0  ;;  %v3843_v1 = vpop.f32.mrb[0].mxu1 }
 0x296   :  { %4130 = vst [vmem:[%s7933_s5] sm:$0xff] %v3650_v0  ;;  %4132 = vst [vmem:[%s7933_s5 + $0x10] sm:$0xff] %v3843_v1  ;;  %v3652_v2 = vpop.f32.mrb[1].mxu0  ;;  %v3845_v3 = vpop.f32.mrb[1].mxu1  ;;  %v4453_v4 = vmul.f32 %v3650_v0, %v3650_v0  ;;  %v4455_v5 = vmul.f32 %v3843_v1, %v3843_v1 }
 0x297   :  { %4131 = vst [vmem:[%s7933_s5 + $0x8] sm:$0xff] %v3652_v2  ;;  %v4454_v6 = vmul.f32 %v3652_v2, %v3652_v2  ;;  %4133 = vst [vmem:[%s7933_s5 + $0x18] sm:$0xff] %v3845_v3  ;;  %v4456_v7 = vmul.f32 %v3845_v3, %v3845_v3  ;;  %v3654_v8 = vpop.f32.mrb[2].mxu0  ;;  %v3847_v9 = vpop.f32.mrb[2].mxu1 }
 0x298   :  { %4134 = vst [vmem:[%s7933_s5 + $0x20] sm:$0xff] %v3654_v8  ;;  %v4269_v10 = vadd.f32 %v3654_v8, %v3650_v0  ;;  %v4457_v11 = vmul.f32 %v3654_v8, %v3654_v8  ;;  %4136 = vst [vmem:[%s7933_s5 + $0x30] sm:$0xff] %v3847_v9  ;;  %v4343_v12 = vadd.f32 %v3847_v9, %v3843_v1  ;;  %v3656_v14 = vpop.f32.mrb[3].mxu0  ;;  %v3849_v15 = vpop.f32.mrb[3].mxu1 }
 0x299   :  { %v4459_v13 = vmul.f32 %v3847_v9, %v3847_v9  ;;  %4135 = vst [vmem:[%s7933_s5 + $0x28] sm:$0xff] %v3656_v14  ;;  %v4306_v16 = vadd.f32 %v3656_v14, %v3652_v2  ;;  %v4458_v17 = vmul.f32 %v3656_v14, %v3656_v14  ;;  %4137 = vst [vmem:[%s7933_s5 + $0x38] sm:$0xff] %v3849_v15 }
 0x29a   :  { %v4380_v18 = vadd.f32 %v3849_v15, %v3845_v3  ;;  %v4460_v19 = vmul.f32 %v3849_v15, %v3849_v15  ;;  %v4581_v20 = vadd.f32 %v4457_v11, %v4453_v4 }
 0x29b   :  { %v4655_v21 = vadd.f32 %v4459_v13, %v4455_v5  ;;  %v4618_v22 = vadd.f32 %v4458_v17, %v4454_v6 }
 0x29c   :  { %v4692_v23 = vadd.f32 %v4460_v19, %v4456_v7 }
 0x29d   :  { %v3660_v24 = vpop.f32.mrb[4].mxu0  ;;  %v3853_v25 = vpop.f32.mrb[4].mxu1 }
 0x29e   :  { %4138 = vst [vmem:[%s7933_s5 + $0x40] sm:$0xff] %v3660_v24  ;;  %v4270_v27 = vadd.f32 %v4269_v10, %v3660_v24  ;;  %v4461_v28 = vmul.f32 %v3660_v24, %v3660_v24  ;;  %4140 = vst [vmem:[%s7933_s5 + $0x50] sm:$0xff] %v3853_v25  ;;  %v4344_v29 = vadd.f32 %v4343_v12, %v3853_v25  ;;  %v3662_v31 = vpop.f32.mrb[5].mxu0  ;;  %v3855_v32 = vpop.f32.mrb[5].mxu1 }
 0x29f   :  { %v4463_v30 = vmul.f32 %v3853_v25, %v3853_v25  ;;  %4139 = vst [vmem:[%s7933_s5 + $0x48] sm:$0xff] %v3662_v31  ;;  %v4307_v33 = vadd.f32 %v4306_v16, %v3662_v31  ;;  %v4462_v34 = vmul.f32 %v3662_v31, %v3662_v31  ;;  %4141 = vst [vmem:[%s7933_s5 + $0x58] sm:$0xff] %v3855_v32  ;;  %v3664_v37 = vpop.f32.mrb[6].mxu0  ;;  %v3857_v38 = vpop.f32.mrb[6].mxu1 }
 0x2a0   :  { %v4381_v35 = vadd.f32 %v4380_v18, %v3855_v32  ;;  %v4464_v36 = vmul.f32 %v3855_v32, %v3855_v32  ;;  %v4582_v39 = vadd.f32 %v4581_v20, %v4461_v28  ;;  %4142 = vst [vmem:[%s7933_s5 + $0x60] sm:$0xff] %v3664_v37  ;;  %v4271_v41 = vadd.f32 %v4270_v27, %v3664_v37  ;;  %v3666_v43 = vpop.f32.mrb[7].mxu0  ;;  %v3859_v44 = vpop.f32.mrb[7].mxu1 }
 0x2a1   :  { %v4656_v40 = vadd.f32 %v4655_v21, %v4463_v30  ;;  %v4465_v42 = vmul.f32 %v3664_v37, %v3664_v37  ;;  %4144 = vst [vmem:[%s7933_s5 + $0x70] sm:$0xff] %v3857_v38  ;;  %v4619_v45 = vadd.f32 %v4618_v22, %v4462_v34  ;;  %v4345_v47 = vadd.f32 %v4344_v29, %v3857_v38 }
 0x2a2   :  { %v4693_v46 = vadd.f32 %v4692_v23, %v4464_v36  ;;  %v4467_v48 = vmul.f32 %v3857_v38, %v3857_v38  ;;  %4143 = vst [vmem:[%s7933_s5 + $0x68] sm:$0xff] %v3666_v43  ;;  %4145 = vst [vmem:[%s7933_s5 + $0x78] sm:$0xff] %v3859_v44  ;;  %v4308_v50 = vadd.f32 %v4307_v33, %v3666_v43 }
 0x2a3   :  { %v4583_v49 = vadd.f32 %v4582_v39, %v4465_v42  ;;  %v4466_v51 = vmul.f32 %v3666_v43, %v3666_v43  ;;  %v4382_v52 = vadd.f32 %v4381_v35, %v3859_v44  ;;  %v4468_v54 = vmul.f32 %v3859_v44, %v3859_v44 }
 0x2a4   :  { %v4657_v53 = vadd.f32 %v4656_v40, %v4467_v48 }
 0x2a5   :  { %v4620_v55 = vadd.f32 %v4619_v45, %v4466_v51  ;;  %v4694_v57 = vadd.f32 %v4693_v46, %v4468_v54  ;;  %v3670_v58 = vpop.f32.mrb[8].mxu0  ;;  %v3863_v59 = vpop.f32.mrb[8].mxu1 }
 0x2a6   :  { %4146 = vst [vmem:[%s7933_s5 + $0x80] sm:$0xff] %v3670_v58  ;;  %v4272_v61 = vadd.f32 %v4271_v41, %v3670_v58  ;;  %v4469_v62 = vmul.f32 %v3670_v58, %v3670_v58  ;;  %4148 = vst [vmem:[%s7933_s5 + $0x90] sm:$0xff] %v3863_v59  ;;  %v4346_v63 = vadd.f32 %v4345_v47, %v3863_v59  ;;  %v3672_v1 = vpop.f32.mrb[9].mxu0  ;;  %v3865_v2 = vpop.f32.mrb[9].mxu1 }
 0x2a7   :  { %v4471_v0 = vmul.f32 %v3863_v59, %v3863_v59  ;;  %4147 = vst [vmem:[%s7933_s5 + $0x88] sm:$0xff] %v3672_v1  ;;  %v4309_v3 = vadd.f32 %v4308_v50, %v3672_v1  ;;  %v4470_v4 = vmul.f32 %v3672_v1, %v3672_v1  ;;  %4149 = vst [vmem:[%s7933_s5 + $0x98] sm:$0xff] %v3865_v2  ;;  %v3674_v7 = vpop.f32.mrb[10].mxu0  ;;  %v3867_v8 = vpop.f32.mrb[10].mxu1 }
 0x2a8   :  { %v4383_v5 = vadd.f32 %v4382_v52, %v3865_v2  ;;  %v4472_v6 = vmul.f32 %v3865_v2, %v3865_v2  ;;  %v4584_v9 = vadd.f32 %v4583_v49, %v4469_v62  ;;  %4150 = vst [vmem:[%s7933_s5 + $0xa0] sm:$0xff] %v3674_v7  ;;  %v4273_v11 = vadd.f32 %v4272_v61, %v3674_v7  ;;  %v3676_v13 = vpop.f32.mrb[11].mxu0  ;;  %v3869_v14 = vpop.f32.mrb[11].mxu1 }
 0x2a9   :  { %v4658_v10 = vadd.f32 %v4657_v53, %v4471_v0  ;;  %v4473_v12 = vmul.f32 %v3674_v7, %v3674_v7  ;;  %4152 = vst [vmem:[%s7933_s5 + $0xb0] sm:$0xff] %v3867_v8  ;;  %v4621_v15 = vadd.f32 %v4620_v55, %v4470_v4  ;;  %v4347_v17 = vadd.f32 %v4346_v63, %v3867_v8 }
 0x2aa   :  { %v4695_v16 = vadd.f32 %v4694_v57, %v4472_v6  ;;  %v4475_v18 = vmul.f32 %v3867_v8, %v3867_v8  ;;  %4151 = vst [vmem:[%s7933_s5 + $0xa8] sm:$0xff] %v3676_v13  ;;  %4153 = vst [vmem:[%s7933_s5 + $0xb8] sm:$0xff] %v3869_v14  ;;  %v4310_v20 = vadd.f32 %v4309_v3, %v3676_v13 }
 0x2ab   :  { %v4585_v19 = vadd.f32 %v4584_v9, %v4473_v12  ;;  %v4474_v21 = vmul.f32 %v3676_v13, %v3676_v13  ;;  %v4384_v22 = vadd.f32 %v4383_v5, %v3869_v14  ;;  %v4476_v24 = vmul.f32 %v3869_v14, %v3869_v14 }
 0x2ac   :  { %v4659_v23 = vadd.f32 %v4658_v10, %v4475_v18 }
 0x2ad   :  { %v4622_v25 = vadd.f32 %v4621_v15, %v4474_v21  ;;  %v4696_v27 = vadd.f32 %v4695_v16, %v4476_v24  ;;  %v3680_v28 = vpop.f32.mrb[12].mxu0  ;;  %v3873_v29 = vpop.f32.mrb[12].mxu1 }
 0x2ae   :  { %4154 = vst [vmem:[%s7933_s5 + $0xc0] sm:$0xff] %v3680_v28  ;;  %v4274_v30 = vadd.f32 %v4273_v11, %v3680_v28  ;;  %v4477_v31 = vmul.f32 %v3680_v28, %v3680_v28  ;;  %4156 = vst [vmem:[%s7933_s5 + $0xd0] sm:$0xff] %v3873_v29  ;;  %v4348_v32 = vadd.f32 %v4347_v17, %v3873_v29  ;;  %v3682_v34 = vpop.f32.mrb[13].mxu0  ;;  %v3875_v35 = vpop.f32.mrb[13].mxu1 }
 0x2af   :  { %v4479_v33 = vmul.f32 %v3873_v29, %v3873_v29  ;;  %4155 = vst [vmem:[%s7933_s5 + $0xc8] sm:$0xff] %v3682_v34  ;;  %v4311_v36 = vadd.f32 %v4310_v20, %v3682_v34  ;;  %v4478_v37 = vmul.f32 %v3682_v34, %v3682_v34  ;;  %4157 = vst [vmem:[%s7933_s5 + $0xd8] sm:$0xff] %v3875_v35  ;;  %v3684_v40 = vpop.f32.mrb[14].mxu0  ;;  %v3877_v41 = vpop.f32.mrb[14].mxu1 }
 0x2b0   :  { %v4385_v38 = vadd.f32 %v4384_v22, %v3875_v35  ;;  %v4480_v39 = vmul.f32 %v3875_v35, %v3875_v35  ;;  %v4586_v42 = vadd.f32 %v4585_v19, %v4477_v31  ;;  %4158 = vst [vmem:[%s7933_s5 + $0xe0] sm:$0xff] %v3684_v40  ;;  %v4275_v44 = vadd.f32 %v4274_v30, %v3684_v40  ;;  %v3686_v46 = vpop.f32.mrb[15].mxu0  ;;  %v3879_v47 = vpop.f32.mrb[15].mxu1 }
 0x2b1   :  { %v4660_v43 = vadd.f32 %v4659_v23, %v4479_v33  ;;  %v4481_v45 = vmul.f32 %v3684_v40, %v3684_v40  ;;  %4160 = vst [vmem:[%s7933_s5 + $0xf0] sm:$0xff] %v3877_v41  ;;  %v4623_v48 = vadd.f32 %v4622_v25, %v4478_v37  ;;  %v4349_v50 = vadd.f32 %v4348_v32, %v3877_v41 }
 0x2b2   :  { %v4697_v49 = vadd.f32 %v4696_v27, %v4480_v39  ;;  %v4483_v51 = vmul.f32 %v3877_v41, %v3877_v41  ;;  %4159 = vst [vmem:[%s7933_s5 + $0xe8] sm:$0xff] %v3686_v46  ;;  %4161 = vst [vmem:[%s7933_s5 + $0xf8] sm:$0xff] %v3879_v47  ;;  %v4312_v53 = vadd.f32 %v4311_v36, %v3686_v46 }
 0x2b3   :  { %v4587_v52 = vadd.f32 %v4586_v42, %v4481_v45  ;;  %v4482_v54 = vmul.f32 %v3686_v46, %v3686_v46  ;;  %v4386_v55 = vadd.f32 %v4385_v38, %v3879_v47  ;;  %v4484_v58 = vmul.f32 %v3879_v47, %v3879_v47 }
 0x2b4   :  { %v4661_v57 = vadd.f32 %v4660_v43, %v4483_v51 }
 0x2b5   :  { %v4624_v59 = vadd.f32 %v4623_v48, %v4482_v54  ;;  %v4698_v60 = vadd.f32 %v4697_v49, %v4484_v58  ;;  %v3690_v61 = vpop.f32.mrb[16].mxu0  ;;  %v3883_v62 = vpop.f32.mrb[16].mxu1 }
 0x2b6   :  { %4162 = vst [vmem:[%s7933_s5 + $0x100] sm:$0xff] %v3690_v61  ;;  %v4276_v63 = vadd.f32 %v4275_v44, %v3690_v61  ;;  %v4485_v0 = vmul.f32 %v3690_v61, %v3690_v61  ;;  %4164 = vst [vmem:[%s7933_s5 + $0x110] sm:$0xff] %v3883_v62  ;;  %v4350_v1 = vadd.f32 %v4349_v50, %v3883_v62  ;;  %v3692_v3 = vpop.f32.mrb[17].mxu0  ;;  %v3885_v4 = vpop.f32.mrb[17].mxu1 }
 0x2b7   :  { %v4487_v2 = vmul.f32 %v3883_v62, %v3883_v62  ;;  %4163 = vst [vmem:[%s7933_s5 + $0x108] sm:$0xff] %v3692_v3  ;;  %v4313_v5 = vadd.f32 %v4312_v53, %v3692_v3  ;;  %v4486_v6 = vmul.f32 %v3692_v3, %v3692_v3  ;;  %4165 = vst [vmem:[%s7933_s5 + $0x118] sm:$0xff] %v3885_v4  ;;  %v3694_v9 = vpop.f32.mrb[18].mxu0  ;;  %v3887_v10 = vpop.f32.mrb[18].mxu1 }
 0x2b8   :  { %v4387_v7 = vadd.f32 %v4386_v55, %v3885_v4  ;;  %v4488_v8 = vmul.f32 %v3885_v4, %v3885_v4  ;;  %v4588_v11 = vadd.f32 %v4587_v52, %v4485_v0  ;;  %4166 = vst [vmem:[%s7933_s5 + $0x120] sm:$0xff] %v3694_v9  ;;  %v4277_v13 = vadd.f32 %v4276_v63, %v3694_v9  ;;  %v3696_v15 = vpop.f32.mrb[19].mxu0  ;;  %v3889_v16 = vpop.f32.mrb[19].mxu1 }
 0x2b9   :  { %v4662_v12 = vadd.f32 %v4661_v57, %v4487_v2  ;;  %v4489_v14 = vmul.f32 %v3694_v9, %v3694_v9  ;;  %4168 = vst [vmem:[%s7933_s5 + $0x130] sm:$0xff] %v3887_v10  ;;  %v4625_v17 = vadd.f32 %v4624_v59, %v4486_v6  ;;  %v4351_v19 = vadd.f32 %v4350_v1, %v3887_v10 }
 0x2ba   :  { %v4699_v18 = vadd.f32 %v4698_v60, %v4488_v8  ;;  %v4491_v20 = vmul.f32 %v3887_v10, %v3887_v10  ;;  %4167 = vst [vmem:[%s7933_s5 + $0x128] sm:$0xff] %v3696_v15  ;;  %4169 = vst [vmem:[%s7933_s5 + $0x138] sm:$0xff] %v3889_v16  ;;  %v4314_v22 = vadd.f32 %v4313_v5, %v3696_v15 }
 0x2bb   :  { %v4589_v21 = vadd.f32 %v4588_v11, %v4489_v14  ;;  %v4490_v23 = vmul.f32 %v3696_v15, %v3696_v15  ;;  %v4388_v24 = vadd.f32 %v4387_v7, %v3889_v16  ;;  %v4492_v27 = vmul.f32 %v3889_v16, %v3889_v16 }
 0x2bc   :  { %v4663_v25 = vadd.f32 %v4662_v12, %v4491_v20 }
 0x2bd   :  { %v4626_v28 = vadd.f32 %v4625_v17, %v4490_v23  ;;  %v4700_v29 = vadd.f32 %v4699_v18, %v4492_v27  ;;  %v3700_v30 = vpop.f32.mrb[20].mxu0  ;;  %v3893_v31 = vpop.f32.mrb[20].mxu1 }
 0x2be   :  { %4170 = vst [vmem:[%s7933_s5 + $0x140] sm:$0xff] %v3700_v30  ;;  %v4278_v32 = vadd.f32 %v4277_v13, %v3700_v30  ;;  %v4493_v33 = vmul.f32 %v3700_v30, %v3700_v30  ;;  %4172 = vst [vmem:[%s7933_s5 + $0x150] sm:$0xff] %v3893_v31  ;;  %v4352_v34 = vadd.f32 %v4351_v19, %v3893_v31  ;;  %v3702_v36 = vpop.f32.mrb[21].mxu0  ;;  %v3895_v37 = vpop.f32.mrb[21].mxu1 }
 0x2bf   :  { %v4495_v35 = vmul.f32 %v3893_v31, %v3893_v31  ;;  %4171 = vst [vmem:[%s7933_s5 + $0x148] sm:$0xff] %v3702_v36  ;;  %v4315_v38 = vadd.f32 %v4314_v22, %v3702_v36  ;;  %v4494_v39 = vmul.f32 %v3702_v36, %v3702_v36  ;;  %4173 = vst [vmem:[%s7933_s5 + $0x158] sm:$0xff] %v3895_v37  ;;  %v3704_v42 = vpop.f32.mrb[22].mxu0  ;;  %v3897_v43 = vpop.f32.mrb[22].mxu1 }
 0x2c0   :  { %v4389_v40 = vadd.f32 %v4388_v24, %v3895_v37  ;;  %v4496_v41 = vmul.f32 %v3895_v37, %v3895_v37  ;;  %v4590_v44 = vadd.f32 %v4589_v21, %v4493_v33  ;;  %4174 = vst [vmem:[%s7933_s5 + $0x160] sm:$0xff] %v3704_v42  ;;  %v4279_v46 = vadd.f32 %v4278_v32, %v3704_v42  ;;  %v3706_v48 = vpop.f32.mrb[23].mxu0  ;;  %v3899_v49 = vpop.f32.mrb[23].mxu1 }
 0x2c1   :  { %v4664_v45 = vadd.f32 %v4663_v25, %v4495_v35  ;;  %v4497_v47 = vmul.f32 %v3704_v42, %v3704_v42  ;;  %4176 = vst [vmem:[%s7933_s5 + $0x170] sm:$0xff] %v3897_v43  ;;  %v4627_v50 = vadd.f32 %v4626_v28, %v4494_v39  ;;  %v4353_v52 = vadd.f32 %v4352_v34, %v3897_v43 }
 0x2c2   :  { %v4701_v51 = vadd.f32 %v4700_v29, %v4496_v41  ;;  %v4499_v53 = vmul.f32 %v3897_v43, %v3897_v43  ;;  %4175 = vst [vmem:[%s7933_s5 + $0x168] sm:$0xff] %v3706_v48  ;;  %4177 = vst [vmem:[%s7933_s5 + $0x178] sm:$0xff] %v3899_v49  ;;  %v4316_v55 = vadd.f32 %v4315_v38, %v3706_v48 }
 0x2c3   :  { %v4591_v54 = vadd.f32 %v4590_v44, %v4497_v47  ;;  %v4498_v57 = vmul.f32 %v3706_v48, %v3706_v48  ;;  %v4390_v58 = vadd.f32 %v4389_v40, %v3899_v49  ;;  %v4500_v60 = vmul.f32 %v3899_v49, %v3899_v49 }
 0x2c4   :  { %v4665_v59 = vadd.f32 %v4664_v45, %v4499_v53 }
 0x2c5   :  { %v4628_v61 = vadd.f32 %v4627_v50, %v4498_v57  ;;  %v4702_v62 = vadd.f32 %v4701_v51, %v4500_v60  ;;  %v3710_v63 = vpop.f32.mrb[24].mxu0  ;;  %v3903_v0 = vpop.f32.mrb[24].mxu1 }
 0x2c6   :  { %4178 = vst [vmem:[%s7933_s5 + $0x180] sm:$0xff] %v3710_v63  ;;  %v4280_v1 = vadd.f32 %v4279_v46, %v3710_v63  ;;  %v4501_v2 = vmul.f32 %v3710_v63, %v3710_v63  ;;  %4180 = vst [vmem:[%s7933_s5 + $0x190] sm:$0xff] %v3903_v0  ;;  %v4354_v3 = vadd.f32 %v4353_v52, %v3903_v0  ;;  %v3712_v5 = vpop.f32.mrb[25].mxu0  ;;  %v3905_v6 = vpop.f32.mrb[25].mxu1 }
 0x2c7   :  { %v4503_v4 = vmul.f32 %v3903_v0, %v3903_v0  ;;  %4179 = vst [vmem:[%s7933_s5 + $0x188] sm:$0xff] %v3712_v5  ;;  %v4317_v7 = vadd.f32 %v4316_v55, %v3712_v5  ;;  %v4502_v8 = vmul.f32 %v3712_v5, %v3712_v5  ;;  %4181 = vst [vmem:[%s7933_s5 + $0x198] sm:$0xff] %v3905_v6  ;;  %v3714_v11 = vpop.f32.mrb[26].mxu0  ;;  %v3907_v12 = vpop.f32.mrb[26].mxu1 }
 0x2c8   :  { %v4391_v9 = vadd.f32 %v4390_v58, %v3905_v6  ;;  %v4504_v10 = vmul.f32 %v3905_v6, %v3905_v6  ;;  %v4592_v13 = vadd.f32 %v4591_v54, %v4501_v2  ;;  %4182 = vst [vmem:[%s7933_s5 + $0x1a0] sm:$0xff] %v3714_v11  ;;  %v4281_v15 = vadd.f32 %v4280_v1, %v3714_v11  ;;  %v3716_v17 = vpop.f32.mrb[27].mxu0  ;;  %v3909_v18 = vpop.f32.mrb[27].mxu1 }
 0x2c9   :  { %v4666_v14 = vadd.f32 %v4665_v59, %v4503_v4  ;;  %v4505_v16 = vmul.f32 %v3714_v11, %v3714_v11  ;;  %4184 = vst [vmem:[%s7933_s5 + $0x1b0] sm:$0xff] %v3907_v12  ;;  %v4629_v19 = vadd.f32 %v4628_v61, %v4502_v8  ;;  %v4355_v21 = vadd.f32 %v4354_v3, %v3907_v12 }
 0x2ca   :  { %v4703_v20 = vadd.f32 %v4702_v62, %v4504_v10  ;;  %v4507_v22 = vmul.f32 %v3907_v12, %v3907_v12  ;;  %4183 = vst [vmem:[%s7933_s5 + $0x1a8] sm:$0xff] %v3716_v17  ;;  %4185 = vst [vmem:[%s7933_s5 + $0x1b8] sm:$0xff] %v3909_v18  ;;  %v4318_v24 = vadd.f32 %v4317_v7, %v3716_v17 }
 0x2cb   :  { %v4593_v23 = vadd.f32 %v4592_v13, %v4505_v16  ;;  %v4506_v25 = vmul.f32 %v3716_v17, %v3716_v17  ;;  %v4392_v27 = vadd.f32 %v4391_v9, %v3909_v18  ;;  %v4508_v29 = vmul.f32 %v3909_v18, %v3909_v18 }
 0x2cc   :  { %v4667_v28 = vadd.f32 %v4666_v14, %v4507_v22 }
 0x2cd   :  { %v4630_v30 = vadd.f32 %v4629_v19, %v4506_v25  ;;  %v4704_v31 = vadd.f32 %v4703_v20, %v4508_v29  ;;  %v3720_v32 = vpop.f32.mrb[28].mxu0  ;;  %v3913_v33 = vpop.f32.mrb[28].mxu1 }
 0x2ce   :  { %4186 = vst [vmem:[%s7933_s5 + $0x1c0] sm:$0xff] %v3720_v32  ;;  %v4282_v34 = vadd.f32 %v4281_v15, %v3720_v32  ;;  %v4509_v35 = vmul.f32 %v3720_v32, %v3720_v32  ;;  %4188 = vst [vmem:[%s7933_s5 + $0x1d0] sm:$0xff] %v3913_v33  ;;  %v4356_v36 = vadd.f32 %v4355_v21, %v3913_v33  ;;  %v3722_v38 = vpop.f32.mrb[29].mxu0  ;;  %v3915_v39 = vpop.f32.mrb[29].mxu1 }
 0x2cf   :  { %v4511_v37 = vmul.f32 %v3913_v33, %v3913_v33  ;;  %4187 = vst [vmem:[%s7933_s5 + $0x1c8] sm:$0xff] %v3722_v38  ;;  %v4319_v40 = vadd.f32 %v4318_v24, %v3722_v38  ;;  %v4510_v41 = vmul.f32 %v3722_v38, %v3722_v38  ;;  %4189 = vst [vmem:[%s7933_s5 + $0x1d8] sm:$0xff] %v3915_v39  ;;  %v3724_v44 = vpop.f32.mrb[30].mxu0  ;;  %v3917_v45 = vpop.f32.mrb[30].mxu1 }
 0x2d0   :  { %v4393_v42 = vadd.f32 %v4392_v27, %v3915_v39  ;;  %v4512_v43 = vmul.f32 %v3915_v39, %v3915_v39  ;;  %v4594_v46 = vadd.f32 %v4593_v23, %v4509_v35  ;;  %4190 = vst [vmem:[%s7933_s5 + $0x1e0] sm:$0xff] %v3724_v44  ;;  %v4283_v48 = vadd.f32 %v4282_v34, %v3724_v44  ;;  %v3726_v50 = vpop.f32.mrb[31].mxu0  ;;  %v3919_v51 = vpop.f32.mrb[31].mxu1 }
 0x2d1   :  { %v4668_v47 = vadd.f32 %v4667_v28, %v4511_v37  ;;  %v4513_v49 = vmul.f32 %v3724_v44, %v3724_v44  ;;  %4192 = vst [vmem:[%s7933_s5 + $0x1f0] sm:$0xff] %v3917_v45  ;;  %v4631_v52 = vadd.f32 %v4630_v30, %v4510_v41  ;;  %v4357_v54 = vadd.f32 %v4356_v36, %v3917_v45 }
 0x2d2   :  { %v4705_v53 = vadd.f32 %v4704_v31, %v4512_v43  ;;  %v4515_v55 = vmul.f32 %v3917_v45, %v3917_v45  ;;  %4191 = vst [vmem:[%s7933_s5 + $0x1e8] sm:$0xff] %v3726_v50  ;;  %4193 = vst [vmem:[%s7933_s5 + $0x1f8] sm:$0xff] %v3919_v51  ;;  %v4320_v58 = vadd.f32 %v4319_v40, %v3726_v50 }
 0x2d3   :  { %v4595_v57 = vadd.f32 %v4594_v46, %v4513_v49  ;;  %v4514_v59 = vmul.f32 %v3726_v50, %v3726_v50  ;;  %v4394_v60 = vadd.f32 %v4393_v42, %v3919_v51  ;;  %v4516_v62 = vmul.f32 %v3919_v51, %v3919_v51 }
 0x2d4   :  { %v4669_v61 = vadd.f32 %v4668_v47, %v4515_v55 }
 0x2d5   :  { %v4632_v63 = vadd.f32 %v4631_v52, %v4514_v59  ;;  %v4706_v0 = vadd.f32 %v4705_v53, %v4516_v62  ;;  %v3730_v1 = vpop.f32.mrb[32].mxu0  ;;  %v3923_v2 = vpop.f32.mrb[32].mxu1 }
 0x2d6   :  { %4194 = vst [vmem:[%s7933_s5 + $0x200] sm:$0xff] %v3730_v1  ;;  %v4284_v3 = vadd.f32 %v4283_v48, %v3730_v1  ;;  %v4517_v4 = vmul.f32 %v3730_v1, %v3730_v1  ;;  %4196 = vst [vmem:[%s7933_s5 + $0x210] sm:$0xff] %v3923_v2  ;;  %v4358_v5 = vadd.f32 %v4357_v54, %v3923_v2  ;;  %v3732_v7 = vpop.f32.mrb[33].mxu0  ;;  %v3925_v8 = vpop.f32.mrb[33].mxu1 }
 0x2d7   :  { %v4519_v6 = vmul.f32 %v3923_v2, %v3923_v2  ;;  %4195 = vst [vmem:[%s7933_s5 + $0x208] sm:$0xff] %v3732_v7  ;;  %v4321_v9 = vadd.f32 %v4320_v58, %v3732_v7  ;;  %v4518_v10 = vmul.f32 %v3732_v7, %v3732_v7  ;;  %4197 = vst [vmem:[%s7933_s5 + $0x218] sm:$0xff] %v3925_v8  ;;  %v3734_v13 = vpop.f32.mrb[34].mxu0  ;;  %v3927_v14 = vpop.f32.mrb[34].mxu1 }
 0x2d8   :  { %v4395_v11 = vadd.f32 %v4394_v60, %v3925_v8  ;;  %v4520_v12 = vmul.f32 %v3925_v8, %v3925_v8  ;;  %v4596_v15 = vadd.f32 %v4595_v57, %v4517_v4  ;;  %4198 = vst [vmem:[%s7933_s5 + $0x220] sm:$0xff] %v3734_v13  ;;  %v4285_v17 = vadd.f32 %v4284_v3, %v3734_v13  ;;  %v3736_v19 = vpop.f32.mrb[35].mxu0  ;;  %v3929_v20 = vpop.f32.mrb[35].mxu1 }
 0x2d9   :  { %v4670_v16 = vadd.f32 %v4669_v61, %v4519_v6  ;;  %v4521_v18 = vmul.f32 %v3734_v13, %v3734_v13  ;;  %4200 = vst [vmem:[%s7933_s5 + $0x230] sm:$0xff] %v3927_v14  ;;  %v4633_v21 = vadd.f32 %v4632_v63, %v4518_v10  ;;  %v4359_v23 = vadd.f32 %v4358_v5, %v3927_v14 }
 0x2da   :  { %v4707_v22 = vadd.f32 %v4706_v0, %v4520_v12  ;;  %v4523_v24 = vmul.f32 %v3927_v14, %v3927_v14  ;;  %4199 = vst [vmem:[%s7933_s5 + $0x228] sm:$0xff] %v3736_v19  ;;  %4201 = vst [vmem:[%s7933_s5 + $0x238] sm:$0xff] %v3929_v20  ;;  %v4322_v27 = vadd.f32 %v4321_v9, %v3736_v19 }
 0x2db   :  { %v4597_v25 = vadd.f32 %v4596_v15, %v4521_v18  ;;  %v4522_v28 = vmul.f32 %v3736_v19, %v3736_v19  ;;  %v4396_v29 = vadd.f32 %v4395_v11, %v3929_v20  ;;  %v4524_v31 = vmul.f32 %v3929_v20, %v3929_v20 }
 0x2dc   :  { %v4671_v30 = vadd.f32 %v4670_v16, %v4523_v24 }
 0x2dd   :  { %v4634_v32 = vadd.f32 %v4633_v21, %v4522_v28  ;;  %v4708_v33 = vadd.f32 %v4707_v22, %v4524_v31  ;;  %v3740_v34 = vpop.f32.mrb[36].mxu0  ;;  %v3933_v35 = vpop.f32.mrb[36].mxu1 }
 0x2de   :  { %4202 = vst [vmem:[%s7933_s5 + $0x240] sm:$0xff] %v3740_v34  ;;  %v4286_v36 = vadd.f32 %v4285_v17, %v3740_v34  ;;  %v4525_v37 = vmul.f32 %v3740_v34, %v3740_v34  ;;  %4204 = vst [vmem:[%s7933_s5 + $0x250] sm:$0xff] %v3933_v35  ;;  %v4360_v38 = vadd.f32 %v4359_v23, %v3933_v35  ;;  %v3742_v40 = vpop.f32.mrb[37].mxu0  ;;  %v3935_v41 = vpop.f32.mrb[37].mxu1 }
 0x2df   :  { %v4527_v39 = vmul.f32 %v3933_v35, %v3933_v35  ;;  %4203 = vst [vmem:[%s7933_s5 + $0x248] sm:$0xff] %v3742_v40  ;;  %v4323_v42 = vadd.f32 %v4322_v27, %v3742_v40  ;;  %v4526_v43 = vmul.f32 %v3742_v40, %v3742_v40  ;;  %4205 = vst [vmem:[%s7933_s5 + $0x258] sm:$0xff] %v3935_v41  ;;  %v3744_v46 = vpop.f32.mrb[38].mxu0  ;;  %v3937_v47 = vpop.f32.mrb[38].mxu1 }
 0x2e0   :  { %v4397_v44 = vadd.f32 %v4396_v29, %v3935_v41  ;;  %v4528_v45 = vmul.f32 %v3935_v41, %v3935_v41  ;;  %v4598_v48 = vadd.f32 %v4597_v25, %v4525_v37  ;;  %4206 = vst [vmem:[%s7933_s5 + $0x260] sm:$0xff] %v3744_v46  ;;  %v4287_v50 = vadd.f32 %v4286_v36, %v3744_v46  ;;  %v3746_v52 = vpop.f32.mrb[39].mxu0  ;;  %v3939_v53 = vpop.f32.mrb[39].mxu1 }
 0x2e1   :  { %v4672_v49 = vadd.f32 %v4671_v30, %v4527_v39  ;;  %v4529_v51 = vmul.f32 %v3744_v46, %v3744_v46  ;;  %4208 = vst [vmem:[%s7933_s5 + $0x270] sm:$0xff] %v3937_v47  ;;  %v4635_v54 = vadd.f32 %v4634_v32, %v4526_v43  ;;  %v4361_v57 = vadd.f32 %v4360_v38, %v3937_v47 }
 0x2e2   :  { %v4709_v55 = vadd.f32 %v4708_v33, %v4528_v45  ;;  %v4531_v58 = vmul.f32 %v3937_v47, %v3937_v47  ;;  %4207 = vst [vmem:[%s7933_s5 + $0x268] sm:$0xff] %v3746_v52  ;;  %4209 = vst [vmem:[%s7933_s5 + $0x278] sm:$0xff] %v3939_v53  ;;  %v4324_v60 = vadd.f32 %v4323_v42, %v3746_v52 }
 0x2e3   :  { %v4599_v59 = vadd.f32 %v4598_v48, %v4529_v51  ;;  %v4530_v61 = vmul.f32 %v3746_v52, %v3746_v52  ;;  %v4398_v62 = vadd.f32 %v4397_v44, %v3939_v53  ;;  %v4532_v0 = vmul.f32 %v3939_v53, %v3939_v53 }
 0x2e4   :  { %v4673_v63 = vadd.f32 %v4672_v49, %v4531_v58 }
 0x2e5   :  { %v4636_v1 = vadd.f32 %v4635_v54, %v4530_v61  ;;  %v4710_v2 = vadd.f32 %v4709_v55, %v4532_v0  ;;  %v3750_v3 = vpop.f32.mrb[40].mxu0  ;;  %v3943_v4 = vpop.f32.mrb[40].mxu1 }
 0x2e6   :  { %4210 = vst [vmem:[%s7933_s5 + $0x280] sm:$0xff] %v3750_v3  ;;  %v4288_v5 = vadd.f32 %v4287_v50, %v3750_v3  ;;  %v4533_v6 = vmul.f32 %v3750_v3, %v3750_v3  ;;  %4212 = vst [vmem:[%s7933_s5 + $0x290] sm:$0xff] %v3943_v4  ;;  %v4362_v7 = vadd.f32 %v4361_v57, %v3943_v4  ;;  %v3752_v9 = vpop.f32.mrb[41].mxu0  ;;  %v3945_v10 = vpop.f32.mrb[41].mxu1 }
 0x2e7   :  { %v4535_v8 = vmul.f32 %v3943_v4, %v3943_v4  ;;  %4211 = vst [vmem:[%s7933_s5 + $0x288] sm:$0xff] %v3752_v9  ;;  %v4325_v11 = vadd.f32 %v4324_v60, %v3752_v9  ;;  %v4534_v12 = vmul.f32 %v3752_v9, %v3752_v9  ;;  %4213 = vst [vmem:[%s7933_s5 + $0x298] sm:$0xff] %v3945_v10  ;;  %v3754_v15 = vpop.f32.mrb[42].mxu0  ;;  %v3947_v16 = vpop.f32.mrb[42].mxu1 }
 0x2e8   :  { %v4399_v13 = vadd.f32 %v4398_v62, %v3945_v10  ;;  %v4536_v14 = vmul.f32 %v3945_v10, %v3945_v10  ;;  %v4600_v17 = vadd.f32 %v4599_v59, %v4533_v6  ;;  %4214 = vst [vmem:[%s7933_s5 + $0x2a0] sm:$0xff] %v3754_v15  ;;  %v4289_v19 = vadd.f32 %v4288_v5, %v3754_v15  ;;  %v3756_v21 = vpop.f32.mrb[43].mxu0  ;;  %v3949_v22 = vpop.f32.mrb[43].mxu1 }
 0x2e9   :  { %v4674_v18 = vadd.f32 %v4673_v63, %v4535_v8  ;;  %v4537_v20 = vmul.f32 %v3754_v15, %v3754_v15  ;;  %4216 = vst [vmem:[%s7933_s5 + $0x2b0] sm:$0xff] %v3947_v16  ;;  %v4637_v23 = vadd.f32 %v4636_v1, %v4534_v12  ;;  %v4363_v25 = vadd.f32 %v4362_v7, %v3947_v16 }
 0x2ea   :  { %v4711_v24 = vadd.f32 %v4710_v2, %v4536_v14  ;;  %v4539_v27 = vmul.f32 %v3947_v16, %v3947_v16  ;;  %4215 = vst [vmem:[%s7933_s5 + $0x2a8] sm:$0xff] %v3756_v21  ;;  %4217 = vst [vmem:[%s7933_s5 + $0x2b8] sm:$0xff] %v3949_v22  ;;  %v4326_v29 = vadd.f32 %v4325_v11, %v3756_v21 }
 0x2eb   :  { %v4601_v28 = vadd.f32 %v4600_v17, %v4537_v20  ;;  %v4538_v30 = vmul.f32 %v3756_v21, %v3756_v21  ;;  %v4400_v31 = vadd.f32 %v4399_v13, %v3949_v22  ;;  %v4540_v33 = vmul.f32 %v3949_v22, %v3949_v22 }
 0x2ec   :  { %v4675_v32 = vadd.f32 %v4674_v18, %v4539_v27 }
 0x2ed   :  { %v4638_v34 = vadd.f32 %v4637_v23, %v4538_v30  ;;  %v4712_v35 = vadd.f32 %v4711_v24, %v4540_v33  ;;  %v3760_v36 = vpop.f32.mrb[44].mxu0  ;;  %v3953_v37 = vpop.f32.mrb[44].mxu1 }
 0x2ee   :  { %4218 = vst [vmem:[%s7933_s5 + $0x2c0] sm:$0xff] %v3760_v36  ;;  %v4290_v38 = vadd.f32 %v4289_v19, %v3760_v36  ;;  %v4541_v39 = vmul.f32 %v3760_v36, %v3760_v36  ;;  %4220 = vst [vmem:[%s7933_s5 + $0x2d0] sm:$0xff] %v3953_v37  ;;  %v4364_v40 = vadd.f32 %v4363_v25, %v3953_v37  ;;  %v3762_v42 = vpop.f32.mrb[45].mxu0  ;;  %v3955_v43 = vpop.f32.mrb[45].mxu1 }
 0x2ef   :  { %v4543_v41 = vmul.f32 %v3953_v37, %v3953_v37  ;;  %4219 = vst [vmem:[%s7933_s5 + $0x2c8] sm:$0xff] %v3762_v42  ;;  %v4327_v44 = vadd.f32 %v4326_v29, %v3762_v42  ;;  %v4542_v45 = vmul.f32 %v3762_v42, %v3762_v42  ;;  %4221 = vst [vmem:[%s7933_s5 + $0x2d8] sm:$0xff] %v3955_v43  ;;  %v3764_v48 = vpop.f32.mrb[46].mxu0  ;;  %v3957_v49 = vpop.f32.mrb[46].mxu1 }
 0x2f0   :  { %v4401_v46 = vadd.f32 %v4400_v31, %v3955_v43  ;;  %v4544_v47 = vmul.f32 %v3955_v43, %v3955_v43  ;;  %v4602_v50 = vadd.f32 %v4601_v28, %v4541_v39  ;;  %4222 = vst [vmem:[%s7933_s5 + $0x2e0] sm:$0xff] %v3764_v48  ;;  %v4291_v52 = vadd.f32 %v4290_v38, %v3764_v48  ;;  %v3766_v54 = vpop.f32.mrb[47].mxu0  ;;  %v3959_v55 = vpop.f32.mrb[47].mxu1 }
 0x2f1   :  { %v4676_v51 = vadd.f32 %v4675_v32, %v4543_v41  ;;  %v4545_v53 = vmul.f32 %v3764_v48, %v3764_v48  ;;  %4224 = vst [vmem:[%s7933_s5 + $0x2f0] sm:$0xff] %v3957_v49  ;;  %v4639_v57 = vadd.f32 %v4638_v34, %v4542_v45  ;;  %v4365_v59 = vadd.f32 %v4364_v40, %v3957_v49 }
 0x2f2   :  { %v4713_v58 = vadd.f32 %v4712_v35, %v4544_v47  ;;  %v4547_v60 = vmul.f32 %v3957_v49, %v3957_v49  ;;  %4223 = vst [vmem:[%s7933_s5 + $0x2e8] sm:$0xff] %v3766_v54  ;;  %4225 = vst [vmem:[%s7933_s5 + $0x2f8] sm:$0xff] %v3959_v55  ;;  %v4328_v62 = vadd.f32 %v4327_v44, %v3766_v54 }
 0x2f3   :  { %v4603_v61 = vadd.f32 %v4602_v50, %v4545_v53  ;;  %v4546_v63 = vmul.f32 %v3766_v54, %v3766_v54  ;;  %v4402_v0 = vadd.f32 %v4401_v46, %v3959_v55  ;;  %v4548_v2 = vmul.f32 %v3959_v55, %v3959_v55 }
 0x2f4   :  { %v4677_v1 = vadd.f32 %v4676_v51, %v4547_v60 }
 0x2f5   :  { %v4640_v3 = vadd.f32 %v4639_v57, %v4546_v63  ;;  %v4714_v4 = vadd.f32 %v4713_v58, %v4548_v2  ;;  %v3770_v5 = vpop.f32.mrb[48].mxu0  ;;  %v3963_v6 = vpop.f32.mrb[48].mxu1 }
 0x2f6   :  { %4226 = vst [vmem:[%s7933_s5 + $0x300] sm:$0xff] %v3770_v5  ;;  %v4292_v7 = vadd.f32 %v4291_v52, %v3770_v5  ;;  %v4549_v8 = vmul.f32 %v3770_v5, %v3770_v5  ;;  %4228 = vst [vmem:[%s7933_s5 + $0x310] sm:$0xff] %v3963_v6  ;;  %v4366_v9 = vadd.f32 %v4365_v59, %v3963_v6  ;;  %v3772_v11 = vpop.f32.mrb[49].mxu0  ;;  %v3965_v12 = vpop.f32.mrb[49].mxu1 }
 0x2f7   :  { %v4551_v10 = vmul.f32 %v3963_v6, %v3963_v6  ;;  %4227 = vst [vmem:[%s7933_s5 + $0x308] sm:$0xff] %v3772_v11  ;;  %v4329_v13 = vadd.f32 %v4328_v62, %v3772_v11  ;;  %v4550_v14 = vmul.f32 %v3772_v11, %v3772_v11  ;;  %4229 = vst [vmem:[%s7933_s5 + $0x318] sm:$0xff] %v3965_v12  ;;  %v3774_v17 = vpop.f32.mrb[50].mxu0  ;;  %v3967_v18 = vpop.f32.mrb[50].mxu1 }
 0x2f8   :  { %v4403_v15 = vadd.f32 %v4402_v0, %v3965_v12  ;;  %v4552_v16 = vmul.f32 %v3965_v12, %v3965_v12  ;;  %v4604_v19 = vadd.f32 %v4603_v61, %v4549_v8  ;;  %4230 = vst [vmem:[%s7933_s5 + $0x320] sm:$0xff] %v3774_v17  ;;  %v4293_v21 = vadd.f32 %v4292_v7, %v3774_v17  ;;  %v3776_v23 = vpop.f32.mrb[51].mxu0  ;;  %v3969_v24 = vpop.f32.mrb[51].mxu1 }
 0x2f9   :  { %v4678_v20 = vadd.f32 %v4677_v1, %v4551_v10  ;;  %v4553_v22 = vmul.f32 %v3774_v17, %v3774_v17  ;;  %4232 = vst [vmem:[%s7933_s5 + $0x330] sm:$0xff] %v3967_v18  ;;  %v4641_v25 = vadd.f32 %v4640_v3, %v4550_v14  ;;  %v4367_v28 = vadd.f32 %v4366_v9, %v3967_v18 }
 0x2fa   :  { %v4715_v27 = vadd.f32 %v4714_v4, %v4552_v16  ;;  %v4555_v29 = vmul.f32 %v3967_v18, %v3967_v18  ;;  %4231 = vst [vmem:[%s7933_s5 + $0x328] sm:$0xff] %v3776_v23  ;;  %4233 = vst [vmem:[%s7933_s5 + $0x338] sm:$0xff] %v3969_v24  ;;  %v4330_v31 = vadd.f32 %v4329_v13, %v3776_v23  ;;  %v6311_v9 = vmov 1966171168  }
 0x2fb   :  { %v4605_v30 = vadd.f32 %v4604_v19, %v4553_v22  ;;  %v4554_v32 = vmul.f32 %v3776_v23, %v3776_v23  ;;  %v4404_v33 = vadd.f32 %v4403_v15, %v3969_v24  ;;  %v4556_v35 = vmul.f32 %v3969_v24, %v3969_v24 }
 0x2fc   :  { %v4679_v34 = vadd.f32 %v4678_v20, %v4555_v29  ;;  %v7855_v10 = vunpack.c.l.s4 %v6311_v9 }
 0x2fd   :  { %v4642_v36 = vadd.f32 %v4641_v25, %v4554_v32  ;;  %v4716_v37 = vadd.f32 %v4715_v27, %v4556_v35  ;;  %v3780_v38 = vpop.f32.mrb[52].mxu0  ;;  %v3973_v39 = vpop.f32.mrb[52].mxu1 }
 0x2fe   :  { %4234 = vst [vmem:[%s7933_s5 + $0x340] sm:$0xff] %v3780_v38  ;;  %v4294_v40 = vadd.f32 %v4293_v21, %v3780_v38  ;;  %v4557_v41 = vmul.f32 %v3780_v38, %v3780_v38  ;;  %4236 = vst [vmem:[%s7933_s5 + $0x350] sm:$0xff] %v3973_v39  ;;  %v4368_v42 = vadd.f32 %v4367_v28, %v3973_v39  ;;  %v3782_v44 = vpop.f32.mrb[53].mxu0  ;;  %v3975_v45 = vpop.f32.mrb[53].mxu1 }
 0x2ff   :  { %v4559_v43 = vmul.f32 %v3973_v39, %v3973_v39  ;;  %4235 = vst [vmem:[%s7933_s5 + $0x348] sm:$0xff] %v3782_v44  ;;  %v4331_v46 = vadd.f32 %v4330_v31, %v3782_v44  ;;  %v4558_v47 = vmul.f32 %v3782_v44, %v3782_v44  ;;  %4237 = vst [vmem:[%s7933_s5 + $0x358] sm:$0xff] %v3975_v45  ;;  %v3784_v50 = vpop.f32.mrb[54].mxu0  ;;  %v3977_v51 = vpop.f32.mrb[54].mxu1  ;;  %v4425_v44 = vunpack.c.0.s8 %v7855_v10  ;;  %v4268_v10 = vld [vmem:[%s7934_s6] sm:$0xf] }
 0x300   :  { %v4405_v48 = vadd.f32 %v4404_v33, %v3975_v45  ;;  %v4560_v49 = vmul.f32 %v3975_v45, %v3975_v45  ;;  %v4606_v52 = vadd.f32 %v4605_v30, %v4557_v41  ;;  %4238 = vst [vmem:[%s7933_s5 + $0x360] sm:$0xff] %v3784_v50  ;;  %v4295_v54 = vadd.f32 %v4294_v40, %v3784_v50  ;;  %v3786_v57 = vpop.f32.mrb[55].mxu0  ;;  %v3979_v58 = vpop.f32.mrb[55].mxu1 }
 0x301   :  { %v4680_v53 = vadd.f32 %v4679_v34, %v4559_v43  ;;  %v4561_v55 = vmul.f32 %v3784_v50, %v3784_v50  ;;  %4240 = vst [vmem:[%s7933_s5 + $0x370] sm:$0xff] %v3977_v51  ;;  %v4643_v59 = vadd.f32 %v4642_v36, %v4558_v47  ;;  %v4369_v61 = vadd.f32 %v4368_v42, %v3977_v51 }
 0x302   :  { %v4717_v60 = vadd.f32 %v4716_v37, %v4560_v49  ;;  %v4563_v62 = vmul.f32 %v3977_v51, %v3977_v51  ;;  %4239 = vst [vmem:[%s7933_s5 + $0x368] sm:$0xff] %v3786_v57  ;;  %4241 = vst [vmem:[%s7933_s5 + $0x378] sm:$0xff] %v3979_v58  ;;  %v4332_v0 = vadd.f32 %v4331_v46, %v3786_v57  ;;  %v7883_v45 = vshrl.u32 %v4262_v26, 7 }
 0x303   :  { %v4607_v63 = vadd.f32 %v4606_v52, %v4561_v55  ;;  %v4562_v1 = vmul.f32 %v3786_v57, %v3786_v57  ;;  %v4406_v2 = vadd.f32 %v4405_v48, %v3979_v58  ;;  %v4564_v4 = vmul.f32 %v3979_v58, %v3979_v58 }
 0x304   :  { %v4681_v3 = vadd.f32 %v4680_v53, %v4563_v62 }
 0x305   :  { %v4644_v5 = vadd.f32 %v4643_v59, %v4562_v1  ;;  %v4718_v6 = vadd.f32 %v4717_v60, %v4564_v4  ;;  %v3790_v7 = vpop.f32.mrb[56].mxu0  ;;  %v3983_v8 = vpop.f32.mrb[56].mxu1 }
 0x306   :  { %4242 = vst [vmem:[%s7933_s5 + $0x380] sm:$0xff] %v3790_v7  ;;  %v4296_v11 = vadd.f32 %v4295_v54, %v3790_v7  ;;  %v4565_v12 = vmul.f32 %v3790_v7, %v3790_v7  ;;  %4244 = vst [vmem:[%s7933_s5 + $0x390] sm:$0xff] %v3983_v8  ;;  %v4370_v13 = vadd.f32 %v4369_v61, %v3983_v8  ;;  %v3792_v15 = vpop.f32.mrb[57].mxu0  ;;  %v3985_v16 = vpop.f32.mrb[57].mxu1 }
 0x307   :  { %v4567_v14 = vmul.f32 %v3983_v8, %v3983_v8  ;;  %4243 = vst [vmem:[%s7933_s5 + $0x388] sm:$0xff] %v3792_v15  ;;  %v4333_v17 = vadd.f32 %v4332_v0, %v3792_v15  ;;  %v4566_v18 = vmul.f32 %v3792_v15, %v3792_v15  ;;  %4245 = vst [vmem:[%s7933_s5 + $0x398] sm:$0xff] %v3985_v16  ;;  %v3794_v21 = vpop.f32.mrb[58].mxu0  ;;  %v3987_v22 = vpop.f32.mrb[58].mxu1 }
 0x308   :  { %v4407_v19 = vadd.f32 %v4406_v2, %v3985_v16  ;;  %v4568_v20 = vmul.f32 %v3985_v16, %v3985_v16  ;;  %v4608_v23 = vadd.f32 %v4607_v63, %v4565_v12  ;;  %4246 = vst [vmem:[%s7933_s5 + $0x3a0] sm:$0xff] %v3794_v21  ;;  %v4297_v25 = vadd.f32 %v4296_v11, %v3794_v21  ;;  %v3796_v28 = vpop.f32.mrb[59].mxu0  ;;  %v3989_v29 = vpop.f32.mrb[59].mxu1 }
 0x309   :  { %v4682_v24 = vadd.f32 %v4681_v3, %v4567_v14  ;;  %v4569_v27 = vmul.f32 %v3794_v21, %v3794_v21  ;;  %4248 = vst [vmem:[%s7933_s5 + $0x3b0] sm:$0xff] %v3987_v22  ;;  %v4645_v30 = vadd.f32 %v4644_v5, %v4566_v18  ;;  %v4371_v32 = vadd.f32 %v4370_v13, %v3987_v22 }
 0x30a   :  { %v4719_v31 = vadd.f32 %v4718_v6, %v4568_v20  ;;  %v4571_v33 = vmul.f32 %v3987_v22, %v3987_v22  ;;  %4247 = vst [vmem:[%s7933_s5 + $0x3a8] sm:$0xff] %v3796_v28  ;;  %4249 = vst [vmem:[%s7933_s5 + $0x3b8] sm:$0xff] %v3989_v29  ;;  %v4334_v35 = vadd.f32 %v4333_v17, %v3796_v28 }
 0x30b   :  { %v4609_v34 = vadd.f32 %v4608_v23, %v4569_v27  ;;  %v4570_v36 = vmul.f32 %v3796_v28, %v3796_v28  ;;  %v4408_v37 = vadd.f32 %v4407_v19, %v3989_v29  ;;  %v4572_v39 = vmul.f32 %v3989_v29, %v3989_v29 }
 0x30c   :  { %v4683_v38 = vadd.f32 %v4682_v24, %v4571_v33 }
 0x30d   :  { %v4646_v40 = vadd.f32 %v4645_v30, %v4570_v36  ;;  %v4720_v41 = vadd.f32 %v4719_v31, %v4572_v39  ;;  %v3800_v42 = vpop.f32.mrb[60].mxu0  ;;  %v3993_v43 = vpop.f32.mrb[60].mxu1 }
 0x30e   :  { %4250 = vst [vmem:[%s7933_s5 + $0x3c0] sm:$0xff] %v3800_v42  ;;  %v4298_v46 = vadd.f32 %v4297_v25, %v3800_v42  ;;  %v4573_v47 = vmul.f32 %v3800_v42, %v3800_v42  ;;  %4252 = vst [vmem:[%s7933_s5 + $0x3d0] sm:$0xff] %v3993_v43  ;;  %v4372_v48 = vadd.f32 %v4371_v32, %v3993_v43  ;;  %v3802_v50 = vpop.f32.mrb[61].mxu0  ;;  %v3995_v51 = vpop.f32.mrb[61].mxu1 }
 0x30f   :  { %v4575_v49 = vmul.f32 %v3993_v43, %v3993_v43  ;;  %4251 = vst [vmem:[%s7933_s5 + $0x3c8] sm:$0xff] %v3802_v50  ;;  %v4335_v26 = vadd.f32 %v4334_v35, %v3802_v50  ;;  %v4574_v52 = vmul.f32 %v3802_v50, %v3802_v50  ;;  %4253 = vst [vmem:[%s7933_s5 + $0x3d8] sm:$0xff] %v3995_v51  ;;  %v3804_v55 = vpop.f32.mrb[62].mxu0  ;;  %v3997_v57 = vpop.f32.mrb[62].mxu1 }
 0x310   :  { %v4409_v53 = vadd.f32 %v4408_v37, %v3995_v51  ;;  %v4576_v54 = vmul.f32 %v3995_v51, %v3995_v51  ;;  %v4610_v58 = vadd.f32 %v4609_v34, %v4573_v47  ;;  %4254 = vst [vmem:[%s7933_s5 + $0x3e0] sm:$0xff] %v3804_v55  ;;  %v4299_v60 = vadd.f32 %v4298_v46, %v3804_v55  ;;  %v3806_v62 = vpop.f32.mrb[63].mxu0  ;;  %v3999_v63 = vpop.f32.mrb[63].mxu1 }
 0x311   :  { %v4684_v59 = vadd.f32 %v4683_v38, %v4575_v49  ;;  %v4577_v61 = vmul.f32 %v3804_v55, %v3804_v55  ;;  %4256 = vst [vmem:[%s7933_s5 + $0x3f0] sm:$0xff] %v3997_v57  ;;  %v4647_v0 = vadd.f32 %v4646_v40, %v4574_v52  ;;  %v4373_v2 = vadd.f32 %v4372_v48, %v3997_v57 }
 0x312   :  { %v4721_v1 = vadd.f32 %v4720_v41, %v4576_v54  ;;  %v4579_v3 = vmul.f32 %v3997_v57, %v3997_v57  ;;  %4255 = vst [vmem:[%s7933_s5 + $0x3e8] sm:$0xff] %v3806_v62  ;;  %4257 = vst [vmem:[%s7933_s5 + $0x3f8] sm:$0xff] %v3999_v63  ;;  %v4300_v4 = vrot.slane %v4299_v60, 4  ;;  %v4336_v6 = vadd.f32 %v4335_v26, %v3806_v62 }
 0x313   :  { %v4611_v5 = vadd.f32 %v4610_v58, %v4577_v61  ;;  %v4578_v7 = vmul.f32 %v3806_v62, %v3806_v62  ;;  %v4374_v8 = vrot.slane %v4373_v2, 4  ;;  %v4410_v11 = vadd.f32 %v4409_v53, %v3999_v63 }
 0x314   :  { %v4685_v9 = vadd.f32 %v4684_v59, %v4579_v3  ;;  %v4580_v12 = vmul.f32 %v3999_v63, %v3999_v63  ;;  %v4301_v13 = vadd.f32 %v4300_v4, %v4299_v60  ;;  %v4337_v15 = vrot.slane %v4336_v6, 4 }
 0x315   :  { %v4612_v14 = vrot.slane %v4611_v5, 4  ;;  %v4648_v16 = vadd.f32 %v4647_v0, %v4578_v7  ;;  %v4375_v17 = vadd.f32 %v4374_v8, %v4373_v2  ;;  %v4411_v19 = vrot.slane %v4410_v11, 4 }
 0x316   :  { %v4686_v18 = vrot.slane %v4685_v9, 4  ;;  %v4722_v20 = vadd.f32 %v4721_v1, %v4580_v12  ;;  %v4302_v21 = vrot.slane %v4301_v13, 2  ;;  %v4338_v23 = vadd.f32 %v4337_v15, %v4336_v6 }
 0x317   :  { %v4613_v22 = vadd.f32 %v4612_v14, %v4611_v5  ;;  %v4649_v24 = vrot.slane %v4648_v16, 4  ;;  %v4376_v25 = vrot.slane %v4375_v17, 2  ;;  %v4412_v28 = vadd.f32 %v4411_v19, %v4410_v11  ;;  %v4452_v11 = vld [vmem:[%s7935_s7] sm:$0xf] }
 0x318   :  { %v4687_v27 = vadd.f32 %v4686_v18, %v4685_v9  ;;  %v4723_v29 = vrot.slane %v4722_v20, 4  ;;  %v4303_v30 = vadd.f32 %v4302_v21, %v4301_v13  ;;  %v4339_v32 = vrot.slane %v4338_v23, 2 }
 0x319   :  { %v4614_v31 = vrot.slane %v4613_v22, 2  ;;  %v4650_v33 = vadd.f32 %v4649_v24, %v4648_v16  ;;  %v4377_v34 = vadd.f32 %v4376_v25, %v4375_v17  ;;  %v4413_v36 = vrot.slane %v4412_v28, 2 }
 0x31a   :  { %v4688_v35 = vrot.slane %v4687_v27, 2  ;;  %v4724_v37 = vadd.f32 %v4723_v29, %v4722_v20  ;;  %v4304_v38 = vrot.slane %v4303_v30, 1  ;;  %v4340_v40 = vadd.f32 %v4339_v32, %v4338_v23 }
 0x31b   :  { %v4615_v39 = vadd.f32 %v4614_v31, %v4613_v22  ;;  %v4651_v41 = vrot.slane %v4650_v33, 2  ;;  %v4378_v42 = vrot.slane %v4377_v34, 1  ;;  %v4414_v46 = vadd.f32 %v4413_v36, %v4412_v28 }
 0x31c   :  { %v4689_v43 = vadd.f32 %v4688_v35, %v4687_v27  ;;  %v4725_v47 = vrot.slane %v4724_v37, 2  ;;  %v4305_v48 = vadd.f32 %v4304_v38, %v4303_v30  ;;  %v4341_v50 = vrot.slane %v4340_v40, 1 }
 0x31d   :  { %v4616_v49 = vrot.slane %v4615_v39, 1  ;;  %v4652_v51 = vadd.f32 %v4651_v41, %v4650_v33  ;;  %v4379_v26 = vadd.f32 %v4378_v42, %v4377_v34  ;;  %v4415_v53 = vrot.slane %v4414_v46, 1 }
 0x31e   :  { %v4690_v52 = vrot.slane %v4689_v43, 1  ;;  %v4726_v54 = vadd.f32 %v4725_v47, %v4724_v37  ;;  %v4342_v57 = vadd.f32 %v4341_v50, %v4340_v40  ;;  %v4428_v58 = vsub.s32 %v4425_v44, %v7883_v45 }
 0x31f   :  { %v4617_v55 = vadd.f32 %v4616_v49, %v4615_v39  ;;  %v4653_v59 = vrot.slane %v4652_v51, 1  ;;  %v4416_v61 = vadd.f32 %v4415_v53, %v4414_v46 }
 0x320   :  { %v4691_v60 = vadd.f32 %v4690_v52, %v4689_v43  ;;  %v4727_v62 = vrot.slane %v4726_v54, 1  ;;  %v4421_v63 = vcombine.low %v4305_v48, %v4342_v57 }
 0x321   :  { %v4654_v0 = vadd.f32 %v4653_v59, %v4652_v51  ;;  %v4422_v1 = vcombine.low %v4379_v26, %v4416_v61 }
 0x322   :  { %v4728_v2 = vadd.f32 %v4727_v62, %v4726_v54  ;;  %v4429_v3 = vrot.slane %v4421_v63, %v4428_v58 }
 0x323   :  { %v4733_v4 = vcombine.low %v4617_v55, %v4654_v0  ;;  %v4436_v5 = vrot.slane %v4422_v1, %v4428_v58 }
 0x324   :  { %v4734_v6 = vcombine.low %v4691_v60, %v4728_v2 }
 0x325   :  { %v4741_v7 = vrot.slane %v4733_v4, %v4428_v58  ;;  %v4437_v8 = vcombine.low %v4429_v3, %v4436_v5 }
 0x326   :  { %v4748_v9 = vrot.slane %v4734_v6, %v4428_v58 }
 0x327   :  { %v4444_v44 = vrot.slane %v4437_v8, %v4428_v58 }
 0x328   :  { %v4749_v45 = vcombine.low %v4741_v7, %v4748_v9 }
 0x329   :  { %v4446_v12 = vadd.f32 %v4444_v44, %v4268_v10 }
 0x32a   :  { %v4756_v13 = vrot.slane %v4749_v45, %v4428_v58 }
 0x32b   :  { %4451 = vst.msk [vmem:[%s7934_s6] sm:$0xf] %vm7553_vm0, %v4446_v12 }
 0x32c   :  { %v4758_v14 = vadd.f32 %v4756_v13, %v4452_v11 }
 0x32e   :  { %4759 = vst.msk [vmem:[%s7935_s7] sm:$0xf] %vm7553_vm0, %v4758_v14 }

// kernel: hdnet_forward.6
= control target key start
LH: loop header
LB: loop body
LE: loop exit
PB: predicated region body
PF: predicated region fallthrough
CT: control target
= control target key end

     0   :  { %v150_v37 = vlaneseq  ;;  %s3102_s3 = inlined_call_operand.vmem [shape: bf16[512,256], index: 3, kind: input, shape index: {}]   ;;  %s3103_s0 = inlined_call_operand.vmem [shape: f32[256,512], index: 0, kind: input, shape index: {}]   ;;  %s3104_s1 = inlined_call_operand.vmem [shape: f32[1,512], index: 1, kind: input, shape index: {}]   ;;  %s3105_s2 = inlined_call_operand.vmem [shape: f32[1,512], index: 2, kind: input, shape index: {}]   ;;  %s3106_s4 = inlined_call_operand.vmem [shape: f32[256,256], index: 4, kind: output, shape index: {0}]   ;;  %s3107_s5 = inlined_call_operand.vmem [shape: f32[1,256], index: 5, kind: output, shape index: {1}]   ;;  %s3108_s6 = inlined_call_operand.vmem [shape: f32[1,256], index: 6, kind: output, shape index: {2}]  }
   0x1   :  { %v1884_v0 = vld [vmem:[%s3102_s3 + $0x4] ss:$8 sps:$4 sm:$0xff]   ;;  %v1888_v2 = vld [vmem:[%s3102_s3] ss:$8 sps:$4 sm:$0xff]   ;;  %v1890_v4 = vld [vmem:[%s3102_s3 + $0x14] ss:$8 sps:$4 sm:$0xff]  }
   0x2   :  { %v1886_v1 = vld [vmem:[%s3102_s3 + $0x104] ss:$8 sps:$4 sm:$0xff]   ;;  %1024 = vmatprep.subr.bf16.mxu1 %v1884_v0  ;;  %v1889_v3 = vld [vmem:[%s3102_s3 + $0x100] ss:$8 sps:$4 sm:$0xff]   ;;  %v1892_v5 = vld [vmem:[%s3102_s3 + $0x114] ss:$8 sps:$4 sm:$0xff]  }
   0x3   :  { %1217 = vmatprep.subr.bf16.mxu0 %v1886_v1  ;;  %1025 = vmatpush1.bf16.msra.mxu1 %v1888_v2  ;;  %v1894_v6 = vld [vmem:[%s3102_s3 + $0x10] ss:$8 sps:$4 sm:$0xff]   ;;  %v1896_v8 = vld [vmem:[%s3102_s3 + $0x24] ss:$8 sps:$4 sm:$0xff]   ;;  %v1900_v10 = vld [vmem:[%s3102_s3 + $0x20] ss:$8 sps:$4 sm:$0xff]  }
   0x4   :  { %1218 = vmatpush1.bf16.msra.mxu0 %v1889_v3  ;;  %1026 = vmatprep.subr.bf16.mxu1 %v1890_v4  ;;  %v1895_v7 = vld [vmem:[%s3102_s3 + $0x110] ss:$8 sps:$4 sm:$0xff]   ;;  %v1898_v9 = vld [vmem:[%s3102_s3 + $0x124] ss:$8 sps:$4 sm:$0xff]   ;;  %v1901_v11 = vld [vmem:[%s3102_s3 + $0x120] ss:$8 sps:$4 sm:$0xff]  }
   0x5   :  { %1219 = vmatprep.subr.bf16.mxu0 %v1892_v5  ;;  %v1902_v12 = vld [vmem:[%s3102_s3 + $0x34] ss:$8 sps:$4 sm:$0xff]   ;;  %v1906_v14 = vld [vmem:[%s3102_s3 + $0x30] ss:$8 sps:$4 sm:$0xff]   ;;  %v1908_v16 = vld [vmem:[%s3102_s3 + $0x44] ss:$8 sps:$4 sm:$0xff]  }
   0x6   :  { %v1904_v13 = vld [vmem:[%s3102_s3 + $0x134] ss:$8 sps:$4 sm:$0xff]   ;;  %v1907_v15 = vld [vmem:[%s3102_s3 + $0x130] ss:$8 sps:$4 sm:$0xff]   ;;  %v1910_v17 = vld [vmem:[%s3102_s3 + $0x144] ss:$8 sps:$4 sm:$0xff]  }
   0x7   :  { %1027 = vmatpush1.bf16.msra.mxu1 %v1894_v6  ;;  %v1912_v18 = vld [vmem:[%s3102_s3 + $0x40] ss:$8 sps:$4 sm:$0xff]   ;;  %v1914_v20 = vld [vmem:[%s3102_s3 + $0x54] ss:$8 sps:$4 sm:$0xff]   ;;  %v1918_v22 = vld [vmem:[%s3102_s3 + $0x50] ss:$8 sps:$4 sm:$0xff]  }
   0x8   :  { %1220 = vmatpush1.bf16.msra.mxu0 %v1895_v7  ;;  %1028 = vmatprep.subr.bf16.mxu1 %v1896_v8  ;;  %v1913_v19 = vld [vmem:[%s3102_s3 + $0x140] ss:$8 sps:$4 sm:$0xff]   ;;  %v1916_v21 = vld [vmem:[%s3102_s3 + $0x154] ss:$8 sps:$4 sm:$0xff]   ;;  %v1919_v23 = vld [vmem:[%s3102_s3 + $0x150] ss:$8 sps:$4 sm:$0xff]  }
   0x9   :  { %1221 = vmatprep.subr.bf16.mxu0 %v1898_v9  ;;  %v1920_v24 = vld [vmem:[%s3102_s3 + $0x64] ss:$8 sps:$4 sm:$0xff]   ;;  %v1924_v26 = vld [vmem:[%s3102_s3 + $0x60] ss:$8 sps:$4 sm:$0xff]   ;;  %v1926_v28 = vld [vmem:[%s3102_s3 + $0x74] ss:$8 sps:$4 sm:$0xff]  }
   0xa   :  { %v1922_v25 = vld [vmem:[%s3102_s3 + $0x164] ss:$8 sps:$4 sm:$0xff]   ;;  %v1925_v27 = vld [vmem:[%s3102_s3 + $0x160] ss:$8 sps:$4 sm:$0xff]   ;;  %v1928_v29 = vld [vmem:[%s3102_s3 + $0x174] ss:$8 sps:$4 sm:$0xff]  }
   0xb   :  { %1029 = vmatpush1.bf16.msra.mxu1 %v1900_v10  ;;  %v1930_v30 = vld [vmem:[%s3102_s3 + $0x70] ss:$8 sps:$4 sm:$0xff]   ;;  %v1932_v32 = vld [vmem:[%s3102_s3 + $0x84] ss:$8 sps:$4 sm:$0xff]   ;;  %v1936_v34 = vld [vmem:[%s3102_s3 + $0x80] ss:$8 sps:$4 sm:$0xff]  }
   0xc   :  { %1222 = vmatpush1.bf16.msra.mxu0 %v1901_v11  ;;  %1030 = vmatprep.subr.bf16.mxu1 %v1902_v12  ;;  %v1931_v31 = vld [vmem:[%s3102_s3 + $0x170] ss:$8 sps:$4 sm:$0xff]   ;;  %v1934_v33 = vld [vmem:[%s3102_s3 + $0x184] ss:$8 sps:$4 sm:$0xff]   ;;  %v1937_v35 = vld [vmem:[%s3102_s3 + $0x180] ss:$8 sps:$4 sm:$0xff]  }
   0xd   :  { %1223 = vmatprep.subr.bf16.mxu0 %v1904_v13  ;;  %v1938_v36 = vld [vmem:[%s3102_s3 + $0x94] ss:$8 sps:$4 sm:$0xff]   ;;  %v1942_v39 = vld [vmem:[%s3102_s3 + $0x90] ss:$8 sps:$4 sm:$0xff]   ;;  %v1944_v41 = vld [vmem:[%s3102_s3 + $0xa4] ss:$8 sps:$4 sm:$0xff]  }
   0xe   :  { %v1940_v38 = vld [vmem:[%s3102_s3 + $0x194] ss:$8 sps:$4 sm:$0xff]   ;;  %v1943_v40 = vld [vmem:[%s3102_s3 + $0x190] ss:$8 sps:$4 sm:$0xff]   ;;  %v2141_v42 = vshrl.u32 %v150_v37, 7  ;;  %v21_v53 = vld [vmem:[%s3103_s0 + $0x8] sm:$0xff] }
   0xf   :  { %1031 = vmatpush1.bf16.msra.mxu1 %v1906_v14  ;;  %v1946_v43 = vld [vmem:[%s3102_s3 + $0x1a4] ss:$8 sps:$4 sm:$0xff]   ;;  %v1948_v44 = vld [vmem:[%s3102_s3 + $0xa0] ss:$8 sps:$4 sm:$0xff]   ;;  %v1950_v46 = vld [vmem:[%s3102_s3 + $0xb4] ss:$8 sps:$4 sm:$0xff]  }
  0x10   :  { %1224 = vmatpush1.bf16.msra.mxu0 %v1907_v15  ;;  %1032 = vmatprep.subr.bf16.mxu1 %v1908_v16  ;;  %v1949_v45 = vld [vmem:[%s3102_s3 + $0x1a0] ss:$8 sps:$4 sm:$0xff]   ;;  %v156_v47 = vsub.s32 1, %v2141_v42  ;;  %v164_v48 = vsub.s32 3, %v2141_v42  ;;  %v1952_v49 = vld [vmem:[%s3102_s3 + $0x1b4] ss:$8 sps:$4 sm:$0xff]  }
  0x11   :  { %1225 = vmatprep.subr.bf16.mxu0 %v1910_v17  ;;  %v152_v50 = vsub.s32 0, %v2141_v42  ;;  %v1954_v51 = vld [vmem:[%s3102_s3 + $0xb0] ss:$8 sps:$4 sm:$0xff]   ;;  %v25_v54 = vld [vmem:[%s3103_s0 + $0x28] sm:$0xff]  ;;  %v148_v55 = vld [vmem:[%s3104_s1] sm:$0xf] }
  0x12   :  { %v1955_v52 = vld [vmem:[%s3102_s3 + $0x1b0] ss:$8 sps:$4 sm:$0xff]   ;;  %v298_v56 = vld [vmem:[%s3105_s2] sm:$0xf]  ;;  %v160_v57 = vsub.s32 2, %v2141_v42  ;;  %v2180_v58 = vrot.slane %v148_v55, %v156_v47  ;;  %v2190_v62 = vrot.slane %v148_v55, %v164_v48  ;;  %vm2891_vm0 = vcmp.lt.s32.totalorder %v150_v37, 256 }
  0x13   :  { %1033 = vmatpush1.bf16.msra.mxu1 %v1912_v18  ;;  %v2182_v59 = vrot.slane %v298_v56, %v156_v47  ;;  %v23_v60 = vld [vmem:[%s3103_s0 + $0x18] sm:$0xff]  ;;  %v20_v63 = vld [vmem:[%s3103_s0] sm:$0xff]  ;;  %v2201_v2 = vrot.slane %v298_v56, %v164_v48  ;;  %v2203_v3 = vrot.slane %v148_v55, %v152_v50  ;;  %v2213_v10 = vrot.slane %v298_v56, %v152_v50  ;;  %v22_v11 = vld [vmem:[%s3103_s0 + $0x10] sm:$0xff] }
  0x14   :  { %1226 = vmatpush1.bf16.msra.mxu0 %v1913_v19  ;;  %1034 = vmatprep.subr.bf16.mxu1 %v1914_v20  ;;  %v27_v61 = vld [vmem:[%s3103_s0 + $0x38] sm:$0xff]  ;;  %v1956_v0 = vld [vmem:[%s3102_s3 + $0xc4] ss:$8 sps:$4 sm:$0xff]   ;;  %v171_v4 = vmul.f32 %v2180_v58, %v21_v53  ;;  %v175_v5 = vmul.f32 %v2180_v58, %v25_v54  ;;  %v173_v6 = vmul.f32 %v2190_v62, %v23_v60  ;;  %v1960_v13 = vld [vmem:[%s3102_s3 + $0xc0] ss:$8 sps:$4 sm:$0xff]  }
  0x15   :  { %1227 = vmatprep.subr.bf16.mxu0 %v1916_v21  ;;  %v1958_v1 = vld [vmem:[%s3102_s3 + $0x1c4] ss:$8 sps:$4 sm:$0xff]   ;;  %v177_v7 = vmul.f32 %v2190_v62, %v27_v61  ;;  %v170_v9 = vmul.f32 %v2203_v3, %v20_v63  ;;  %v2218_v12 = vrot.slane %v148_v55, %v160_v57  ;;  %v1961_v14 = vld [vmem:[%s3102_s3 + $0x1c0] ss:$8 sps:$4 sm:$0xff]   ;;  %v26_v18 = vld [vmem:[%s3103_s0 + $0x30] sm:$0xff] }
  0x16   :  { %v24_v8 = vld [vmem:[%s3103_s0 + $0x20] sm:$0xff]  ;;  %v321_v15 = vadd.f32 %v2182_v59, %v171_v4  ;;  %v325_v16 = vadd.f32 %v2182_v59, %v175_v5  ;;  %v323_v17 = vadd.f32 %v2201_v2, %v173_v6  ;;  %v1962_v19 = vld [vmem:[%s3102_s3 + $0xd4] ss:$8 sps:$4 sm:$0xff]   ;;  %v37_v63 = vld [vmem:[%s3103_s0 + $0x88] sm:$0xff] }
  0x17   :  { %1035 = vmatpush1.bf16.msra.mxu1 %v1918_v22  ;;  %v1964_v20 = vld [vmem:[%s3102_s3 + $0x1d4] ss:$8 sps:$4 sm:$0xff]   ;;  %v327_v21 = vadd.f32 %v2201_v2, %v177_v7  ;;  %v174_v22 = vmul.f32 %v2203_v3, %v24_v8  ;;  %v1972_v55 = vld [vmem:[%s3102_s3 + $0xe0] ss:$8 sps:$4 sm:$0xff]  }
  0x18   :  { %1228 = vmatpush1.bf16.msra.mxu0 %v1919_v23  ;;  %1036 = vmatprep.subr.bf16.mxu1 %v1920_v24  ;;  %v2240_v23 = vrot.slane %v298_v56, %v160_v57  ;;  %v29_v24 = vld [vmem:[%s3103_s0 + $0x48] sm:$0xff]  ;;  %v30_v50 = vld [vmem:[%s3103_s0 + $0x50] sm:$0xff] }
  0x19   :  { %1229 = vmatprep.subr.bf16.mxu0 %v1922_v25  ;;  %v449_v25 = vmax.f32 %v321_v15, 0.0  ;;  %v34_v54 = vld [vmem:[%s3103_s0 + $0x70] sm:$0xff]  ;;  %v1973_v56 = vld [vmem:[%s3102_s3 + $0x1e0] ss:$8 sps:$4 sm:$0xff]   ;;  %v180_v6 = vmul.f32 %v2218_v12, %v30_v50 }
  0x1a   :  { %v41_v7 = vld [vmem:[%s3103_s0 + $0xa8] sm:$0xff] }
  0x1b   :  { %1037 = vmatpush1.bf16.msra.mxu1 %v1924_v26  ;;  %v453_v26 = vmax.f32 %v325_v16, 0.0 }
  0x1c   :  { %1230 = vmatpush1.bf16.msra.mxu0 %v1925_v27  ;;  %1038 = vmatprep.subr.bf16.mxu1 %v1926_v28  ;;  %v451_v27 = vmax.f32 %v323_v17, 0.0  ;;  %v172_v28 = vmul.f32 %v2218_v12, %v22_v11 }
  0x1d   :  { %1231 = vmatprep.subr.bf16.mxu0 %v1928_v29  ;;  %v455_v29 = vmax.f32 %v327_v21, 0.0  ;;  %v1979_v21 = vld [vmem:[%s3102_s3 + $0x1f0] ss:$8 sps:$4 sm:$0xff]  }
  0x1f   :  { %1039 = vmatpush1.bf16.msra.mxu1 %v1930_v30  ;;  %v176_v30 = vmul.f32 %v2218_v12, %v26_v18  ;;  %v187_v18 = vmul.f32 %v2180_v58, %v37_v63 }
  0x20   :  { %1232 = vmatpush1.bf16.msra.mxu0 %v1931_v31  ;;  %1040 = vmatprep.subr.bf16.mxu1 %v1932_v32  ;;  %v33_v31 = vld [vmem:[%s3103_s0 + $0x68] sm:$0xff]  ;;  %v31_v32 = vld [vmem:[%s3103_s0 + $0x58] sm:$0xff] }
  0x21   :  { %1233 = vmatprep.subr.bf16.mxu0 %v1934_v33  ;;  %v1966_v33 = vld [vmem:[%s3102_s3 + $0xd0] ss:$8 sps:$4 sm:$0xff]   ;;  %v183_v47 = vmul.f32 %v2180_v58, %v33_v31  ;;  %v181_v48 = vmul.f32 %v2190_v62, %v31_v32 }
  0x23   :  { %1041 = vmatpush1.bf16.msra.mxu1 %v1936_v34  ;;  %v1967_v34 = vld [vmem:[%s3102_s3 + $0x1d0] ss:$8 sps:$4 sm:$0xff]   ;;  %v333_v57 = vadd.f32 %v2182_v59, %v183_v47  ;;  %v331_v60 = vadd.f32 %v2201_v2, %v181_v48  ;;  %v49_v47 = vld [vmem:[%s3103_s0 + $0xe8] sm:$0xff] }
  0x24   :  { %1234 = vmatpush1.bf16.msra.mxu0 %v1937_v35  ;;  %1042 = vmatprep.subr.bf16.mxu1 %v1938_v36  ;;  %v577_v35 = vpack.c.bf16 %v453_v26, %v449_v25  ;;  %v179_v36 = vmul.f32 %v2180_v58, %v29_v24  ;;  %v191_v26 = vmul.f32 %v2180_v58, %v41_v7 }
  0x25   :  { %1235 = vmatprep.subr.bf16.mxu0 %v1940_v38  ;;  %v35_v38 = vld [vmem:[%s3103_s0 + $0x78] sm:$0xff]  ;;  %v461_v17 = vmax.f32 %v333_v57, 0.0 }
  0x26   :  { %1056 = vmatprep.mubr.bf16.mxu1 %v577_v35  ;;  %v185_v53 = vmul.f32 %v2190_v62, %v35_v38  ;;  %v341_v38 = vadd.f32 %v2182_v59, %v191_v26  ;;  %v51_v57 = vld [vmem:[%s3103_s0 + $0xf8] sm:$0xff] }
  0x27   :  { %1043 = vmatpush1.bf16.msra.mxu1 %v1942_v39  ;;  %v1968_v39 = vld [vmem:[%s3102_s3 + $0xe4] ss:$8 sps:$4 sm:$0xff]   ;;  %v201_v7 = vmul.f32 %v2190_v62, %v51_v57 }
  0x28   :  { %1236 = vmatpush1.bf16.msra.mxu0 %v1943_v40  ;;  %1044 = vmatprep.subr.bf16.mxu1 %v1944_v41  ;;  %v1970_v40 = vld [vmem:[%s3102_s3 + $0x1e4] ss:$8 sps:$4 sm:$0xff]   ;;  %v579_v41 = vpack.c.bf16 %v455_v29, %v451_v27  ;;  %v335_v4 = vadd.f32 %v2201_v2, %v185_v53 }
  0x29   :  { %1237 = vmatprep.subr.bf16.mxu0 %v1946_v43  ;;  %v320_v43 = vadd.f32 %v2213_v10, %v170_v9  ;;  %v351_v26 = vadd.f32 %v2201_v2, %v201_v7 }
  0x2a   :  { %1249 = vmatprep.mubr.bf16.mxu0 %v579_v41  ;;  %v463_v24 = vmax.f32 %v335_v4, 0.0  ;;  %v42_v41 = vld [vmem:[%s3103_s0 + $0xb0] sm:$0xff] }
  0x2b   :  { %1045 = vmatpush1.bf16.msra.mxu1 %v1948_v44  ;;  %v28_v44 = vld [vmem:[%s3103_s0 + $0x40] sm:$0xff]  ;;  %v448_v8 = vmax.f32 %v320_v43, 0.0 }
  0x2c   :  { %1238 = vmatpush1.bf16.msra.mxu0 %v1949_v45  ;;  %1046 = vmatprep.subr.bf16.mxu1 %v1950_v46  ;;  %v324_v45 = vadd.f32 %v2213_v10, %v174_v22  ;;  %v322_v46 = vadd.f32 %v2240_v23, %v172_v28  ;;  %v178_v61 = vmul.f32 %v2203_v3, %v28_v44  ;;  %v459_v22 = vmax.f32 %v331_v60, 0.0 }
  0x2d   :  { %1239 = vmatprep.subr.bf16.mxu0 %v1952_v49  ;;  %v32_v49 = vld [vmem:[%s3103_s0 + $0x60] sm:$0xff]  ;;  %v330_v28 = vadd.f32 %v2240_v23, %v180_v6 }
  0x2e   :  { %v182_v5 = vmul.f32 %v2203_v3, %v32_v49  ;;  %v452_v9 = vmax.f32 %v324_v45, 0.0  ;;  %v450_v11 = vmax.f32 %v322_v46, 0.0  ;;  %v328_v25 = vadd.f32 %v2213_v10, %v178_v61  ;;  %v45_v46 = vld [vmem:[%s3103_s0 + $0xc8] sm:$0xff] }
  0x2f   :  { %1047 = vmatpush1.bf16.msra.mxu1 %v1954_v51  ;;  %v326_v51 = vadd.f32 %v2240_v23, %v176_v30  ;;  %v583_v43 = vpack.c.bf16 %v463_v24, %v459_v22  ;;  %v458_v50 = vmax.f32 %v330_v28, 0.0  ;;  %v469_v61 = vmax.f32 %v341_v38, 0.0  ;;  %v53_v22 = vld [vmem:[%s3103_s0 + $0x108] sm:$0xff] }
  0x30   :  { %1240 = vmatpush1.bf16.msra.mxu0 %v1955_v52  ;;  %1048 = vmatprep.subr.bf16.mxu1 %v1956_v0  ;;  %v329_v52 = vadd.f32 %v2182_v59, %v179_v36  ;;  %v1974_v0 = vld [vmem:[%s3102_s3 + $0xf4] ss:$8 sps:$4 sm:$0xff]   ;;  %v332_v27 = vadd.f32 %v2213_v10, %v182_v5  ;;  %v576_v30 = vpack.c.bf16 %v452_v9, %v448_v8  ;;  %v456_v48 = vmax.f32 %v328_v25, 0.0  ;;  %v44_v8 = vld [vmem:[%s3103_s0 + $0xc0] sm:$0xff]  ;;  %v57_v28 = vld [vmem:[%s3103_s0 + $0x128] sm:$0xff] }
  0x31   :  { %1241 = vmatprep.subr.bf16.mxu0 %v1958_v1  ;;  %v1976_v1 = vld [vmem:[%s3102_s3 + $0x1f4] ss:$8 sps:$4 sm:$0xff]   ;;  %v454_v15 = vmax.f32 %v326_v51, 0.0  ;;  %v337_v36 = vadd.f32 %v2182_v59, %v187_v18  ;;  %v195_v63 = vmul.f32 %v2180_v58, %v45_v46  ;;  %v479_v46 = vmax.f32 %v351_v26, 0.0 }
  0x32   :  { %v457_v16 = vmax.f32 %v329_v52, 0.0  ;;  %v460_v49 = vmax.f32 %v332_v27, 0.0  ;;  %v47_v52 = vld [vmem:[%s3103_s0 + $0xd8] sm:$0xff]  ;;  %v194_v27 = vmul.f32 %v2203_v3, %v44_v8 }
  0x33   :  { %1049 = vmatpush1.bf16.msra.mxu1 %v1960_v13  ;;  %v184_v13 = vmul.f32 %v2218_v12, %v34_v54  ;;  %v465_v60 = vmax.f32 %v337_v36, 0.0  ;;  %v197_v5 = vmul.f32 %v2190_v62, %v47_v52 }
  0x34   :  { %1242 = vmatpush1.bf16.msra.mxu0 %v1961_v14  ;;  %1050 = vmatprep.subr.bf16.mxu1 %v1962_v19  ;;  %v39_v14 = vld [vmem:[%s3103_s0 + $0x98] sm:$0xff]  ;;  %v581_v35 = vpack.c.bf16 %v461_v17, %v457_v16  ;;  %v580_v9 = vpack.c.bf16 %v460_v49, %v456_v48  ;;  %v46_v16 = vld [vmem:[%s3103_s0 + $0xd0] sm:$0xff] }
  0x35   :  { %1243 = vmatprep.subr.bf16.mxu0 %v1964_v20  ;;  %v43_v19 = vld [vmem:[%s3103_s0 + $0xb8] sm:$0xff]  ;;  %v189_v29 = vmul.f32 %v2190_v62, %v39_v14  ;;  %v334_v31 = vadd.f32 %v2240_v23, %v184_v13  ;;  %v50_v17 = vld [vmem:[%s3103_s0 + $0xf0] sm:$0xff]  ;;  %v347_v25 = vadd.f32 %v2201_v2, %v197_v5 }
  0x36   :  { %v1978_v20 = vld [vmem:[%s3102_s3 + $0xf0] ss:$8 sps:$4 sm:$0xff]   ;;  %v193_v32 = vmul.f32 %v2190_v62, %v43_v19  ;;  %v585_v19 = vpack.c.bf16 %v469_v61, %v465_v60  ;;  %v56_v61 = vld [vmem:[%s3103_s0 + $0x120] sm:$0xff] }
  0x37   :  { %1051 = vmatpush1.bf16.msra.mxu1 %v1966_v33  ;;  %v36_v33 = vld [vmem:[%s3103_s0 + $0x80] sm:$0xff]  ;;  %v339_v44 = vadd.f32 %v2201_v2, %v189_v29  ;;  %v462_v53 = vmax.f32 %v334_v31, 0.0  ;;  %v55_v29 = vld [vmem:[%s3103_s0 + $0x118] sm:$0xff] }
  0x38   :  { %1244 = vmatpush1.bf16.msra.mxu0 %v1967_v34  ;;  %1052 = vmatprep.subr.bf16.mxu1 %v1968_v39  ;;  %v578_v34 = vpack.c.bf16 %v454_v15, %v450_v11  ;;  %v40_v39 = vld [vmem:[%s3103_s0 + $0xa0] sm:$0xff]  ;;  %v343_v45 = vadd.f32 %v2201_v2, %v193_v32  ;;  %v186_v51 = vmul.f32 %v2203_v3, %v36_v33 }
  0x39   :  { %1245 = vmatprep.subr.bf16.mxu0 %v1970_v40  ;;  %v38_v40 = vld [vmem:[%s3103_s0 + $0x90] sm:$0xff]  ;;  %v190_v54 = vmul.f32 %v2203_v3, %v40_v39  ;;  %v48_v15 = vld [vmem:[%s3103_s0 + $0xe0] sm:$0xff]  ;;  %v582_v18 = vpack.c.bf16 %v462_v53, %v458_v50  ;;  %v196_v32 = vmul.f32 %v2218_v12, %v46_v16  ;;  %v200_v33 = vmul.f32 %v2218_v12, %v50_v17 }
  0x3a   :  { %v471_v4 = vmax.f32 %v343_v45, 0.0  ;;  %v336_v6 = vadd.f32 %v2213_v10, %v186_v51  ;;  %v198_v31 = vmul.f32 %v2203_v3, %v48_v15  ;;  %v203_v39 = vmul.f32 %v2180_v58, %v53_v22  ;;  %v67_v15 = vld [vmem:[%s3103_s0 + $0x178] sm:$0xff] }
  0x3b   :  { %1053 = vmatpush1.bf16.msra.mxu1 %v1972_v55  ;;  %v188_v55 = vmul.f32 %v2218_v12, %v38_v40  ;;  %v340_v11 = vadd.f32 %v2213_v10, %v190_v54  ;;  %v475_v45 = vmax.f32 %v347_v25, 0.0  ;;  %v346_v50 = vadd.f32 %v2240_v23, %v196_v32  ;;  %v52_v54 = vld [vmem:[%s3103_s0 + $0x100] sm:$0xff] }
  0x3c   :  { %1246 = vmatpush1.bf16.msra.mxu0 %v1973_v56  ;;  %1054 = vmatprep.subr.bf16.mxu1 %v1974_v0  ;;  %v192_v56 = vmul.f32 %v2218_v12, %v42_v41  ;;  %v199_v0 = vmul.f32 %v2180_v58, %v49_v47  ;;  %v344_v47 = vadd.f32 %v2213_v10, %v194_v27 }
  0x3d   :  { %1247 = vmatprep.subr.bf16.mxu0 %v1976_v1  ;;  %v467_v1 = vmax.f32 %v339_v44, 0.0  ;;  %v338_v13 = vadd.f32 %v2240_v23, %v188_v55  ;;  %v205_v44 = vmul.f32 %v2190_v62, %v55_v29  ;;  %v348_v49 = vadd.f32 %v2213_v10, %v198_v31  ;;  %v60_v29 = vld [vmem:[%s3103_s0 + $0x140] sm:$0xff] }
  0x3e   :  { %v342_v14 = vadd.f32 %v2240_v23, %v192_v56  ;;  %v350_v51 = vadd.f32 %v2240_v23, %v200_v33  ;;  %v353_v53 = vadd.f32 %v2182_v59, %v203_v39  ;;  %v472_v5 = vmax.f32 %v344_v47, 0.0 }
  0x3f   :  { %1055 = vmatpush1.bf16.msra.mxu1 %v1978_v20  ;;  %v345_v20 = vadd.f32 %v2182_v59, %v195_v63  ;;  %v587_v24 = vpack.c.bf16 %v471_v4, %v467_v1  ;;  %v466_v36 = vmax.f32 %v338_v13, 0.0  ;;  %v355_v57 = vadd.f32 %v2201_v2, %v205_v44  ;;  %v54_v63 = vld [vmem:[%s3103_s0 + $0x110] sm:$0xff]  ;;  %v65_v13 = vld [vmem:[%s3103_s0 + $0x168] sm:$0xff] }
  0x40   :  { %1248 = vmatpush1.bf16.msra.mxu0 %v1979_v21  ;;  %v349_v21 = vadd.f32 %v2182_v59, %v199_v0  ;;  %v470_v38 = vmax.f32 %v342_v14, 0.0  ;;  %v58_v0 = vld [vmem:[%s3103_s0 + $0x130] sm:$0xff]  ;;  %v591_v4 = vpack.c.bf16 %v479_v46, %v475_v45  ;;  %v476_v7 = vmax.f32 %v348_v49, 0.0  ;;  %v63_v14 = vld [vmem:[%s3103_s0 + $0x158] sm:$0xff] }
  0x41   :  { %v473_v40 = vmax.f32 %v345_v20, 0.0  ;;  %v474_v8 = vmax.f32 %v346_v50, 0.0  ;;  %v481_v16 = vmax.f32 %v353_v53, 0.0  ;;  %v206_v17 = vmul.f32 %v2203_v3, %v56_v61  ;;  %v71_v49 = vld [vmem:[%s3103_s0 + $0x198] sm:$0xff] }
  0x42   :  { %1057 = vmatmul.mubr.bf16.vlgmr.msra.gmra.mrb[0].mxu1 %v576_v30  ;;  %v464_v30 = vmax.f32 %v336_v6, 0.0  ;;  %v477_v41 = vmax.f32 %v349_v21, 0.0  ;;  %v586_v55 = vpack.c.bf16 %v470_v38, %v466_v36  ;;  %v61_v6 = vld [vmem:[%s3103_s0 + $0x148] sm:$0xff]  ;;  %v483_v21 = vmax.f32 %v355_v57, 0.0  ;;  %v66_v36 = vld [vmem:[%s3103_s0 + $0x170] sm:$0xff]  ;;  %v75_v50 = vld [vmem:[%s3103_s0 + $0x1b8] sm:$0xff] }
  0x43   :  { %1250 = vmatmul.mubr.bf16.vlgmr.msra.gmra.mrb[0].mxu0 %v578_v34  ;;  %1066 = vmatprep.mubr.bf16.mxu1 %v581_v35  ;;  %v59_v34 = vld [vmem:[%s3103_s0 + $0x138] sm:$0xff]  ;;  %v468_v35 = vmax.f32 %v340_v11, 0.0  ;;  %v202_v11 = vmul.f32 %v2203_v3, %v52_v54  ;;  %v215_v25 = vmul.f32 %v2180_v58, %v65_v13  ;;  %v213_v26 = vmul.f32 %v2190_v62, %v63_v14 }
  0x44   :  { %1259 = vmatprep.mubr.bf16.mxu0 %v583_v43  ;;  %v207_v43 = vmul.f32 %v2180_v58, %v57_v28  ;;  %v209_v48 = vmul.f32 %v2190_v62, %v59_v34  ;;  %v589_v1 = vpack.c.bf16 %v477_v41, %v473_v40  ;;  %v217_v27 = vmul.f32 %v2190_v62, %v67_v15  ;;  %v64_v34 = vld [vmem:[%s3103_s0 + $0x160] sm:$0xff] }
  0x45   :  { %v584_v52 = vpack.c.bf16 %v468_v35, %v464_v30  ;;  %v352_v28 = vadd.f32 %v2213_v10, %v202_v11  ;;  %v588_v30 = vpack.c.bf16 %v476_v7, %v472_v5  ;;  %v356_v31 = vadd.f32 %v2213_v10, %v206_v17  ;;  %v62_v35 = vld [vmem:[%s3103_s0 + $0x150] sm:$0xff]  ;;  %v68_v15 = vld [vmem:[%s3103_s0 + $0x180] sm:$0xff] }
  0x46   :  { %v357_v56 = vadd.f32 %v2182_v59, %v207_v43  ;;  %v359_v60 = vadd.f32 %v2201_v2, %v209_v48  ;;  %v69_v43 = vld [vmem:[%s3103_s0 + $0x188] sm:$0xff]  ;;  %v365_v44 = vadd.f32 %v2182_v59, %v215_v25  ;;  %v363_v45 = vadd.f32 %v2201_v2, %v213_v26 }
  0x47   :  { %v367_v46 = vadd.f32 %v2201_v2, %v217_v27  ;;  %v210_v47 = vmul.f32 %v2203_v3, %v60_v29  ;;  %v73_v48 = vld [vmem:[%s3103_s0 + $0x1a8] sm:$0xff]  ;;  %v212_v53 = vmul.f32 %v2218_v12, %v62_v35  ;;  %v216_v54 = vmul.f32 %v2218_v12, %v66_v36 }
  0x48   :  { %v485_v20 = vmax.f32 %v357_v56, 0.0  ;;  %v487_v22 = vmax.f32 %v359_v60, 0.0  ;;  %v219_v60 = vmul.f32 %v2180_v58, %v69_v43  ;;  %v491_v5 = vmax.f32 %v363_v45, 0.0  ;;  %v77_v27 = vld [vmem:[%s3103_s0 + $0x1c8] sm:$0xff] }
  0x49   :  { %v360_v7 = vadd.f32 %v2213_v10, %v210_v47  ;;  %v366_v11 = vadd.f32 %v2240_v23, %v216_v54  ;;  %v80_v54 = vld [vmem:[%s3103_s0 + $0x1e0] sm:$0xff] }
  0x4a   :  { %1067 = vmatmul.mubr.bf16.gmra.mrb[4].mxu1 %v580_v9  ;;  %v478_v9 = vmax.f32 %v350_v51, 0.0  ;;  %v593_v39 = vpack.c.bf16 %v485_v20, %v481_v16  ;;  %v595_v40 = vpack.c.bf16 %v487_v22, %v483_v21  ;;  %v480_v51 = vmax.f32 %v352_v28, 0.0  ;;  %v72_v20 = vld [vmem:[%s3103_s0 + $0x1a0] sm:$0xff]  ;;  %v70_v21 = vld [vmem:[%s3103_s0 + $0x190] sm:$0xff] }
  0x4b   :  { %1260 = vmatmul.mubr.bf16.gmra.mrb[4].mxu0 %v582_v18  ;;  %1076 = vmatprep.mubr.bf16.mxu1 %v585_v19  ;;  %v204_v18 = vmul.f32 %v2218_v12, %v54_v63  ;;  %v208_v19 = vmul.f32 %v2218_v12, %v58_v0  ;;  %v223_v63 = vmul.f32 %v2180_v58, %v73_v48  ;;  %v74_v22 = vld [vmem:[%s3103_s0 + $0x1b0] sm:$0xff]  ;;  %v488_v26 = vmax.f32 %v360_v7, 0.0  ;;  %v89_v7 = vld [vmem:[%s3103_s0 + $0x228] sm:$0xff] }
  0x4c   :  { %1269 = vmatprep.mubr.bf16.mxu0 %v587_v24  ;;  %v211_v24 = vmul.f32 %v2180_v58, %v61_v6  ;;  %v590_v38 = vpack.c.bf16 %v478_v9, %v474_v8  ;;  %v221_v0 = vmul.f32 %v2190_v62, %v71_v49  ;;  %v495_v6 = vmax.f32 %v367_v46, 0.0  ;;  %v76_v49 = vld [vmem:[%s3103_s0 + $0x1c0] sm:$0xff] }
  0x4d   :  { %v354_v32 = vadd.f32 %v2240_v23, %v204_v18  ;;  %v358_v33 = vadd.f32 %v2240_v23, %v208_v19  ;;  %v362_v9 = vadd.f32 %v2240_v23, %v212_v53  ;;  %v369_v14 = vadd.f32 %v2182_v59, %v219_v60 }
  0x4e   :  { %v361_v41 = vadd.f32 %v2182_v59, %v211_v24  ;;  %v373_v17 = vadd.f32 %v2182_v59, %v223_v63  ;;  %v371_v18 = vadd.f32 %v2201_v2, %v221_v0  ;;  %v599_v25 = vpack.c.bf16 %v495_v6, %v491_v5  ;;  %v85_v0 = vld [vmem:[%s3103_s0 + $0x208] sm:$0xff] }
  0x4f   :  { %v482_v56 = vmax.f32 %v354_v32, 0.0  ;;  %v486_v57 = vmax.f32 %v358_v33, 0.0  ;;  %v490_v29 = vmax.f32 %v362_v9, 0.0  ;;  %v81_v32 = vld [vmem:[%s3103_s0 + $0x1e8] sm:$0xff]  ;;  %v79_v33 = vld [vmem:[%s3103_s0 + $0x1d8] sm:$0xff]  ;;  %v497_v35 = vmax.f32 %v369_v14, 0.0 }
  0x50   :  { %v489_v61 = vmax.f32 %v361_v41, 0.0  ;;  %v222_v36 = vmul.f32 %v2203_v3, %v72_v20  ;;  %v499_v41 = vmax.f32 %v371_v18, 0.0  ;;  %v231_v45 = vmul.f32 %v2180_v58, %v81_v32  ;;  %v91_v9 = vld [vmem:[%s3103_s0 + $0x238] sm:$0xff] }
  0x51   :  { %v594_v16 = vpack.c.bf16 %v486_v57, %v482_v56  ;;  %v229_v46 = vmul.f32 %v2190_v62, %v79_v33  ;;  %v82_v56 = vld [vmem:[%s3103_s0 + $0x1f0] sm:$0xff]  ;;  %v226_v6 = vmul.f32 %v2203_v3, %v76_v49 }
  0x52   :  { %1077 = vmatmul.mubr.bf16.gmra.mrb[8].mxu1 %v584_v52  ;;  %v214_v52 = vmul.f32 %v2203_v3, %v64_v34  ;;  %v83_v34 = vld [vmem:[%s3103_s0 + $0x1f8] sm:$0xff] }
  0x53   :  { %1270 = vmatmul.mubr.bf16.gmra.mrb[8].mxu0 %v586_v55  ;;  %1086 = vmatprep.mubr.bf16.mxu1 %v589_v1  ;;  %v484_v55 = vmax.f32 %v356_v31, 0.0  ;;  %v225_v1 = vmul.f32 %v2190_v62, %v75_v50  ;;  %v218_v31 = vmul.f32 %v2203_v3, %v68_v15  ;;  %v233_v47 = vmul.f32 %v2190_v62, %v83_v34  ;;  %v84_v34 = vld [vmem:[%s3103_s0 + $0x200] sm:$0xff] }
  0x54   :  { %1279 = vmatprep.mubr.bf16.mxu0 %v591_v4  ;;  %v493_v4 = vmax.f32 %v365_v44, 0.0  ;;  %v364_v8 = vadd.f32 %v2213_v10, %v214_v52  ;;  %v227_v44 = vmul.f32 %v2180_v58, %v77_v27  ;;  %v232_v15 = vmul.f32 %v2218_v12, %v82_v56 }
  0x55   :  { %v592_v13 = vpack.c.bf16 %v484_v55, %v480_v51  ;;  %v375_v19 = vadd.f32 %v2201_v2, %v225_v1  ;;  %v368_v48 = vadd.f32 %v2213_v10, %v218_v31  ;;  %v372_v51 = vadd.f32 %v2213_v10, %v222_v36  ;;  %v78_v55 = vld [vmem:[%s3103_s0 + $0x1d0] sm:$0xff] }
  0x56   :  { %v597_v24 = vpack.c.bf16 %v493_v4, %v489_v61  ;;  %v492_v28 = vmax.f32 %v364_v8, 0.0  ;;  %v377_v63 = vadd.f32 %v2182_v59, %v227_v44  ;;  %v381_v1 = vadd.f32 %v2182_v59, %v231_v45  ;;  %v87_v8 = vld [vmem:[%s3103_s0 + $0x218] sm:$0xff] }
  0x57   :  { %v503_v43 = vmax.f32 %v375_v19, 0.0  ;;  %v379_v4 = vadd.f32 %v2201_v2, %v229_v46  ;;  %v383_v5 = vadd.f32 %v2201_v2, %v233_v47  ;;  %v228_v14 = vmul.f32 %v2218_v12, %v78_v55  ;;  %v93_v47 = vld [vmem:[%s3103_s0 + $0x248] sm:$0xff] }
  0x58   :  { %v596_v50 = vpack.c.bf16 %v492_v28, %v488_v26  ;;  %v235_v19 = vmul.f32 %v2180_v58, %v85_v0  ;;  %v505_v20 = vmax.f32 %v377_v63, 0.0  ;;  %v376_v28 = vadd.f32 %v2213_v10, %v226_v6 }
  0x59   :  { %v603_v61 = vpack.c.bf16 %v503_v43, %v499_v41  ;;  %v507_v26 = vmax.f32 %v379_v4, 0.0  ;;  %v511_v27 = vmax.f32 %v383_v5, 0.0  ;;  %v382_v31 = vadd.f32 %v2240_v23, %v232_v15  ;;  %v86_v41 = vld [vmem:[%s3103_s0 + $0x210] sm:$0xff]  ;;  %v96_v15 = vld [vmem:[%s3103_s0 + $0x260] sm:$0xff] }
  0x5a   :  { %1087 = vmatmul.mubr.bf16.gmra.mrb[12].mxu1 %v588_v30  ;;  %v494_v30 = vmax.f32 %v366_v11, 0.0  ;;  %v496_v11 = vmax.f32 %v368_v48, 0.0  ;;  %v385_v33 = vadd.f32 %v2182_v59, %v235_v19  ;;  %v90_v43 = vld [vmem:[%s3103_s0 + $0x230] sm:$0xff]  ;;  %v504_v46 = vmax.f32 %v376_v28, 0.0  ;;  %v105_v28 = vld [vmem:[%s3103_s0 + $0x2a8] sm:$0xff] }
  0x5b   :  { %1280 = vmatmul.mubr.bf16.gmra.mrb[12].mxu0 %v590_v38  ;;  %1096 = vmatprep.mubr.bf16.mxu1 %v593_v39  ;;  %v220_v38 = vmul.f32 %v2218_v12, %v70_v21  ;;  %v224_v39 = vmul.f32 %v2218_v12, %v74_v22  ;;  %v239_v21 = vmul.f32 %v2180_v58, %v89_v7 }
  0x5c   :  { %1289 = vmatprep.mubr.bf16.mxu0 %v595_v40  ;;  %v501_v40 = vmax.f32 %v373_v17, 0.0  ;;  %v598_v57 = vpack.c.bf16 %v494_v30, %v490_v29  ;;  %v237_v22 = vmul.f32 %v2190_v62, %v87_v8  ;;  %v378_v30 = vadd.f32 %v2240_v23, %v228_v14  ;;  %v92_v8 = vld [vmem:[%s3103_s0 + $0x240] sm:$0xff] }
  0x5d   :  { %v370_v52 = vadd.f32 %v2240_v23, %v220_v38  ;;  %v374_v53 = vadd.f32 %v2240_v23, %v224_v39  ;;  %v389_v36 = vadd.f32 %v2182_v59, %v239_v21  ;;  %v607_v45 = vpack.c.bf16 %v511_v27, %v507_v26 }
  0x5e   :  { %v601_v60 = vpack.c.bf16 %v501_v40, %v497_v35  ;;  %v387_v38 = vadd.f32 %v2201_v2, %v237_v22  ;;  %v88_v40 = vld [vmem:[%s3103_s0 + $0x220] sm:$0xff]  ;;  %v506_v49 = vmax.f32 %v378_v30, 0.0  ;;  %v513_v55 = vmax.f32 %v385_v33, 0.0  ;;  %v101_v22 = vld [vmem:[%s3103_s0 + $0x288] sm:$0xff]  ;;  %v107_v30 = vld [vmem:[%s3103_s0 + $0x2b8] sm:$0xff] }
  0x5f   :  { %v498_v17 = vmax.f32 %v370_v52, 0.0  ;;  %v502_v18 = vmax.f32 %v374_v53, 0.0  ;;  %v97_v52 = vld [vmem:[%s3103_s0 + $0x268] sm:$0xff]  ;;  %v95_v53 = vld [vmem:[%s3103_s0 + $0x258] sm:$0xff]  ;;  %v238_v56 = vmul.f32 %v2203_v3, %v88_v40  ;;  %v242_v27 = vmul.f32 %v2203_v3, %v92_v8 }
  0x60   :  { %v515_v63 = vmax.f32 %v387_v38, 0.0  ;;  %v247_v4 = vmul.f32 %v2180_v58, %v97_v52  ;;  %v245_v5 = vmul.f32 %v2190_v62, %v95_v53 }
  0x61   :  { %v602_v35 = vpack.c.bf16 %v502_v18, %v498_v17  ;;  %v98_v17 = vld [vmem:[%s3103_s0 + $0x270] sm:$0xff] }
  0x62   :  { %1097 = vmatmul.mubr.bf16.gmra.mrb[16].mxu1 %v592_v13  ;;  %v230_v13 = vmul.f32 %v2203_v3, %v80_v54  ;;  %v99_v54 = vld [vmem:[%s3103_s0 + $0x278] sm:$0xff] }
  0x63   :  { %1290 = vmatmul.mubr.bf16.gmra.mrb[16].mxu0 %v594_v16  ;;  %1106 = vmatprep.mubr.bf16.mxu1 %v597_v24  ;;  %v500_v16 = vmax.f32 %v372_v51, 0.0  ;;  %v241_v24 = vmul.f32 %v2190_v62, %v91_v9  ;;  %v234_v51 = vmul.f32 %v2203_v3, %v84_v34  ;;  %v249_v6 = vmul.f32 %v2190_v62, %v99_v54  ;;  %v100_v54 = vld [vmem:[%s3103_s0 + $0x280] sm:$0xff] }
  0x64   :  { %1299 = vmatprep.mubr.bf16.mxu0 %v599_v25  ;;  %v509_v25 = vmax.f32 %v381_v1, 0.0  ;;  %v380_v29 = vadd.f32 %v2213_v10, %v230_v13  ;;  %v243_v1 = vmul.f32 %v2180_v58, %v93_v47  ;;  %v248_v34 = vmul.f32 %v2218_v12, %v98_v17 }
  0x65   :  { %v600_v32 = vpack.c.bf16 %v500_v16, %v496_v11  ;;  %v391_v39 = vadd.f32 %v2201_v2, %v241_v24  ;;  %v384_v7 = vadd.f32 %v2213_v10, %v234_v51  ;;  %v388_v11 = vadd.f32 %v2213_v10, %v238_v56  ;;  %v94_v16 = vld [vmem:[%s3103_s0 + $0x250] sm:$0xff] }
  0x66   :  { %v605_v44 = vpack.c.bf16 %v509_v25, %v505_v20  ;;  %v508_v48 = vmax.f32 %v380_v29, 0.0  ;;  %v393_v21 = vadd.f32 %v2182_v59, %v243_v1  ;;  %v397_v24 = vadd.f32 %v2182_v59, %v247_v4  ;;  %v103_v29 = vld [vmem:[%s3103_s0 + $0x298] sm:$0xff] }
  0x67   :  { %v519_v0 = vmax.f32 %v391_v39, 0.0  ;;  %v395_v25 = vadd.f32 %v2201_v2, %v245_v5  ;;  %v399_v26 = vadd.f32 %v2201_v2, %v249_v6  ;;  %v244_v33 = vmul.f32 %v2218_v12, %v94_v16  ;;  %v109_v6 = vld [vmem:[%s3103_s0 + $0x2c8] sm:$0xff] }
  0x68   :  { %v604_v9 = vpack.c.bf16 %v508_v48, %v504_v46  ;;  %v251_v39 = vmul.f32 %v2180_v58, %v101_v22  ;;  %v521_v40 = vmax.f32 %v393_v21, 0.0  ;;  %v392_v48 = vadd.f32 %v2213_v10, %v242_v27 }
  0x69   :  { %v611_v20 = vpack.c.bf16 %v519_v0, %v515_v63  ;;  %v523_v46 = vmax.f32 %v395_v25, 0.0  ;;  %v527_v47 = vmax.f32 %v399_v26, 0.0  ;;  %v398_v51 = vadd.f32 %v2240_v23, %v248_v34  ;;  %v102_v63 = vld [vmem:[%s3103_s0 + $0x290] sm:$0xff]  ;;  %v112_v34 = vld [vmem:[%s3103_s0 + $0x2e0] sm:$0xff] }
  0x6a   :  { %1107 = vmatmul.mubr.bf16.gmra.mrb[20].mxu1 %v596_v50  ;;  %v510_v50 = vmax.f32 %v382_v31, 0.0  ;;  %v512_v31 = vmax.f32 %v384_v7, 0.0  ;;  %v401_v53 = vadd.f32 %v2182_v59, %v251_v39  ;;  %v106_v0 = vld [vmem:[%s3103_s0 + $0x2b0] sm:$0xff]  ;;  %v520_v5 = vmax.f32 %v392_v48, 0.0  ;;  %v121_v48 = vld [vmem:[%s3103_s0 + $0x328] sm:$0xff] }
  0x6b   :  { %1300 = vmatmul.mubr.bf16.gmra.mrb[20].mxu0 %v598_v57  ;;  %1116 = vmatprep.mubr.bf16.mxu1 %v601_v60  ;;  %v236_v57 = vmul.f32 %v2218_v12, %v86_v41  ;;  %v240_v60 = vmul.f32 %v2218_v12, %v90_v43  ;;  %v255_v41 = vmul.f32 %v2180_v58, %v105_v28 }
  0x6c   :  { %1309 = vmatprep.mubr.bf16.mxu0 %v603_v61  ;;  %v517_v61 = vmax.f32 %v389_v36, 0.0  ;;  %v606_v18 = vpack.c.bf16 %v510_v50, %v506_v49  ;;  %v253_v43 = vmul.f32 %v2190_v62, %v103_v29  ;;  %v394_v50 = vadd.f32 %v2240_v23, %v244_v33  ;;  %v108_v29 = vld [vmem:[%s3103_s0 + $0x2c0] sm:$0xff] }
  0x6d   :  { %v386_v13 = vadd.f32 %v2240_v23, %v236_v57  ;;  %v390_v14 = vadd.f32 %v2240_v23, %v240_v60  ;;  %v405_v56 = vadd.f32 %v2182_v59, %v255_v41  ;;  %v615_v4 = vpack.c.bf16 %v527_v47, %v523_v46 }
  0x6e   :  { %v609_v19 = vpack.c.bf16 %v517_v61, %v513_v55  ;;  %v403_v57 = vadd.f32 %v2201_v2, %v253_v43  ;;  %v104_v61 = vld [vmem:[%s3103_s0 + $0x2a0] sm:$0xff]  ;;  %v522_v8 = vmax.f32 %v394_v50, 0.0  ;;  %v529_v16 = vmax.f32 %v401_v53, 0.0  ;;  %v117_v43 = vld [vmem:[%s3103_s0 + $0x308] sm:$0xff]  ;;  %v123_v50 = vld [vmem:[%s3103_s0 + $0x338] sm:$0xff] }
  0x6f   :  { %v514_v36 = vmax.f32 %v386_v13, 0.0  ;;  %v518_v38 = vmax.f32 %v390_v14, 0.0  ;;  %v113_v13 = vld [vmem:[%s3103_s0 + $0x2e8] sm:$0xff]  ;;  %v111_v14 = vld [vmem:[%s3103_s0 + $0x2d8] sm:$0xff]  ;;  %v254_v17 = vmul.f32 %v2203_v3, %v104_v61  ;;  %v258_v47 = vmul.f32 %v2203_v3, %v108_v29 }
  0x70   :  { %v531_v21 = vmax.f32 %v403_v57, 0.0  ;;  %v263_v25 = vmul.f32 %v2180_v58, %v113_v13  ;;  %v261_v26 = vmul.f32 %v2190_v62, %v111_v14 }
  0x71   :  { %v610_v55 = vpack.c.bf16 %v518_v38, %v514_v36  ;;  %v114_v36 = vld [vmem:[%s3103_s0 + $0x2f0] sm:$0xff] }
  0x72   :  { %1117 = vmatmul.mubr.bf16.gmra.mrb[24].mxu1 %v600_v32  ;;  %v246_v32 = vmul.f32 %v2203_v3, %v96_v15  ;;  %v115_v15 = vld [vmem:[%s3103_s0 + $0x2f8] sm:$0xff] }
  0x73   :  { %1310 = vmatmul.mubr.bf16.gmra.mrb[24].mxu0 %v602_v35  ;;  %1126 = vmatprep.mubr.bf16.mxu1 %v605_v44  ;;  %v516_v35 = vmax.f32 %v388_v11, 0.0  ;;  %v257_v44 = vmul.f32 %v2190_v62, %v107_v30  ;;  %v250_v11 = vmul.f32 %v2203_v3, %v100_v54  ;;  %v265_v27 = vmul.f32 %v2190_v62, %v115_v15  ;;  %v116_v15 = vld [vmem:[%s3103_s0 + $0x300] sm:$0xff] }
  0x74   :  { %1319 = vmatprep.mubr.bf16.mxu0 %v607_v45  ;;  %v525_v45 = vmax.f32 %v397_v24, 0.0  ;;  %v396_v49 = vadd.f32 %v2213_v10, %v246_v32  ;;  %v259_v24 = vmul.f32 %v2180_v58, %v109_v6  ;;  %v264_v54 = vmul.f32 %v2218_v12, %v114_v36 }
  0x75   :  { %v608_v52 = vpack.c.bf16 %v516_v35, %v512_v31  ;;  %v407_v60 = vadd.f32 %v2201_v2, %v257_v44  ;;  %v400_v28 = vadd.f32 %v2213_v10, %v250_v11  ;;  %v404_v31 = vadd.f32 %v2213_v10, %v254_v17  ;;  %v110_v35 = vld [vmem:[%s3103_s0 + $0x2d0] sm:$0xff] }
  0x76   :  { %v613_v1 = vpack.c.bf16 %v525_v45, %v521_v40  ;;  %v524_v7 = vmax.f32 %v396_v49, 0.0  ;;  %v409_v41 = vadd.f32 %v2182_v59, %v259_v24  ;;  %v413_v44 = vadd.f32 %v2182_v59, %v263_v25  ;;  %v119_v49 = vld [vmem:[%s3103_s0 + $0x318] sm:$0xff] }
  0x77   :  { %v535_v22 = vmax.f32 %v407_v60, 0.0  ;;  %v411_v45 = vadd.f32 %v2201_v2, %v261_v26  ;;  %v415_v46 = vadd.f32 %v2201_v2, %v265_v27  ;;  %v260_v53 = vmul.f32 %v2218_v12, %v110_v35  ;;  %v125_v27 = vld [vmem:[%s3103_s0 + $0x348] sm:$0xff] }
  0x78   :  { %v612_v30 = vpack.c.bf16 %v524_v7, %v520_v5  ;;  %v267_v60 = vmul.f32 %v2180_v58, %v117_v43  ;;  %v537_v61 = vmax.f32 %v409_v41, 0.0  ;;  %v408_v7 = vadd.f32 %v2213_v10, %v258_v47 }
  0x79   :  { %v619_v40 = vpack.c.bf16 %v535_v22, %v531_v21  ;;  %v539_v5 = vmax.f32 %v411_v45, 0.0  ;;  %v543_v6 = vmax.f32 %v415_v46, 0.0  ;;  %v414_v11 = vadd.f32 %v2240_v23, %v264_v54  ;;  %v118_v21 = vld [vmem:[%s3103_s0 + $0x310] sm:$0xff]  ;;  %v128_v54 = vld [vmem:[%s3103_s0 + $0x360] sm:$0xff] }
  0x7a   :  { %1127 = vmatmul.mubr.bf16.gmra.mrb[28].mxu1 %v604_v9  ;;  %v526_v9 = vmax.f32 %v398_v51, 0.0  ;;  %v528_v51 = vmax.f32 %v400_v28, 0.0  ;;  %v417_v14 = vadd.f32 %v2182_v59, %v267_v60  ;;  %v122_v22 = vld [vmem:[%s3103_s0 + $0x330] sm:$0xff]  ;;  %v536_v26 = vmax.f32 %v408_v7, 0.0  ;;  %v137_v7 = vld [vmem:[%s3103_s0 + $0x3a8] sm:$0xff] }
  0x7b   :  { %1320 = vmatmul.mubr.bf16.gmra.mrb[28].mxu0 %v606_v18  ;;  %1136 = vmatprep.mubr.bf16.mxu1 %v609_v19  ;;  %v252_v18 = vmul.f32 %v2218_v12, %v102_v63  ;;  %v256_v19 = vmul.f32 %v2218_v12, %v106_v0  ;;  %v271_v63 = vmul.f32 %v2180_v58, %v121_v48 }
  0x7c   :  { %1329 = vmatprep.mubr.bf16.mxu0 %v611_v20  ;;  %v533_v20 = vmax.f32 %v405_v56, 0.0  ;;  %v614_v38 = vpack.c.bf16 %v526_v9, %v522_v8  ;;  %v269_v0 = vmul.f32 %v2190_v62, %v119_v49  ;;  %v410_v9 = vadd.f32 %v2240_v23, %v260_v53  ;;  %v124_v49 = vld [vmem:[%s3103_s0 + $0x340] sm:$0xff] }
  0x7d   :  { %v402_v32 = vadd.f32 %v2240_v23, %v252_v18  ;;  %v406_v33 = vadd.f32 %v2240_v23, %v256_v19  ;;  %v421_v17 = vadd.f32 %v2182_v59, %v271_v63  ;;  %v623_v25 = vpack.c.bf16 %v543_v6, %v539_v5 }
  0x7e   :  { %v617_v39 = vpack.c.bf16 %v533_v20, %v529_v16  ;;  %v419_v18 = vadd.f32 %v2201_v2, %v269_v0  ;;  %v120_v20 = vld [vmem:[%s3103_s0 + $0x320] sm:$0xff]  ;;  %v538_v29 = vmax.f32 %v410_v9, 0.0  ;;  %v545_v35 = vmax.f32 %v417_v14, 0.0  ;;  %v133_v0 = vld [vmem:[%s3103_s0 + $0x388] sm:$0xff]  ;;  %v139_v9 = vld [vmem:[%s3103_s0 + $0x3b8] sm:$0xff] }
  0x7f   :  { %v530_v56 = vmax.f32 %v402_v32, 0.0  ;;  %v534_v57 = vmax.f32 %v406_v33, 0.0  ;;  %v129_v32 = vld [vmem:[%s3103_s0 + $0x368] sm:$0xff]  ;;  %v127_v33 = vld [vmem:[%s3103_s0 + $0x358] sm:$0xff]  ;;  %v270_v36 = vmul.f32 %v2203_v3, %v120_v20  ;;  %v274_v6 = vmul.f32 %v2203_v3, %v124_v49 }
  0x80   :  { %v547_v41 = vmax.f32 %v419_v18, 0.0  ;;  %v279_v45 = vmul.f32 %v2180_v58, %v129_v32  ;;  %v277_v46 = vmul.f32 %v2190_v62, %v127_v33 }
  0x81   :  { %v618_v16 = vpack.c.bf16 %v534_v57, %v530_v56  ;;  %v130_v56 = vld [vmem:[%s3103_s0 + $0x370] sm:$0xff] }
  0x82   :  { %1137 = vmatmul.mubr.bf16.gmra.mrb[32].mxu1 %v608_v52  ;;  %v262_v52 = vmul.f32 %v2203_v3, %v112_v34  ;;  %v131_v34 = vld [vmem:[%s3103_s0 + $0x378] sm:$0xff] }
  0x83   :  { %1330 = vmatmul.mubr.bf16.gmra.mrb[32].mxu0 %v610_v55  ;;  %1146 = vmatprep.mubr.bf16.mxu1 %v613_v1  ;;  %v532_v55 = vmax.f32 %v404_v31, 0.0  ;;  %v273_v1 = vmul.f32 %v2190_v62, %v123_v50  ;;  %v266_v31 = vmul.f32 %v2203_v3, %v116_v15  ;;  %v281_v47 = vmul.f32 %v2190_v62, %v131_v34  ;;  %v132_v34 = vld [vmem:[%s3103_s0 + $0x380] sm:$0xff] }
  0x84   :  { %1339 = vmatprep.mubr.bf16.mxu0 %v615_v4  ;;  %v541_v4 = vmax.f32 %v413_v44, 0.0  ;;  %v412_v8 = vadd.f32 %v2213_v10, %v262_v52  ;;  %v275_v44 = vmul.f32 %v2180_v58, %v125_v27  ;;  %v280_v15 = vmul.f32 %v2218_v12, %v130_v56 }
  0x85   :  { %v616_v13 = vpack.c.bf16 %v532_v55, %v528_v51  ;;  %v423_v19 = vadd.f32 %v2201_v2, %v273_v1  ;;  %v416_v48 = vadd.f32 %v2213_v10, %v266_v31  ;;  %v420_v51 = vadd.f32 %v2213_v10, %v270_v36  ;;  %v126_v55 = vld [vmem:[%s3103_s0 + $0x350] sm:$0xff] }
  0x86   :  { %v621_v24 = vpack.c.bf16 %v541_v4, %v537_v61  ;;  %v540_v28 = vmax.f32 %v412_v8, 0.0  ;;  %v425_v63 = vadd.f32 %v2182_v59, %v275_v44  ;;  %v429_v1 = vadd.f32 %v2182_v59, %v279_v45  ;;  %v135_v8 = vld [vmem:[%s3103_s0 + $0x398] sm:$0xff] }
  0x87   :  { %v551_v43 = vmax.f32 %v423_v19, 0.0  ;;  %v427_v4 = vadd.f32 %v2201_v2, %v277_v46  ;;  %v431_v5 = vadd.f32 %v2201_v2, %v281_v47  ;;  %v276_v14 = vmul.f32 %v2218_v12, %v126_v55  ;;  %v141_v47 = vld [vmem:[%s3103_s0 + $0x3c8] sm:$0xff] }
  0x88   :  { %v620_v50 = vpack.c.bf16 %v540_v28, %v536_v26  ;;  %v283_v19 = vmul.f32 %v2180_v58, %v133_v0  ;;  %v553_v20 = vmax.f32 %v425_v63, 0.0  ;;  %v424_v28 = vadd.f32 %v2213_v10, %v274_v6 }
  0x89   :  { %v627_v61 = vpack.c.bf16 %v551_v43, %v547_v41  ;;  %v555_v26 = vmax.f32 %v427_v4, 0.0  ;;  %v559_v27 = vmax.f32 %v431_v5, 0.0  ;;  %v430_v31 = vadd.f32 %v2240_v23, %v280_v15  ;;  %v134_v41 = vld [vmem:[%s3103_s0 + $0x390] sm:$0xff] }
  0x8a   :  { %1147 = vmatmul.mubr.bf16.gmra.mrb[36].mxu1 %v612_v30  ;;  %v542_v30 = vmax.f32 %v414_v11, 0.0  ;;  %v544_v11 = vmax.f32 %v416_v48, 0.0  ;;  %v433_v33 = vadd.f32 %v2182_v59, %v283_v19  ;;  %v138_v43 = vld [vmem:[%s3103_s0 + $0x3b0] sm:$0xff]  ;;  %v552_v46 = vmax.f32 %v424_v28, 0.0 }
  0x8b   :  { %1340 = vmatmul.mubr.bf16.gmra.mrb[36].mxu0 %v614_v38  ;;  %1156 = vmatprep.mubr.bf16.mxu1 %v617_v39  ;;  %v268_v38 = vmul.f32 %v2218_v12, %v118_v21  ;;  %v272_v39 = vmul.f32 %v2218_v12, %v122_v22  ;;  %v287_v21 = vmul.f32 %v2180_v58, %v137_v7 }
  0x8c   :  { %1349 = vmatprep.mubr.bf16.mxu0 %v619_v40  ;;  %v549_v40 = vmax.f32 %v421_v17, 0.0  ;;  %v622_v57 = vpack.c.bf16 %v542_v30, %v538_v29  ;;  %v285_v22 = vmul.f32 %v2190_v62, %v135_v8  ;;  %v426_v30 = vadd.f32 %v2240_v23, %v276_v14 }
  0x8d   :  { %v418_v52 = vadd.f32 %v2240_v23, %v268_v38  ;;  %v422_v53 = vadd.f32 %v2240_v23, %v272_v39  ;;  %v437_v36 = vadd.f32 %v2182_v59, %v287_v21  ;;  %v631_v45 = vpack.c.bf16 %v559_v27, %v555_v26  ;;  %v142_v21 = vld [vmem:[%s3103_s0 + $0x3d0] sm:$0xff] }
  0x8e   :  { %v625_v60 = vpack.c.bf16 %v549_v40, %v545_v35  ;;  %v435_v38 = vadd.f32 %v2201_v2, %v285_v22  ;;  %v136_v40 = vld [vmem:[%s3103_s0 + $0x3a0] sm:$0xff]  ;;  %v554_v49 = vmax.f32 %v426_v30, 0.0  ;;  %v561_v55 = vmax.f32 %v433_v33, 0.0  ;;  %v146_v22 = vld [vmem:[%s3103_s0 + $0x3f0] sm:$0xff] }
  0x8f   :  { %v546_v17 = vmax.f32 %v418_v52, 0.0  ;;  %v550_v18 = vmax.f32 %v422_v53, 0.0  ;;  %v145_v52 = vld [vmem:[%s3103_s0 + $0x3e8] sm:$0xff]  ;;  %v143_v53 = vld [vmem:[%s3103_s0 + $0x3d8] sm:$0xff]  ;;  %v286_v56 = vmul.f32 %v2203_v3, %v136_v40  ;;  %v292_v28 = vmul.f32 %v2218_v12, %v142_v21 }
  0x90   :  { %v563_v63 = vmax.f32 %v435_v38, 0.0  ;;  %v295_v4 = vmul.f32 %v2180_v58, %v145_v52  ;;  %v293_v5 = vmul.f32 %v2190_v62, %v143_v53 }
  0x91   :  { %v626_v35 = vpack.c.bf16 %v550_v18, %v546_v17  ;;  %v436_v8 = vadd.f32 %v2213_v10, %v286_v56 }
  0x92   :  { %1157 = vmatmul.mubr.bf16.gmra.mrb[40].mxu1 %v616_v13  ;;  %v278_v13 = vmul.f32 %v2203_v3, %v128_v54  ;;  %v147_v54 = vld [vmem:[%s3103_s0 + $0x3f8] sm:$0xff]  ;;  %v443_v18 = vadd.f32 %v2201_v2, %v293_v5 }
  0x93   :  { %1350 = vmatmul.mubr.bf16.gmra.mrb[40].mxu0 %v618_v16  ;;  %1166 = vmatprep.mubr.bf16.mxu1 %v621_v24  ;;  %v548_v16 = vmax.f32 %v420_v51, 0.0  ;;  %v289_v24 = vmul.f32 %v2190_v62, %v139_v9  ;;  %v282_v51 = vmul.f32 %v2203_v3, %v132_v34  ;;  %v297_v6 = vmul.f32 %v2190_v62, %v147_v54 }
  0x94   :  { %1359 = vmatprep.mubr.bf16.mxu0 %v623_v25  ;;  %v557_v25 = vmax.f32 %v429_v1, 0.0  ;;  %v428_v29 = vadd.f32 %v2213_v10, %v278_v13  ;;  %v291_v1 = vmul.f32 %v2180_v58, %v141_v47  ;;  %v140_v58 = vld [vmem:[%s3103_s0 + $0x3c0] sm:$0xff]  ;;  %v445_v62 = vadd.f32 %v2182_v59, %v295_v4 }
  0x95   :  { %v624_v32 = vpack.c.bf16 %v548_v16, %v544_v11  ;;  %v439_v39 = vadd.f32 %v2201_v2, %v289_v24  ;;  %v432_v7 = vadd.f32 %v2213_v10, %v282_v51  ;;  %v447_v19 = vadd.f32 %v2201_v2, %v297_v6 }
  0x96   :  { %v629_v44 = vpack.c.bf16 %v557_v25, %v553_v20  ;;  %v556_v48 = vmax.f32 %v428_v29, 0.0  ;;  %v441_v17 = vadd.f32 %v2182_v59, %v291_v1  ;;  %v144_v20 = vld [vmem:[%s3103_s0 + $0x3e0] sm:$0xff]  ;;  %v564_v25 = vmax.f32 %v436_v8, 0.0 }
  0x97   :  { %v567_v0 = vmax.f32 %v439_v39, 0.0  ;;  %v560_v24 = vmax.f32 %v432_v7, 0.0  ;;  %v290_v27 = vmul.f32 %v2203_v3, %v140_v58  ;;  %v294_v2 = vmul.f32 %v2203_v3, %v144_v20 }
  0x98   :  { %v628_v13 = vpack.c.bf16 %v556_v48, %v552_v46  ;;  %v296_v29 = vmul.f32 %v2218_v12, %v146_v22  ;;  %v569_v30 = vmax.f32 %v441_v17, 0.0  ;;  %v575_v33 = vmax.f32 %v447_v19, 0.0 }
  0x99   :  { %v635_v16 = vpack.c.bf16 %v567_v0, %v563_v63  ;;  %v632_v34 = vpack.c.bf16 %v564_v25, %v560_v24  ;;  %v444_v38 = vadd.f32 %v2213_v10, %v294_v2  ;;  %v442_v39 = vadd.f32 %v2240_v23, %v292_v28 }
  0x9a   :  { %1167 = vmatmul.mubr.bf16.gmra.mrb[44].mxu1 %v620_v50  ;;  %v558_v50 = vmax.f32 %v430_v31, 0.0  ;;  %v573_v31 = vmax.f32 %v445_v62, 0.0  ;;  %v446_v3 = vadd.f32 %v2240_v23, %v296_v29  ;;  %v1980_v17 = vmov 0.0  }
  0x9b   :  { %1360 = vmatmul.mubr.bf16.gmra.mrb[44].mxu0 %v622_v57  ;;  %1176 = vmatprep.mubr.bf16.mxu1 %v625_v60  ;;  %v284_v57 = vmul.f32 %v2218_v12, %v134_v41  ;;  %v288_v60 = vmul.f32 %v2218_v12, %v138_v43  ;;  %v572_v43 = vmax.f32 %v444_v38, 0.0  ;;  %1482 = vst.msk [vmem:[%s3107_s5] sm:$0x3] %vm2891_vm0, %v1980_v17  ;;  %1483 = vst.msk [vmem:[%s3108_s6] sm:$0x3] %vm2891_vm0, %v1980_v17 }
  0x9c   :  { %1369 = vmatprep.mubr.bf16.mxu0 %v627_v61  ;;  %v565_v61 = vmax.f32 %v437_v36, 0.0  ;;  %v630_v14 = vpack.c.bf16 %v558_v50, %v554_v49  ;;  %v440_v36 = vadd.f32 %v2213_v10, %v290_v27  ;;  %v637_v40 = vpack.c.bf16 %v573_v31, %v569_v30 }
  0x9d   :  { %v434_v9 = vadd.f32 %v2240_v23, %v284_v57  ;;  %v438_v11 = vadd.f32 %v2240_v23, %v288_v60 }
  0x9e   :  { %v633_v15 = vpack.c.bf16 %v565_v61, %v561_v55  ;;  %v568_v12 = vmax.f32 %v440_v36, 0.0 }
  0x9f   :  { %v562_v26 = vmax.f32 %v434_v9, 0.0  ;;  %v566_v59 = vmax.f32 %v438_v11, 0.0 }
  0xa0   :  { %v636_v46 = vpack.c.bf16 %v572_v43, %v568_v12 }
  0xa2   :  { %1177 = vmatmul.mubr.bf16.gmra.mrb[48].mxu1 %v624_v32  ;;  %v571_v32 = vmax.f32 %v443_v18, 0.0 }
  0xa3   :  { %1370 = vmatmul.mubr.bf16.gmra.mrb[48].mxu0 %v626_v35  ;;  %1186 = vmatprep.mubr.bf16.mxu1 %v629_v44  ;;  %v634_v35 = vpack.c.bf16 %v566_v59, %v562_v26  ;;  %v570_v44 = vmax.f32 %v442_v39, 0.0 }
  0xa4   :  { %1379 = vmatprep.mubr.bf16.mxu0 %v631_v45  ;;  %v639_v41 = vpack.c.bf16 %v575_v33, %v571_v32  ;;  %v574_v45 = vmax.f32 %v446_v3, 0.0 }
  0xa6   :  { %v638_v47 = vpack.c.bf16 %v574_v45, %v570_v44 }
  0xaa   :  { %1187 = vmatmul.mubr.bf16.gmra.mrb[52].mxu1 %v628_v13 }
  0xab   :  { %1380 = vmatmul.mubr.bf16.gmra.mrb[52].mxu0 %v630_v14  ;;  %1196 = vmatprep.mubr.bf16.mxu1 %v633_v15 }
  0xac   :  { %1389 = vmatprep.mubr.bf16.mxu0 %v635_v16 }
  0xb2   :  { %1197 = vmatmul.mubr.bf16.gmra.mrb[56].mxu1 %v632_v34 }
  0xb3   :  { %1390 = vmatmul.mubr.bf16.gmra.mrb[56].mxu0 %v634_v35  ;;  %1206 = vmatprep.mubr.bf16.mxu1 %v637_v40 }
  0xb4   :  { %1399 = vmatprep.mubr.bf16.mxu0 %v639_v41 }
  0xba   :  { %1207 = vmatmul.mubr.bf16.gmra.mrb[60].mxu1 %v636_v46 }
  0xbb   :  { %1400 = vmatmul.mubr.bf16.gmra.mrb[60].mxu0 %v638_v47 }
 0x115   :  { %v1058_v48 = vpop.f32.mrb[0].mxu1 }
 0x116   :  { %v1251_v10 = vpop.f32.mrb[0].mxu0  ;;  %v1060_v50 = vpop.f32.mrb[1].mxu1 }
 0x117   :  { %v1252_v49 = vadd.f32 %v1251_v10, %v1058_v48  ;;  %v1253_v51 = vpop.f32.mrb[1].mxu0  ;;  %v1062_v52 = vpop.f32.mrb[2].mxu1 }
 0x118   :  { %v1254_v23 = vadd.f32 %v1253_v51, %v1060_v50  ;;  %v1255_v53 = vpop.f32.mrb[2].mxu0  ;;  %v1064_v55 = vpop.f32.mrb[3].mxu1 }
 0x119   :  { %1410 = vst [vmem:[%s3106_s4] sm:$0xff] %v1252_v49  ;;  %v1256_v54 = vadd.f32 %v1255_v53, %v1062_v52  ;;  %v1257_v56 = vpop.f32.mrb[3].mxu0  ;;  %v1584_v60 = vmul.f32 %v1252_v49, %v1252_v49 }
 0x11a   :  { %1411 = vst [vmem:[%s3106_s4 + $0x8] sm:$0xff] %v1254_v23  ;;  %v1258_v57 = vadd.f32 %v1257_v56, %v1064_v55  ;;  %v1585_v0 = vmul.f32 %v1254_v23, %v1254_v23 }
 0x11b   :  { %1412 = vst [vmem:[%s3106_s4 + $0x10] sm:$0xff] %v1256_v54  ;;  %v1485_v61 = vadd.f32 %v1256_v54, %v1252_v49  ;;  %v1586_v63 = vmul.f32 %v1256_v54, %v1256_v54 }
 0x11c   :  { %1413 = vst [vmem:[%s3106_s4 + $0x18] sm:$0xff] %v1258_v57  ;;  %v1522_v1 = vadd.f32 %v1258_v57, %v1254_v23  ;;  %v1587_v4 = vmul.f32 %v1258_v57, %v1258_v57 }
 0x11d   :  { %v1648_v5 = vadd.f32 %v1586_v63, %v1584_v60  ;;  %v1068_v7 = vpop.f32.mrb[4].mxu1 }
 0x11e   :  { %v1685_v6 = vadd.f32 %v1587_v4, %v1585_v0  ;;  %v1261_v8 = vpop.f32.mrb[4].mxu0  ;;  %v1070_v11 = vpop.f32.mrb[5].mxu1 }
 0x11f   :  { %v1262_v9 = vadd.f32 %v1261_v8, %v1068_v7  ;;  %v1263_v13 = vpop.f32.mrb[5].mxu0  ;;  %v1072_v16 = vpop.f32.mrb[6].mxu1 }
 0x120   :  { %v1264_v15 = vadd.f32 %v1263_v13, %v1070_v11  ;;  %v1265_v58 = vpop.f32.mrb[6].mxu0  ;;  %v1074_v19 = vpop.f32.mrb[7].mxu1 }
 0x121   :  { %1414 = vst [vmem:[%s3106_s4 + $0x20] sm:$0xff] %v1262_v9  ;;  %v1486_v62 = vadd.f32 %v1485_v61, %v1262_v9  ;;  %v1588_v18 = vmul.f32 %v1262_v9, %v1262_v9  ;;  %v1266_v37 = vadd.f32 %v1265_v58, %v1072_v16  ;;  %v1267_v20 = vpop.f32.mrb[7].mxu0 }
 0x122   :  { %1415 = vst [vmem:[%s3106_s4 + $0x28] sm:$0xff] %v1264_v15  ;;  %v1523_v21 = vadd.f32 %v1522_v1, %v1264_v15  ;;  %v1589_v22 = vmul.f32 %v1264_v15, %v1264_v15  ;;  %v1268_v24 = vadd.f32 %v1267_v20, %v1074_v19 }
 0x123   :  { %v1649_v25 = vadd.f32 %v1648_v5, %v1588_v18  ;;  %1416 = vst [vmem:[%s3106_s4 + $0x30] sm:$0xff] %v1266_v37  ;;  %v1487_v26 = vadd.f32 %v1486_v62, %v1266_v37  ;;  %v1590_v59 = vmul.f32 %v1266_v37, %v1266_v37 }
 0x124   :  { %v1686_v27 = vadd.f32 %v1685_v6, %v1589_v22  ;;  %1417 = vst [vmem:[%s3106_s4 + $0x38] sm:$0xff] %v1268_v24  ;;  %v1524_v2 = vadd.f32 %v1523_v21, %v1268_v24  ;;  %v1591_v28 = vmul.f32 %v1268_v24, %v1268_v24 }
 0x125   :  { %v1650_v29 = vadd.f32 %v1649_v25, %v1590_v59  ;;  %v1078_v31 = vpop.f32.mrb[8].mxu1 }
 0x126   :  { %v1687_v30 = vadd.f32 %v1686_v27, %v1591_v28  ;;  %v1271_v32 = vpop.f32.mrb[8].mxu0  ;;  %v1080_v34 = vpop.f32.mrb[9].mxu1 }
 0x127   :  { %v1272_v33 = vadd.f32 %v1271_v32, %v1078_v31  ;;  %v1273_v35 = vpop.f32.mrb[9].mxu0  ;;  %v1082_v38 = vpop.f32.mrb[10].mxu1 }
 0x128   :  { %v1274_v36 = vadd.f32 %v1273_v35, %v1080_v34  ;;  %v1275_v39 = vpop.f32.mrb[10].mxu0  ;;  %v1084_v12 = vpop.f32.mrb[11].mxu1 }
 0x129   :  { %1418 = vst [vmem:[%s3106_s4 + $0x40] sm:$0xff] %v1272_v33  ;;  %v1488_v3 = vadd.f32 %v1487_v26, %v1272_v33  ;;  %v1592_v40 = vmul.f32 %v1272_v33, %v1272_v33  ;;  %v1276_v41 = vadd.f32 %v1275_v39, %v1082_v38  ;;  %v1277_v43 = vpop.f32.mrb[11].mxu0 }
 0x12a   :  { %1419 = vst [vmem:[%s3106_s4 + $0x48] sm:$0xff] %v1274_v36  ;;  %v1525_v44 = vadd.f32 %v1524_v2, %v1274_v36  ;;  %v1593_v45 = vmul.f32 %v1274_v36, %v1274_v36  ;;  %v1278_v46 = vadd.f32 %v1277_v43, %v1084_v12 }
 0x12b   :  { %v1651_v47 = vadd.f32 %v1650_v29, %v1592_v40  ;;  %1420 = vst [vmem:[%s3106_s4 + $0x50] sm:$0xff] %v1276_v41  ;;  %v1489_v48 = vadd.f32 %v1488_v3, %v1276_v41  ;;  %v1594_v10 = vmul.f32 %v1276_v41, %v1276_v41 }
 0x12c   :  { %v1688_v49 = vadd.f32 %v1687_v30, %v1593_v45  ;;  %1421 = vst [vmem:[%s3106_s4 + $0x58] sm:$0xff] %v1278_v46  ;;  %v1526_v50 = vadd.f32 %v1525_v44, %v1278_v46  ;;  %v1595_v51 = vmul.f32 %v1278_v46, %v1278_v46 }
 0x12d   :  { %v1652_v23 = vadd.f32 %v1651_v47, %v1594_v10  ;;  %v1088_v53 = vpop.f32.mrb[12].mxu1 }
 0x12e   :  { %v1689_v52 = vadd.f32 %v1688_v49, %v1595_v51  ;;  %v1281_v54 = vpop.f32.mrb[12].mxu0  ;;  %v1090_v56 = vpop.f32.mrb[13].mxu1 }
 0x12f   :  { %v1282_v55 = vadd.f32 %v1281_v54, %v1088_v53  ;;  %v1283_v57 = vpop.f32.mrb[13].mxu0  ;;  %v1092_v61 = vpop.f32.mrb[14].mxu1 }
 0x130   :  { %v1284_v60 = vadd.f32 %v1283_v57, %v1090_v56  ;;  %v1285_v63 = vpop.f32.mrb[14].mxu0  ;;  %v1094_v5 = vpop.f32.mrb[15].mxu1 }
 0x131   :  { %1422 = vst [vmem:[%s3106_s4 + $0x60] sm:$0xff] %v1282_v55  ;;  %v1490_v0 = vadd.f32 %v1489_v48, %v1282_v55  ;;  %v1596_v1 = vmul.f32 %v1282_v55, %v1282_v55  ;;  %v1286_v4 = vadd.f32 %v1285_v63, %v1092_v61  ;;  %v1287_v6 = vpop.f32.mrb[15].mxu0 }
 0x132   :  { %1423 = vst [vmem:[%s3106_s4 + $0x68] sm:$0xff] %v1284_v60  ;;  %v1527_v7 = vadd.f32 %v1526_v50, %v1284_v60  ;;  %v1597_v8 = vmul.f32 %v1284_v60, %v1284_v60  ;;  %v1288_v9 = vadd.f32 %v1287_v6, %v1094_v5 }
 0x133   :  { %v1653_v11 = vadd.f32 %v1652_v23, %v1596_v1  ;;  %1424 = vst [vmem:[%s3106_s4 + $0x70] sm:$0xff] %v1286_v4  ;;  %v1491_v13 = vadd.f32 %v1490_v0, %v1286_v4  ;;  %v1598_v15 = vmul.f32 %v1286_v4, %v1286_v4 }
 0x134   :  { %v1690_v16 = vadd.f32 %v1689_v52, %v1597_v8  ;;  %1425 = vst [vmem:[%s3106_s4 + $0x78] sm:$0xff] %v1288_v9  ;;  %v1528_v58 = vadd.f32 %v1527_v7, %v1288_v9  ;;  %v1599_v17 = vmul.f32 %v1288_v9, %v1288_v9 }
 0x135   :  { %v1654_v62 = vadd.f32 %v1653_v11, %v1598_v15  ;;  %v1098_v37 = vpop.f32.mrb[16].mxu1 }
 0x136   :  { %v1691_v18 = vadd.f32 %v1690_v16, %v1599_v17  ;;  %v1291_v19 = vpop.f32.mrb[16].mxu0  ;;  %v1100_v21 = vpop.f32.mrb[17].mxu1 }
 0x137   :  { %v1292_v20 = vadd.f32 %v1291_v19, %v1098_v37  ;;  %v1293_v22 = vpop.f32.mrb[17].mxu0  ;;  %v1102_v25 = vpop.f32.mrb[18].mxu1 }
 0x138   :  { %v1294_v24 = vadd.f32 %v1293_v22, %v1100_v21  ;;  %v1295_v26 = vpop.f32.mrb[18].mxu0  ;;  %v1104_v28 = vpop.f32.mrb[19].mxu1 }
 0x139   :  { %1426 = vst [vmem:[%s3106_s4 + $0x80] sm:$0xff] %v1292_v20  ;;  %v1492_v59 = vadd.f32 %v1491_v13, %v1292_v20  ;;  %v1600_v27 = vmul.f32 %v1292_v20, %v1292_v20  ;;  %v1296_v2 = vadd.f32 %v1295_v26, %v1102_v25  ;;  %v1297_v29 = vpop.f32.mrb[19].mxu0 }
 0x13a   :  { %1427 = vst [vmem:[%s3106_s4 + $0x88] sm:$0xff] %v1294_v24  ;;  %v1529_v30 = vadd.f32 %v1528_v58, %v1294_v24  ;;  %v1601_v31 = vmul.f32 %v1294_v24, %v1294_v24  ;;  %v1298_v32 = vadd.f32 %v1297_v29, %v1104_v28 }
 0x13b   :  { %v1655_v33 = vadd.f32 %v1654_v62, %v1600_v27  ;;  %1428 = vst [vmem:[%s3106_s4 + $0x90] sm:$0xff] %v1296_v2  ;;  %v1493_v34 = vadd.f32 %v1492_v59, %v1296_v2  ;;  %v1602_v35 = vmul.f32 %v1296_v2, %v1296_v2 }
 0x13c   :  { %v1692_v36 = vadd.f32 %v1691_v18, %v1601_v31  ;;  %1429 = vst [vmem:[%s3106_s4 + $0x98] sm:$0xff] %v1298_v32  ;;  %v1530_v38 = vadd.f32 %v1529_v30, %v1298_v32  ;;  %v1603_v39 = vmul.f32 %v1298_v32, %v1298_v32 }
 0x13d   :  { %v1656_v3 = vadd.f32 %v1655_v33, %v1602_v35  ;;  %v1108_v41 = vpop.f32.mrb[20].mxu1 }
 0x13e   :  { %v1693_v40 = vadd.f32 %v1692_v36, %v1603_v39  ;;  %v1301_v12 = vpop.f32.mrb[20].mxu0  ;;  %v1110_v44 = vpop.f32.mrb[21].mxu1 }
 0x13f   :  { %v1302_v43 = vadd.f32 %v1301_v12, %v1108_v41  ;;  %v1303_v45 = vpop.f32.mrb[21].mxu0  ;;  %v1112_v47 = vpop.f32.mrb[22].mxu1 }
 0x140   :  { %v1304_v46 = vadd.f32 %v1303_v45, %v1110_v44  ;;  %v1305_v48 = vpop.f32.mrb[22].mxu0  ;;  %v1114_v51 = vpop.f32.mrb[23].mxu1 }
 0x141   :  { %1430 = vst [vmem:[%s3106_s4 + $0xa0] sm:$0xff] %v1302_v43  ;;  %v1494_v10 = vadd.f32 %v1493_v34, %v1302_v43  ;;  %v1604_v49 = vmul.f32 %v1302_v43, %v1302_v43  ;;  %v1306_v50 = vadd.f32 %v1305_v48, %v1112_v47  ;;  %v1307_v23 = vpop.f32.mrb[23].mxu0 }
 0x142   :  { %1431 = vst [vmem:[%s3106_s4 + $0xa8] sm:$0xff] %v1304_v46  ;;  %v1531_v52 = vadd.f32 %v1530_v38, %v1304_v46  ;;  %v1605_v53 = vmul.f32 %v1304_v46, %v1304_v46  ;;  %v1308_v54 = vadd.f32 %v1307_v23, %v1114_v51 }
 0x143   :  { %v1657_v55 = vadd.f32 %v1656_v3, %v1604_v49  ;;  %1432 = vst [vmem:[%s3106_s4 + $0xb0] sm:$0xff] %v1306_v50  ;;  %v1495_v56 = vadd.f32 %v1494_v10, %v1306_v50  ;;  %v1606_v57 = vmul.f32 %v1306_v50, %v1306_v50 }
 0x144   :  { %v1694_v60 = vadd.f32 %v1693_v40, %v1605_v53  ;;  %1433 = vst [vmem:[%s3106_s4 + $0xb8] sm:$0xff] %v1308_v54  ;;  %v1532_v61 = vadd.f32 %v1531_v52, %v1308_v54  ;;  %v1607_v63 = vmul.f32 %v1308_v54, %v1308_v54 }
 0x145   :  { %v1658_v0 = vadd.f32 %v1657_v55, %v1606_v57  ;;  %v1118_v4 = vpop.f32.mrb[24].mxu1 }
 0x146   :  { %v1695_v1 = vadd.f32 %v1694_v60, %v1607_v63  ;;  %v1311_v5 = vpop.f32.mrb[24].mxu0  ;;  %v1120_v7 = vpop.f32.mrb[25].mxu1 }
 0x147   :  { %v1312_v6 = vadd.f32 %v1311_v5, %v1118_v4  ;;  %v1313_v8 = vpop.f32.mrb[25].mxu0  ;;  %v1122_v11 = vpop.f32.mrb[26].mxu1 }
 0x148   :  { %v1314_v9 = vadd.f32 %v1313_v8, %v1120_v7  ;;  %v1315_v13 = vpop.f32.mrb[26].mxu0  ;;  %v1124_v17 = vpop.f32.mrb[27].mxu1 }
 0x149   :  { %1434 = vst [vmem:[%s3106_s4 + $0xc0] sm:$0xff] %v1312_v6  ;;  %v1496_v15 = vadd.f32 %v1495_v56, %v1312_v6  ;;  %v1608_v16 = vmul.f32 %v1312_v6, %v1312_v6  ;;  %v1316_v58 = vadd.f32 %v1315_v13, %v1122_v11  ;;  %v1317_v62 = vpop.f32.mrb[27].mxu0 }
 0x14a   :  { %1435 = vst [vmem:[%s3106_s4 + $0xc8] sm:$0xff] %v1314_v9  ;;  %v1533_v18 = vadd.f32 %v1532_v61, %v1314_v9  ;;  %v1609_v37 = vmul.f32 %v1314_v9, %v1314_v9  ;;  %v1318_v19 = vadd.f32 %v1317_v62, %v1124_v17 }
 0x14b   :  { %v1659_v20 = vadd.f32 %v1658_v0, %v1608_v16  ;;  %1436 = vst [vmem:[%s3106_s4 + $0xd0] sm:$0xff] %v1316_v58  ;;  %v1497_v21 = vadd.f32 %v1496_v15, %v1316_v58  ;;  %v1610_v22 = vmul.f32 %v1316_v58, %v1316_v58 }
 0x14c   :  { %v1696_v24 = vadd.f32 %v1695_v1, %v1609_v37  ;;  %1437 = vst [vmem:[%s3106_s4 + $0xd8] sm:$0xff] %v1318_v19  ;;  %v1534_v25 = vadd.f32 %v1533_v18, %v1318_v19  ;;  %v1611_v26 = vmul.f32 %v1318_v19, %v1318_v19 }
 0x14d   :  { %v1660_v59 = vadd.f32 %v1659_v20, %v1610_v22  ;;  %v1128_v2 = vpop.f32.mrb[28].mxu1 }
 0x14e   :  { %v1697_v27 = vadd.f32 %v1696_v24, %v1611_v26  ;;  %v1321_v28 = vpop.f32.mrb[28].mxu0  ;;  %v1130_v30 = vpop.f32.mrb[29].mxu1 }
 0x14f   :  { %v1322_v29 = vadd.f32 %v1321_v28, %v1128_v2  ;;  %v1323_v31 = vpop.f32.mrb[29].mxu0  ;;  %v1132_v33 = vpop.f32.mrb[30].mxu1 }
 0x150   :  { %v1324_v32 = vadd.f32 %v1323_v31, %v1130_v30  ;;  %v1325_v34 = vpop.f32.mrb[30].mxu0  ;;  %v1134_v39 = vpop.f32.mrb[31].mxu1 }
 0x151   :  { %1438 = vst [vmem:[%s3106_s4 + $0xe0] sm:$0xff] %v1322_v29  ;;  %v1498_v35 = vadd.f32 %v1497_v21, %v1322_v29  ;;  %v1612_v36 = vmul.f32 %v1322_v29, %v1322_v29  ;;  %v1326_v38 = vadd.f32 %v1325_v34, %v1132_v33  ;;  %v1327_v3 = vpop.f32.mrb[31].mxu0 }
 0x152   :  { %1439 = vst [vmem:[%s3106_s4 + $0xe8] sm:$0xff] %v1324_v32  ;;  %v1535_v40 = vadd.f32 %v1534_v25, %v1324_v32  ;;  %v1613_v41 = vmul.f32 %v1324_v32, %v1324_v32  ;;  %v1328_v12 = vadd.f32 %v1327_v3, %v1134_v39 }
 0x153   :  { %v1661_v43 = vadd.f32 %v1660_v59, %v1612_v36  ;;  %1440 = vst [vmem:[%s3106_s4 + $0xf0] sm:$0xff] %v1326_v38  ;;  %v1499_v44 = vadd.f32 %v1498_v35, %v1326_v38  ;;  %v1614_v45 = vmul.f32 %v1326_v38, %v1326_v38 }
 0x154   :  { %v1698_v46 = vadd.f32 %v1697_v27, %v1613_v41  ;;  %1441 = vst [vmem:[%s3106_s4 + $0xf8] sm:$0xff] %v1328_v12  ;;  %v1536_v47 = vadd.f32 %v1535_v40, %v1328_v12  ;;  %v1615_v48 = vmul.f32 %v1328_v12, %v1328_v12 }
 0x155   :  { %v1662_v10 = vadd.f32 %v1661_v43, %v1614_v45  ;;  %v1138_v50 = vpop.f32.mrb[32].mxu1 }
 0x156   :  { %v1699_v49 = vadd.f32 %v1698_v46, %v1615_v48  ;;  %v1331_v51 = vpop.f32.mrb[32].mxu0  ;;  %v1140_v52 = vpop.f32.mrb[33].mxu1 }
 0x157   :  { %v1332_v23 = vadd.f32 %v1331_v51, %v1138_v50  ;;  %v1333_v53 = vpop.f32.mrb[33].mxu0  ;;  %v1142_v55 = vpop.f32.mrb[34].mxu1 }
 0x158   :  { %v1334_v54 = vadd.f32 %v1333_v53, %v1140_v52  ;;  %v1335_v56 = vpop.f32.mrb[34].mxu0  ;;  %v1144_v63 = vpop.f32.mrb[35].mxu1 }
 0x159   :  { %1442 = vst [vmem:[%s3106_s4 + $0x100] sm:$0xff] %v1332_v23  ;;  %v1500_v57 = vadd.f32 %v1499_v44, %v1332_v23  ;;  %v1616_v60 = vmul.f32 %v1332_v23, %v1332_v23  ;;  %v1336_v61 = vadd.f32 %v1335_v56, %v1142_v55  ;;  %v1337_v0 = vpop.f32.mrb[35].mxu0 }
 0x15a   :  { %1443 = vst [vmem:[%s3106_s4 + $0x108] sm:$0xff] %v1334_v54  ;;  %v1537_v1 = vadd.f32 %v1536_v47, %v1334_v54  ;;  %v1617_v4 = vmul.f32 %v1334_v54, %v1334_v54  ;;  %v1338_v5 = vadd.f32 %v1337_v0, %v1144_v63 }
 0x15b   :  { %v1663_v6 = vadd.f32 %v1662_v10, %v1616_v60  ;;  %1444 = vst [vmem:[%s3106_s4 + $0x110] sm:$0xff] %v1336_v61  ;;  %v1501_v7 = vadd.f32 %v1500_v57, %v1336_v61  ;;  %v1618_v8 = vmul.f32 %v1336_v61, %v1336_v61 }
 0x15c   :  { %v1700_v9 = vadd.f32 %v1699_v49, %v1617_v4  ;;  %1445 = vst [vmem:[%s3106_s4 + $0x118] sm:$0xff] %v1338_v5  ;;  %v1538_v11 = vadd.f32 %v1537_v1, %v1338_v5  ;;  %v1619_v13 = vmul.f32 %v1338_v5, %v1338_v5 }
 0x15d   :  { %v1664_v15 = vadd.f32 %v1663_v6, %v1618_v8  ;;  %v1148_v58 = vpop.f32.mrb[36].mxu1 }
 0x15e   :  { %v1701_v16 = vadd.f32 %v1700_v9, %v1619_v13  ;;  %v1341_v17 = vpop.f32.mrb[36].mxu0  ;;  %v1150_v18 = vpop.f32.mrb[37].mxu1 }
 0x15f   :  { %v1342_v62 = vadd.f32 %v1341_v17, %v1148_v58  ;;  %v1343_v37 = vpop.f32.mrb[37].mxu0  ;;  %v1152_v20 = vpop.f32.mrb[38].mxu1 }
 0x160   :  { %v1344_v19 = vadd.f32 %v1343_v37, %v1150_v18  ;;  %v1345_v21 = vpop.f32.mrb[38].mxu0  ;;  %v1154_v26 = vpop.f32.mrb[39].mxu1 }
 0x161   :  { %1446 = vst [vmem:[%s3106_s4 + $0x120] sm:$0xff] %v1342_v62  ;;  %v1502_v22 = vadd.f32 %v1501_v7, %v1342_v62  ;;  %v1620_v24 = vmul.f32 %v1342_v62, %v1342_v62  ;;  %v1346_v25 = vadd.f32 %v1345_v21, %v1152_v20  ;;  %v1347_v59 = vpop.f32.mrb[39].mxu0 }
 0x162   :  { %1447 = vst [vmem:[%s3106_s4 + $0x128] sm:$0xff] %v1344_v19  ;;  %v1539_v27 = vadd.f32 %v1538_v11, %v1344_v19  ;;  %v1621_v2 = vmul.f32 %v1344_v19, %v1344_v19  ;;  %v1348_v28 = vadd.f32 %v1347_v59, %v1154_v26 }
 0x163   :  { %v1665_v29 = vadd.f32 %v1664_v15, %v1620_v24  ;;  %1448 = vst [vmem:[%s3106_s4 + $0x130] sm:$0xff] %v1346_v25  ;;  %v1503_v30 = vadd.f32 %v1502_v22, %v1346_v25  ;;  %v1622_v31 = vmul.f32 %v1346_v25, %v1346_v25 }
 0x164   :  { %v1702_v32 = vadd.f32 %v1701_v16, %v1621_v2  ;;  %1449 = vst [vmem:[%s3106_s4 + $0x138] sm:$0xff] %v1348_v28  ;;  %v1540_v33 = vadd.f32 %v1539_v27, %v1348_v28  ;;  %v1623_v34 = vmul.f32 %v1348_v28, %v1348_v28 }
 0x165   :  { %v1666_v35 = vadd.f32 %v1665_v29, %v1622_v31  ;;  %v1158_v38 = vpop.f32.mrb[40].mxu1 }
 0x166   :  { %v1703_v36 = vadd.f32 %v1702_v32, %v1623_v34  ;;  %v1351_v39 = vpop.f32.mrb[40].mxu0  ;;  %v1160_v40 = vpop.f32.mrb[41].mxu1 }
 0x167   :  { %v1352_v3 = vadd.f32 %v1351_v39, %v1158_v38  ;;  %v1353_v41 = vpop.f32.mrb[41].mxu0  ;;  %v1162_v43 = vpop.f32.mrb[42].mxu1 }
 0x168   :  { %v1354_v12 = vadd.f32 %v1353_v41, %v1160_v40  ;;  %v1355_v44 = vpop.f32.mrb[42].mxu0  ;;  %v1164_v48 = vpop.f32.mrb[43].mxu1 }
 0x169   :  { %1450 = vst [vmem:[%s3106_s4 + $0x140] sm:$0xff] %v1352_v3  ;;  %v1504_v45 = vadd.f32 %v1503_v30, %v1352_v3  ;;  %v1624_v46 = vmul.f32 %v1352_v3, %v1352_v3  ;;  %v1356_v47 = vadd.f32 %v1355_v44, %v1162_v43  ;;  %v1357_v10 = vpop.f32.mrb[43].mxu0 }
 0x16a   :  { %1451 = vst [vmem:[%s3106_s4 + $0x148] sm:$0xff] %v1354_v12  ;;  %v1541_v49 = vadd.f32 %v1540_v33, %v1354_v12  ;;  %v1625_v50 = vmul.f32 %v1354_v12, %v1354_v12  ;;  %v1358_v51 = vadd.f32 %v1357_v10, %v1164_v48 }
 0x16b   :  { %v1667_v23 = vadd.f32 %v1666_v35, %v1624_v46  ;;  %1452 = vst [vmem:[%s3106_s4 + $0x150] sm:$0xff] %v1356_v47  ;;  %v1505_v52 = vadd.f32 %v1504_v45, %v1356_v47  ;;  %v1626_v53 = vmul.f32 %v1356_v47, %v1356_v47 }
 0x16c   :  { %v1704_v54 = vadd.f32 %v1703_v36, %v1625_v50  ;;  %1453 = vst [vmem:[%s3106_s4 + $0x158] sm:$0xff] %v1358_v51  ;;  %v1542_v55 = vadd.f32 %v1541_v49, %v1358_v51  ;;  %v1627_v56 = vmul.f32 %v1358_v51, %v1358_v51 }
 0x16d   :  { %v1668_v57 = vadd.f32 %v1667_v23, %v1626_v53  ;;  %v1168_v61 = vpop.f32.mrb[44].mxu1 }
 0x16e   :  { %v1705_v60 = vadd.f32 %v1704_v54, %v1627_v56  ;;  %v1361_v63 = vpop.f32.mrb[44].mxu0  ;;  %v1170_v1 = vpop.f32.mrb[45].mxu1 }
 0x16f   :  { %v1362_v0 = vadd.f32 %v1361_v63, %v1168_v61  ;;  %v1363_v4 = vpop.f32.mrb[45].mxu0  ;;  %v1172_v6 = vpop.f32.mrb[46].mxu1 }
 0x170   :  { %v1364_v5 = vadd.f32 %v1363_v4, %v1170_v1  ;;  %v1365_v7 = vpop.f32.mrb[46].mxu0  ;;  %v1174_v13 = vpop.f32.mrb[47].mxu1 }
 0x171   :  { %1454 = vst [vmem:[%s3106_s4 + $0x160] sm:$0xff] %v1362_v0  ;;  %v1506_v8 = vadd.f32 %v1505_v52, %v1362_v0  ;;  %v1628_v9 = vmul.f32 %v1362_v0, %v1362_v0  ;;  %v1366_v11 = vadd.f32 %v1365_v7, %v1172_v6  ;;  %v1367_v15 = vpop.f32.mrb[47].mxu0 }
 0x172   :  { %1455 = vst [vmem:[%s3106_s4 + $0x168] sm:$0xff] %v1364_v5  ;;  %v1543_v16 = vadd.f32 %v1542_v55, %v1364_v5  ;;  %v1629_v58 = vmul.f32 %v1364_v5, %v1364_v5  ;;  %v1368_v17 = vadd.f32 %v1367_v15, %v1174_v13 }
 0x173   :  { %v1669_v62 = vadd.f32 %v1668_v57, %v1628_v9  ;;  %1456 = vst [vmem:[%s3106_s4 + $0x170] sm:$0xff] %v1366_v11  ;;  %v1507_v18 = vadd.f32 %v1506_v8, %v1366_v11  ;;  %v1630_v37 = vmul.f32 %v1366_v11, %v1366_v11 }
 0x174   :  { %v1706_v19 = vadd.f32 %v1705_v60, %v1629_v58  ;;  %1457 = vst [vmem:[%s3106_s4 + $0x178] sm:$0xff] %v1368_v17  ;;  %v1544_v20 = vadd.f32 %v1543_v16, %v1368_v17  ;;  %v1631_v21 = vmul.f32 %v1368_v17, %v1368_v17 }
 0x175   :  { %v1670_v22 = vadd.f32 %v1669_v62, %v1630_v37  ;;  %v1178_v25 = vpop.f32.mrb[48].mxu1 }
 0x176   :  { %v1707_v24 = vadd.f32 %v1706_v19, %v1631_v21  ;;  %v1371_v26 = vpop.f32.mrb[48].mxu0  ;;  %v1180_v27 = vpop.f32.mrb[49].mxu1 }
 0x177   :  { %v1372_v59 = vadd.f32 %v1371_v26, %v1178_v25  ;;  %v1373_v2 = vpop.f32.mrb[49].mxu0  ;;  %v1182_v29 = vpop.f32.mrb[50].mxu1 }
 0x178   :  { %v1374_v28 = vadd.f32 %v1373_v2, %v1180_v27  ;;  %v1375_v30 = vpop.f32.mrb[50].mxu0  ;;  %v1184_v34 = vpop.f32.mrb[51].mxu1 }
 0x179   :  { %1458 = vst [vmem:[%s3106_s4 + $0x180] sm:$0xff] %v1372_v59  ;;  %v1508_v31 = vadd.f32 %v1507_v18, %v1372_v59  ;;  %v1632_v32 = vmul.f32 %v1372_v59, %v1372_v59  ;;  %v1376_v33 = vadd.f32 %v1375_v30, %v1182_v29  ;;  %v1377_v35 = vpop.f32.mrb[51].mxu0 }
 0x17a   :  { %1459 = vst [vmem:[%s3106_s4 + $0x188] sm:$0xff] %v1374_v28  ;;  %v1545_v36 = vadd.f32 %v1544_v20, %v1374_v28  ;;  %v1633_v38 = vmul.f32 %v1374_v28, %v1374_v28  ;;  %v1378_v39 = vadd.f32 %v1377_v35, %v1184_v34 }
 0x17b   :  { %v1671_v3 = vadd.f32 %v1670_v22, %v1632_v32  ;;  %1460 = vst [vmem:[%s3106_s4 + $0x190] sm:$0xff] %v1376_v33  ;;  %v1509_v40 = vadd.f32 %v1508_v31, %v1376_v33  ;;  %v1634_v41 = vmul.f32 %v1376_v33, %v1376_v33 }
 0x17c   :  { %v1708_v12 = vadd.f32 %v1707_v24, %v1633_v38  ;;  %1461 = vst [vmem:[%s3106_s4 + $0x198] sm:$0xff] %v1378_v39  ;;  %v1546_v43 = vadd.f32 %v1545_v36, %v1378_v39  ;;  %v1635_v44 = vmul.f32 %v1378_v39, %v1378_v39 }
 0x17d   :  { %v1672_v45 = vadd.f32 %v1671_v3, %v1634_v41  ;;  %v1188_v47 = vpop.f32.mrb[52].mxu1 }
 0x17e   :  { %v1709_v46 = vadd.f32 %v1708_v12, %v1635_v44  ;;  %v1381_v48 = vpop.f32.mrb[52].mxu0  ;;  %v1190_v49 = vpop.f32.mrb[53].mxu1 }
 0x17f   :  { %v1382_v10 = vadd.f32 %v1381_v48, %v1188_v47  ;;  %v1383_v50 = vpop.f32.mrb[53].mxu0  ;;  %v1192_v23 = vpop.f32.mrb[54].mxu1 }
 0x180   :  { %v1384_v51 = vadd.f32 %v1383_v50, %v1190_v49  ;;  %v1385_v52 = vpop.f32.mrb[54].mxu0  ;;  %v1194_v56 = vpop.f32.mrb[55].mxu1 }
 0x181   :  { %1462 = vst [vmem:[%s3106_s4 + $0x1a0] sm:$0xff] %v1382_v10  ;;  %v1510_v53 = vadd.f32 %v1509_v40, %v1382_v10  ;;  %v1636_v54 = vmul.f32 %v1382_v10, %v1382_v10  ;;  %v1386_v55 = vadd.f32 %v1385_v52, %v1192_v23  ;;  %v1387_v57 = vpop.f32.mrb[55].mxu0 }
 0x182   :  { %1463 = vst [vmem:[%s3106_s4 + $0x1a8] sm:$0xff] %v1384_v51  ;;  %v1547_v60 = vadd.f32 %v1546_v43, %v1384_v51  ;;  %v1637_v61 = vmul.f32 %v1384_v51, %v1384_v51  ;;  %v1388_v63 = vadd.f32 %v1387_v57, %v1194_v56 }
 0x183   :  { %v1673_v0 = vadd.f32 %v1672_v45, %v1636_v54  ;;  %1464 = vst [vmem:[%s3106_s4 + $0x1b0] sm:$0xff] %v1386_v55  ;;  %v1511_v1 = vadd.f32 %v1510_v53, %v1386_v55  ;;  %v1638_v4 = vmul.f32 %v1386_v55, %v1386_v55 }
 0x184   :  { %v1710_v5 = vadd.f32 %v1709_v46, %v1637_v61  ;;  %1465 = vst [vmem:[%s3106_s4 + $0x1b8] sm:$0xff] %v1388_v63  ;;  %v1548_v6 = vadd.f32 %v1547_v60, %v1388_v63  ;;  %v1639_v7 = vmul.f32 %v1388_v63, %v1388_v63  ;;  %v1981_v63 = vmov 1966171168  }
 0x185   :  { %v1674_v8 = vadd.f32 %v1673_v0, %v1638_v4  ;;  %v1198_v11 = vpop.f32.mrb[56].mxu1  ;;  %v1563_v0 = vunpack.c.l.s4 %v1981_v63 }
 0x186   :  { %v1711_v9 = vadd.f32 %v1710_v5, %v1639_v7  ;;  %v1391_v13 = vpop.f32.mrb[56].mxu0  ;;  %v1200_v16 = vpop.f32.mrb[57].mxu1 }
 0x187   :  { %v1392_v15 = vadd.f32 %v1391_v13, %v1198_v11  ;;  %v1393_v58 = vpop.f32.mrb[57].mxu0  ;;  %v1202_v62 = vpop.f32.mrb[58].mxu1  ;;  %v1564_v13 = vunpack.c.0.s8 %v1563_v0 }
 0x188   :  { %v1394_v17 = vadd.f32 %v1393_v58, %v1200_v16  ;;  %v1395_v18 = vpop.f32.mrb[58].mxu0  ;;  %v1204_v21 = vpop.f32.mrb[59].mxu1 }
 0x189   :  { %1466 = vst [vmem:[%s3106_s4 + $0x1c0] sm:$0xff] %v1392_v15  ;;  %v1512_v37 = vadd.f32 %v1511_v1, %v1392_v15  ;;  %v1640_v19 = vmul.f32 %v1392_v15, %v1392_v15  ;;  %v1396_v20 = vadd.f32 %v1395_v18, %v1202_v62  ;;  %v1397_v22 = vpop.f32.mrb[59].mxu0 }
 0x18a   :  { %1467 = vst [vmem:[%s3106_s4 + $0x1c8] sm:$0xff] %v1394_v17  ;;  %v1549_v24 = vadd.f32 %v1548_v6, %v1394_v17  ;;  %v1641_v25 = vmul.f32 %v1394_v17, %v1394_v17  ;;  %v1398_v26 = vadd.f32 %v1397_v22, %v1204_v21 }
 0x18b   :  { %v1675_v59 = vadd.f32 %v1674_v8, %v1640_v19  ;;  %1468 = vst [vmem:[%s3106_s4 + $0x1d0] sm:$0xff] %v1396_v20  ;;  %v1513_v27 = vadd.f32 %v1512_v37, %v1396_v20  ;;  %v1642_v2 = vmul.f32 %v1396_v20, %v1396_v20  ;;  %v1567_v20 = vsub.s32 %v1564_v13, %v2141_v42 }
 0x18c   :  { %v1712_v28 = vadd.f32 %v1711_v9, %v1641_v25  ;;  %1469 = vst [vmem:[%s3106_s4 + $0x1d8] sm:$0xff] %v1398_v26  ;;  %v1550_v29 = vadd.f32 %v1549_v24, %v1398_v26  ;;  %v1643_v30 = vmul.f32 %v1398_v26, %v1398_v26 }
 0x18d   :  { %v1676_v31 = vadd.f32 %v1675_v59, %v1642_v2  ;;  %v1208_v33 = vpop.f32.mrb[60].mxu1 }
 0x18e   :  { %v1713_v32 = vadd.f32 %v1712_v28, %v1643_v30  ;;  %v1401_v34 = vpop.f32.mrb[60].mxu0  ;;  %v1210_v36 = vpop.f32.mrb[61].mxu1 }
 0x18f   :  { %v1402_v35 = vadd.f32 %v1401_v34, %v1208_v33  ;;  %v1403_v38 = vpop.f32.mrb[61].mxu0  ;;  %v1212_v3 = vpop.f32.mrb[62].mxu1 }
 0x190   :  { %v1404_v39 = vadd.f32 %v1403_v38, %v1210_v36  ;;  %v1405_v40 = vpop.f32.mrb[62].mxu0  ;;  %v1214_v44 = vpop.f32.mrb[63].mxu1 }
 0x191   :  { %1470 = vst [vmem:[%s3106_s4 + $0x1e0] sm:$0xff] %v1402_v35  ;;  %v1514_v41 = vadd.f32 %v1513_v27, %v1402_v35  ;;  %v1644_v12 = vmul.f32 %v1402_v35, %v1402_v35  ;;  %v1406_v43 = vadd.f32 %v1405_v40, %v1212_v3  ;;  %v1407_v45 = vpop.f32.mrb[63].mxu0  ;;  %v1484_v27 = vld [vmem:[%s3107_s5] sm:$0x3] }
 0x192   :  { %1471 = vst [vmem:[%s3106_s4 + $0x1e8] sm:$0xff] %v1404_v39  ;;  %v1551_v46 = vadd.f32 %v1550_v29, %v1404_v39  ;;  %v1645_v47 = vmul.f32 %v1404_v39, %v1404_v39  ;;  %v1408_v48 = vadd.f32 %v1407_v45, %v1214_v44  ;;  %v1583_v29 = vld [vmem:[%s3108_s6] sm:$0x3] }
 0x193   :  { %v1677_v10 = vadd.f32 %v1676_v31, %v1644_v12  ;;  %1472 = vst [vmem:[%s3106_s4 + $0x1f0] sm:$0xff] %v1406_v43  ;;  %v1515_v49 = vadd.f32 %v1514_v41, %v1406_v43  ;;  %v1646_v50 = vmul.f32 %v1406_v43, %v1406_v43 }
 0x194   :  { %v1714_v51 = vadd.f32 %v1713_v32, %v1645_v47  ;;  %1473 = vst [vmem:[%s3106_s4 + $0x1f8] sm:$0xff] %v1408_v48  ;;  %v1552_v23 = vadd.f32 %v1551_v46, %v1408_v48  ;;  %v1647_v52 = vmul.f32 %v1408_v48, %v1408_v48 }
 0x195   :  { %v1516_v53 = vrot.slane %v1515_v49, 4  ;;  %v1678_v54 = vadd.f32 %v1677_v10, %v1646_v50 }
 0x196   :  { %v1553_v55 = vrot.slane %v1552_v23, 4  ;;  %v1715_v56 = vadd.f32 %v1714_v51, %v1647_v52 }
 0x197   :  { %v1517_v57 = vadd.f32 %v1516_v53, %v1515_v49  ;;  %v1679_v60 = vrot.slane %v1678_v54, 4 }
 0x198   :  { %v1554_v61 = vadd.f32 %v1553_v55, %v1552_v23  ;;  %v1716_v1 = vrot.slane %v1715_v56, 4 }
 0x199   :  { %v1518_v4 = vrot.slane %v1517_v57, 2  ;;  %v1680_v5 = vadd.f32 %v1679_v60, %v1678_v54 }
 0x19a   :  { %v1555_v6 = vrot.slane %v1554_v61, 2  ;;  %v1717_v7 = vadd.f32 %v1716_v1, %v1715_v56 }
 0x19b   :  { %v1519_v8 = vadd.f32 %v1518_v4, %v1517_v57  ;;  %v1681_v9 = vrot.slane %v1680_v5, 2 }
 0x19c   :  { %v1556_v11 = vadd.f32 %v1555_v6, %v1554_v61  ;;  %v1718_v15 = vrot.slane %v1717_v7, 2 }
 0x19d   :  { %v1520_v16 = vrot.slane %v1519_v8, 1  ;;  %v1682_v58 = vadd.f32 %v1681_v9, %v1680_v5 }
 0x19e   :  { %v1557_v17 = vrot.slane %v1556_v11, 1  ;;  %v1719_v62 = vadd.f32 %v1718_v15, %v1717_v7 }
 0x19f   :  { %v1521_v18 = vadd.f32 %v1520_v16, %v1519_v8  ;;  %v1683_v37 = vrot.slane %v1682_v58, 1 }
 0x1a0   :  { %v1558_v19 = vadd.f32 %v1557_v17, %v1556_v11  ;;  %v1720_v21 = vrot.slane %v1719_v62, 1 }
 0x1a1   :  { %v1684_v22 = vadd.f32 %v1683_v37, %v1682_v58 }
 0x1a2   :  { %v1561_v24 = vcombine.low %v1521_v18, %v1558_v19  ;;  %v1721_v25 = vadd.f32 %v1720_v21, %v1719_v62 }
 0x1a4   :  { %v1568_v26 = vrot.slane %v1561_v24, %v1567_v20  ;;  %v1724_v59 = vcombine.low %v1684_v22, %v1721_v25 }
 0x1a6   :  { %v1575_v2 = vrot.slane %v1568_v26, %v1567_v20  ;;  %v1731_v28 = vrot.slane %v1724_v59, %v1567_v20 }
 0x1a8   :  { %v1577_v30 = vadd.f32 %v1575_v2, %v1484_v27  ;;  %v1738_v31 = vrot.slane %v1731_v28, %v1567_v20 }
 0x1aa   :  { %1582 = vst.msk [vmem:[%s3107_s5] sm:$0x3] %vm2891_vm0, %v1577_v30  ;;  %v1740_v42 = vadd.f32 %v1738_v31, %v1583_v29 }
 0x1ac   :  { %1741 = vst.msk [vmem:[%s3108_s6] sm:$0x3] %vm2891_vm0, %v1740_v42 }

// kernel: hdnet_forward.8
= control target key start
LH: loop header
LB: loop body
LE: loop exit
PB: predicated region body
PF: predicated region fallthrough
CT: control target
= control target key end

     0   :  { %v119_v5 = vlaneseq  ;;  %vm1008_vm0 = vcmask 64512   ;;  %s2108_s3 = inlined_call_operand.vmem [shape: bf16[384,8], index: 3, kind: input, shape index: {}]   ;;  %s2109_s0 = inlined_call_operand.vmem [shape: f32[256,384], index: 0, kind: input, shape index: {}]   ;;  %s2110_s1 = inlined_call_operand.vmem [shape: f32[1,384], index: 1, kind: input, shape index: {}]   ;;  %s2111_s2 = inlined_call_operand.vmem [shape: f32[1,384], index: 2, kind: input, shape index: {}]   ;;  %s2112_s4 = inlined_call_operand.vmem [shape: f32[1,8], index: 4, kind: input, shape index: {}]   ;;  %s2113_s5 = inlined_call_operand.vmem [shape: f32[256,8], index: 5, kind: output, shape index: {}]  }
   0x1   :  { %v1270_v0 = vld [vmem:[%s2108_s3 + $0x40] sm:$0xff]   ;;  %v1272_v2 = vld [vmem:[%s2108_s3 + $0x48] sm:$0xff]   ;;  %v1274_v4 = vld [vmem:[%s2108_s3 + $0x50] sm:$0xff]  }
   0x2   :  { %v1271_v1 = vld [vmem:[%s2108_s3] sm:$0xff]   ;;  %1070 = vmatprep.subr.bf16.mxu0 %v1270_v0  ;;  %1254 = vmatprep.subr.bf16.mxu1 %v1270_v0  ;;  %v1273_v3 = vld [vmem:[%s2108_s3 + $0x8] sm:$0xff]   ;;  %v1275_v6 = vld [vmem:[%s2108_s3 + $0x10] sm:$0xff]   ;;  %v1345_v8 = vshrl.u32 %v119_v5, 7 }
   0x3   :  { %1071 = vmatpush3.bf16.msra.mxu0 %v1271_v1  ;;  %1262 = vmatpush3.bf16.msra.mxu1 %v1271_v1  ;;  %v1276_v7 = vld [vmem:[%s2108_s3 + $0x58] sm:$0xff]   ;;  %v1278_v10 = vld [vmem:[%s2108_s3 + $0x60] sm:$0xff]   ;;  %v1280_v14 = vld [vmem:[%s2108_s3 + $0x68] sm:$0xff]  }
   0x4   :  { %1072 = vmatprep.subr.bf16.mxu0 %v1272_v2  ;;  %1255 = vmatprep.subr.bf16.mxu1 %v1272_v2  ;;  %v1277_v9 = vld [vmem:[%s2108_s3 + $0x18] sm:$0xff]   ;;  %v125_v11 = vsub.s32 1, %v1345_v8  ;;  %v121_v12 = vsub.s32 0, %v1345_v8  ;;  %v1279_v13 = vld [vmem:[%s2108_s3 + $0x20] sm:$0xff]   ;;  %v22_v15 = vld [vmem:[%s2109_s0 + $0x8] sm:$0xff] }
   0x5   :  { %v25_v16 = vld [vmem:[%s2109_s0 + $0x20] sm:$0xff]  ;;  %v1281_v18 = vld [vmem:[%s2108_s3 + $0x28] sm:$0xff]   ;;  %v24_v26 = vld [vmem:[%s2109_s0 + $0x18] sm:$0xff] }
   0x6   :  { %v1370_v17 = vld [vmem:[%s2110_s1] sm:$0x7]  ;;  %v94_v21 = vld [vmem:[%s2109_s0 + $0x248] sm:$0xff]  ;;  %v96_v32 = vld [vmem:[%s2109_s0 + $0x258] sm:$0xff] }
   0x7   :  { %1073 = vmatpush3.bf16.msra.mxu0 %v1273_v3  ;;  %1263 = vmatpush3.bf16.msra.mxu1 %v1273_v3  ;;  %v1376_v19 = vrot.slane %v1370_v17, %v125_v11  ;;  %v1381_v20 = vld [vmem:[%s2111_s2] sm:$0x7]  ;;  %v1390_v23 = vrot.slane %v1370_v17, %v121_v12  ;;  %v1282_v33 = vld [vmem:[%s2108_s3 + $0x70] sm:$0xff]   ;;  %v28_v45 = vld [vmem:[%s2109_s0 + $0x38] sm:$0xff] }
   0x8   :  { %1074 = vmatprep.subr.bf16.mxu0 %v1274_v4  ;;  %1256 = vmatprep.subr.bf16.mxu1 %v1274_v4  ;;  %v97_v22 = vld [vmem:[%s2109_s0 + $0x260] sm:$0xff]  ;;  %v1393_v24 = vrot.slane %v1381_v20, %v125_v11  ;;  %v1402_v27 = vrot.slane %v1381_v20, %v121_v12  ;;  %v31_v46 = vld [vmem:[%s2109_s0 + $0x50] sm:$0xff]  ;;  %v1284_v48 = vld [vmem:[%s2108_s3 + $0x78] sm:$0xff]  }
   0x9   :  { %v21_v25 = vld [vmem:[%s2109_s0] sm:$0xff]  ;;  %v135_v29 = vmul.f32 %v1376_v19, %v22_v15  ;;  %v138_v30 = vmul.f32 %v1376_v19, %v25_v16  ;;  %v207_v31 = vmul.f32 %v1376_v19, %v94_v21  ;;  %v210_v34 = vmul.f32 %v1376_v19, %v97_v22  ;;  %v1283_v47 = vld [vmem:[%s2108_s3 + $0x30] sm:$0xff]   ;;  %v100_v53 = vld [vmem:[%s2109_s0 + $0x278] sm:$0xff] }
   0xa   :  { %v93_v28 = vld [vmem:[%s2109_s0 + $0x240] sm:$0xff]  ;;  %v134_v35 = vmul.f32 %v1390_v23, %v21_v25  ;;  %v137_v36 = vmul.f32 %v1390_v23, %v24_v26  ;;  %v209_v44 = vmul.f32 %v1390_v23, %v96_v32  ;;  %v103_v58 = vld [vmem:[%s2109_s0 + $0x290] sm:$0xff]  ;;  %v141_v61 = vmul.f32 %v1376_v19, %v28_v45  ;;  %v30_v4 = vld [vmem:[%s2109_s0 + $0x48] sm:$0xff] }
   0xb   :  { %1075 = vmatpush3.bf16.msra.mxu0 %v1275_v6  ;;  %1264 = vmatpush3.bf16.msra.mxu1 %v1275_v6  ;;  %v248_v37 = vadd.f32 %v1393_v24, %v135_v29  ;;  %v251_v38 = vadd.f32 %v1393_v24, %v138_v30  ;;  %v320_v39 = vadd.f32 %v1393_v24, %v207_v31  ;;  %v27_v63 = vld [vmem:[%s2109_s0 + $0x30] sm:$0xff]  ;;  %v1285_v5 = vld [vmem:[%s2108_s3 + $0x38] sm:$0xff]   ;;  %v102_v11 = vld [vmem:[%s2109_s0 + $0x288] sm:$0xff]  ;;  %v129_v21 = vsub.s32 2, %v1345_v8 }
   0xc   :  { %1076 = vmatprep.subr.bf16.mxu0 %v1276_v7  ;;  %1257 = vmatprep.subr.bf16.mxu1 %v1276_v7  ;;  %v206_v40 = vmul.f32 %v1390_v23, %v93_v28  ;;  %v323_v41 = vadd.f32 %v1393_v24, %v210_v34  ;;  %v247_v42 = vadd.f32 %v1402_v27, %v134_v35  ;;  %v34_v16 = vld [vmem:[%s2109_s0 + $0x68] sm:$0xff] }
   0xd   :  { %v250_v43 = vadd.f32 %v1402_v27, %v137_v36  ;;  %v344_v49 = vmax.f32 %v248_v37, 0.0  ;;  %v347_v50 = vmax.f32 %v251_v38, 0.0  ;;  %v416_v51 = vmax.f32 %v320_v39, 0.0  ;;  %v109_v38 = vld [vmem:[%s2109_s0 + $0x2c0] sm:$0xff]  ;;  %v1287_v39 = vld [vmem:[%s2108_s3 + $0x88] sm:$0xff]  }
   0xe   :  { %v319_v52 = vadd.f32 %v1402_v27, %v206_v40  ;;  %v419_v54 = vmax.f32 %v323_v41, 0.0  ;;  %v343_v55 = vmax.f32 %v247_v42, 0.0  ;;  %v322_v57 = vadd.f32 %v1402_v27, %v209_v44  ;;  %v33_v44 = vld [vmem:[%s2109_s0 + $0x60] sm:$0xff] }
   0xf   :  { %1077 = vmatpush3.bf16.msra.mxu0 %v1277_v9  ;;  %1265 = vmatpush3.bf16.msra.mxu1 %v1277_v9  ;;  %v346_v56 = vmax.f32 %v250_v43, 0.0  ;;  %v440_v59 = vpack.c.bf16 %v347_v50, %v344_v49  ;;  %v144_v62 = vmul.f32 %v1376_v19, %v31_v46  ;;  %v213_v3 = vmul.f32 %v1376_v19, %v100_v53  ;;  %v36_v49 = vld [vmem:[%s2109_s0 + $0x78] sm:$0xff]  ;;  %v105_v50 = vld [vmem:[%s2109_s0 + $0x2a0] sm:$0xff] }
  0x10   :  { %1078 = vmatprep.subr.bf16.mxu0 %v1278_v10  ;;  %1258 = vmatprep.subr.bf16.mxu1 %v1278_v10  ;;  %v415_v60 = vmax.f32 %v319_v52, 0.0  ;;  %v476_v0 = vpack.c.bf16 %v419_v54, %v416_v51  ;;  %v418_v2 = vmax.f32 %v322_v57, 0.0  ;;  %v254_v6 = vadd.f32 %v1393_v24, %v141_v61  ;;  %v99_v10 = vld [vmem:[%s2109_s0 + $0x270] sm:$0xff]  ;;  %v108_v51 = vld [vmem:[%s2109_s0 + $0x2b8] sm:$0xff] }
  0x11   :  { %v439_v1 = vpack.c.bf16 %v346_v56, %v343_v55  ;;  %v257_v7 = vadd.f32 %v1393_v24, %v144_v62  ;;  %v216_v9 = vmul.f32 %v1376_v19, %v103_v58  ;;  %v140_v15 = vmul.f32 %v1390_v23, %v27_v63  ;;  %718 = vmatprep.mubr.bf16.mxu0 %v440_v59  ;;  %v40_v59 = vld [vmem:[%s2109_s0 + $0x98] sm:$0xff]  ;;  %v1288_v62 = vld [vmem:[%s2108_s3 + $0x90] sm:$0xff]  }
  0x12   :  { %v475_v12 = vpack.c.bf16 %v418_v2, %v415_v60  ;;  %814 = vmatprep.mubr.bf16.mxu1 %v476_v0  ;;  %v350_v22 = vmax.f32 %v254_v6, 0.0  ;;  %v143_v28 = vmul.f32 %v1390_v23, %v30_v4  ;;  %v212_v31 = vmul.f32 %v1390_v23, %v99_v10  ;;  %v43_v2 = vld [vmem:[%s2109_s0 + $0xb0] sm:$0xff]  ;;  %v112_v6 = vld [vmem:[%s2109_s0 + $0x2d8] sm:$0xff] }
  0x13   :  { %1079 = vmatpush3.bf16.msra.mxu0 %v1279_v13  ;;  %1266 = vmatpush3.bf16.msra.mxu1 %v1279_v13  ;;  %v1286_v13 = vld [vmem:[%s2108_s3 + $0x80] sm:$0xff]   ;;  %v353_v25 = vmax.f32 %v257_v7, 0.0  ;;  %v329_v26 = vadd.f32 %v1393_v24, %v216_v9  ;;  %v253_v30 = vadd.f32 %v1402_v27, %v140_v15  ;;  %v215_v32 = vmul.f32 %v1390_v23, %v102_v11 }
  0x14   :  { %1080 = vmatprep.subr.bf16.mxu0 %v1280_v14  ;;  %1259 = vmatprep.subr.bf16.mxu1 %v1280_v14  ;;  %v326_v14 = vadd.f32 %v1393_v24, %v213_v3  ;;  %v256_v36 = vadd.f32 %v1402_v27, %v143_v28  ;;  %v147_v37 = vmul.f32 %v1376_v19, %v34_v16 }
  0x15   :  { %v443_v34 = vpack.c.bf16 %v353_v25, %v350_v22  ;;  %v425_v35 = vmax.f32 %v329_v26, 0.0  ;;  %v349_v40 = vmax.f32 %v253_v30, 0.0  ;;  %v325_v41 = vadd.f32 %v1402_v27, %v212_v31  ;;  %v1289_v22 = vld [vmem:[%s2108_s3 + $0x98] sm:$0xff]  }
  0x16   :  { %v422_v29 = vmax.f32 %v326_v14, 0.0  ;;  %v328_v42 = vadd.f32 %v1402_v27, %v215_v32  ;;  %v352_v46 = vmax.f32 %v256_v36, 0.0  ;;  %v222_v55 = vmul.f32 %v1376_v19, %v109_v38  ;;  %v114_v36 = vld [vmem:[%s2109_s0 + $0x2e8] sm:$0xff] }
  0x17   :  { %1081 = vmatpush3.bf16.msra.mxu0 %v1281_v18  ;;  %1267 = vmatpush3.bf16.msra.mxu1 %v1281_v18  ;;  %v37_v18 = vld [vmem:[%s2109_s0 + $0x80] sm:$0xff]  ;;  %v421_v52 = vmax.f32 %v325_v41, 0.0  ;;  %v146_v58 = vmul.f32 %v1390_v23, %v33_v44  ;;  %v1523_v60 = vrot.slane %v1370_v17, %v129_v21  ;;  %v218_v4 = vmul.f32 %v1390_v23, %v105_v50  ;;  %v46_v38 = vld [vmem:[%s2109_s0 + $0xc8] sm:$0xff] }
  0x18   :  { %1082 = vmatprep.subr.bf16.mxu0 %v1282_v33  ;;  %1260 = vmatprep.subr.bf16.mxu1 %v1282_v33  ;;  %v106_v33 = vld [vmem:[%s2109_s0 + $0x2a8] sm:$0xff]  ;;  %v150_v43 = vmul.f32 %v1376_v19, %v37_v18  ;;  %v479_v45 = vpack.c.bf16 %v425_v35, %v422_v29  ;;  %v424_v53 = vmax.f32 %v328_v42, 0.0  ;;  %v442_v61 = vpack.c.bf16 %v352_v46, %v349_v40  ;;  %v39_v18 = vld [vmem:[%s2109_s0 + $0x90] sm:$0xff]  ;;  %v1290_v44 = vld [vmem:[%s2108_s3 + $0xa0] sm:$0xff]  }
  0x19   :  { %v335_v0 = vadd.f32 %v1393_v24, %v222_v55  ;;  %v259_v17 = vadd.f32 %v1402_v27, %v146_v58  ;;  %v153_v11 = vmul.f32 %v1376_v19, %v40_v59  ;;  %v331_v14 = vadd.f32 %v1402_v27, %v218_v4  ;;  %v42_v29 = vld [vmem:[%s2109_s0 + $0xa8] sm:$0xff]  ;;  %v111_v35 = vld [vmem:[%s2109_s0 + $0x2d0] sm:$0xff]  ;;  %v45_v59 = vld [vmem:[%s2109_s0 + $0xc0] sm:$0xff] }
  0x1a   :  { %v263_v54 = vadd.f32 %v1393_v24, %v150_v43  ;;  %v478_v7 = vpack.c.bf16 %v424_v53, %v421_v52  ;;  %v156_v16 = vmul.f32 %v1376_v19, %v43_v2  ;;  %v225_v28 = vmul.f32 %v1376_v19, %v112_v6  ;;  %v49_v43 = vld [vmem:[%s2109_s0 + $0xe0] sm:$0xff]  ;;  %v1291_v2 = vld [vmem:[%s2108_s3 + $0xa8] sm:$0xff]  }
  0x1b   :  { %1083 = vmatpush3.bf16.msra.mxu0 %v1283_v47  ;;  %1268 = vmatpush3.bf16.msra.mxu1 %v1283_v47  ;;  %v260_v47 = vadd.f32 %v1393_v24, %v147_v37  ;;  %v431_v9 = vmax.f32 %v335_v0, 0.0  ;;  %v266_v26 = vadd.f32 %v1393_v24, %v153_v11  ;;  %v1561_v30 = vrot.slane %v1381_v20, %v129_v21  ;;  %v29_v6 = vld [vmem:[%s2109_s0 + $0x40] sm:$0xff] }
  0x1c   :  { %1084 = vmatprep.subr.bf16.mxu0 %v1284_v48  ;;  %1261 = vmatprep.subr.bf16.mxu1 %v1284_v48  ;;  %v219_v48 = vmul.f32 %v1376_v19, %v106_v33  ;;  %v359_v63 = vmax.f32 %v263_v54, 0.0  ;;  %v355_v31 = vmax.f32 %v259_v17, 0.0  ;;  %v269_v33 = vadd.f32 %v1393_v24, %v156_v16  ;;  %v26_v54 = vld [vmem:[%s2109_s0 + $0x28] sm:$0xff] }
  0x1d   :  { %v356_v56 = vmax.f32 %v260_v47, 0.0  ;;  %v427_v8 = vmax.f32 %v331_v14, 0.0  ;;  %v338_v20 = vadd.f32 %v1393_v24, %v225_v28  ;;  %v152_v21 = vmul.f32 %v1390_v23, %v39_v18 }
  0x1e   :  { %v332_v57 = vadd.f32 %v1393_v24, %v219_v48  ;;  %v365_v40 = vmax.f32 %v269_v33, 0.0  ;;  %v155_v42 = vmul.f32 %v1390_v23, %v42_v29  ;;  %v224_v47 = vmul.f32 %v1390_v23, %v111_v35 }
  0x1f   :  { %1085 = vmatpush3.bf16.msra.mxu0 %v1285_v5  ;;  %1269 = vmatpush3.bf16.msra.mxu1 %v1285_v5  ;;  %v221_v5 = vmul.f32 %v1390_v23, %v108_v51  ;;  %v265_v46 = vadd.f32 %v1402_v27, %v152_v21  ;;  %v227_v48 = vmul.f32 %v1390_v23, %v114_v36  ;;  %v38_v36 = vld [vmem:[%s2109_s0 + $0x88] sm:$0xff] }
  0x20   :  { %1206 = vmatprep.subr.bf16.mxu1 %v1286_v13  ;;  %v428_v3 = vmax.f32 %v332_v57, 0.0  ;;  %v268_v52 = vadd.f32 %v1402_v27, %v155_v42  ;;  %v159_v53 = vmul.f32 %v1376_v19, %v46_v38  ;;  %v162_v58 = vmul.f32 %v1376_v19, %v49_v43  ;;  %v51_v38 = vld [vmem:[%s2109_s0 + $0xf0] sm:$0xff]  ;;  %v54_v43 = vld [vmem:[%s2109_s0 + $0x108] sm:$0xff] }
  0x21   :  { %v334_v15 = vadd.f32 %v1402_v27, %v221_v5  ;;  %v340_v57 = vadd.f32 %v1402_v27, %v227_v48  ;;  %v139_v5 = vmul.f32 %v1523_v60, %v26_v54  ;;  %v142_v28 = vmul.f32 %v1523_v60, %v29_v6  ;;  %v41_v48 = vld [vmem:[%s2109_s0 + $0xa0] sm:$0xff]  ;;  %v50_v6 = vld [vmem:[%s2109_s0 + $0xe8] sm:$0xff] }
  0x22   :  { %719 = vmatmul.mubr.bf16.vlgmr.msra.gmra.mrb[0].mxu0 %v439_v1  ;;  %815 = vmatmul.mubr.bf16.vlgmr.msra.gmra.mrb[0].mxu1 %v475_v12  ;;  %v149_v1 = vmul.f32 %v1390_v23, %v36_v49  ;;  %v115_v12 = vld [vmem:[%s2109_s0 + $0x2f0] sm:$0xff]  ;;  %v482_v25 = vpack.c.bf16 %v431_v9, %v428_v3  ;;  %v364_v17 = vmax.f32 %v268_v52, 0.0  ;;  %v275_v4 = vadd.f32 %v1393_v24, %v162_v58 }
  0x23   :  { %1207 = vmatpush3.bf16.msra.mxu1 %v1286_v13  ;;  %726 = vmatprep.mubr.bf16.mxu0 %v443_v34  ;;  %v446_v13 = vpack.c.bf16 %v359_v63, %v356_v56  ;;  %v228_v34 = vmul.f32 %v1376_v19, %v115_v12  ;;  %v430_v37 = vmax.f32 %v334_v15, 0.0  ;;  %v23_v49 = vld [vmem:[%s2109_s0 + $0x10] sm:$0xff]  ;;  %v337_v56 = vadd.f32 %v1402_v27, %v224_v47 }
  0x24   :  { %1208 = vmatprep.subr.bf16.mxu1 %v1287_v39  ;;  %822 = vmatprep.mubr.bf16.mxu1 %v479_v45  ;;  %v262_v10 = vadd.f32 %v1402_v27, %v149_v1  ;;  %v434_v45 = vmax.f32 %v338_v20, 0.0  ;;  %v272_v63 = vadd.f32 %v1393_v24, %v159_v53  ;;  %v136_v0 = vmul.f32 %v1523_v60, %v23_v49  ;;  %v48_v1 = vld [vmem:[%s2109_s0 + $0xd8] sm:$0xff] }
  0x25   :  { %v341_v41 = vadd.f32 %v1393_v24, %v228_v34  ;;  %v481_v55 = vpack.c.bf16 %v430_v37, %v427_v8  ;;  %v433_v9 = vmax.f32 %v337_v56, 0.0  ;;  %v158_v12 = vmul.f32 %v1390_v23, %v45_v59  ;;  %v44_v49 = vld [vmem:[%s2109_s0 + $0xb8] sm:$0xff] }
  0x26   :  { %v358_v32 = vmax.f32 %v262_v10, 0.0  ;;  %v436_v10 = vmax.f32 %v340_v57, 0.0  ;;  %v249_v11 = vadd.f32 %v1561_v30, %v136_v0  ;;  %v368_v14 = vmax.f32 %v272_v63, 0.0 }
  0x27   :  { %1209 = vmatpush3.bf16.msra.mxu1 %v1287_v39  ;;  %v362_v39 = vmax.f32 %v266_v26, 0.0  ;;  %v437_v51 = vmax.f32 %v341_v41, 0.0  ;;  %v371_v15 = vmax.f32 %v275_v4, 0.0  ;;  %v252_v16 = vadd.f32 %v1561_v30, %v139_v5 }
  0x28   :  { %1210 = vmatprep.subr.bf16.mxu1 %v1288_v62  ;;  %v445_v50 = vpack.c.bf16 %v358_v32, %v355_v31  ;;  %v161_v18 = vmul.f32 %v1390_v23, %v48_v1  ;;  %v271_v26 = vadd.f32 %v1402_v27, %v158_v12  ;;  %v35_v31 = vld [vmem:[%s2109_s0 + $0x70] sm:$0xff]  ;;  %v255_v37 = vadd.f32 %v1561_v30, %v142_v28 }
  0x29   :  { %v485_v3 = vpack.c.bf16 %v437_v51, %v434_v45  ;;  %v1292_v32 = vld [vmem:[%s2108_s3 + $0xb0] sm:$0xff]   ;;  %v348_v33 = vmax.f32 %v252_v16, 0.0  ;;  %v148_v42 = vmul.f32 %v1523_v60, %v35_v31  ;;  %v151_v47 = vmul.f32 %v1523_v60, %v38_v36 }
  0x2a   :  { %727 = vmatmul.mubr.bf16.gmra.mrb[4].mxu0 %v442_v61  ;;  %823 = vmatmul.mubr.bf16.gmra.mrb[4].mxu1 %v478_v7  ;;  %v449_v61 = vpack.c.bf16 %v365_v40, %v362_v39  ;;  %v32_v7 = vld [vmem:[%s2109_s0 + $0x58] sm:$0xff]  ;;  %v274_v34 = vadd.f32 %v1402_v27, %v161_v18  ;;  %v484_v39 = vpack.c.bf16 %v436_v10, %v433_v9  ;;  %v367_v45 = vmax.f32 %v271_v26, 0.0  ;;  %v57_v18 = vld [vmem:[%s2109_s0 + $0x120] sm:$0xff] }
  0x2b   :  { %1211 = vmatpush3.bf16.msra.mxu1 %v1288_v62  ;;  %734 = vmatprep.mubr.bf16.mxu0 %v446_v13  ;;  %v361_v62 = vmax.f32 %v265_v46, 0.0  ;;  %v52_v13 = vld [vmem:[%s2109_s0 + $0xf8] sm:$0xff]  ;;  %v145_v29 = vmul.f32 %v1523_v60, %v32_v7  ;;  %v452_v40 = vpack.c.bf16 %v371_v15, %v368_v14  ;;  %v351_v52 = vmax.f32 %v255_v37, 0.0  ;;  %v67_v37 = vld [vmem:[%s2109_s0 + $0x170] sm:$0xff] }
  0x2c   :  { %1212 = vmatprep.subr.bf16.mxu1 %v1289_v22  ;;  %830 = vmatprep.mubr.bf16.mxu1 %v482_v25  ;;  %v345_v25 = vmax.f32 %v249_v11, 0.0  ;;  %v165_v35 = vmul.f32 %v1376_v19, %v52_v13  ;;  %v370_v51 = vmax.f32 %v274_v34, 0.0  ;;  %v261_v53 = vadd.f32 %v1561_v30, %v148_v42 }
  0x2d   :  { %v448_v8 = vpack.c.bf16 %v364_v17, %v361_v62  ;;  %v258_v20 = vadd.f32 %v1561_v30, %v145_v29  ;;  %v164_v54 = vmul.f32 %v1390_v23, %v51_v38  ;;  %v264_v58 = vadd.f32 %v1561_v30, %v151_v47 }
  0x2e   :  { %v278_v41 = vadd.f32 %v1393_v24, %v165_v35  ;;  %v167_v59 = vmul.f32 %v1390_v23, %v54_v43  ;;  %v357_v63 = vmax.f32 %v261_v53, 0.0  ;;  %v154_v0 = vmul.f32 %v1523_v60, %v41_v48 }
  0x2f   :  { %1213 = vmatpush3.bf16.msra.mxu1 %v1289_v22  ;;  %v55_v22 = vld [vmem:[%s2109_s0 + $0x110] sm:$0xff]  ;;  %v354_v56 = vmax.f32 %v258_v20, 0.0  ;;  %v157_v1 = vmul.f32 %v1523_v60, %v44_v49  ;;  %v277_v17 = vadd.f32 %v1402_v27, %v164_v54  ;;  %v451_v11 = vpack.c.bf16 %v370_v51, %v367_v45 }
  0x30   :  { %1214 = vmatprep.subr.bf16.mxu1 %v1290_v44  ;;  %v168_v21 = vmul.f32 %v1376_v19, %v55_v22  ;;  %v374_v57 = vmax.f32 %v278_v41, 0.0  ;;  %v280_v4 = vadd.f32 %v1402_v27, %v167_v59  ;;  %v267_v7 = vadd.f32 %v1561_v30, %v154_v0  ;;  %v60_v22 = vld [vmem:[%s2109_s0 + $0x138] sm:$0xff]  ;;  %v63_v51 = vld [vmem:[%s2109_s0 + $0x150] sm:$0xff]  ;;  %v70_v0 = vld [vmem:[%s2109_s0 + $0x188] sm:$0xff] }
  0x31   :  { %v270_v9 = vadd.f32 %v1561_v30, %v157_v1  ;;  %v444_v13 = vpack.c.bf16 %v354_v56, %v351_v52  ;;  %v163_v16 = vmul.f32 %v1523_v60, %v50_v6  ;;  %v373_v29 = vmax.f32 %v277_v17, 0.0  ;;  %v66_v56 = vld [vmem:[%s2109_s0 + $0x168] sm:$0xff] }
  0x32   :  { %735 = vmatmul.mubr.bf16.gmra.mrb[8].mxu0 %v445_v50  ;;  %831 = vmatmul.mubr.bf16.gmra.mrb[8].mxu1 %v481_v55  ;;  %v281_v46 = vadd.f32 %v1393_v24, %v168_v21  ;;  %v1293_v50 = vld [vmem:[%s2108_s3 + $0xb8] sm:$0xff]   ;;  %v58_v55 = vld [vmem:[%s2109_s0 + $0x128] sm:$0xff]  ;;  %v376_v34 = vmax.f32 %v280_v4, 0.0  ;;  %v363_v35 = vmax.f32 %v267_v7, 0.0  ;;  %v170_v20 = vmul.f32 %v1390_v23, %v57_v18  ;;  %v73_v4 = vld [vmem:[%s2109_s0 + $0x1a0] sm:$0xff] }
  0x33   :  { %1215 = vmatpush3.bf16.msra.mxu1 %v1290_v44  ;;  %742 = vmatprep.mubr.bf16.mxu0 %v449_v61  ;;  %v441_v44 = vpack.c.bf16 %v348_v33, %v345_v25  ;;  %v61_v61 = vld [vmem:[%s2109_s0 + $0x140] sm:$0xff]  ;;  %v171_v5 = vmul.f32 %v1376_v19, %v58_v55  ;;  %v64_v33 = vld [vmem:[%s2109_s0 + $0x158] sm:$0xff]  ;;  %v366_v36 = vmax.f32 %v270_v9, 0.0  ;;  %v173_v21 = vmul.f32 %v1390_v23, %v60_v22  ;;  %v71_v9 = vld [vmem:[%s2109_s0 + $0x190] sm:$0xff] }
  0x34   :  { %1216 = vmatprep.subr.bf16.mxu1 %v1291_v2  ;;  %838 = vmatprep.mubr.bf16.mxu1 %v485_v3  ;;  %v377_v62 = vmax.f32 %v281_v46, 0.0  ;;  %v360_v3 = vmax.f32 %v264_v58, 0.0  ;;  %v174_v10 = vmul.f32 %v1376_v19, %v61_v61  ;;  %v53_v25 = vld [vmem:[%s2109_s0 + $0x100] sm:$0xff]  ;;  %v177_v43 = vmul.f32 %v1376_v19, %v64_v33  ;;  %v68_v58 = vld [vmem:[%s2109_s0 + $0x178] sm:$0xff] }
  0x35   :  { %v284_v14 = vadd.f32 %v1393_v24, %v171_v5  ;;  %v166_v38 = vmul.f32 %v1523_v60, %v53_v25  ;;  %v180_v47 = vmul.f32 %v1376_v19, %v67_v37  ;;  %v454_v48 = vpack.c.bf16 %v376_v34, %v373_v29 }
  0x36   :  { %v287_v15 = vadd.f32 %v1393_v24, %v174_v10  ;;  %v455_v26 = vpack.c.bf16 %v377_v62, %v374_v57  ;;  %v447_v28 = vpack.c.bf16 %v360_v3, %v357_v63  ;;  %v450_v49 = vpack.c.bf16 %v366_v36, %v363_v35  ;;  %v65_v57 = vld [vmem:[%s2109_s0 + $0x160] sm:$0xff] }
  0x37   :  { %1217 = vmatpush3.bf16.msra.mxu1 %v1291_v2  ;;  %v47_v2 = vld [vmem:[%s2109_s0 + $0xd0] sm:$0xff]  ;;  %v283_v52 = vadd.f32 %v1402_v27, %v170_v20  ;;  %v286_v53 = vadd.f32 %v1402_v27, %v173_v21  ;;  %v279_v54 = vadd.f32 %v1561_v30, %v166_v38  ;;  %v290_v62 = vadd.f32 %v1393_v24, %v177_v43 }
  0x38   :  { %1218 = vmatprep.subr.bf16.mxu1 %v1292_v32  ;;  %v160_v12 = vmul.f32 %v1523_v60, %v47_v2  ;;  %v383_v41 = vmax.f32 %v287_v15, 0.0  ;;  %v293_v63 = vadd.f32 %v1393_v24, %v180_v47  ;;  %v176_v17 = vmul.f32 %v1390_v23, %v63_v51  ;;  %v83_v51 = vld [vmem:[%s2109_s0 + $0x1f0] sm:$0xff] }
  0x39   :  { %v179_v5 = vmul.f32 %v1390_v23, %v66_v56  ;;  %v178_v6 = vmul.f32 %v1523_v60, %v65_v57  ;;  %v181_v7 = vmul.f32 %v1523_v60, %v68_v58  ;;  %v379_v10 = vmax.f32 %v283_v52, 0.0  ;;  %v86_v52 = vld [vmem:[%s2109_s0 + $0x208] sm:$0xff] }
  0x3a   :  { %743 = vmatmul.mubr.bf16.gmra.mrb[12].mxu0 %v448_v8  ;;  %839 = vmatmul.mubr.bf16.gmra.mrb[12].mxu1 %v484_v39  ;;  %v273_v31 = vadd.f32 %v1561_v30, %v160_v12  ;;  %v276_v8 = vadd.f32 %v1561_v30, %v163_v16  ;;  %v59_v39 = vld [vmem:[%s2109_s0 + $0x130] sm:$0xff]  ;;  %v375_v12 = vmax.f32 %v279_v54, 0.0  ;;  %v386_v16 = vmax.f32 %v290_v62, 0.0 }
  0x3b   :  { %1219 = vmatpush3.bf16.msra.mxu1 %v1292_v32  ;;  %750 = vmatprep.mubr.bf16.mxu0 %v452_v40  ;;  %v56_v32 = vld [vmem:[%s2109_s0 + $0x118] sm:$0xff]  ;;  %v380_v40 = vmax.f32 %v284_v14, 0.0  ;;  %v74_v14 = vld [vmem:[%s2109_s0 + $0x1a8] sm:$0xff]  ;;  %v389_v18 = vmax.f32 %v293_v63, 0.0  ;;  %v186_v22 = vmul.f32 %v1376_v19, %v73_v4  ;;  %v184_v29 = vmul.f32 %v1523_v60, %v71_v9 }
  0x3c   :  { %1220 = vmatprep.subr.bf16.mxu1 %v1293_v50  ;;  %1222 = vmatprep.mubr.bf16.mxu1 %v441_v44  ;;  %v169_v42 = vmul.f32 %v1523_v60, %v56_v32  ;;  %v62_v44 = vld [vmem:[%s2109_s0 + $0x148] sm:$0xff]  ;;  %v369_v45 = vmax.f32 %v273_v31, 0.0  ;;  %v372_v46 = vmax.f32 %v276_v8, 0.0  ;;  %v292_v31 = vadd.f32 %v1402_v27, %v179_v5  ;;  %v69_v8 = vld [vmem:[%s2109_s0 + $0x180] sm:$0xff]  ;;  %v92_v9 = vld [vmem:[%s2109_s0 + $0x238] sm:$0xff] }
  0x3d   :  { %v175_v55 = vmul.f32 %v1523_v60, %v62_v44  ;;  %v458_v59 = vpack.c.bf16 %v383_v41, %v380_v40  ;;  %v291_v32 = vadd.f32 %v1561_v30, %v178_v6  ;;  %v294_v33 = vadd.f32 %v1561_v30, %v181_v7  ;;  %v77_v40 = vld [vmem:[%s2109_s0 + $0x1c0] sm:$0xff]  ;;  %v80_v41 = vld [vmem:[%s2109_s0 + $0x1d8] sm:$0xff]  ;;  %v78_v6 = vld [vmem:[%s2109_s0 + $0x1c8] sm:$0xff] }
  0x3e   :  { %v282_v61 = vadd.f32 %v1561_v30, %v169_v42  ;;  %v453_v1 = vpack.c.bf16 %v372_v46, %v369_v45  ;;  %v187_v34 = vmul.f32 %v1523_v60, %v74_v14  ;;  %v299_v20 = vadd.f32 %v1393_v24, %v186_v22  ;;  %v76_v45 = vld [vmem:[%s2109_s0 + $0x1b8] sm:$0xff]  ;;  %v89_v7 = vld [vmem:[%s2109_s0 + $0x220] sm:$0xff]  ;;  %v82_v14 = vld [vmem:[%s2109_s0 + $0x1e8] sm:$0xff] }
  0x3f   :  { %1221 = vmatpush3.bf16.msra.mxu1 %v1293_v50  ;;  %v172_v50 = vmul.f32 %v1523_v60, %v59_v39  ;;  %v288_v3 = vadd.f32 %v1561_v30, %v175_v55  ;;  %v297_v21 = vadd.f32 %v1561_v30, %v184_v29  ;;  %v72_v39 = vld [vmem:[%s2109_s0 + $0x198] sm:$0xff]  ;;  %v461_v42 = vpack.c.bf16 %v389_v18, %v386_v16 }
  0x40   :  { %v378_v15 = vmax.f32 %v282_v61, 0.0  ;;  %v300_v38 = vadd.f32 %v1561_v30, %v187_v34  ;;  %v388_v46 = vmax.f32 %v292_v31, 0.0  ;;  %v387_v47 = vmax.f32 %v291_v32, 0.0 }
  0x41   :  { %v285_v2 = vadd.f32 %v1561_v30, %v172_v50  ;;  %v79_v50 = vld [vmem:[%s2109_s0 + $0x1d0] sm:$0xff]  ;;  %v185_v54 = vmul.f32 %v1390_v23, %v72_v39  ;;  %v190_v55 = vmul.f32 %v1523_v60, %v77_v40  ;;  %v193_v56 = vmul.f32 %v1523_v60, %v80_v41 }
  0x42   :  { %751 = vmatmul.mubr.bf16.gmra.mrb[16].mxu0 %v451_v11  ;;  %1223 = vmatmul.mubr.bf16.vlgmr.msra.gmra.mrb[16].mxu1 %v444_v13  ;;  %v382_v11 = vmax.f32 %v286_v53, 0.0  ;;  %v183_v13 = vmul.f32 %v1376_v19, %v70_v0  ;;  %v456_v37 = vpack.c.bf16 %v378_v15, %v375_v12  ;;  %v395_v57 = vmax.f32 %v299_v20, 0.0 }
  0x43   :  { %758 = vmatprep.mubr.bf16.mxu0 %v455_v26  ;;  %1226 = vmatprep.mubr.bf16.mxu1 %v447_v28  ;;  %v381_v25 = vmax.f32 %v285_v2, 0.0  ;;  %v384_v26 = vmax.f32 %v288_v3, 0.0  ;;  %v289_v28 = vadd.f32 %v1402_v27, %v176_v17  ;;  %v393_v58 = vmax.f32 %v297_v21, 0.0  ;;  %v75_v2 = vld [vmem:[%s2109_s0 + $0x1b0] sm:$0xff] }
  0x44   :  { %v457_v35 = vpack.c.bf16 %v382_v11, %v379_v10  ;;  %v296_v36 = vadd.f32 %v1393_v24, %v183_v13  ;;  %v189_v61 = vmul.f32 %v1376_v19, %v76_v45  ;;  %v192_v62 = vmul.f32 %v1376_v19, %v79_v50 }
  0x45   :  { %v459_v43 = vpack.c.bf16 %v384_v26, %v381_v25  ;;  %v385_v44 = vmax.f32 %v289_v28, 0.0  ;;  %v196_v63 = vmul.f32 %v1523_v60, %v83_v51  ;;  %v199_v0 = vmul.f32 %v1523_v60, %v86_v52  ;;  %v85_v25 = vld [vmem:[%s2109_s0 + $0x200] sm:$0xff]  ;;  %v95_v26 = vld [vmem:[%s2109_s0 + $0x250] sm:$0xff]  ;;  %v98_v28 = vld [vmem:[%s2109_s0 + $0x268] sm:$0xff] }
  0x46   :  { %v392_v53 = vmax.f32 %v296_v36, 0.0  ;;  %v298_v17 = vadd.f32 %v1402_v27, %v185_v54  ;;  %v303_v4 = vadd.f32 %v1561_v30, %v190_v55  ;;  %v306_v5 = vadd.f32 %v1561_v30, %v193_v56  ;;  %v101_v54 = vld [vmem:[%s2109_s0 + $0x280] sm:$0xff]  ;;  %v104_v55 = vld [vmem:[%s2109_s0 + $0x298] sm:$0xff] }
  0x47   :  { %v460_v3 = vpack.c.bf16 %v388_v46, %v385_v44  ;;  %v302_v13 = vadd.f32 %v1393_v24, %v189_v61  ;;  %v305_v15 = vadd.f32 %v1393_v24, %v192_v62  ;;  %v309_v16 = vadd.f32 %v1561_v30, %v196_v63 }
  0x48   :  { %v464_v11 = vpack.c.bf16 %v395_v57, %v392_v53  ;;  %v312_v18 = vadd.f32 %v1561_v30, %v199_v0  ;;  %v188_v22 = vmul.f32 %v1390_v23, %v75_v2  ;;  %v191_v31 = vmul.f32 %v1390_v23, %v78_v6  ;;  %v84_v53 = vld [vmem:[%s2109_s0 + $0x1f8] sm:$0xff]  ;;  %v107_v2 = vld [vmem:[%s2109_s0 + $0x2b0] sm:$0xff] }
  0x49   :  { %v202_v32 = vmul.f32 %v1523_v60, %v89_v7  ;;  %v394_v34 = vmax.f32 %v298_v17, 0.0  ;;  %v402_v36 = vmax.f32 %v306_v5, 0.0  ;;  %v198_v20 = vmul.f32 %v1376_v19, %v85_v25 }
  0x4a   :  { %759 = vmatmul.mubr.bf16.gmra.mrb[20].mxu0 %v454_v48  ;;  %1227 = vmatmul.mubr.bf16.gmra.mrb[20].mxu1 %v450_v49  ;;  %v390_v48 = vmax.f32 %v294_v33, 0.0  ;;  %v182_v49 = vmul.f32 %v1390_v23, %v69_v8  ;;  %v205_v33 = vmul.f32 %v1523_v60, %v92_v9  ;;  %v195_v8 = vmul.f32 %v1376_v19, %v82_v14 }
  0x4b   :  { %766 = vmatprep.mubr.bf16.mxu0 %v458_v59  ;;  %1230 = vmatprep.mubr.bf16.mxu1 %v453_v1  ;;  %v396_v59 = vmax.f32 %v300_v38, 0.0  ;;  %v208_v21 = vmul.f32 %v1523_v60, %v95_v26  ;;  %v211_v38 = vmul.f32 %v1523_v60, %v98_v28  ;;  %v401_v39 = vmax.f32 %v305_v15, 0.0 }
  0x4c   :  { %v295_v1 = vadd.f32 %v1402_v27, %v182_v49  ;;  %v462_v10 = vpack.c.bf16 %v390_v48, %v387_v47  ;;  %v405_v40 = vmax.f32 %v309_v16, 0.0  ;;  %v408_v41 = vmax.f32 %v312_v18, 0.0  ;;  %v81_v48 = vld [vmem:[%s2109_s0 + $0x1e0] sm:$0xff] }
  0x4d   :  { %v465_v12 = vpack.c.bf16 %v396_v59, %v393_v58  ;;  %v315_v44 = vadd.f32 %v1561_v30, %v202_v32  ;;  %v318_v45 = vadd.f32 %v1561_v30, %v205_v33  ;;  %v308_v47 = vadd.f32 %v1393_v24, %v195_v8  ;;  %v88_v59 = vld [vmem:[%s2109_s0 + $0x218] sm:$0xff] }
  0x4e   :  { %v391_v29 = vmax.f32 %v295_v1, 0.0  ;;  %v311_v50 = vadd.f32 %v1393_v24, %v198_v20  ;;  %v321_v51 = vadd.f32 %v1561_v30, %v208_v21  ;;  %v324_v52 = vadd.f32 %v1561_v30, %v211_v38  ;;  %v91_v1 = vld [vmem:[%s2109_s0 + $0x230] sm:$0xff]  ;;  %v116_v8 = vld [vmem:[%s2109_s0 + $0x2f8] sm:$0xff] }
  0x4f   :  { %v471_v57 = vpack.c.bf16 %v408_v41, %v405_v40  ;;  %v411_v62 = vmax.f32 %v315_v44, 0.0  ;;  %v414_v63 = vmax.f32 %v318_v45, 0.0  ;;  %v194_v0 = vmul.f32 %v1390_v23, %v81_v48 }
  0x50   :  { %v463_v46 = vpack.c.bf16 %v394_v34, %v391_v29  ;;  %v404_v17 = vmax.f32 %v308_v47, 0.0  ;;  %v214_v5 = vmul.f32 %v1523_v60, %v101_v54  ;;  %v217_v6 = vmul.f32 %v1523_v60, %v104_v55 }
  0x51   :  { %v407_v7 = vmax.f32 %v311_v50, 0.0  ;;  %v417_v9 = vmax.f32 %v321_v51, 0.0  ;;  %v307_v15 = vadd.f32 %v1402_v27, %v194_v0  ;;  %v474_v26 = vpack.c.bf16 %v414_v63, %v411_v62 }
  0x52   :  { %767 = vmatmul.mubr.bf16.gmra.mrb[24].mxu0 %v457_v35  ;;  %1231 = vmatmul.mubr.bf16.gmra.mrb[24].mxu1 %v456_v37  ;;  %v399_v35 = vmax.f32 %v303_v4, 0.0  ;;  %v398_v37 = vmax.f32 %v302_v13, 0.0  ;;  %v197_v4 = vmul.f32 %v1390_v23, %v84_v53  ;;  %v220_v13 = vmul.f32 %v1523_v60, %v107_v2 }
  0x53   :  { %774 = vmatprep.mubr.bf16.mxu0 %v461_v42  ;;  %1234 = vmatprep.mubr.bf16.mxu1 %v459_v43  ;;  %v301_v42 = vadd.f32 %v1402_v27, %v188_v22  ;;  %v304_v43 = vadd.f32 %v1402_v27, %v191_v31  ;;  %v327_v18 = vadd.f32 %v1561_v30, %v214_v5 }
  0x54   :  { %v468_v49 = vpack.c.bf16 %v402_v36, %v399_v35  ;;  %v467_v56 = vpack.c.bf16 %v401_v39, %v398_v37  ;;  %v310_v16 = vadd.f32 %v1402_v27, %v197_v4  ;;  %v330_v22 = vadd.f32 %v1561_v30, %v217_v6  ;;  %v90_v35 = vld [vmem:[%s2109_s0 + $0x228] sm:$0xff]  ;;  %v113_v36 = vld [vmem:[%s2109_s0 + $0x2e0] sm:$0xff] }
  0x55   :  { %v397_v58 = vmax.f32 %v301_v42, 0.0  ;;  %v400_v61 = vmax.f32 %v304_v43, 0.0  ;;  %v470_v28 = vpack.c.bf16 %v407_v7, %v404_v17  ;;  %v333_v33 = vadd.f32 %v1561_v30, %v220_v13 }
  0x56   :  { %v403_v37 = vmax.f32 %v307_v15, 0.0  ;;  %v406_v20 = vmax.f32 %v310_v16, 0.0  ;;  %v423_v21 = vmax.f32 %v327_v18, 0.0  ;;  %v203_v39 = vmul.f32 %v1390_v23, %v90_v35 }
  0x57   :  { %v466_v25 = vpack.c.bf16 %v400_v61, %v397_v58  ;;  %v226_v40 = vmul.f32 %v1523_v60, %v113_v36  ;;  %v229_v41 = vmul.f32 %v1523_v60, %v116_v8  ;;  %v429_v44 = vmax.f32 %v333_v33, 0.0 }
  0x59   :  { %v339_v50 = vadd.f32 %v1561_v30, %v226_v40 }
  0x5a   :  { %775 = vmatmul.mubr.bf16.gmra.mrb[28].mxu0 %v460_v3  ;;  %1235 = vmatmul.mubr.bf16.gmra.mrb[28].mxu1 %v462_v10  ;;  %v110_v3 = vld [vmem:[%s2109_s0 + $0x2c8] sm:$0xff]  ;;  %v420_v10 = vmax.f32 %v324_v52, 0.0 }
  0x5b   :  { %782 = vmatprep.mubr.bf16.mxu0 %v464_v11  ;;  %1238 = vmatprep.mubr.bf16.mxu1 %v465_v12  ;;  %v201_v11 = vmul.f32 %v1376_v19, %v88_v59  ;;  %v204_v12 = vmul.f32 %v1376_v19, %v91_v1  ;;  %v223_v14 = vmul.f32 %v1523_v60, %v110_v3  ;;  %v87_v19 = vld [vmem:[%s2109_s0 + $0x210] sm:$0xff]  ;;  %v435_v54 = vmax.f32 %v339_v50, 0.0 }
  0x5c   :  { %v477_v29 = vpack.c.bf16 %v420_v10, %v417_v9  ;;  %v200_v38 = vmul.f32 %v1390_v23, %v87_v19  ;;  %v342_v23 = vadd.f32 %v1561_v30, %v229_v41 }
  0x5d   :  { %v314_v31 = vadd.f32 %v1393_v24, %v201_v11  ;;  %v317_v32 = vadd.f32 %v1393_v24, %v204_v12  ;;  %v336_v34 = vadd.f32 %v1561_v30, %v223_v14  ;;  %v426_v24 = vmax.f32 %v330_v22, 0.0 }
  0x5e   :  { %v313_v48 = vadd.f32 %v1402_v27, %v200_v38  ;;  %v438_v55 = vmax.f32 %v342_v23, 0.0 }
  0x5f   :  { %v410_v42 = vmax.f32 %v314_v31, 0.0  ;;  %v413_v43 = vmax.f32 %v317_v32, 0.0  ;;  %v432_v45 = vmax.f32 %v336_v34, 0.0  ;;  %v480_v47 = vpack.c.bf16 %v426_v24, %v423_v21 }
  0x60   :  { %v409_v60 = vmax.f32 %v313_v48, 0.0 }
  0x61   :  { %v473_v51 = vpack.c.bf16 %v413_v43, %v410_v42  ;;  %v483_v52 = vpack.c.bf16 %v432_v45, %v429_v44  ;;  %v1932_v44 = vld [vmem:[%s2112_s4] ss:$0 sm:$0xff] }
  0x62   :  { %783 = vmatmul.mubr.bf16.gmra.mrb[32].mxu0 %v463_v46  ;;  %1239 = vmatmul.mubr.bf16.gmra.mrb[32].mxu1 %v468_v49  ;;  %v469_v46 = vpack.c.bf16 %v406_v20, %v403_v37  ;;  %v316_v49 = vadd.f32 %v1402_v27, %v203_v39 }
  0x63   :  { %790 = vmatprep.mubr.bf16.mxu0 %v467_v56  ;;  %1242 = vmatprep.mubr.bf16.mxu1 %v471_v57  ;;  %v486_v57 = vpack.c.bf16 %v438_v55, %v435_v54 }
  0x64   :  { %v412_v53 = vmax.f32 %v316_v49, 0.0 }
  0x66   :  { %v472_v56 = vpack.c.bf16 %v412_v53, %v409_v60 }
  0x6a   :  { %791 = vmatmul.mubr.bf16.gmra.mrb[36].mxu0 %v466_v25  ;;  %1243 = vmatmul.mubr.bf16.gmra.mrb[36].mxu1 %v474_v26 }
  0x6b   :  { %798 = vmatprep.mubr.bf16.mxu0 %v470_v28  ;;  %1246 = vmatprep.mubr.bf16.mxu1 %v477_v29 }
  0x72   :  { %799 = vmatmul.mubr.bf16.gmra.mrb[40].mxu0 %v469_v46  ;;  %1247 = vmatmul.mubr.bf16.gmra.mrb[40].mxu1 %v480_v47 }
  0x73   :  { %806 = vmatprep.mubr.bf16.mxu0 %v473_v51  ;;  %1250 = vmatprep.mubr.bf16.mxu1 %v483_v52 }
  0x7a   :  { %807 = vmatmul.mubr.bf16.gmra.mrb[44].mxu0 %v472_v56  ;;  %1251 = vmatmul.mubr.bf16.gmra.mrb[44].mxu1 %v486_v57 }
  0xf5   :  { %v1086_v58 = vpop.f32.mrb[0].mxu0  ;;  %v1158_v27 = vpop.f32.mrb[0].mxu1 }
  0xf6   :  { %v1087_v59 = vpop.f32.mrb[1].mxu0  ;;  %v1159_v61 = vpop.f32.mrb[1].mxu1 }
  0xf7   :  { %v1088_v62 = vadd.f32 %v1087_v59, %v1086_v58  ;;  %v1089_v30 = vpop.f32.mrb[2].mxu0  ;;  %v1913_v63 = vadd.f32 %v1159_v61, %v1158_v27  ;;  %v1161_v0 = vpop.f32.mrb[2].mxu1 }
  0xf8   :  { %v1090_v1 = vpop.f32.mrb[3].mxu0  ;;  %v1162_v2 = vpop.f32.mrb[3].mxu1 }
  0xf9   :  { %v1091_v3 = vadd.f32 %v1090_v1, %v1089_v30  ;;  %v1915_v17 = vadd.f32 %v1162_v2, %v1161_v0  ;;  %v721_v48 = vadd.f32 %v1088_v62, %v1932_v44 }
  0xfb   :  { %v724_v55 = vadd.f32 %v1091_v3, %v1932_v44 }
  0xfd   :  { %v1092_v4 = vpop.f32.mrb[4].mxu0  ;;  %v1164_v5 = vpop.f32.mrb[4].mxu1 }
  0xfe   :  { %v1093_v6 = vpop.f32.mrb[5].mxu0  ;;  %v1165_v7 = vpop.f32.mrb[5].mxu1 }
  0xff   :  { %v1094_v9 = vadd.f32 %v1093_v6, %v1092_v4  ;;  %v1095_v10 = vpop.f32.mrb[6].mxu0  ;;  %v1917_v11 = vadd.f32 %v1165_v7, %v1164_v5  ;;  %v1167_v12 = vpop.f32.mrb[6].mxu1 }
 0x100   :  { %v1096_v13 = vpop.f32.mrb[7].mxu0  ;;  %v1168_v14 = vpop.f32.mrb[7].mxu1 }
 0x101   :  { %v1097_v15 = vadd.f32 %v1096_v13, %v1095_v10  ;;  %v1919_v16 = vadd.f32 %v1168_v14, %v1167_v12  ;;  %v729_v45 = vadd.f32 %v1094_v9, %v1932_v44 }
 0x103   :  { %v732_v51 = vadd.f32 %v1097_v15, %v1932_v44 }
 0x105   :  { %v1098_v18 = vpop.f32.mrb[8].mxu0  ;;  %v1170_v22 = vpop.f32.mrb[8].mxu1 }
 0x106   :  { %v1099_v25 = vpop.f32.mrb[9].mxu0  ;;  %v1171_v26 = vpop.f32.mrb[9].mxu1 }
 0x107   :  { %v1100_v28 = vadd.f32 %v1099_v25, %v1098_v18  ;;  %v1101_v29 = vpop.f32.mrb[10].mxu0  ;;  %v1921_v19 = vadd.f32 %v1171_v26, %v1170_v22  ;;  %v1173_v31 = vpop.f32.mrb[10].mxu1 }
 0x108   :  { %v1102_v32 = vpop.f32.mrb[11].mxu0  ;;  %v1174_v33 = vpop.f32.mrb[11].mxu1 }
 0x109   :  { %v1103_v34 = vadd.f32 %v1102_v32, %v1101_v29  ;;  %v1923_v35 = vadd.f32 %v1174_v33, %v1173_v31  ;;  %v737_v0 = vadd.f32 %v1100_v28, %v1932_v44 }
 0x10b   :  { %v740_v10 = vadd.f32 %v1103_v34, %v1932_v44 }
 0x10d   :  { %v1104_v36 = vpop.f32.mrb[12].mxu0  ;;  %v1176_v8 = vpop.f32.mrb[12].mxu1 }
 0x10e   :  { %v1105_v37 = vpop.f32.mrb[13].mxu0  ;;  %v1177_v20 = vpop.f32.mrb[13].mxu1 }
 0x10f   :  { %v1106_v21 = vadd.f32 %v1105_v37, %v1104_v36  ;;  %v1107_v24 = vpop.f32.mrb[14].mxu0  ;;  %v1925_v38 = vadd.f32 %v1177_v20, %v1176_v8  ;;  %v1179_v39 = vpop.f32.mrb[14].mxu1 }
 0x110   :  { %v1108_v40 = vpop.f32.mrb[15].mxu0  ;;  %v1180_v41 = vpop.f32.mrb[15].mxu1 }
 0x111   :  { %v1109_v42 = vadd.f32 %v1108_v40, %v1107_v24  ;;  %v1927_v43 = vadd.f32 %v1180_v41, %v1179_v39  ;;  %v745_v61 = vadd.f32 %v1106_v21, %v1932_v44 }
 0x113   :  { %v748_v4 = vadd.f32 %v1109_v42, %v1932_v44 }
 0x115   :  { %v1110_v46 = vpop.f32.mrb[16].mxu0  ;;  %v1224_v47 = vpop.f32.mrb[16].mxu1 }
 0x116   :  { %v890_v49 = vadd.f32 %v1224_v47, %v729_v45  ;;  %v1111_v50 = vpop.f32.mrb[17].mxu0  ;;  %v881_v23 = vpop.f32.mrb[17].mxu1 }
 0x117   :  { %v1112_v52 = vadd.f32 %v1111_v50, %v1110_v46  ;;  %v882_v60 = vadd.f32 %v881_v23, %v721_v48  ;;  %v1113_v53 = vpop.f32.mrb[18].mxu0  ;;  %v1225_v54 = vpop.f32.mrb[18].mxu1 }
 0x118   :  { %1011 = vst.msk [vmem:[%s2113_s5 + $0x10] sm:$0xff] %vm1008_vm0, %v890_v49  ;;  %v893_v56 = vadd.f32 %v1225_v54, %v732_v51  ;;  %v1114_v57 = vpop.f32.mrb[19].mxu0  ;;  %v884_v58 = vpop.f32.mrb[19].mxu1 }
 0x119   :  { %1009 = vst.msk [vmem:[%s2113_s5] sm:$0xff] %vm1008_vm0, %v882_v60  ;;  %v1115_v27 = vadd.f32 %v1114_v57, %v1113_v53  ;;  %v885_v59 = vadd.f32 %v884_v58, %v724_v55  ;;  %v753_v28 = vadd.f32 %v1112_v52, %v1932_v44 }
 0x11a   :  { %1012 = vst.msk [vmem:[%s2113_s5 + $0x18] sm:$0xff] %vm1008_vm0, %v893_v56 }
 0x11b   :  { %1010 = vst.msk [vmem:[%s2113_s5 + $0x8] sm:$0xff] %vm1008_vm0, %v885_v59  ;;  %v756_v20 = vadd.f32 %v1115_v27, %v1932_v44 }
 0x11d   :  { %v1116_v62 = vpop.f32.mrb[20].mxu0  ;;  %v1228_v30 = vpop.f32.mrb[20].mxu1 }
 0x11e   :  { %v906_v1 = vadd.f32 %v1228_v30, %v745_v61  ;;  %v1117_v2 = vpop.f32.mrb[21].mxu0  ;;  %v897_v3 = vpop.f32.mrb[21].mxu1 }
 0x11f   :  { %v1118_v5 = vadd.f32 %v1117_v2, %v1116_v62  ;;  %v898_v6 = vadd.f32 %v897_v3, %v737_v0  ;;  %v1119_v7 = vpop.f32.mrb[22].mxu0  ;;  %v1229_v9 = vpop.f32.mrb[22].mxu1 }
 0x120   :  { %1015 = vst.msk [vmem:[%s2113_s5 + $0x30] sm:$0xff] %vm1008_vm0, %v906_v1  ;;  %v909_v12 = vadd.f32 %v1229_v9, %v748_v4  ;;  %v1120_v13 = vpop.f32.mrb[23].mxu0  ;;  %v900_v14 = vpop.f32.mrb[23].mxu1 }
 0x121   :  { %1013 = vst.msk [vmem:[%s2113_s5 + $0x20] sm:$0xff] %vm1008_vm0, %v898_v6  ;;  %v1121_v15 = vadd.f32 %v1120_v13, %v1119_v7  ;;  %v901_v18 = vadd.f32 %v900_v14, %v740_v10  ;;  %v761_v22 = vadd.f32 %v1118_v5, %v1932_v44 }
 0x122   :  { %1016 = vst.msk [vmem:[%s2113_s5 + $0x38] sm:$0xff] %vm1008_vm0, %v909_v12 }
 0x123   :  { %1014 = vst.msk [vmem:[%s2113_s5 + $0x28] sm:$0xff] %vm1008_vm0, %v901_v18  ;;  %v764_v33 = vadd.f32 %v1121_v15, %v1932_v44 }
 0x125   :  { %v1122_v25 = vpop.f32.mrb[24].mxu0  ;;  %v1232_v26 = vpop.f32.mrb[24].mxu1 }
 0x126   :  { %v922_v29 = vadd.f32 %v1232_v26, %v761_v22  ;;  %v1123_v31 = vpop.f32.mrb[25].mxu0  ;;  %v913_v32 = vpop.f32.mrb[25].mxu1 }
 0x127   :  { %v1124_v34 = vadd.f32 %v1123_v31, %v1122_v25  ;;  %v914_v36 = vadd.f32 %v913_v32, %v753_v28  ;;  %v1125_v8 = vpop.f32.mrb[26].mxu0  ;;  %v1233_v37 = vpop.f32.mrb[26].mxu1 }
 0x128   :  { %1019 = vst.msk [vmem:[%s2113_s5 + $0x50] sm:$0xff] %vm1008_vm0, %v922_v29  ;;  %v925_v21 = vadd.f32 %v1233_v37, %v764_v33  ;;  %v1126_v24 = vpop.f32.mrb[27].mxu0  ;;  %v916_v39 = vpop.f32.mrb[27].mxu1 }
 0x129   :  { %1017 = vst.msk [vmem:[%s2113_s5 + $0x40] sm:$0xff] %vm1008_vm0, %v914_v36  ;;  %v1127_v40 = vadd.f32 %v1126_v24, %v1125_v8  ;;  %v917_v41 = vadd.f32 %v916_v39, %v756_v20  ;;  %v769_v46 = vadd.f32 %v1124_v34, %v1932_v44  ;;  %v825_v34 = vadd.f32 %v1917_v11, %v1932_v44 }
 0x12a   :  { %1020 = vst.msk [vmem:[%s2113_s5 + $0x58] sm:$0xff] %vm1008_vm0, %v925_v21  ;;  %v817_v20 = vadd.f32 %v1913_v63, %v1932_v44 }
 0x12b   :  { %1018 = vst.msk [vmem:[%s2113_s5 + $0x48] sm:$0xff] %vm1008_vm0, %v917_v41  ;;  %v772_v52 = vadd.f32 %v1127_v40, %v1932_v44  ;;  %v828_v40 = vadd.f32 %v1919_v16, %v1932_v44 }
 0x12d   :  { %v1128_v42 = vpop.f32.mrb[28].mxu0  ;;  %v1236_v45 = vpop.f32.mrb[28].mxu1 }
 0x12e   :  { %v1129_v47 = vpop.f32.mrb[29].mxu0  ;;  %v929_v48 = vpop.f32.mrb[29].mxu1 }
 0x12f   :  { %v1130_v49 = vadd.f32 %v1129_v47, %v1128_v42  ;;  %v930_v50 = vadd.f32 %v929_v48, %v769_v46  ;;  %v1131_v23 = vpop.f32.mrb[30].mxu0  ;;  %v1237_v51 = vpop.f32.mrb[30].mxu1  ;;  %v820_v46 = vadd.f32 %v1915_v17, %v1932_v44 }
 0x130   :  { %v1132_v60 = vpop.f32.mrb[31].mxu0  ;;  %v932_v53 = vpop.f32.mrb[31].mxu1 }
 0x131   :  { %v777_v54 = vadd.f32 %v1130_v49, %v1932_v44  ;;  %1021 = vst.msk [vmem:[%s2113_s5 + $0x60] sm:$0xff] %vm1008_vm0, %v930_v50  ;;  %v1133_v55 = vadd.f32 %v1132_v60, %v1131_v23  ;;  %v933_v56 = vadd.f32 %v932_v53, %v772_v52 }
 0x133   :  { %v938_v57 = vadd.f32 %v1236_v45, %v777_v54  ;;  %v780_v58 = vadd.f32 %v1133_v55, %v1932_v44  ;;  %1022 = vst.msk [vmem:[%s2113_s5 + $0x68] sm:$0xff] %vm1008_vm0, %v933_v56  ;;  %v833_v54 = vadd.f32 %v1921_v19, %v1932_v44 }
 0x135   :  { %1023 = vst.msk [vmem:[%s2113_s5 + $0x70] sm:$0xff] %vm1008_vm0, %v938_v57  ;;  %v941_v27 = vadd.f32 %v1237_v51, %v780_v58  ;;  %v1134_v59 = vpop.f32.mrb[32].mxu0  ;;  %v1240_v61 = vpop.f32.mrb[32].mxu1  ;;  %v841_v51 = vadd.f32 %v1925_v38, %v1932_v44  ;;  %v844_v58 = vadd.f32 %v1927_v43, %v1932_v44 }
 0x136   :  { %v1135_v62 = vpop.f32.mrb[33].mxu0  ;;  %v945_v30 = vpop.f32.mrb[33].mxu1 }
 0x137   :  { %1024 = vst.msk [vmem:[%s2113_s5 + $0x78] sm:$0xff] %vm1008_vm0, %v941_v27  ;;  %v1136_v0 = vadd.f32 %v1135_v62, %v1134_v59  ;;  %v1137_v1 = vpop.f32.mrb[34].mxu0  ;;  %v1241_v2 = vpop.f32.mrb[34].mxu1  ;;  %v836_v62 = vadd.f32 %v1923_v35, %v1932_v44 }
 0x138   :  { %v1138_v3 = vpop.f32.mrb[35].mxu0  ;;  %v948_v4 = vpop.f32.mrb[35].mxu1 }
 0x139   :  { %v785_v5 = vadd.f32 %v1136_v0, %v1932_v44  ;;  %v1139_v6 = vadd.f32 %v1138_v3, %v1137_v1 }
 0x13b   :  { %v946_v7 = vadd.f32 %v945_v30, %v785_v5  ;;  %v788_v9 = vadd.f32 %v1139_v6, %v1932_v44 }
 0x13d   :  { %1025 = vst.msk [vmem:[%s2113_s5 + $0x80] sm:$0xff] %vm1008_vm0, %v946_v7  ;;  %v949_v10 = vadd.f32 %v948_v4, %v788_v9  ;;  %v1140_v12 = vpop.f32.mrb[36].mxu0  ;;  %v2020_v13 = vpop.f32.mrb[36].mxu1 }
 0x13e   :  { %v1141_v14 = vpop.f32.mrb[37].mxu0  ;;  %v961_v15 = vpop.f32.mrb[37].mxu1 }
 0x13f   :  { %1026 = vst.msk [vmem:[%s2113_s5 + $0x88] sm:$0xff] %vm1008_vm0, %v949_v10  ;;  %v1142_v18 = vadd.f32 %v1141_v14, %v1140_v12  ;;  %v1143_v22 = vpop.f32.mrb[38].mxu0  ;;  %v2026_v25 = vpop.f32.mrb[38].mxu1 }
 0x140   :  { %v1144_v26 = vpop.f32.mrb[39].mxu0  ;;  %v964_v28 = vpop.f32.mrb[39].mxu1 }
 0x141   :  { %v793_v29 = vadd.f32 %v1142_v18, %v1932_v44  ;;  %v1145_v31 = vadd.f32 %v1144_v26, %v1143_v22 }
 0x143   :  { %v954_v32 = vadd.f32 %v1240_v61, %v793_v29  ;;  %v796_v33 = vadd.f32 %v1145_v31, %v1932_v44 }
 0x145   :  { %1027 = vst.msk [vmem:[%s2113_s5 + $0x90] sm:$0xff] %vm1008_vm0, %v954_v32  ;;  %v957_v36 = vadd.f32 %v1241_v2, %v796_v33  ;;  %v1146_v8 = vpop.f32.mrb[40].mxu0  ;;  %v1248_v37 = vpop.f32.mrb[40].mxu1 }
 0x146   :  { %v986_v21 = vadd.f32 %v1248_v37, %v825_v34  ;;  %v1147_v24 = vpop.f32.mrb[41].mxu0  ;;  %v977_v39 = vpop.f32.mrb[41].mxu1 }
 0x147   :  { %1028 = vst.msk [vmem:[%s2113_s5 + $0x98] sm:$0xff] %vm1008_vm0, %v957_v36  ;;  %v1148_v11 = vadd.f32 %v1147_v24, %v1146_v8  ;;  %v978_v41 = vadd.f32 %v977_v39, %v817_v20  ;;  %v1149_v42 = vpop.f32.mrb[42].mxu0  ;;  %v1249_v45 = vpop.f32.mrb[42].mxu1 }
 0x148   :  { %1035 = vst.msk [vmem:[%s2113_s5 + $0xd0] sm:$0xff] %vm1008_vm0, %v986_v21  ;;  %v989_v63 = vadd.f32 %v1249_v45, %v828_v40  ;;  %v1150_v47 = vpop.f32.mrb[43].mxu0  ;;  %v980_v16 = vpop.f32.mrb[43].mxu1 }
 0x149   :  { %v801_v48 = vadd.f32 %v1148_v11, %v1932_v44  ;;  %1033 = vst.msk [vmem:[%s2113_s5 + $0xc0] sm:$0xff] %vm1008_vm0, %v978_v41  ;;  %v1151_v49 = vadd.f32 %v1150_v47, %v1149_v42  ;;  %v981_v50 = vadd.f32 %v980_v16, %v820_v46 }
 0x14a   :  { %1036 = vst.msk [vmem:[%s2113_s5 + $0xd8] sm:$0xff] %vm1008_vm0, %v989_v63 }
 0x14b   :  { %v962_v17 = vadd.f32 %v961_v15, %v801_v48  ;;  %v804_v23 = vadd.f32 %v1151_v49, %v1932_v44  ;;  %1034 = vst.msk [vmem:[%s2113_s5 + $0xc8] sm:$0xff] %vm1008_vm0, %v981_v50 }
 0x14d   :  { %1029 = vst.msk [vmem:[%s2113_s5 + $0xa0] sm:$0xff] %vm1008_vm0, %v962_v17  ;;  %v965_v52 = vadd.f32 %v964_v28, %v804_v23  ;;  %v1152_v60 = vpop.f32.mrb[44].mxu0  ;;  %v1252_v53 = vpop.f32.mrb[44].mxu1 }
 0x14e   :  { %v1002_v55 = vadd.f32 %v1252_v53, %v841_v51  ;;  %v1153_v56 = vpop.f32.mrb[45].mxu0  ;;  %v993_v57 = vpop.f32.mrb[45].mxu1 }
 0x14f   :  { %1030 = vst.msk [vmem:[%s2113_s5 + $0xa8] sm:$0xff] %vm1008_vm0, %v965_v52  ;;  %v1154_v38 = vadd.f32 %v1153_v56, %v1152_v60  ;;  %v994_v27 = vadd.f32 %v993_v57, %v833_v54  ;;  %v1155_v59 = vpop.f32.mrb[46].mxu0  ;;  %v1253_v61 = vpop.f32.mrb[46].mxu1 }
 0x150   :  { %1039 = vst.msk [vmem:[%s2113_s5 + $0xf0] sm:$0xff] %vm1008_vm0, %v1002_v55  ;;  %v1005_v19 = vadd.f32 %v1253_v61, %v844_v58  ;;  %v1156_v30 = vpop.f32.mrb[47].mxu0  ;;  %v996_v43 = vpop.f32.mrb[47].mxu1 }
 0x151   :  { %v809_v0 = vadd.f32 %v1154_v38, %v1932_v44  ;;  %1037 = vst.msk [vmem:[%s2113_s5 + $0xe0] sm:$0xff] %vm1008_vm0, %v994_v27  ;;  %v1157_v1 = vadd.f32 %v1156_v30, %v1155_v59  ;;  %v997_v2 = vadd.f32 %v996_v43, %v836_v62 }
 0x152   :  { %1040 = vst.msk [vmem:[%s2113_s5 + $0xf8] sm:$0xff] %vm1008_vm0, %v1005_v19 }
 0x153   :  { %v970_v35 = vadd.f32 %v2020_v13, %v809_v0  ;;  %v812_v3 = vadd.f32 %v1157_v1, %v1932_v44  ;;  %1038 = vst.msk [vmem:[%s2113_s5 + $0xe8] sm:$0xff] %vm1008_vm0, %v997_v2 }
 0x155   :  { %1031 = vst.msk [vmem:[%s2113_s5 + $0xb0] sm:$0xff] %vm1008_vm0, %v970_v35  ;;  %v973_v4 = vadd.f32 %v2026_v25, %v812_v3 }
 0x157   :  { %1032 = vst.msk [vmem:[%s2113_s5 + $0xb8] sm:$0xff] %vm1008_vm0, %v973_v4 }

// kernel: hdnet_forward.7
= control target key start
LH: loop header
LB: loop body
LE: loop exit
PB: predicated region body
PF: predicated region fallthrough
CT: control target
= control target key end

     0   :  { %v3229_v17 = vlaneseq  ;;  %s3221_s3 = inlined_call_operand.vmem [shape: bf16[256,384], index: 3, kind: input, shape index: {}]   ;;  %s3222_s0 = inlined_call_operand.vmem [shape: f32[256,256], index: 0, kind: input, shape index: {}]   ;;  %s3223_s1 = inlined_call_operand.vmem [shape: f32[1,256], index: 1, kind: input, shape index: {}]   ;;  %s3224_s2 = inlined_call_operand.vmem [shape: f32[1,256], index: 2, kind: input, shape index: {}]   ;;  %s3225_s4 = inlined_call_operand.vmem [shape: f32[256,256], index: 4, kind: output, shape index: {0}]   ;;  %s3226_s5 = inlined_call_operand.vmem [shape: f32[256,384], index: 5, kind: output, shape index: {1}]   ;;  %s3227_s6 = inlined_call_operand.vmem [shape: f32[1,384], index: 6, kind: output, shape index: {2}]   ;;  %s3228_s7 = inlined_call_operand.vmem [shape: f32[1,384], index: 7, kind: output, shape index: {3}]  }
   0x1   :  { %v1738_v0 = vld [vmem:[%s3221_s3 + $0x4] ss:$12 sps:$4 sm:$0xff]   ;;  %v1740_v1 = vld [vmem:[%s3221_s3 + $0xc8] ss:$12 sps:$4 sm:$0xff]   ;;  %v1741_v2 = vld [vmem:[%s3221_s3] ss:$12 sps:$4 sm:$0xff]  }
   0x2   :  { %718 = vmatprep.subr.bf16.mxu0 %v1738_v0  ;;  %1624 = vmatprep.subr.bf16.mxu1 %v1740_v1  ;;  %v1742_v3 = vld [vmem:[%s3221_s3 + $0x8] ss:$12 sps:$4 sm:$0xff]   ;;  %v1745_v5 = vld [vmem:[%s3221_s3 + $0xe0] ss:$12 sps:$4 sm:$0xff]   ;;  %v1746_v6 = vld [vmem:[%s3221_s3 + $0x18] ss:$12 sps:$4 sm:$0xff]  }
   0x3   :  { %719 = vmatpush1.bf16.msra.mxu0 %v1741_v2  ;;  %v1743_v4 = vld [vmem:[%s3221_s3 + $0x1c] ss:$12 sps:$4 sm:$0xff]   ;;  %1625 = vmatpush3.bf16.msra.mxu1 %v1742_v3  ;;  %v1747_v7 = vld [vmem:[%s3221_s3 + $0x20] ss:$12 sps:$4 sm:$0xff]   ;;  %v1750_v9 = vld [vmem:[%s3221_s3 + $0xf8] ss:$12 sps:$4 sm:$0xff]  }
   0x4   :  { %720 = vmatprep.subr.bf16.mxu0 %v1743_v4  ;;  %1626 = vmatprep.subr.bf16.mxu1 %v1745_v5  ;;  %v1748_v8 = vld [vmem:[%s3221_s3 + $0x34] ss:$12 sps:$4 sm:$0xff]   ;;  %v1751_v10 = vld [vmem:[%s3221_s3 + $0x30] ss:$12 sps:$4 sm:$0xff]   ;;  %v1752_v11 = vld [vmem:[%s3221_s3 + $0x38] ss:$12 sps:$4 sm:$0xff]  }
   0x5   :  { %v1753_v12 = vld [vmem:[%s3221_s3 + $0x4c] ss:$12 sps:$4 sm:$0xff]   ;;  %v1755_v13 = vld [vmem:[%s3221_s3 + $0x110] ss:$12 sps:$4 sm:$0xff]   ;;  %v1756_v14 = vld [vmem:[%s3221_s3 + $0x48] ss:$12 sps:$4 sm:$0xff]  }
   0x6   :  { %v1757_v15 = vld [vmem:[%s3221_s3 + $0x50] ss:$12 sps:$4 sm:$0xff]   ;;  %v1760_v18 = vld [vmem:[%s3221_s3 + $0x128] ss:$12 sps:$4 sm:$0xff]   ;;  %v1761_v19 = vld [vmem:[%s3221_s3 + $0x60] ss:$12 sps:$4 sm:$0xff]  }
   0x7   :  { %721 = vmatpush1.bf16.msra.mxu0 %v1746_v6  ;;  %1627 = vmatpush3.bf16.msra.mxu1 %v1747_v7  ;;  %v1758_v16 = vld [vmem:[%s3221_s3 + $0x64] ss:$12 sps:$4 sm:$0xff]   ;;  %v1762_v20 = vld [vmem:[%s3221_s3 + $0x68] ss:$12 sps:$4 sm:$0xff]   ;;  %v1765_v22 = vld [vmem:[%s3221_s3 + $0x140] ss:$12 sps:$4 sm:$0xff]  }
   0x8   :  { %722 = vmatprep.subr.bf16.mxu0 %v1748_v8  ;;  %1628 = vmatprep.subr.bf16.mxu1 %v1750_v9  ;;  %v1763_v21 = vld [vmem:[%s3221_s3 + $0x7c] ss:$12 sps:$4 sm:$0xff]   ;;  %v1911_v23 = vshrl.u32 %v3229_v17, 7  ;;  %v1766_v24 = vld [vmem:[%s3221_s3 + $0x78] ss:$12 sps:$4 sm:$0xff]   ;;  %v24_v46 = vld [vmem:[%s3222_s0 + $0x10] sm:$0xff] }
   0x9   :  { %v1767_v25 = vld [vmem:[%s3221_s3 + $0x80] ss:$12 sps:$4 sm:$0xff]   ;;  %v1770_v27 = vld [vmem:[%s3221_s3 + $0x158] ss:$12 sps:$4 sm:$0xff]   ;;  %v1771_v28 = vld [vmem:[%s3221_s3 + $0x90] ss:$12 sps:$4 sm:$0xff]  }
   0xa   :  { %v1768_v26 = vld [vmem:[%s3221_s3 + $0x94] ss:$12 sps:$4 sm:$0xff]   ;;  %v90_v29 = vsub.s32 0, %v1911_v23  ;;  %v94_v30 = vsub.s32 1, %v1911_v23  ;;  %v1772_v31 = vld [vmem:[%s3221_s3 + $0x98] ss:$12 sps:$4 sm:$0xff]  }
   0xb   :  { %723 = vmatpush1.bf16.msra.mxu0 %v1751_v10  ;;  %1629 = vmatpush3.bf16.msra.mxu1 %v1752_v11  ;;  %v1773_v32 = vld [vmem:[%s3221_s3 + $0xac] ss:$12 sps:$4 sm:$0xff]   ;;  %v1775_v33 = vld [vmem:[%s3221_s3 + $0x170] ss:$12 sps:$4 sm:$0xff]   ;;  %v1776_v34 = vld [vmem:[%s3221_s3 + $0xa8] ss:$12 sps:$4 sm:$0xff]  }
   0xc   :  { %724 = vmatprep.subr.bf16.mxu0 %v1753_v12  ;;  %1630 = vmatprep.subr.bf16.mxu1 %v1755_v13  ;;  %v23_v35 = vld [vmem:[%s3222_s0 + $0x8] sm:$0xff]  ;;  %v25_v36 = vld [vmem:[%s3222_s0 + $0x18] sm:$0xff]  ;;  %v86_v37 = vld [vmem:[%s3223_s1] sm:$0x3] }
   0xd   :  { %v162_v38 = vld [vmem:[%s3224_s2] sm:$0x3]  ;;  %v1777_v39 = vld [vmem:[%s3221_s3 + $0xb0] ss:$12 sps:$4 sm:$0xff]   ;;  %v1957_v40 = vrot.slane %v86_v37, %v90_v29  ;;  %v1959_v41 = vrot.slane %v86_v37, %v94_v30  ;;  %v27_v51 = vld [vmem:[%s3222_s0 + $0x28] sm:$0xff] }
   0xe   :  { %v1961_v42 = vrot.slane %v162_v38, %v90_v29  ;;  %v1963_v43 = vrot.slane %v162_v38, %v94_v30  ;;  %v1778_v44 = vld [vmem:[%s3221_s3 + $0xc4] ss:$12 sps:$4 sm:$0xff]   ;;  %v29_v52 = vld [vmem:[%s3222_s0 + $0x38] sm:$0xff]  ;;  %v1780_v57 = vld [vmem:[%s3221_s3 + $0xc0] ss:$12 sps:$4 sm:$0xff]  }
   0xf   :  { %725 = vmatpush1.bf16.msra.mxu0 %v1756_v14  ;;  %1631 = vmatpush3.bf16.msra.mxu1 %v1757_v15  ;;  %v22_v45 = vld [vmem:[%s3222_s0] sm:$0xff]  ;;  %v99_v47 = vmul.f32 %v1959_v41, %v23_v35  ;;  %v101_v48 = vmul.f32 %v1959_v41, %v25_v36  ;;  %v100_v50 = vmul.f32 %v1957_v40, %v24_v46  ;;  %v1781_v58 = vld [vmem:[%s3221_s3 + $0xdc] ss:$12 sps:$4 sm:$0xff]   ;;  %v28_v62 = vld [vmem:[%s3222_s0 + $0x30] sm:$0xff] }
  0x10   :  { %726 = vmatprep.subr.bf16.mxu0 %v1758_v16  ;;  %1632 = vmatprep.subr.bf16.mxu1 %v1760_v18  ;;  %v98_v49 = vmul.f32 %v1957_v40, %v22_v45  ;;  %v103_v59 = vmul.f32 %v1959_v41, %v27_v51  ;;  %v105_v60 = vmul.f32 %v1959_v41, %v29_v52  ;;  %v26_v61 = vld [vmem:[%s3222_s0 + $0x20] sm:$0xff]  ;;  %v31_v8 = vld [vmem:[%s3222_s0 + $0x48] sm:$0xff]  ;;  %v33_v11 = vld [vmem:[%s3222_s0 + $0x58] sm:$0xff] }
  0x11   :  { %v175_v53 = vadd.f32 %v1963_v43, %v99_v47  ;;  %v177_v54 = vadd.f32 %v1963_v43, %v101_v48  ;;  %v176_v56 = vadd.f32 %v1961_v42, %v100_v50  ;;  %v1783_v3 = vld [vmem:[%s3221_s3 + $0xd8] ss:$12 sps:$4 sm:$0xff]   ;;  %v102_v6 = vmul.f32 %v1957_v40, %v26_v61  ;;  %v1784_v15 = vld [vmem:[%s3221_s3 + $0xf4] ss:$12 sps:$4 sm:$0xff]   ;;  %v1786_v29 = vld [vmem:[%s3221_s3 + $0xf0] ss:$12 sps:$4 sm:$0xff]  }
  0x12   :  { %v174_v55 = vadd.f32 %v1961_v42, %v98_v49  ;;  %v179_v4 = vadd.f32 %v1963_v43, %v103_v59  ;;  %v181_v5 = vadd.f32 %v1963_v43, %v105_v60  ;;  %v104_v7 = vmul.f32 %v1957_v40, %v28_v62  ;;  %v37_v35 = vld [vmem:[%s3222_s0 + $0x78] sm:$0xff]  ;;  %v36_v47 = vld [vmem:[%s3222_s0 + $0x70] sm:$0xff] }
  0x13   :  { %727 = vmatpush1.bf16.msra.mxu0 %v1761_v19  ;;  %1633 = vmatpush3.bf16.msra.mxu1 %v1762_v20  ;;  %v239_v63 = vmax.f32 %v175_v53, 0.0  ;;  %v241_v0 = vmax.f32 %v177_v54, 0.0  ;;  %v240_v2 = vmax.f32 %v176_v56, 0.0  ;;  %v107_v12 = vmul.f32 %v1959_v41, %v31_v8  ;;  %v30_v19 = vld [vmem:[%s3222_s0 + $0x40] sm:$0xff]  ;;  %v32_v20 = vld [vmem:[%s3222_s0 + $0x50] sm:$0xff]  ;;  %v73_v17 = vld [vmem:[%s3222_s0 + $0x198] sm:$0xff] }
  0x14   :  { %728 = vmatprep.subr.bf16.mxu0 %v1763_v21  ;;  %1634 = vmatprep.subr.bf16.mxu1 %v1765_v22  ;;  %v238_v1 = vmax.f32 %v174_v55, 0.0  ;;  %v243_v13 = vmax.f32 %v179_v4, 0.0  ;;  %v245_v14 = vmax.f32 %v181_v5, 0.0  ;;  %v178_v16 = vadd.f32 %v1961_v42, %v102_v6  ;;  %v1787_v36 = vld [vmem:[%s3221_s3 + $0x10c] ss:$12 sps:$4 sm:$0xff]  }
  0x15   :  { %303 = vst [vmem:[%s3225_s4 + $0x8] sm:$0xff] %v239_v63  ;;  %305 = vst [vmem:[%s3225_s4 + $0x18] sm:$0xff] %v241_v0  ;;  %v367_v9 = vpack.c.bf16 %v241_v0, %v239_v63  ;;  %v180_v18 = vadd.f32 %v1961_v42, %v104_v7  ;;  %v109_v21 = vmul.f32 %v1959_v41, %v33_v11  ;;  %v1789_v50 = vld [vmem:[%s3221_s3 + $0x108] ss:$12 sps:$4 sm:$0xff]   ;;  %v1790_v55 = vld [vmem:[%s3221_s3 + $0x124] ss:$12 sps:$4 sm:$0xff]  }
  0x16   :  { %302 = vst [vmem:[%s3225_s4] sm:$0xff] %v238_v1  ;;  %304 = vst [vmem:[%s3225_s4 + $0x10] sm:$0xff] %v240_v2  ;;  %v2024_v10 = vpack.c.bf16 %v240_v2, %v238_v1  ;;  %v183_v22 = vadd.f32 %v1963_v43, %v107_v12  ;;  %v113_v38 = vmul.f32 %v1959_v41, %v37_v35  ;;  %v38_v63 = vld [vmem:[%s3222_s0 + $0x80] sm:$0xff]  ;;  %v40_v0 = vld [vmem:[%s3222_s0 + $0x90] sm:$0xff] }
  0x17   :  { %729 = vmatpush1.bf16.msra.mxu0 %v1766_v24  ;;  %1635 = vmatpush3.bf16.msra.mxu1 %v1767_v25  ;;  %v106_v24 = vmul.f32 %v1957_v40, %v30_v19  ;;  %v108_v25 = vmul.f32 %v1957_v40, %v32_v20  ;;  %307 = vst [vmem:[%s3225_s4 + $0x28] sm:$0xff] %v243_v13  ;;  %309 = vst [vmem:[%s3225_s4 + $0x38] sm:$0xff] %v245_v14  ;;  %v43_v1 = vld [vmem:[%s3222_s0 + $0xa8] sm:$0xff]  ;;  %v45_v6 = vld [vmem:[%s3222_s0 + $0xb8] sm:$0xff] }
  0x18   :  { %730 = vmatprep.subr.bf16.mxu0 %v1768_v26  ;;  %1636 = vmatprep.subr.bf16.mxu1 %v1770_v27  ;;  %v2052_v26 = vpack.c.bf16 %v245_v14, %v243_v13  ;;  %v242_v27 = vmax.f32 %v178_v16, 0.0  ;;  %v185_v30 = vadd.f32 %v1963_v43, %v109_v21  ;;  %v2100_v52 = vadd.f32 %v1963_v43, %v113_v38  ;;  %v42_v11 = vld [vmem:[%s3222_s0 + $0xa0] sm:$0xff]  ;;  %v44_v16 = vld [vmem:[%s3222_s0 + $0xb0] sm:$0xff]  ;;  %v1793_v20 = vld [vmem:[%s3221_s3 + $0x13c] ss:$12 sps:$4 sm:$0xff]  }
  0x19   :  { %943 = vmatprep.mubr.bf16.mxu1 %v367_v9  ;;  %750 = vmatprep.mubr.bf16.mxu0 %v367_v9  ;;  %v112_v53 = vmul.f32 %v1957_v40, %v36_v47  ;;  %v114_v4 = vmul.f32 %v1957_v40, %v38_v63  ;;  %v116_v5 = vmul.f32 %v1957_v40, %v40_v0  ;;  %v1792_v12 = vld [vmem:[%s3221_s3 + $0x120] ss:$12 sps:$4 sm:$0xff]   ;;  %v1795_v38 = vld [vmem:[%s3221_s3 + $0x138] ss:$12 sps:$4 sm:$0xff]  }
  0x1a   :  { %306 = vst [vmem:[%s3225_s4 + $0x20] sm:$0xff] %v242_v27  ;;  %v253_v60 = vmax.f32 %v2100_v52, 0.0  ;;  %v119_v9 = vmul.f32 %v1959_v41, %v43_v1  ;;  %v53_v52 = vld [vmem:[%s3222_s0 + $0xf8] sm:$0xff] }
  0x1b   :  { %731 = vmatpush1.bf16.msra.mxu0 %v1771_v28  ;;  %1637 = vmatpush3.bf16.msra.mxu1 %v1772_v31  ;;  %v244_v28 = vmax.f32 %v180_v18, 0.0  ;;  %v247_v31 = vmax.f32 %v183_v22, 0.0  ;;  %v2129_v61 = vadd.f32 %v1961_v42, %v112_v53  ;;  %v2176_v14 = vadd.f32 %v1961_v42, %v114_v4  ;;  %v47_v18 = vld [vmem:[%s3222_s0 + $0xc8] sm:$0xff]  ;;  %v1798_v1 = vld [vmem:[%s3221_s3 + $0x150] ss:$12 sps:$4 sm:$0xff]  }
  0x1c   :  { %732 = vmatprep.subr.bf16.mxu0 %v1773_v32  ;;  %1638 = vmatprep.subr.bf16.mxu1 %v1775_v33  ;;  %v2059_v32 = vadd.f32 %v1961_v42, %v106_v24  ;;  %v184_v33 = vadd.f32 %v1961_v42, %v108_v25  ;;  %317 = vst [vmem:[%s3225_s4 + $0x78] sm:$0xff] %v253_v60  ;;  %v49_v25 = vld [vmem:[%s3222_s0 + $0xd8] sm:$0xff] }
  0x1d   :  { %308 = vst [vmem:[%s3225_s4 + $0x30] sm:$0xff] %v244_v28  ;;  %311 = vst [vmem:[%s3225_s4 + $0x48] sm:$0xff] %v247_v31  ;;  %v2091_v49 = vpack.c.bf16 %v244_v28, %v242_v27  ;;  %v252_v7 = vmax.f32 %v2129_v61, 0.0  ;;  %v121_v22 = vmul.f32 %v1959_v41, %v45_v6  ;;  %v2200_v24 = vadd.f32 %v1963_v43, %v119_v9  ;;  %v55_v9 = vld [vmem:[%s3222_s0 + $0x108] sm:$0xff] }
  0x1e   :  { %v246_v45 = vmax.f32 %v2059_v32, 0.0  ;;  %v248_v46 = vmax.f32 %v184_v33, 0.0  ;;  %v254_v28 = vmax.f32 %v2176_v14, 0.0  ;;  %v123_v35 = vmul.f32 %v1959_v41, %v47_v18 }
  0x1f   :  { %733 = vmatpush1.bf16.msra.mxu0 %v1776_v34  ;;  %1639 = vmatpush3.bf16.msra.mxu1 %v1777_v39  ;;  %v35_v34 = vld [vmem:[%s3222_s0 + $0x68] sm:$0xff]  ;;  %v34_v39 = vld [vmem:[%s3222_s0 + $0x60] sm:$0xff]  ;;  %316 = vst [vmem:[%s3225_s4 + $0x70] sm:$0xff] %v252_v7  ;;  %v2218_v32 = vadd.f32 %v1963_v43, %v121_v22  ;;  %v259_v33 = vmax.f32 %v2200_v24, 0.0 }
  0x20   :  { %734 = vmatprep.subr.bf16.mxu0 %v1778_v44  ;;  %v111_v37 = vmul.f32 %v1959_v41, %v35_v34  ;;  %v249_v44 = vmax.f32 %v185_v30, 0.0  ;;  %v110_v48 = vmul.f32 %v1957_v40, %v34_v39  ;;  %310 = vst [vmem:[%s3225_s4 + $0x40] sm:$0xff] %v246_v45  ;;  %312 = vst [vmem:[%s3225_s4 + $0x50] sm:$0xff] %v248_v46  ;;  %v54_v22 = vld [vmem:[%s3222_s0 + $0x100] sm:$0xff] }
  0x21   :  { %v2187_v19 = vpack.c.bf16 %v248_v46, %v246_v45  ;;  %v118_v30 = vmul.f32 %v1957_v40, %v42_v11  ;;  %v120_v34 = vmul.f32 %v1957_v40, %v44_v16  ;;  %318 = vst [vmem:[%s3225_s4 + $0x80] sm:$0xff] %v254_v28  ;;  %v125_v45 = vmul.f32 %v1959_v41, %v49_v25  ;;  %v1796_v46 = vld [vmem:[%s3221_s3 + $0x154] ss:$12 sps:$4 sm:$0xff]   ;;  %v57_v11 = vld [vmem:[%s3222_s0 + $0x118] sm:$0xff] }
  0x22   :  { %944 = vmatmul.mubr.bf16.vlgmr.msra.gmra.mrb[0].mxu1 %v2024_v10  ;;  %v2097_v51 = vadd.f32 %v1963_v43, %v111_v37  ;;  %313 = vst [vmem:[%s3225_s4 + $0x58] sm:$0xff] %v249_v44  ;;  %v2106_v54 = vpack.c.bf16 %v249_v44, %v247_v31  ;;  %v2118_v56 = vadd.f32 %v1961_v42, %v110_v48  ;;  %v46_v31 = vld [vmem:[%s3222_s0 + $0xc0] sm:$0xff]  ;;  %v51_v37 = vld [vmem:[%s3222_s0 + $0xe8] sm:$0xff]  ;;  %v261_v47 = vmax.f32 %v2218_v32, 0.0  ;;  %v56_v25 = vld [vmem:[%s3222_s0 + $0x110] sm:$0xff] }
  0x23   :  { %735 = vmatpush1.bf16.msra.mxu0 %v1780_v57  ;;  %951 = vmatprep.mubr.bf16.mxu1 %v2052_v26  ;;  %v39_v57 = vld [vmem:[%s3222_s0 + $0x88] sm:$0xff]  ;;  %v2250_v44 = vadd.f32 %v1961_v42, %v118_v30  ;;  %323 = vst [vmem:[%s3225_s4 + $0xa8] sm:$0xff] %v259_v33  ;;  %v2263_v48 = vadd.f32 %v1961_v42, %v120_v34 }
  0x24   :  { %736 = vmatprep.subr.bf16.mxu0 %v1781_v58  ;;  %v41_v58 = vld [vmem:[%s3222_s0 + $0x98] sm:$0xff]  ;;  %v251_v59 = vmax.f32 %v2097_v51, 0.0  ;;  %v115_v62 = vmul.f32 %v1959_v41, %v39_v57  ;;  %v250_v2 = vmax.f32 %v2118_v56, 0.0  ;;  %v122_v51 = vmul.f32 %v1957_v40, %v46_v31  ;;  %325 = vst [vmem:[%s3225_s4 + $0xb8] sm:$0xff] %v261_v47 }
  0x25   :  { %v258_v53 = vmax.f32 %v2250_v44, 0.0 }
  0x26   :  { %315 = vst [vmem:[%s3225_s4 + $0x68] sm:$0xff] %v251_v59  ;;  %v2157_v8 = vadd.f32 %v1963_v43, %v115_v62  ;;  %314 = vst [vmem:[%s3225_s4 + $0x60] sm:$0xff] %v250_v2  ;;  %v2232_v39 = vpack.c.bf16 %v253_v60, %v251_v59  ;;  %v50_v59 = vld [vmem:[%s3222_s0 + $0xe0] sm:$0xff]  ;;  %v52_v60 = vld [vmem:[%s3222_s0 + $0xf0] sm:$0xff]  ;;  %v260_v62 = vmax.f32 %v2263_v48, 0.0  ;;  %v2293_v0 = vadd.f32 %v1961_v42, %v122_v51 }
  0x27   :  { %737 = vmatpush1.bf16.msra.mxu0 %v1783_v3  ;;  %v117_v3 = vmul.f32 %v1959_v41, %v41_v58  ;;  %v127_v58 = vmul.f32 %v1959_v41, %v51_v37  ;;  %322 = vst [vmem:[%s3225_s4 + $0xa0] sm:$0xff] %v258_v53  ;;  %v126_v18 = vmul.f32 %v1957_v40, %v50_v59  ;;  %v1801_v37 = vld [vmem:[%s3221_s3 + $0x168] ss:$12 sps:$4 sm:$0xff]   ;;  %v77_v48 = vld [vmem:[%s3222_s0 + $0x1b8] sm:$0xff] }
  0x28   :  { %738 = vmatprep.subr.bf16.mxu0 %v1784_v15  ;;  %v2179_v15 = vadd.f32 %v1961_v42, %v116_v5  ;;  %v255_v21 = vmax.f32 %v2157_v8, 0.0  ;;  %v129_v5 = vmul.f32 %v1959_v41, %v53_v52  ;;  %324 = vst [vmem:[%s3225_s4 + $0xb0] sm:$0xff] %v260_v62  ;;  %v262_v16 = vmax.f32 %v2293_v0, 0.0 }
  0x29   :  { %v2173_v13 = vadd.f32 %v1963_v43, %v117_v3  ;;  %v2310_v6 = vadd.f32 %v1963_v43, %v127_v58  ;;  %v2344_v30 = vpack.c.bf16 %v252_v7, %v250_v2  ;;  %v2362_v56 = vadd.f32 %v1961_v42, %v126_v18  ;;  %v65_v18 = vld [vmem:[%s3222_s0 + $0x158] sm:$0xff] }
  0x2a   :  { %952 = vmatmul.mubr.bf16.gmra.mrb[4].mxu1 %v2091_v49  ;;  %319 = vst [vmem:[%s3225_s4 + $0x88] sm:$0xff] %v255_v21  ;;  %v2353_v34 = vadd.f32 %v1963_v43, %v129_v5  ;;  %326 = vst [vmem:[%s3225_s4 + $0xc0] sm:$0xff] %v262_v16  ;;  %v131_v2 = vmul.f32 %v1959_v41, %v55_v9  ;;  %v133_v7 = vmul.f32 %v1959_v41, %v57_v11  ;;  %v63_v5 = vld [vmem:[%s3222_s0 + $0x148] sm:$0xff] }
  0x2b   :  { %739 = vmatpush1.bf16.msra.mxu0 %v1786_v29  ;;  %959 = vmatprep.mubr.bf16.mxu1 %v2106_v54  ;;  %v257_v27 = vmax.f32 %v2173_v13, 0.0  ;;  %v256_v29 = vmax.f32 %v2179_v15, 0.0  ;;  %v130_v8 = vmul.f32 %v1957_v40, %v54_v22  ;;  %v132_v13 = vmul.f32 %v1957_v40, %v56_v25 }
  0x2c   :  { %740 = vmatprep.subr.bf16.mxu0 %v1787_v36  ;;  %v48_v36 = vld [vmem:[%s3222_s0 + $0xd0] sm:$0xff]  ;;  %v2400_v51 = vadd.f32 %v1963_v43, %v131_v2  ;;  %v2403_v52 = vadd.f32 %v1963_v43, %v133_v7  ;;  %v62_v7 = vld [vmem:[%s3222_s0 + $0x140] sm:$0xff]  ;;  %v139_v15 = vmul.f32 %v1959_v41, %v63_v5  ;;  %v141_v32 = vmul.f32 %v1959_v41, %v65_v18 }
  0x2d   :  { %321 = vst [vmem:[%s3225_s4 + $0x98] sm:$0xff] %v257_v27  ;;  %320 = vst [vmem:[%s3225_s4 + $0x90] sm:$0xff] %v256_v29  ;;  %v124_v57 = vmul.f32 %v1957_v40, %v48_v36  ;;  %v59_v36 = vld [vmem:[%s3222_s0 + $0x128] sm:$0xff]  ;;  %v2414_v58 = vadd.f32 %v1961_v42, %v130_v8  ;;  %v2417_v59 = vadd.f32 %v1961_v42, %v132_v13  ;;  %v66_v18 = vld [vmem:[%s3222_s0 + $0x160] sm:$0xff] }
  0x2e   :  { %v271_v9 = vmax.f32 %v2400_v51, 0.0  ;;  %v273_v11 = vmax.f32 %v2403_v52, 0.0  ;;  %v2484_v8 = vpack.c.bf16 %v261_v47, %v259_v33 }
  0x2f   :  { %741 = vmatpush1.bf16.msra.mxu0 %v1789_v50  ;;  %v2266_v50 = vadd.f32 %v1963_v43, %v123_v35  ;;  %v2306_v4 = vadd.f32 %v1961_v42, %v124_v57  ;;  %v267_v35 = vmax.f32 %v2310_v6, 0.0  ;;  %v58_v57 = vld [vmem:[%s3222_s0 + $0x120] sm:$0xff]  ;;  %v3236_v22 = vmax.f32 %v2417_v59, 0.0 }
  0x30   :  { %742 = vmatprep.subr.bf16.mxu0 %v1790_v55  ;;  %v2274_v55 = vadd.f32 %v1963_v43, %v125_v45  ;;  %v269_v45 = vmax.f32 %v2353_v34, 0.0  ;;  %v134_v2 = vmul.f32 %v1957_v40, %v58_v57  ;;  %335 = vst [vmem:[%s3225_s4 + $0x108] sm:$0xff] %v271_v9  ;;  %337 = vst [vmem:[%s3225_s4 + $0x118] sm:$0xff] %v273_v11 }
  0x31   :  { %v263_v63 = vmax.f32 %v2266_v50, 0.0  ;;  %v264_v31 = vmax.f32 %v2306_v4, 0.0  ;;  %331 = vst [vmem:[%s3225_s4 + $0xe8] sm:$0xff] %v267_v35  ;;  %336 = vst [vmem:[%s3225_s4 + $0x110] sm:$0xff] %v3236_v22  ;;  %v138_v57 = vmul.f32 %v1957_v40, %v62_v7  ;;  %v149_v22 = vmul.f32 %v1959_v41, %v73_v17  ;;  %v76_v50 = vld [vmem:[%s3222_s0 + $0x1b0] sm:$0xff] }
  0x32   :  { %960 = vmatmul.mubr.bf16.gmra.mrb[8].mxu1 %v2187_v19  ;;  %v265_v3 = vmax.f32 %v2274_v55, 0.0  ;;  %333 = vst [vmem:[%s3225_s4 + $0xf8] sm:$0xff] %v269_v45  ;;  %v2498_v24 = vadd.f32 %v1961_v42, %v134_v2  ;;  %v79_v55 = vld [vmem:[%s3222_s0 + $0x1c8] sm:$0xff] }
  0x33   :  { %743 = vmatpush1.bf16.msra.mxu0 %v1792_v12  ;;  %967 = vmatprep.mubr.bf16.mxu1 %v2232_v39  ;;  %v1799_v12 = vld [vmem:[%s3221_s3 + $0x16c] ss:$12 sps:$4 sm:$0xff]   ;;  %327 = vst [vmem:[%s3225_s4 + $0xc8] sm:$0xff] %v263_v63  ;;  %328 = vst [vmem:[%s3225_s4 + $0xd0] sm:$0xff] %v264_v31 }
  0x34   :  { %744 = vmatprep.subr.bf16.mxu0 %v1793_v20  ;;  %v128_v20 = vmul.f32 %v1957_v40, %v52_v60  ;;  %329 = vst [vmem:[%s3225_s4 + $0xd8] sm:$0xff] %v265_v3  ;;  %v135_v60 = vmul.f32 %v1959_v41, %v59_v36  ;;  %v2457_v36 = vpack.c.bf16 %v256_v29, %v254_v28  ;;  %v64_v28 = vld [vmem:[%s3222_s0 + $0x150] sm:$0xff]  ;;  %v67_v29 = vld [vmem:[%s3222_s0 + $0x168] sm:$0xff]  ;;  %v3251_v51 = vmax.f32 %v2498_v24, 0.0 }
  0x35   :  { %v140_v5 = vmul.f32 %v1957_v40, %v64_v28 }
  0x36   :  { %v2365_v61 = vadd.f32 %v1961_v42, %v128_v20  ;;  %v3237_v20 = vmax.f32 %v2414_v58, 0.0  ;;  %v2447_v25 = vadd.f32 %v1963_v43, %v135_v60  ;;  %v69_v60 = vld [vmem:[%s3222_s0 + $0x178] sm:$0xff] }
  0x37   :  { %745 = vmatpush1.bf16.msra.mxu0 %v1795_v38  ;;  %v2379_v38 = vpack.c.bf16 %v257_v27, %v255_v21  ;;  %v61_v21 = vld [vmem:[%s3222_s0 + $0x138] sm:$0xff]  ;;  %v266_v27 = vmax.f32 %v2362_v56, 0.0  ;;  %v2548_v28 = vadd.f32 %v1961_v42, %v140_v5  ;;  %v142_v5 = vmul.f32 %v1957_v40, %v66_v18 }
  0x38   :  { %746 = vmatprep.subr.bf16.mxu0 %v1796_v46  ;;  %v268_v46 = vmax.f32 %v2365_v61, 0.0  ;;  %334 = vst [vmem:[%s3225_s4 + $0x100] sm:$0xff] %v3237_v20  ;;  %v3234_v13 = vmax.f32 %v2447_v25, 0.0  ;;  %v2611_v20 = vpack.c.bf16 %v260_v62, %v258_v53  ;;  %v3247_v56 = vmax.f32 %v2414_v58, 0.0 }
  0x39   :  { %330 = vst [vmem:[%s3225_s4 + $0xe0] sm:$0xff] %v266_v27  ;;  %v280_v18 = vmax.f32 %v2548_v28, 0.0  ;;  %v3248_v61 = vmax.f32 %v2417_v59, 0.0 }
  0x3a   :  { %968 = vmatmul.mubr.bf16.gmra.mrb[12].mxu1 %v2344_v30  ;;  %332 = vst [vmem:[%s3225_s4 + $0xf0] sm:$0xff] %v268_v46  ;;  %339 = vst [vmem:[%s3225_s4 + $0x128] sm:$0xff] %v3234_v13 }
  0x3b   :  { %747 = vmatpush1.bf16.msra.mxu0 %v1798_v1  ;;  %v60_v1 = vld [vmem:[%s3222_s0 + $0x130] sm:$0xff]  ;;  %975 = vmatprep.mubr.bf16.mxu1 %v2379_v38  ;;  %344 = vst [vmem:[%s3225_s4 + $0x150] sm:$0xff] %v280_v18 }
  0x3c   :  { %748 = vmatprep.subr.bf16.mxu0 %v1799_v12  ;;  %v137_v12 = vmul.f32 %v1959_v41, %v61_v21  ;;  %v136_v14 = vmul.f32 %v1957_v40, %v60_v1  ;;  %v2507_v21 = vadd.f32 %v1963_v43, %v139_v15  ;;  %v2521_v1 = vadd.f32 %v1963_v43, %v141_v32 }
  0x3e   :  { %v2504_v47 = vadd.f32 %v1961_v42, %v136_v14  ;;  %v3232_v7 = vmax.f32 %v2507_v21, 0.0  ;;  %v2539_v14 = vadd.f32 %v1961_v42, %v138_v57  ;;  %v3235_v15 = vmax.f32 %v2521_v1, 0.0  ;;  %v71_v57 = vld [vmem:[%s3222_s0 + $0x188] sm:$0xff] }
  0x3f   :  { %749 = vmatpush1.bf16.msra.mxu0 %v1801_v37  ;;  %v2470_v37 = vadd.f32 %v1963_v43, %v137_v12  ;;  %v143_v12 = vmul.f32 %v1959_v41, %v67_v29  ;;  %v145_v29 = vmul.f32 %v1959_v41, %v69_v60  ;;  %v3253_v58 = vmax.f32 %v2507_v21, 0.0 }
  0x40   :  { %v3231_v2 = vmax.f32 %v2504_v47, 0.0  ;;  %343 = vst [vmem:[%s3225_s4 + $0x148] sm:$0xff] %v3232_v7  ;;  %v278_v60 = vmax.f32 %v2539_v14, 0.0  ;;  %345 = vst [vmem:[%s3225_s4 + $0x158] sm:$0xff] %v3235_v15  ;;  %v147_v15 = vmul.f32 %v1959_v41, %v71_v57  ;;  %v3252_v52 = vmax.f32 %v2504_v47, 0.0 }
  0x41   :  { %v3233_v33 = vmax.f32 %v2470_v37, 0.0  ;;  %v2552_v32 = vadd.f32 %v1963_v43, %v143_v12  ;;  %v3254_v59 = vmax.f32 %v2521_v1, 0.0 }
  0x42   :  { %751 = vmatmul.mubr.bf16.vlgmr.msra.gmra.mrb[0].mxu0 %v2024_v10  ;;  %v3230_v10 = vmax.f32 %v2498_v24, 0.0  ;;  %976 = vmatmul.mubr.bf16.gmra.mrb[16].mxu1 %v2457_v36  ;;  %340 = vst [vmem:[%s3225_s4 + $0x130] sm:$0xff] %v3231_v2  ;;  %v72_v2 = vld [vmem:[%s3222_s0 + $0x190] sm:$0xff]  ;;  %342 = vst [vmem:[%s3225_s4 + $0x140] sm:$0xff] %v278_v60 }
  0x43   :  { %760 = vmatprep.mubr.bf16.mxu0 %v2052_v26  ;;  %v68_v26 = vld [vmem:[%s3222_s0 + $0x170] sm:$0xff]  ;;  %341 = vst [vmem:[%s3225_s4 + $0x138] sm:$0xff] %v3233_v33  ;;  %983 = vmatprep.mubr.bf16.mxu1 %v2484_v8  ;;  %v3241_v7 = vmax.f32 %v2552_v32, 0.0  ;;  %v2597_v33 = vadd.f32 %v1961_v42, %v142_v5  ;;  %v148_v44 = vmul.f32 %v1957_v40, %v72_v2 }
  0x44   :  { %338 = vst [vmem:[%s3225_s4 + $0x120] sm:$0xff] %v3230_v10  ;;  %v144_v12 = vmul.f32 %v1957_v40, %v68_v26  ;;  %v70_v10 = vld [vmem:[%s3222_s0 + $0x180] sm:$0xff]  ;;  %v2588_v26 = vadd.f32 %v1963_v43, %v145_v29  ;;  %v75_v29 = vld [vmem:[%s3222_s0 + $0x1a8] sm:$0xff]  ;;  %v2633_v5 = vadd.f32 %v1963_v43, %v147_v15  ;;  %v153_v15 = vmul.f32 %v1959_v41, %v77_v48 }
  0x45   :  { %347 = vst [vmem:[%s3225_s4 + $0x168] sm:$0xff] %v3241_v7  ;;  %v146_v17 = vmul.f32 %v1957_v40, %v70_v10  ;;  %v3238_v53 = vmax.f32 %v2597_v33, 0.0  ;;  %v74_v10 = vld [vmem:[%s3222_s0 + $0x1a0] sm:$0xff]  ;;  %v2657_v2 = vadd.f32 %v1961_v42, %v148_v44  ;;  %v80_v7 = vld [vmem:[%s3222_s0 + $0x1d0] sm:$0xff] }
  0x46   :  { %v2600_v13 = vadd.f32 %v1961_v42, %v144_v12  ;;  %v3239_v57 = vmax.f32 %v2588_v26, 0.0  ;;  %v2636_v12 = vadd.f32 %v1963_v43, %v149_v22  ;;  %v2703_v48 = vadd.f32 %v1963_v43, %v153_v15 }
  0x47   :  { %v2654_v22 = vadd.f32 %v1961_v42, %v146_v17  ;;  %346 = vst [vmem:[%s3225_s4 + $0x160] sm:$0xff] %v3238_v53  ;;  %v3244_v44 = vmax.f32 %v2657_v2, 0.0  ;;  %v2718_v15 = vpack.c.bf16 %v264_v31, %v262_v16  ;;  %v3259_v21 = vmax.f32 %v2633_v5, 0.0 }
  0x48   :  { %v3240_v62 = vmax.f32 %v2600_v13, 0.0  ;;  %349 = vst [vmem:[%s3225_s4 + $0x178] sm:$0xff] %v3239_v57  ;;  %v150_v57 = vmul.f32 %v1957_v40, %v74_v10  ;;  %v152_v10 = vmul.f32 %v1957_v40, %v76_v50  ;;  %v293_v16 = vmax.f32 %v2703_v48, 0.0 }
  0x49   :  { %v3243_v17 = vmax.f32 %v2654_v22, 0.0  ;;  %352 = vst [vmem:[%s3225_s4 + $0x190] sm:$0xff] %v3244_v44  ;;  %v85_v44 = vld [vmem:[%s3222_s0 + $0x1f8] sm:$0xff]  ;;  %v3258_v24 = vmax.f32 %v2600_v13, 0.0  ;;  %v3260_v1 = vmax.f32 %v2636_v12, 0.0  ;;  %v3261_v28 = vmax.f32 %v2654_v22, 0.0 }
  0x4a   :  { %761 = vmatmul.mubr.bf16.gmra.mrb[4].mxu0 %v2091_v49  ;;  %v2646_v49 = vpack.c.bf16 %v265_v3, %v263_v63  ;;  %348 = vst [vmem:[%s3225_s4 + $0x170] sm:$0xff] %v3240_v62  ;;  %v3242_v63 = vmax.f32 %v2633_v5, 0.0  ;;  %v3245_v3 = vmax.f32 %v2636_v12, 0.0  ;;  %v78_v62 = vld [vmem:[%s3222_s0 + $0x1c0] sm:$0xff]  ;;  %984 = vmatmul.mubr.bf16.gmra.mrb[20].mxu1 %v2611_v20  ;;  %v2732_v0 = vadd.f32 %v1961_v42, %v150_v57 }
  0x4b   :  { %770 = vmatprep.mubr.bf16.mxu0 %v2106_v54  ;;  %v151_v54 = vmul.f32 %v1959_v41, %v75_v29  ;;  %v81_v29 = vld [vmem:[%s3222_s0 + $0x1d8] sm:$0xff]  ;;  %350 = vst [vmem:[%s3225_s4 + $0x180] sm:$0xff] %v3243_v17  ;;  %v2737_v31 = vadd.f32 %v1961_v42, %v152_v10  ;;  %v154_v17 = vmul.f32 %v1957_v40, %v78_v62  ;;  %v82_v62 = vld [vmem:[%s3222_s0 + $0x1e0] sm:$0xff]  ;;  %357 = vst [vmem:[%s3225_s4 + $0x1b8] sm:$0xff] %v293_v16 }
  0x4c   :  { %351 = vst [vmem:[%s3225_s4 + $0x188] sm:$0xff] %v3242_v63  ;;  %353 = vst [vmem:[%s3225_s4 + $0x198] sm:$0xff] %v3245_v3  ;;  %v83_v63 = vld [vmem:[%s3222_s0 + $0x1e8] sm:$0xff]  ;;  %991 = vmatprep.mubr.bf16.mxu1 %v2646_v49  ;;  %v157_v4 = vmul.f32 %v1959_v41, %v81_v29  ;;  %v290_v57 = vmax.f32 %v2732_v0, 0.0  ;;  %v156_v10 = vmul.f32 %v1957_v40, %v80_v7  ;;  %v84_v3 = vld [vmem:[%s3222_s0 + $0x1f0] sm:$0xff] }
  0x4d   :  { %v2685_v53 = vadd.f32 %v1963_v43, %v151_v54  ;;  %v155_v54 = vmul.f32 %v1959_v41, %v79_v55  ;;  %v292_v7 = vmax.f32 %v2737_v31, 0.0  ;;  %v161_v34 = vmul.f32 %v1959_v41, %v85_v44 }
  0x4e   :  { %v2753_v29 = vadd.f32 %v1963_v43, %v157_v4  ;;  %v381_v4 = vpack.c.bf16 %v269_v45, %v267_v35  ;;  %354 = vst [vmem:[%s3225_s4 + $0x1a0] sm:$0xff] %v290_v57  ;;  %v2786_v6 = vadd.f32 %v1961_v42, %v156_v10  ;;  %v158_v45 = vmul.f32 %v1957_v40, %v82_v62 }
  0x4f   :  { %v3246_v50 = vmax.f32 %v2685_v53, 0.0  ;;  %v2740_v55 = vadd.f32 %v1963_v43, %v155_v54  ;;  %v159_v54 = vmul.f32 %v1959_v41, %v83_v63  ;;  %356 = vst [vmem:[%s3225_s4 + $0x1b0] sm:$0xff] %v292_v7  ;;  %v160_v41 = vmul.f32 %v1957_v40, %v84_v3 }
  0x50   :  { %v237_v44 = vadd.f32 %v1963_v43, %v161_v34  ;;  %v234_v40 = vadd.f32 %v1961_v42, %v158_v45  ;;  %v391_v14 = vpack.c.bf16 %v3260_v1, %v3259_v21 }
  0x51   :  { %355 = vst [vmem:[%s3225_s4 + $0x1a8] sm:$0xff] %v3246_v50  ;;  %v295_v63 = vmax.f32 %v2740_v55, 0.0  ;;  %v2776_v50 = vadd.f32 %v1961_v42, %v154_v17  ;;  %v2790_v35 = vadd.f32 %v1963_v43, %v159_v54  ;;  %v296_v17 = vmax.f32 %v2786_v6, 0.0 }
  0x52   :  { %771 = vmatmul.mubr.bf16.gmra.mrb[8].mxu0 %v2187_v19  ;;  %v297_v19 = vmax.f32 %v2753_v29, 0.0  ;;  %992 = vmatmul.mubr.bf16.gmra.mrb[24].mxu1 %v2718_v15  ;;  %v236_v3 = vadd.f32 %v1961_v42, %v160_v41  ;;  %v301_v43 = vmax.f32 %v237_v44, 0.0  ;;  %v298_v54 = vmax.f32 %v234_v40, 0.0 }
  0x53   :  { %780 = vmatprep.mubr.bf16.mxu0 %v2232_v39  ;;  %359 = vst [vmem:[%s3225_s4 + $0x1c8] sm:$0xff] %v295_v63  ;;  %v294_v39 = vmax.f32 %v2776_v50, 0.0  ;;  %v299_v10 = vmax.f32 %v2790_v35, 0.0  ;;  %999 = vmatprep.mubr.bf16.mxu1 %v381_v4  ;;  %360 = vst [vmem:[%s3225_s4 + $0x1d0] sm:$0xff] %v296_v17  ;;  %v380_v42 = vpack.c.bf16 %v268_v46, %v266_v27  ;;  %v3249_v46 = vmax.f32 %v2447_v25, 0.0 }
  0x54   :  { %361 = vst [vmem:[%s3225_s4 + $0x1d8] sm:$0xff] %v297_v19  ;;  %v300_v62 = vmax.f32 %v236_v3, 0.0  ;;  %365 = vst [vmem:[%s3225_s4 + $0x1f8] sm:$0xff] %v301_v43  ;;  %v382_v27 = vpack.c.bf16 %v3248_v61, %v3247_v56  ;;  %v3255_v25 = vmax.f32 %v2552_v32, 0.0  ;;  %v3262_v32 = vmax.f32 %v2657_v2, 0.0 }
  0x55   :  { %358 = vst [vmem:[%s3225_s4 + $0x1c0] sm:$0xff] %v294_v39  ;;  %363 = vst [vmem:[%s3225_s4 + $0x1e8] sm:$0xff] %v299_v10  ;;  %v397_v5 = vpack.c.bf16 %v301_v43, %v299_v10 }
  0x56   :  { %362 = vst [vmem:[%s3225_s4 + $0x1e0] sm:$0xff] %v298_v54  ;;  %364 = vst [vmem:[%s3225_s4 + $0x1f0] sm:$0xff] %v300_v62  ;;  %v396_v6 = vpack.c.bf16 %v300_v62, %v298_v54 }
  0x5a   :  { %781 = vmatmul.mubr.bf16.gmra.mrb[12].mxu0 %v2344_v30  ;;  %v383_v30 = vpack.c.bf16 %v273_v11, %v271_v9  ;;  %1000 = vmatmul.mubr.bf16.gmra.mrb[28].mxu1 %v380_v42  ;;  %v384_v9 = vpack.c.bf16 %v3252_v52, %v3251_v51  ;;  %v387_v11 = vpack.c.bf16 %v3254_v59, %v3253_v58 }
  0x5b   :  { %790 = vmatprep.mubr.bf16.mxu0 %v2379_v38  ;;  %v3250_v38 = vmax.f32 %v2470_v37, 0.0 }
  0x5c   :  { %1007 = vmatprep.mubr.bf16.mxu1 %v383_v30 }
  0x5d   :  { %v385_v34 = vpack.c.bf16 %v3250_v38, %v3249_v46 }
  0x62   :  { %791 = vmatmul.mubr.bf16.gmra.mrb[16].mxu0 %v2457_v36  ;;  %1008 = vmatmul.mubr.bf16.gmra.mrb[32].mxu1 %v382_v27  ;;  %v3256_v36 = vmax.f32 %v2588_v26, 0.0  ;;  %v395_v26 = vpack.c.bf16 %v297_v19, %v295_v63 }
  0x63   :  { %800 = vmatprep.mubr.bf16.mxu0 %v2484_v8  ;;  %1015 = vmatprep.mubr.bf16.mxu1 %v385_v34  ;;  %v3257_v8 = vmax.f32 %v2597_v33, 0.0  ;;  %v3263_v33 = vmax.f32 %v2685_v53, 0.0  ;;  %v394_v53 = vpack.c.bf16 %v296_v17, %v294_v39 }
  0x64   :  { %v389_v37 = vpack.c.bf16 %v3256_v36, %v3255_v25 }
  0x65   :  { %v388_v47 = vpack.c.bf16 %v3258_v24, %v3257_v8  ;;  %v393_v13 = vpack.c.bf16 %v293_v16, %v3263_v33 }
  0x6a   :  { %801 = vmatmul.mubr.bf16.gmra.mrb[20].mxu0 %v2611_v20  ;;  %1016 = vmatmul.mubr.bf16.gmra.mrb[36].mxu1 %v384_v9  ;;  %v386_v20 = vpack.c.bf16 %v280_v18, %v278_v60  ;;  %v390_v60 = vpack.c.bf16 %v3262_v32, %v3261_v28  ;;  %v392_v18 = vpack.c.bf16 %v292_v7, %v290_v57 }
  0x6b   :  { %810 = vmatprep.mubr.bf16.mxu0 %v2646_v49  ;;  %1023 = vmatprep.mubr.bf16.mxu1 %v387_v11 }
  0x72   :  { %811 = vmatmul.mubr.bf16.gmra.mrb[24].mxu0 %v2718_v15  ;;  %1024 = vmatmul.mubr.bf16.gmra.mrb[40].mxu1 %v386_v20 }
  0x73   :  { %820 = vmatprep.mubr.bf16.mxu0 %v381_v4  ;;  %1031 = vmatprep.mubr.bf16.mxu1 %v389_v37 }
  0x7a   :  { %821 = vmatmul.mubr.bf16.gmra.mrb[28].mxu0 %v380_v42  ;;  %1032 = vmatmul.mubr.bf16.gmra.mrb[44].mxu1 %v388_v47 }
  0x7b   :  { %830 = vmatprep.mubr.bf16.mxu0 %v383_v30  ;;  %1039 = vmatprep.mubr.bf16.mxu1 %v391_v14 }
  0x82   :  { %831 = vmatmul.mubr.bf16.gmra.mrb[32].mxu0 %v382_v27  ;;  %1040 = vmatmul.mubr.bf16.gmra.mrb[48].mxu1 %v390_v60 }
  0x83   :  { %840 = vmatprep.mubr.bf16.mxu0 %v385_v34  ;;  %1047 = vmatprep.mubr.bf16.mxu1 %v393_v13 }
  0x8a   :  { %841 = vmatmul.mubr.bf16.gmra.mrb[36].mxu0 %v384_v9  ;;  %1048 = vmatmul.mubr.bf16.gmra.mrb[52].mxu1 %v392_v18 }
  0x8b   :  { %850 = vmatprep.mubr.bf16.mxu0 %v387_v11  ;;  %1055 = vmatprep.mubr.bf16.mxu1 %v395_v26 }
  0x92   :  { %851 = vmatmul.mubr.bf16.gmra.mrb[40].mxu0 %v386_v20  ;;  %1056 = vmatmul.mubr.bf16.gmra.mrb[56].mxu1 %v394_v53 }
  0x93   :  { %860 = vmatprep.mubr.bf16.mxu0 %v389_v37  ;;  %1063 = vmatprep.mubr.bf16.mxu1 %v397_v5 }
  0x9a   :  { %861 = vmatmul.mubr.bf16.gmra.mrb[44].mxu0 %v388_v47  ;;  %1064 = vmatmul.mubr.bf16.gmra.mrb[60].mxu1 %v396_v6 }
  0x9b   :  { %870 = vmatprep.mubr.bf16.mxu0 %v391_v14 }
  0xa2   :  { %871 = vmatmul.mubr.bf16.gmra.mrb[48].mxu0 %v390_v60 }
  0xa3   :  { %880 = vmatprep.mubr.bf16.mxu0 %v393_v13 }
  0xaa   :  { %881 = vmatmul.mubr.bf16.gmra.mrb[52].mxu0 %v392_v18 }
  0xab   :  { %890 = vmatprep.mubr.bf16.mxu0 %v395_v26 }
  0xb2   :  { %891 = vmatmul.mubr.bf16.gmra.mrb[56].mxu0 %v394_v53 }
  0xb3   :  { %900 = vmatprep.mubr.bf16.mxu0 %v397_v5 }
  0xba   :  { %901 = vmatmul.mubr.bf16.gmra.mrb[60].mxu0 %v396_v6 }
  0xf5   :  { %v1640_v12 = vpop.f32.mrb[0].mxu1 }
  0xf6   :  { %v1641_v49 = vpop.f32.mrb[1].mxu1 }
  0xf7   :  { %v1642_v22 = vadd.f32 %v1641_v49, %v1640_v12  ;;  %v1643_v2 = vpop.f32.mrb[2].mxu1 }
  0xf8   :  { %v1644_v48 = vpop.f32.mrb[3].mxu1 }
  0xf9   :  { %1074 = vst [vmem:[%s3226_s5 + $0x10] sm:$0xff] %v1642_v22  ;;  %v1326_v15 = vmul.f32 %v1642_v22, %v1642_v22  ;;  %v1645_v50 = vadd.f32 %v1644_v48, %v1643_v2 }
  0xfb   :  { %1077 = vst [vmem:[%s3226_s5 + $0x28] sm:$0xff] %v1645_v50  ;;  %v1253_v0 = vadd.f32 %v1645_v50, %v1642_v22  ;;  %v1329_v16 = vmul.f32 %v1645_v50, %v1645_v50 }
  0xfd   :  { %v1494_v31 = vadd.f32 %v1329_v16, %v1326_v15  ;;  %v1646_v55 = vpop.f32.mrb[4].mxu1 }
  0xfe   :  { %v1647_v57 = vpop.f32.mrb[5].mxu1 }
  0xff   :  { %v1648_v29 = vadd.f32 %v1647_v57, %v1646_v55  ;;  %v1649_v4 = vpop.f32.mrb[6].mxu1 }
 0x100   :  { %v1650_v7 = vpop.f32.mrb[7].mxu1 }
 0x101   :  { %1080 = vst [vmem:[%s3226_s5 + $0x40] sm:$0xff] %v1648_v29  ;;  %v1254_v63 = vadd.f32 %v1648_v29, %v1253_v0  ;;  %v1332_v19 = vmul.f32 %v1648_v29, %v1648_v29  ;;  %v1651_v35 = vadd.f32 %v1650_v7, %v1649_v4  ;;  %v3264_v0 = vlaneseq }
 0x102   :  { %v1802_v7 = vmov 0.0  }
 0x103   :  { %v1495_v39 = vadd.f32 %v1494_v31, %v1332_v19  ;;  %1083 = vst [vmem:[%s3226_s5 + $0x58] sm:$0xff] %v1651_v35  ;;  %v1255_v45 = vadd.f32 %v1651_v35, %v1254_v63  ;;  %v1335_v41 = vmul.f32 %v1651_v35, %v1651_v35  ;;  %vm2944_vm0 = vcmp.lt.s32.totalorder %v3264_v0, 384 }
 0x104   :  { %1176 = vst.msk [vmem:[%s3227_s6] sm:$0x7] %vm2944_vm0, %v1802_v7  ;;  %1177 = vst.msk [vmem:[%s3228_s7] sm:$0x7] %vm2944_vm0, %v1802_v7 }
 0x105   :  { %v1496_v17 = vadd.f32 %v1495_v39, %v1335_v41  ;;  %v1652_v44 = vpop.f32.mrb[8].mxu1 }
 0x106   :  { %v1653_v10 = vpop.f32.mrb[9].mxu1 }
 0x107   :  { %v1654_v40 = vadd.f32 %v1653_v10, %v1652_v44  ;;  %v1655_v3 = vpop.f32.mrb[10].mxu1 }
 0x108   :  { %v1656_v43 = vpop.f32.mrb[11].mxu1 }
 0x109   :  { %1086 = vst [vmem:[%s3226_s5 + $0x70] sm:$0xff] %v1654_v40  ;;  %v1256_v54 = vadd.f32 %v1654_v40, %v1255_v45  ;;  %v1338_v62 = vmul.f32 %v1654_v40, %v1654_v40  ;;  %v1657_v42 = vadd.f32 %v1656_v43, %v1655_v3 }
 0x10b   :  { %v1497_v6 = vadd.f32 %v1496_v17, %v1338_v62  ;;  %1089 = vst [vmem:[%s3226_s5 + $0x88] sm:$0xff] %v1657_v42  ;;  %v1257_v30 = vadd.f32 %v1657_v42, %v1256_v54  ;;  %v1341_v56 = vmul.f32 %v1657_v42, %v1657_v42 }
 0x10d   :  { %v1498_v61 = vadd.f32 %v1497_v6, %v1341_v56  ;;  %v1658_v27 = vpop.f32.mrb[12].mxu1 }
 0x10e   :  { %v1659_v46 = vpop.f32.mrb[13].mxu1 }
 0x10f   :  { %v1660_v38 = vadd.f32 %v1659_v46, %v1658_v27  ;;  %v1661_v34 = vpop.f32.mrb[14].mxu1 }
 0x110   :  { %v1662_v51 = vpop.f32.mrb[15].mxu1 }
 0x111   :  { %1092 = vst [vmem:[%s3226_s5 + $0xa0] sm:$0xff] %v1660_v38  ;;  %v1258_v9 = vadd.f32 %v1660_v38, %v1257_v30  ;;  %v1344_v58 = vmul.f32 %v1660_v38, %v1660_v38  ;;  %v1663_v59 = vadd.f32 %v1662_v51, %v1661_v34 }
 0x113   :  { %v1499_v25 = vadd.f32 %v1498_v61, %v1344_v58  ;;  %1095 = vst [vmem:[%s3226_s5 + $0xb8] sm:$0xff] %v1663_v59  ;;  %v1259_v36 = vadd.f32 %v1663_v59, %v1258_v9  ;;  %v1347_v37 = vmul.f32 %v1663_v59, %v1663_v59 }
 0x115   :  { %v752_v52 = vpop.f32.mrb[0].mxu0  ;;  %v1500_v32 = vadd.f32 %v1499_v25, %v1347_v37  ;;  %v1664_v60 = vpop.f32.mrb[16].mxu1 }
 0x116   :  { %1072 = vst [vmem:[%s3226_s5] sm:$0xff] %v752_v52  ;;  %v754_v11 = vpop.f32.mrb[1].mxu0  ;;  %v1324_v8 = vmul.f32 %v752_v52, %v752_v52  ;;  %v1665_v13 = vpop.f32.mrb[17].mxu1 }
 0x117   :  { %1073 = vst [vmem:[%s3226_s5 + $0x8] sm:$0xff] %v754_v11  ;;  %v756_v20 = vpop.f32.mrb[2].mxu0  ;;  %v1325_v1 = vmul.f32 %v754_v11, %v754_v11  ;;  %v1666_v26 = vadd.f32 %v1665_v13, %v1664_v60  ;;  %v1667_v53 = vpop.f32.mrb[18].mxu1 }
 0x118   :  { %1075 = vst [vmem:[%s3226_s5 + $0x18] sm:$0xff] %v756_v20  ;;  %v1179_v24 = vadd.f32 %v756_v20, %v752_v52  ;;  %v1327_v47 = vmul.f32 %v756_v20, %v756_v20  ;;  %v758_v21 = vpop.f32.mrb[3].mxu0  ;;  %v1668_v5 = vpop.f32.mrb[19].mxu1 }
 0x119   :  { %1076 = vst [vmem:[%s3226_s5 + $0x20] sm:$0xff] %v758_v21  ;;  %v1216_v14 = vadd.f32 %v758_v21, %v754_v11  ;;  %v1328_v28 = vmul.f32 %v758_v21, %v758_v21  ;;  %1098 = vst [vmem:[%s3226_s5 + $0xd0] sm:$0xff] %v1666_v26  ;;  %v1260_v49 = vadd.f32 %v1666_v26, %v1259_v36 }
 0x11a   :  { %v1420_v33 = vadd.f32 %v1327_v47, %v1324_v8  ;;  %v1350_v22 = vmul.f32 %v1666_v26, %v1666_v26  ;;  %v1669_v2 = vadd.f32 %v1668_v5, %v1667_v53 }
 0x11b   :  { %v1457_v18 = vadd.f32 %v1328_v28, %v1325_v1 }
 0x11c   :  { %v1501_v29 = vadd.f32 %v1500_v32, %v1350_v22  ;;  %1101 = vst [vmem:[%s3226_s5 + $0xe8] sm:$0xff] %v1669_v2  ;;  %v1261_v4 = vadd.f32 %v1669_v2, %v1260_v49  ;;  %v1353_v45 = vmul.f32 %v1669_v2, %v1669_v2 }
 0x11d   :  { %v762_v12 = vpop.f32.mrb[4].mxu0  ;;  %v1670_v10 = vpop.f32.mrb[20].mxu1 }
 0x11e   :  { %1078 = vst [vmem:[%s3226_s5 + $0x30] sm:$0xff] %v762_v12  ;;  %v1180_v48 = vadd.f32 %v1179_v24, %v762_v12  ;;  %v1330_v15 = vmul.f32 %v762_v12, %v762_v12  ;;  %v764_v50 = vpop.f32.mrb[5].mxu0  ;;  %v1502_v3 = vadd.f32 %v1501_v29, %v1353_v45  ;;  %v1671_v43 = vpop.f32.mrb[21].mxu1 }
 0x11f   :  { %1079 = vst [vmem:[%s3226_s5 + $0x38] sm:$0xff] %v764_v50  ;;  %v1217_v31 = vadd.f32 %v1216_v14, %v764_v50  ;;  %v1331_v55 = vmul.f32 %v764_v50, %v764_v50  ;;  %v766_v57 = vpop.f32.mrb[6].mxu0  ;;  %v1672_v62 = vadd.f32 %v1671_v43, %v1670_v10  ;;  %v1673_v42 = vpop.f32.mrb[22].mxu1 }
 0x120   :  { %v1421_v63 = vadd.f32 %v1420_v33, %v1330_v15  ;;  %1081 = vst [vmem:[%s3226_s5 + $0x48] sm:$0xff] %v766_v57  ;;  %v1181_v19 = vadd.f32 %v1180_v48, %v766_v57  ;;  %v1333_v35 = vmul.f32 %v766_v57, %v766_v57  ;;  %v768_v39 = vpop.f32.mrb[7].mxu0  ;;  %v1674_v6 = vpop.f32.mrb[23].mxu1 }
 0x121   :  { %v1458_v41 = vadd.f32 %v1457_v18, %v1331_v55  ;;  %1082 = vst [vmem:[%s3226_s5 + $0x50] sm:$0xff] %v768_v39  ;;  %v1218_v17 = vadd.f32 %v1217_v31, %v768_v39  ;;  %v1334_v44 = vmul.f32 %v768_v39, %v768_v39  ;;  %1104 = vst [vmem:[%s3226_s5 + $0x100] sm:$0xff] %v1672_v62 }
 0x122   :  { %v1422_v40 = vadd.f32 %v1421_v63, %v1333_v35  ;;  %v1262_v56 = vadd.f32 %v1672_v62, %v1261_v4  ;;  %v1356_v61 = vmul.f32 %v1672_v62, %v1672_v62  ;;  %v1675_v27 = vadd.f32 %v1674_v6, %v1673_v42 }
 0x123   :  { %v1459_v54 = vadd.f32 %v1458_v41, %v1334_v44 }
 0x124   :  { %v1503_v58 = vadd.f32 %v1502_v3, %v1356_v61  ;;  %1107 = vst [vmem:[%s3226_s5 + $0x118] sm:$0xff] %v1675_v27  ;;  %v1263_v59 = vadd.f32 %v1675_v27, %v1262_v56  ;;  %v1359_v37 = vmul.f32 %v1675_v27, %v1675_v27 }
 0x125   :  { %v772_v30 = vpop.f32.mrb[8].mxu0  ;;  %v1676_v21 = vpop.f32.mrb[24].mxu1 }
 0x126   :  { %1084 = vst [vmem:[%s3226_s5 + $0x60] sm:$0xff] %v772_v30  ;;  %v1182_v46 = vadd.f32 %v1181_v19, %v772_v30  ;;  %v1336_v38 = vmul.f32 %v772_v30, %v772_v30  ;;  %v774_v34 = vpop.f32.mrb[9].mxu0  ;;  %v1504_v14 = vadd.f32 %v1503_v58, %v1359_v37  ;;  %v1677_v28 = vpop.f32.mrb[25].mxu1 }
 0x127   :  { %1085 = vst [vmem:[%s3226_s5 + $0x68] sm:$0xff] %v774_v34  ;;  %v1219_v51 = vadd.f32 %v1218_v17, %v774_v34  ;;  %v1337_v52 = vmul.f32 %v774_v34, %v774_v34  ;;  %v776_v9 = vpop.f32.mrb[10].mxu0  ;;  %v1678_v60 = vadd.f32 %v1677_v28, %v1676_v21  ;;  %v1679_v33 = vpop.f32.mrb[26].mxu1 }
 0x128   :  { %v1423_v11 = vadd.f32 %v1422_v40, %v1336_v38  ;;  %1087 = vst [vmem:[%s3226_s5 + $0x78] sm:$0xff] %v776_v9  ;;  %v1183_v20 = vadd.f32 %v1182_v46, %v776_v9  ;;  %v1339_v25 = vmul.f32 %v776_v9, %v776_v9  ;;  %v778_v36 = vpop.f32.mrb[11].mxu0  ;;  %v1680_v13 = vpop.f32.mrb[27].mxu1 }
 0x129   :  { %v1460_v8 = vadd.f32 %v1459_v54, %v1337_v52  ;;  %1088 = vst [vmem:[%s3226_s5 + $0x80] sm:$0xff] %v778_v36  ;;  %v1220_v24 = vadd.f32 %v1219_v51, %v778_v36  ;;  %v1340_v47 = vmul.f32 %v778_v36, %v778_v36  ;;  %1110 = vst [vmem:[%s3226_s5 + $0x130] sm:$0xff] %v1678_v60 }
 0x12a   :  { %v1424_v1 = vadd.f32 %v1423_v11, %v1339_v25  ;;  %v1264_v18 = vadd.f32 %v1678_v60, %v1263_v59  ;;  %v1362_v26 = vmul.f32 %v1678_v60, %v1678_v60  ;;  %v1681_v5 = vadd.f32 %v1680_v13, %v1679_v33 }
 0x12b   :  { %v1461_v32 = vadd.f32 %v1460_v8, %v1340_v47 }
 0x12c   :  { %v1505_v2 = vadd.f32 %v1504_v14, %v1362_v26  ;;  %1113 = vst [vmem:[%s3226_s5 + $0x148] sm:$0xff] %v1681_v5  ;;  %v1265_v48 = vadd.f32 %v1681_v5, %v1264_v18  ;;  %v1365_v15 = vmul.f32 %v1681_v5, %v1681_v5 }
 0x12d   :  { %v782_v53 = vpop.f32.mrb[12].mxu0  ;;  %v1682_v63 = vpop.f32.mrb[28].mxu1 }
 0x12e   :  { %1090 = vst [vmem:[%s3226_s5 + $0x90] sm:$0xff] %v782_v53  ;;  %v1184_v12 = vadd.f32 %v1183_v20, %v782_v53  ;;  %v1342_v49 = vmul.f32 %v782_v53, %v782_v53  ;;  %v784_v22 = vpop.f32.mrb[13].mxu0  ;;  %v1506_v7 = vadd.f32 %v1505_v2, %v1365_v15  ;;  %v1683_v41 = vpop.f32.mrb[29].mxu1 }
 0x12f   :  { %1091 = vst [vmem:[%s3226_s5 + $0x98] sm:$0xff] %v784_v22  ;;  %v1221_v50 = vadd.f32 %v1220_v24, %v784_v22  ;;  %v786_v0 = vpop.f32.mrb[14].mxu0  ;;  %v1343_v55 = vmul.f32 %v784_v22, %v784_v22  ;;  %v1684_v17 = vadd.f32 %v1683_v41, %v1682_v63  ;;  %v1685_v44 = vpop.f32.mrb[30].mxu1 }
 0x130   :  { %v1425_v31 = vadd.f32 %v1424_v1, %v1342_v49  ;;  %1093 = vst [vmem:[%s3226_s5 + $0xa8] sm:$0xff] %v786_v0  ;;  %v1185_v57 = vadd.f32 %v1184_v12, %v786_v0  ;;  %v1345_v29 = vmul.f32 %v786_v0, %v786_v0  ;;  %v788_v4 = vpop.f32.mrb[15].mxu0  ;;  %v1686_v40 = vpop.f32.mrb[31].mxu1 }
 0x131   :  { %1094 = vst [vmem:[%s3226_s5 + $0xb0] sm:$0xff] %v788_v4  ;;  %v1222_v19 = vadd.f32 %v1221_v50, %v788_v4  ;;  %v1346_v35 = vmul.f32 %v788_v4, %v788_v4  ;;  %v1462_v39 = vadd.f32 %v1461_v32, %v1343_v55  ;;  %1116 = vst [vmem:[%s3226_s5 + $0x160] sm:$0xff] %v1684_v17 }
 0x132   :  { %v1426_v45 = vadd.f32 %v1425_v31, %v1345_v29  ;;  %v1266_v3 = vadd.f32 %v1684_v17, %v1265_v48  ;;  %v1368_v43 = vmul.f32 %v1684_v17, %v1684_v17  ;;  %v1687_v54 = vadd.f32 %v1686_v40, %v1685_v44 }
 0x133   :  { %v1463_v10 = vadd.f32 %v1462_v39, %v1346_v35 }
 0x134   :  { %v1507_v56 = vadd.f32 %v1506_v7, %v1368_v43  ;;  %1119 = vst [vmem:[%s3226_s5 + $0x178] sm:$0xff] %v1687_v54  ;;  %v1267_v61 = vadd.f32 %v1687_v54, %v1266_v3  ;;  %v1371_v27 = vmul.f32 %v1687_v54, %v1687_v54 }
 0x135   :  { %v792_v62 = vpop.f32.mrb[16].mxu0  ;;  %v1688_v11 = vpop.f32.mrb[32].mxu1 }
 0x136   :  { %1096 = vst [vmem:[%s3226_s5 + $0xc0] sm:$0xff] %v792_v62  ;;  %v1186_v42 = vadd.f32 %v1185_v57, %v792_v62  ;;  %v1348_v6 = vmul.f32 %v792_v62, %v792_v62  ;;  %v794_v30 = vpop.f32.mrb[17].mxu0  ;;  %v1508_v59 = vadd.f32 %v1507_v56, %v1371_v27  ;;  %v1689_v37 = vpop.f32.mrb[33].mxu1 }
 0x137   :  { %1097 = vst [vmem:[%s3226_s5 + $0xc8] sm:$0xff] %v794_v30  ;;  %v1223_v46 = vadd.f32 %v1222_v19, %v794_v30  ;;  %v796_v38 = vpop.f32.mrb[18].mxu0  ;;  %v1349_v51 = vmul.f32 %v794_v30, %v794_v30  ;;  %v1690_v24 = vadd.f32 %v1689_v37, %v1688_v11  ;;  %v1691_v47 = vpop.f32.mrb[34].mxu1 }
 0x138   :  { %v1427_v34 = vadd.f32 %v1426_v45, %v1348_v6  ;;  %1099 = vst [vmem:[%s3226_s5 + $0xd8] sm:$0xff] %v796_v38  ;;  %v1187_v52 = vadd.f32 %v1186_v42, %v796_v38  ;;  %v1351_v9 = vmul.f32 %v796_v38, %v796_v38  ;;  %v798_v58 = vpop.f32.mrb[19].mxu0  ;;  %v1692_v1 = vpop.f32.mrb[35].mxu1 }
 0x139   :  { %1100 = vst [vmem:[%s3226_s5 + $0xe0] sm:$0xff] %v798_v58  ;;  %v1224_v20 = vadd.f32 %v1223_v46, %v798_v58  ;;  %v1352_v25 = vmul.f32 %v798_v58, %v798_v58  ;;  %v1464_v36 = vadd.f32 %v1463_v10, %v1349_v51  ;;  %1122 = vst [vmem:[%s3226_s5 + $0x190] sm:$0xff] %v1690_v24 }
 0x13a   :  { %v1428_v8 = vadd.f32 %v1427_v34, %v1351_v9  ;;  %v1268_v14 = vadd.f32 %v1690_v24, %v1267_v61  ;;  %v1374_v28 = vmul.f32 %v1690_v24, %v1690_v24  ;;  %v1693_v32 = vadd.f32 %v1692_v1, %v1691_v47 }
 0x13b   :  { %v1465_v21 = vadd.f32 %v1464_v36, %v1352_v25 }
 0x13c   :  { %v1509_v26 = vadd.f32 %v1508_v59, %v1374_v28  ;;  %1125 = vst [vmem:[%s3226_s5 + $0x1a8] sm:$0xff] %v1693_v32  ;;  %v1269_v53 = vadd.f32 %v1693_v32, %v1268_v14  ;;  %v1377_v5 = vmul.f32 %v1693_v32, %v1693_v32 }
 0x13d   :  { %v802_v60 = vpop.f32.mrb[20].mxu0  ;;  %v1694_v31 = vpop.f32.mrb[36].mxu1 }
 0x13e   :  { %1102 = vst [vmem:[%s3226_s5 + $0xf0] sm:$0xff] %v802_v60  ;;  %v1188_v33 = vadd.f32 %v1187_v52, %v802_v60  ;;  %v1354_v13 = vmul.f32 %v802_v60, %v802_v60  ;;  %v804_v18 = vpop.f32.mrb[21].mxu0  ;;  %v1510_v0 = vadd.f32 %v1509_v26, %v1377_v5  ;;  %v1695_v4 = vpop.f32.mrb[37].mxu1 }
 0x13f   :  { %1103 = vst [vmem:[%s3226_s5 + $0xf8] sm:$0xff] %v804_v18  ;;  %v1225_v12 = vadd.f32 %v1224_v20, %v804_v18  ;;  %v806_v49 = vpop.f32.mrb[22].mxu0  ;;  %v1355_v2 = vmul.f32 %v804_v18, %v804_v18  ;;  %v1696_v63 = vadd.f32 %v1695_v4, %v1694_v31  ;;  %v1697_v19 = vpop.f32.mrb[38].mxu1 }
 0x140   :  { %v1429_v22 = vadd.f32 %v1428_v8, %v1354_v13  ;;  %1105 = vst [vmem:[%s3226_s5 + $0x108] sm:$0xff] %v806_v49  ;;  %v1189_v48 = vadd.f32 %v1188_v33, %v806_v49  ;;  %v1357_v15 = vmul.f32 %v806_v49, %v806_v49  ;;  %v808_v50 = vpop.f32.mrb[23].mxu0  ;;  %v1698_v39 = vpop.f32.mrb[39].mxu1 }
 0x141   :  { %1106 = vst [vmem:[%s3226_s5 + $0x110] sm:$0xff] %v808_v50  ;;  %v1226_v55 = vadd.f32 %v1225_v12, %v808_v50  ;;  %v1358_v57 = vmul.f32 %v808_v50, %v808_v50  ;;  %v1466_v29 = vadd.f32 %v1465_v21, %v1355_v2  ;;  %1128 = vst [vmem:[%s3226_s5 + $0x1c0] sm:$0xff] %v1696_v63 }
 0x142   :  { %v1430_v7 = vadd.f32 %v1429_v22, %v1357_v15  ;;  %v1270_v45 = vadd.f32 %v1696_v63, %v1269_v53  ;;  %v1380_v41 = vmul.f32 %v1696_v63, %v1696_v63  ;;  %v1699_v17 = vadd.f32 %v1698_v39, %v1697_v19 }
 0x143   :  { %v1467_v35 = vadd.f32 %v1466_v29, %v1358_v57 }
 0x144   :  { %v1511_v43 = vadd.f32 %v1510_v0, %v1380_v41  ;;  %1131 = vst [vmem:[%s3226_s5 + $0x1d8] sm:$0xff] %v1699_v17  ;;  %v1271_v54 = vadd.f32 %v1699_v17, %v1270_v45  ;;  %v1383_v62 = vmul.f32 %v1699_v17, %v1699_v17 }
 0x145   :  { %v812_v44 = vpop.f32.mrb[24].mxu0  ;;  %v1700_v34 = vpop.f32.mrb[40].mxu1 }
 0x146   :  { %1108 = vst [vmem:[%s3226_s5 + $0x120] sm:$0xff] %v812_v44  ;;  %v1190_v10 = vadd.f32 %v1189_v48, %v812_v44  ;;  %v1360_v40 = vmul.f32 %v812_v44, %v812_v44  ;;  %v814_v3 = vpop.f32.mrb[25].mxu0  ;;  %v1512_v38 = vadd.f32 %v1511_v43, %v1383_v62  ;;  %v1701_v58 = vpop.f32.mrb[41].mxu1 }
 0x147   :  { %1109 = vst [vmem:[%s3226_s5 + $0x128] sm:$0xff] %v814_v3  ;;  %v1227_v42 = vadd.f32 %v1226_v55, %v814_v3  ;;  %v816_v6 = vpop.f32.mrb[26].mxu0  ;;  %v1361_v56 = vmul.f32 %v814_v3, %v814_v3  ;;  %v1702_v11 = vadd.f32 %v1701_v58, %v1700_v34  ;;  %v1703_v20 = vpop.f32.mrb[42].mxu1 }
 0x148   :  { %v1431_v30 = vadd.f32 %v1430_v7, %v1360_v40  ;;  %1111 = vst [vmem:[%s3226_s5 + $0x138] sm:$0xff] %v816_v6  ;;  %v1191_v61 = vadd.f32 %v1190_v10, %v816_v6  ;;  %v1363_v27 = vmul.f32 %v816_v6, %v816_v6  ;;  %v818_v46 = vpop.f32.mrb[27].mxu0  ;;  %v1704_v36 = vpop.f32.mrb[43].mxu1 }
 0x149   :  { %1112 = vst [vmem:[%s3226_s5 + $0x140] sm:$0xff] %v818_v46  ;;  %v1228_v51 = vadd.f32 %v1227_v42, %v818_v46  ;;  %v1364_v52 = vmul.f32 %v818_v46, %v818_v46  ;;  %v1468_v9 = vadd.f32 %v1467_v35, %v1361_v56  ;;  %1134 = vst [vmem:[%s3226_s5 + $0x1f0] sm:$0xff] %v1702_v11 }
 0x14a   :  { %v1432_v59 = vadd.f32 %v1431_v30, %v1363_v27  ;;  %v1272_v37 = vadd.f32 %v1702_v11, %v1271_v54  ;;  %v1386_v8 = vmul.f32 %v1702_v11, %v1702_v11  ;;  %v1705_v24 = vadd.f32 %v1704_v36, %v1703_v20 }
 0x14b   :  { %v1469_v25 = vadd.f32 %v1468_v9, %v1364_v52 }
 0x14c   :  { %v1513_v28 = vadd.f32 %v1512_v38, %v1386_v8  ;;  %1137 = vst [vmem:[%s3226_s5 + $0x208] sm:$0xff] %v1705_v24  ;;  %v1273_v32 = vadd.f32 %v1705_v24, %v1272_v37  ;;  %v1389_v60 = vmul.f32 %v1705_v24, %v1705_v24 }
 0x14d   :  { %v822_v47 = vpop.f32.mrb[28].mxu0  ;;  %v1706_v22 = vpop.f32.mrb[44].mxu1 }
 0x14e   :  { %1114 = vst [vmem:[%s3226_s5 + $0x150] sm:$0xff] %v822_v47  ;;  %v1192_v21 = vadd.f32 %v1191_v61, %v822_v47  ;;  %v1366_v1 = vmul.f32 %v822_v47, %v822_v47  ;;  %v824_v14 = vpop.f32.mrb[29].mxu0  ;;  %v1514_v49 = vadd.f32 %v1513_v28, %v1389_v60  ;;  %v1707_v50 = vpop.f32.mrb[45].mxu1 }
 0x14f   :  { %1115 = vst [vmem:[%s3226_s5 + $0x158] sm:$0xff] %v824_v14  ;;  %v1229_v33 = vadd.f32 %v1228_v51, %v824_v14  ;;  %v826_v13 = vpop.f32.mrb[30].mxu0  ;;  %v1367_v26 = vmul.f32 %v824_v14, %v824_v14  ;;  %v1708_v31 = vadd.f32 %v1707_v50, %v1706_v22  ;;  %v1709_v55 = vpop.f32.mrb[46].mxu1 }
 0x150   :  { %v1433_v18 = vadd.f32 %v1432_v59, %v1366_v1  ;;  %1117 = vst [vmem:[%s3226_s5 + $0x168] sm:$0xff] %v826_v13  ;;  %v1193_v53 = vadd.f32 %v1192_v21, %v826_v13  ;;  %v1369_v5 = vmul.f32 %v826_v13, %v826_v13  ;;  %v828_v12 = vpop.f32.mrb[31].mxu0  ;;  %v1710_v29 = vpop.f32.mrb[47].mxu1 }
 0x151   :  { %1118 = vst [vmem:[%s3226_s5 + $0x170] sm:$0xff] %v828_v12  ;;  %v1230_v2 = vadd.f32 %v1229_v33, %v828_v12  ;;  %v1370_v48 = vmul.f32 %v828_v12, %v828_v12  ;;  %v1470_v15 = vadd.f32 %v1469_v25, %v1367_v26  ;;  %1140 = vst [vmem:[%s3226_s5 + $0x220] sm:$0xff] %v1708_v31 }
 0x152   :  { %v1434_v0 = vadd.f32 %v1433_v18, %v1369_v5  ;;  %v1274_v4 = vadd.f32 %v1708_v31, %v1273_v32  ;;  %v1392_v7 = vmul.f32 %v1708_v31, %v1708_v31  ;;  %v1711_v63 = vadd.f32 %v1710_v29, %v1709_v55 }
 0x153   :  { %v1471_v57 = vadd.f32 %v1470_v15, %v1370_v48 }
 0x154   :  { %v1515_v41 = vadd.f32 %v1514_v49, %v1392_v7  ;;  %1143 = vst [vmem:[%s3226_s5 + $0x238] sm:$0xff] %v1711_v63  ;;  %v1275_v17 = vadd.f32 %v1711_v63, %v1274_v4  ;;  %v1395_v44 = vmul.f32 %v1711_v63, %v1711_v63 }
 0x155   :  { %v832_v19 = vpop.f32.mrb[32].mxu0  ;;  %v1712_v30 = vpop.f32.mrb[48].mxu1 }
 0x156   :  { %1120 = vst [vmem:[%s3226_s5 + $0x180] sm:$0xff] %v832_v19  ;;  %v1194_v35 = vadd.f32 %v1193_v53, %v832_v19  ;;  %v1372_v39 = vmul.f32 %v832_v19, %v832_v19  ;;  %v834_v45 = vpop.f32.mrb[33].mxu0  ;;  %v1516_v6 = vadd.f32 %v1515_v41, %v1395_v44  ;;  %v1713_v46 = vpop.f32.mrb[49].mxu1 }
 0x157   :  { %1121 = vst [vmem:[%s3226_s5 + $0x188] sm:$0xff] %v834_v45  ;;  %v1231_v10 = vadd.f32 %v1230_v2, %v834_v45  ;;  %v836_v40 = vpop.f32.mrb[34].mxu0  ;;  %v1373_v43 = vmul.f32 %v834_v45, %v834_v45  ;;  %v1714_v34 = vadd.f32 %v1713_v46, %v1712_v30  ;;  %v1715_v51 = vpop.f32.mrb[50].mxu1 }
 0x158   :  { %v1435_v3 = vadd.f32 %v1434_v0, %v1372_v39  ;;  %1123 = vst [vmem:[%s3226_s5 + $0x198] sm:$0xff] %v836_v40  ;;  %v1195_v54 = vadd.f32 %v1194_v35, %v836_v40  ;;  %v1375_v62 = vmul.f32 %v836_v40, %v836_v40  ;;  %v838_v42 = vpop.f32.mrb[35].mxu0  ;;  %v1716_v9 = vpop.f32.mrb[51].mxu1 }
 0x159   :  { %1124 = vst [vmem:[%s3226_s5 + $0x1a0] sm:$0xff] %v838_v42  ;;  %v1232_v56 = vadd.f32 %v1231_v10, %v838_v42  ;;  %v1376_v61 = vmul.f32 %v838_v42, %v838_v42  ;;  %v1472_v27 = vadd.f32 %v1471_v57, %v1373_v43  ;;  %1146 = vst [vmem:[%s3226_s5 + $0x250] sm:$0xff] %v1714_v34 }
 0x15a   :  { %v1436_v38 = vadd.f32 %v1435_v3, %v1375_v62  ;;  %v1276_v58 = vadd.f32 %v1714_v34, %v1275_v17  ;;  %v1398_v59 = vmul.f32 %v1714_v34, %v1714_v34  ;;  %v1717_v11 = vadd.f32 %v1716_v9, %v1715_v51 }
 0x15b   :  { %v1473_v52 = vadd.f32 %v1472_v27, %v1376_v61 }
 0x15c   :  { %v1517_v8 = vadd.f32 %v1516_v6, %v1398_v59  ;;  %1149 = vst [vmem:[%s3226_s5 + $0x268] sm:$0xff] %v1717_v11  ;;  %v1277_v24 = vadd.f32 %v1717_v11, %v1276_v58  ;;  %v1401_v47 = vmul.f32 %v1717_v11, %v1717_v11 }
 0x15d   :  { %v842_v20 = vpop.f32.mrb[36].mxu0  ;;  %v1718_v18 = vpop.f32.mrb[52].mxu1 }
 0x15e   :  { %1126 = vst [vmem:[%s3226_s5 + $0x1b0] sm:$0xff] %v842_v20  ;;  %v1196_v25 = vadd.f32 %v1195_v54, %v842_v20  ;;  %v1378_v36 = vmul.f32 %v842_v20, %v842_v20  ;;  %v844_v37 = vpop.f32.mrb[37].mxu0  ;;  %v1518_v13 = vadd.f32 %v1517_v8, %v1401_v47  ;;  %v1719_v12 = vpop.f32.mrb[53].mxu1 }
 0x15f   :  { %1127 = vst [vmem:[%s3226_s5 + $0x1b8] sm:$0xff] %v844_v37  ;;  %v1233_v21 = vadd.f32 %v1232_v56, %v844_v37  ;;  %v846_v1 = vpop.f32.mrb[38].mxu0  ;;  %v1379_v28 = vmul.f32 %v844_v37, %v844_v37  ;;  %v1720_v22 = vadd.f32 %v1719_v12, %v1718_v18  ;;  %v1721_v2 = vpop.f32.mrb[54].mxu1 }
 0x160   :  { %v1437_v14 = vadd.f32 %v1436_v38, %v1378_v36  ;;  %1129 = vst [vmem:[%s3226_s5 + $0x1c8] sm:$0xff] %v846_v1  ;;  %v1197_v32 = vadd.f32 %v1196_v25, %v846_v1  ;;  %v1381_v60 = vmul.f32 %v846_v1, %v846_v1  ;;  %v848_v33 = vpop.f32.mrb[39].mxu0  ;;  %v1722_v15 = vpop.f32.mrb[55].mxu1 }
 0x161   :  { %1130 = vst [vmem:[%s3226_s5 + $0x1d0] sm:$0xff] %v848_v33  ;;  %v1234_v26 = vadd.f32 %v1233_v21, %v848_v33  ;;  %v1382_v53 = vmul.f32 %v848_v33, %v848_v33  ;;  %v1474_v5 = vadd.f32 %v1473_v52, %v1379_v28  ;;  %1152 = vst [vmem:[%s3226_s5 + $0x280] sm:$0xff] %v1720_v22 }
 0x162   :  { %v1438_v49 = vadd.f32 %v1437_v14, %v1381_v60  ;;  %v1278_v50 = vadd.f32 %v1720_v22, %v1277_v24  ;;  %v1404_v0 = vmul.f32 %v1720_v22, %v1720_v22  ;;  %v1723_v31 = vadd.f32 %v1722_v15, %v1721_v2 }
 0x163   :  { %v1475_v48 = vadd.f32 %v1474_v5, %v1382_v53 }
 0x164   :  { %v1519_v7 = vadd.f32 %v1518_v13, %v1404_v0  ;;  %1155 = vst [vmem:[%s3226_s5 + $0x298] sm:$0xff] %v1723_v31  ;;  %v1279_v63 = vadd.f32 %v1723_v31, %v1278_v50  ;;  %v1407_v19 = vmul.f32 %v1723_v31, %v1723_v31 }
 0x165   :  { %v852_v55 = vpop.f32.mrb[40].mxu0  ;;  %v1724_v3 = vpop.f32.mrb[56].mxu1 }
 0x166   :  { %1132 = vst [vmem:[%s3226_s5 + $0x1e0] sm:$0xff] %v852_v55  ;;  %v1198_v57 = vadd.f32 %v1197_v32, %v852_v55  ;;  %v1384_v29 = vmul.f32 %v852_v55, %v852_v55  ;;  %v854_v4 = vpop.f32.mrb[41].mxu0  ;;  %v1520_v40 = vadd.f32 %v1519_v7, %v1407_v19  ;;  %v1725_v42 = vpop.f32.mrb[57].mxu1 }
 0x167   :  { %1133 = vst [vmem:[%s3226_s5 + $0x1e8] sm:$0xff] %v854_v4  ;;  %v1235_v35 = vadd.f32 %v1234_v26, %v854_v4  ;;  %v856_v39 = vpop.f32.mrb[42].mxu0  ;;  %v1385_v41 = vmul.f32 %v854_v4, %v854_v4  ;;  %v1726_v30 = vadd.f32 %v1725_v42, %v1724_v3  ;;  %v1727_v56 = vpop.f32.mrb[58].mxu1 }
 0x168   :  { %v1439_v45 = vadd.f32 %v1438_v49, %v1384_v29  ;;  %1135 = vst [vmem:[%s3226_s5 + $0x1f8] sm:$0xff] %v856_v39  ;;  %v1199_v17 = vadd.f32 %v1198_v57, %v856_v39  ;;  %v1387_v44 = vmul.f32 %v856_v39, %v856_v39  ;;  %v858_v10 = vpop.f32.mrb[43].mxu0  ;;  %v1728_v27 = vpop.f32.mrb[59].mxu1 }
 0x169   :  { %1136 = vst [vmem:[%s3226_s5 + $0x200] sm:$0xff] %v858_v10  ;;  %v1236_v43 = vadd.f32 %v1235_v35, %v858_v10  ;;  %v1388_v54 = vmul.f32 %v858_v10, %v858_v10  ;;  %v1476_v62 = vadd.f32 %v1475_v48, %v1385_v41  ;;  %1158 = vst [vmem:[%s3226_s5 + $0x2b0] sm:$0xff] %v1726_v30 }
 0x16a   :  { %v1440_v6 = vadd.f32 %v1439_v45, %v1387_v44  ;;  %v1280_v46 = vadd.f32 %v1726_v30, %v1279_v63  ;;  %v1410_v38 = vmul.f32 %v1726_v30, %v1726_v30  ;;  %v1729_v34 = vadd.f32 %v1728_v27, %v1727_v56 }
 0x16b   :  { %v1477_v61 = vadd.f32 %v1476_v62, %v1388_v54 }
 0x16c   :  { %v1521_v59 = vadd.f32 %v1520_v40, %v1410_v38  ;;  %1161 = vst [vmem:[%s3226_s5 + $0x2c8] sm:$0xff] %v1729_v34  ;;  %v1281_v11 = vadd.f32 %v1729_v34, %v1280_v46  ;;  %v1413_v20 = vmul.f32 %v1729_v34, %v1729_v34 }
 0x16d   :  { %v862_v51 = vpop.f32.mrb[44].mxu0  ;;  %v1730_v14 = vpop.f32.mrb[60].mxu1 }
 0x16e   :  { %1138 = vst [vmem:[%s3226_s5 + $0x210] sm:$0xff] %v862_v51  ;;  %v1200_v52 = vadd.f32 %v1199_v17, %v862_v51  ;;  %v1390_v9 = vmul.f32 %v862_v51, %v862_v51  ;;  %v864_v58 = vpop.f32.mrb[45].mxu0  ;;  %v1522_v1 = vadd.f32 %v1521_v59, %v1413_v20  ;;  %v1731_v33 = vpop.f32.mrb[61].mxu1 }
 0x16f   :  { %1139 = vst [vmem:[%s3226_s5 + $0x218] sm:$0xff] %v864_v58  ;;  %v1237_v25 = vadd.f32 %v1236_v43, %v864_v58  ;;  %v866_v36 = vpop.f32.mrb[46].mxu0  ;;  %v1391_v8 = vmul.f32 %v864_v58, %v864_v58  ;;  %v1732_v18 = vadd.f32 %v1731_v33, %v1730_v14  ;;  %v1733_v26 = vpop.f32.mrb[62].mxu1 }
 0x170   :  { %v1441_v37 = vadd.f32 %v1440_v6, %v1390_v9  ;;  %1141 = vst [vmem:[%s3226_s5 + $0x228] sm:$0xff] %v866_v36  ;;  %v1201_v24 = vadd.f32 %v1200_v52, %v866_v36  ;;  %v1393_v47 = vmul.f32 %v866_v36, %v866_v36  ;;  %v868_v21 = vpop.f32.mrb[47].mxu0  ;;  %v1734_v5 = vpop.f32.mrb[63].mxu1 }
 0x171   :  { %1142 = vst [vmem:[%s3226_s5 + $0x230] sm:$0xff] %v868_v21  ;;  %v1238_v28 = vadd.f32 %v1237_v25, %v868_v21  ;;  %v1394_v32 = vmul.f32 %v868_v21, %v868_v21  ;;  %v1478_v60 = vadd.f32 %v1477_v61, %v1391_v8  ;;  %1164 = vst [vmem:[%s3226_s5 + $0x2e0] sm:$0xff] %v1732_v18 }
 0x172   :  { %v1442_v13 = vadd.f32 %v1441_v37, %v1393_v47  ;;  %v1282_v12 = vadd.f32 %v1732_v18, %v1281_v11  ;;  %v1416_v49 = vmul.f32 %v1732_v18, %v1732_v18  ;;  %v1735_v22 = vadd.f32 %v1734_v5, %v1733_v26 }
 0x173   :  { %v1479_v53 = vadd.f32 %v1478_v60, %v1394_v32 }
 0x174   :  { %v1523_v0 = vadd.f32 %v1522_v1, %v1416_v49  ;;  %1167 = vst [vmem:[%s3226_s5 + $0x2f8] sm:$0xff] %v1735_v22  ;;  %v1283_v31 = vadd.f32 %v1735_v22, %v1282_v12  ;;  %v1419_v55 = vmul.f32 %v1735_v22, %v1735_v22 }
 0x175   :  { %v872_v2 = vpop.f32.mrb[48].mxu0 }
 0x176   :  { %1144 = vst [vmem:[%s3226_s5 + $0x240] sm:$0xff] %v872_v2  ;;  %v1202_v48 = vadd.f32 %v1201_v24, %v872_v2  ;;  %v1396_v15 = vmul.f32 %v872_v2, %v872_v2  ;;  %v874_v50 = vpop.f32.mrb[49].mxu0  ;;  %v1524_v39 = vadd.f32 %v1523_v0, %v1419_v55  ;;  %v1284_v21 = vrot.slane %v1283_v31, 4 }
 0x177   :  { %1145 = vst [vmem:[%s3226_s5 + $0x248] sm:$0xff] %v874_v50  ;;  %v1239_v57 = vadd.f32 %v1238_v28, %v874_v50  ;;  %v876_v29 = vpop.f32.mrb[50].mxu0  ;;  %v1397_v7 = vmul.f32 %v874_v50, %v874_v50 }
 0x178   :  { %v1443_v4 = vadd.f32 %v1442_v13, %v1396_v15  ;;  %1147 = vst [vmem:[%s3226_s5 + $0x258] sm:$0xff] %v876_v29  ;;  %v1203_v63 = vadd.f32 %v1202_v48, %v876_v29  ;;  %v1399_v19 = vmul.f32 %v876_v29, %v876_v29  ;;  %v878_v35 = vpop.f32.mrb[51].mxu0  ;;  %v1525_v60 = vrot.slane %v1524_v39, 4 }
 0x179   :  { %1148 = vst [vmem:[%s3226_s5 + $0x260] sm:$0xff] %v878_v35  ;;  %v1240_v45 = vadd.f32 %v1239_v57, %v878_v35  ;;  %v1400_v41 = vmul.f32 %v878_v35, %v878_v35  ;;  %v1480_v17 = vadd.f32 %v1479_v53, %v1397_v7  ;;  %v1285_v13 = vadd.f32 %v1284_v21, %v1283_v31 }
 0x17a   :  { %v1444_v44 = vadd.f32 %v1443_v4, %v1399_v19  ;;  %v1526_v12 = vadd.f32 %v1525_v60, %v1524_v39 }
 0x17b   :  { %v1481_v10 = vadd.f32 %v1480_v17, %v1400_v41  ;;  %v1286_v31 = vrot.slane %v1285_v13, 2  ;;  %v1803_v17 = vmov 1966171168  }
 0x17d   :  { %v882_v40 = vpop.f32.mrb[52].mxu0  ;;  %v1287_v41 = vadd.f32 %v1286_v31, %v1285_v13 }
 0x17e   :  { %1150 = vst [vmem:[%s3226_s5 + $0x270] sm:$0xff] %v882_v40  ;;  %v1204_v3 = vadd.f32 %v1203_v63, %v882_v40  ;;  %v1402_v43 = vmul.f32 %v882_v40, %v882_v40  ;;  %v884_v54 = vpop.f32.mrb[53].mxu0  ;;  %v1527_v63 = vrot.slane %v1526_v12, 2 }
 0x17f   :  { %1151 = vst [vmem:[%s3226_s5 + $0x278] sm:$0xff] %v884_v54  ;;  %v1241_v62 = vadd.f32 %v1240_v45, %v884_v54  ;;  %v1403_v42 = vmul.f32 %v884_v54, %v884_v54  ;;  %v886_v6 = vpop.f32.mrb[54].mxu0 }
 0x180   :  { %v1445_v30 = vadd.f32 %v1444_v44, %v1402_v43  ;;  %1153 = vst [vmem:[%s3226_s5 + $0x288] sm:$0xff] %v886_v6  ;;  %v1205_v56 = vadd.f32 %v1204_v3, %v886_v6  ;;  %v1405_v61 = vmul.f32 %v886_v6, %v886_v6  ;;  %v888_v27 = vpop.f32.mrb[55].mxu0  ;;  %v1295_v44 = vunpack.c.l.s4 %v1803_v17 }
 0x181   :  { %v1482_v46 = vadd.f32 %v1481_v10, %v1403_v42  ;;  %1154 = vst [vmem:[%s3226_s5 + $0x290] sm:$0xff] %v888_v27  ;;  %v1242_v38 = vadd.f32 %v1241_v62, %v888_v27  ;;  %v1406_v51 = vmul.f32 %v888_v27, %v888_v27  ;;  %v1528_v54 = vadd.f32 %v1527_v63, %v1526_v12 }
 0x182   :  { %v1446_v34 = vadd.f32 %v1445_v30, %v1405_v61  ;;  %v1296_v61 = vunpack.c.0.s8 %v1295_v44 }
 0x183   :  { %v1483_v52 = vadd.f32 %v1482_v46, %v1406_v51  ;;  %v1529_v51 = vrot.slane %v1528_v54, 1 }
 0x185   :  { %v892_v9 = vpop.f32.mrb[56].mxu0 }
 0x186   :  { %1156 = vst [vmem:[%s3226_s5 + $0x2a0] sm:$0xff] %v892_v9  ;;  %v1206_v58 = vadd.f32 %v1205_v56, %v892_v9  ;;  %v1408_v59 = vmul.f32 %v892_v9, %v892_v9  ;;  %v894_v11 = vpop.f32.mrb[57].mxu0  ;;  %v1288_v56 = vrot.slane %v1287_v41, 1 }
 0x187   :  { %1157 = vst [vmem:[%s3226_s5 + $0x2a8] sm:$0xff] %v894_v11  ;;  %v1243_v20 = vadd.f32 %v1242_v38, %v894_v11  ;;  %v1409_v25 = vmul.f32 %v894_v11, %v894_v11  ;;  %v896_v36 = vpop.f32.mrb[58].mxu0 }
 0x188   :  { %v1447_v37 = vadd.f32 %v1446_v34, %v1408_v59  ;;  %1159 = vst [vmem:[%s3226_s5 + $0x2b8] sm:$0xff] %v896_v36  ;;  %v1207_v8 = vadd.f32 %v1206_v58, %v896_v36  ;;  %v1411_v24 = vmul.f32 %v896_v36, %v896_v36  ;;  %v898_v47 = vpop.f32.mrb[59].mxu0  ;;  %v1289_v11 = vadd.f32 %v1288_v56, %v1287_v41 }
 0x189   :  { %v1484_v1 = vadd.f32 %v1483_v52, %v1409_v25  ;;  %1160 = vst [vmem:[%s3226_s5 + $0x2c0] sm:$0xff] %v898_v47  ;;  %v1244_v14 = vadd.f32 %v1243_v20, %v898_v47  ;;  %v1412_v28 = vmul.f32 %v898_v47, %v898_v47  ;;  %v1299_v20 = vsub.s32 %v1296_v61, %v1911_v23  ;;  %v1323_v23 = vld [vmem:[%s3228_s7] sm:$0x7] }
 0x18a   :  { %v1448_v32 = vadd.f32 %v1447_v37, %v1411_v24 }
 0x18b   :  { %v1485_v33 = vadd.f32 %v1484_v1, %v1412_v28  ;;  %v1307_v21 = vrot.slane %v1289_v11, %v1299_v20 }
 0x18d   :  { %v902_v18 = vpop.f32.mrb[60].mxu0 }
 0x18e   :  { %1162 = vst [vmem:[%s3226_s5 + $0x2d0] sm:$0xff] %v902_v18  ;;  %v1208_v26 = vadd.f32 %v1207_v8, %v902_v18  ;;  %v1414_v53 = vmul.f32 %v902_v18, %v902_v18  ;;  %v904_v5 = vpop.f32.mrb[61].mxu0  ;;  %v1530_v8 = vadd.f32 %v1529_v51, %v1528_v54 }
 0x18f   :  { %1163 = vst [vmem:[%s3226_s5 + $0x2d8] sm:$0xff] %v904_v5  ;;  %v1245_v49 = vadd.f32 %v1244_v14, %v904_v5  ;;  %v1415_v22 = vmul.f32 %v904_v5, %v904_v5  ;;  %v906_v2 = vpop.f32.mrb[62].mxu0 }
 0x190   :  { %v1449_v48 = vadd.f32 %v1448_v32, %v1414_v53  ;;  %1165 = vst [vmem:[%s3226_s5 + $0x2e8] sm:$0xff] %v906_v2  ;;  %v1209_v15 = vadd.f32 %v1208_v26, %v906_v2  ;;  %v1417_v50 = vmul.f32 %v906_v2, %v906_v2  ;;  %v908_v0 = vpop.f32.mrb[63].mxu0  ;;  %v1548_v28 = vrot.slane %v1530_v8, %v1299_v20 }
 0x191   :  { %v1486_v55 = vadd.f32 %v1485_v33, %v1415_v22  ;;  %1166 = vst [vmem:[%s3226_s5 + $0x2f0] sm:$0xff] %v908_v0  ;;  %v1246_v57 = vadd.f32 %v1245_v49, %v908_v0  ;;  %v1418_v29 = vmul.f32 %v908_v0, %v908_v0  ;;  %v1178_v33 = vld [vmem:[%s3227_s6] sm:$0x7] }
 0x192   :  { %v1210_v4 = vrot.slane %v1209_v15, 4  ;;  %v1450_v7 = vadd.f32 %v1449_v48, %v1417_v50 }
 0x193   :  { %v1247_v19 = vrot.slane %v1246_v57, 4  ;;  %v1487_v35 = vadd.f32 %v1486_v55, %v1418_v29 }
 0x194   :  { %v1211_v39 = vadd.f32 %v1210_v4, %v1209_v15  ;;  %v1451_v45 = vrot.slane %v1450_v7, 4 }
 0x195   :  { %v1248_v10 = vadd.f32 %v1247_v19, %v1246_v57  ;;  %v1488_v40 = vrot.slane %v1487_v35, 4 }
 0x196   :  { %v1212_v3 = vrot.slane %v1211_v39, 2  ;;  %v1452_v43 = vadd.f32 %v1451_v45, %v1450_v7 }
 0x197   :  { %v1249_v62 = vrot.slane %v1248_v10, 2  ;;  %v1489_v42 = vadd.f32 %v1488_v40, %v1487_v35 }
 0x198   :  { %v1213_v6 = vadd.f32 %v1212_v3, %v1211_v39  ;;  %v1453_v30 = vrot.slane %v1452_v43, 2 }
 0x199   :  { %v1250_v27 = vadd.f32 %v1249_v62, %v1248_v10  ;;  %v1490_v46 = vrot.slane %v1489_v42, 2 }
 0x19a   :  { %v1214_v38 = vrot.slane %v1213_v6, 1  ;;  %v1454_v34 = vadd.f32 %v1453_v30, %v1452_v43 }
 0x19b   :  { %v1251_v52 = vrot.slane %v1250_v27, 1  ;;  %v1491_v9 = vadd.f32 %v1490_v46, %v1489_v42 }
 0x19c   :  { %v1215_v58 = vadd.f32 %v1214_v38, %v1213_v6  ;;  %v1455_v59 = vrot.slane %v1454_v34, 1 }
 0x19d   :  { %v1252_v25 = vadd.f32 %v1251_v52, %v1250_v27  ;;  %v1492_v36 = vrot.slane %v1491_v9, 1 }
 0x19e   :  { %v1456_v37 = vadd.f32 %v1455_v59, %v1454_v34 }
 0x19f   :  { %v1293_v24 = vcombine.low %v1215_v58, %v1252_v25  ;;  %v1493_v47 = vadd.f32 %v1492_v36, %v1491_v9 }
 0x1a1   :  { %v1300_v1 = vrot.slane %v1293_v24, %v1299_v20  ;;  %v1534_v14 = vcombine.low %v1456_v37, %v1493_v47 }
 0x1a3   :  { %v1308_v32 = vcombine.low %v1300_v1, %v1307_v21  ;;  %v1541_v60 = vrot.slane %v1534_v14, %v1299_v20 }
 0x1a5   :  { %v1315_v13 = vrot.slane %v1308_v32, %v1299_v20  ;;  %v1549_v18 = vcombine.low %v1541_v60, %v1548_v28 }
 0x1a7   :  { %v1317_v26 = vadd.f32 %v1315_v13, %v1178_v33  ;;  %v1556_v53 = vrot.slane %v1549_v18, %v1299_v20 }
 0x1a9   :  { %1322 = vst.msk [vmem:[%s3227_s6] sm:$0x7] %vm2944_vm0, %v1317_v26  ;;  %v1558_v5 = vadd.f32 %v1556_v53, %v1323_v23 }
 0x1ab   :  { %1559 = vst.msk [vmem:[%s3228_s7] sm:$0x7] %vm2944_vm0, %v1558_v5 }

// kernel: hdnet_forward.9
= control target key start
LH: loop header
LB: loop body
LE: loop exit
PB: predicated region body
PF: predicated region fallthrough
CT: control target
= control target key end

     0   :  { %s1212_s6 = smov 0   ;;  %s2024_s0 = inlined_call_operand.vmem [shape: f32[1024,256], index: 0, kind: input, shape index: {}]   ;;  %s2025_s1 = inlined_call_operand.vmem [shape: f32[1024,256], index: 1, kind: output, shape index: {}]  }
   0x1 LB: > { %s1015_s7 = sadd.s32 4294967295, %s1200_s6   ;;  %p1019_p0 = scmp.ge.s32.totalorder %s1200_s6, 1  ;;  %s1200_s6 = sphi %s1212_s6, %s11_s6  }
   0x2   : > { %p89_p1 = scmp.lt.s32.totalorder %s1200_s6, 3 }
   0x4   : > { %p90_p2 = pnand %p1019_p0, %p89_p1 }
   0x6   : > { %93 = sbr.rel (%p90_p2) target bundleno = 307 (0x133), region = 24 }
   0xd   : > { %s1020_s8 = sshll.u32 %s1015_s7, 6 }
   0xe   : > { %p112_p3 = scmp.lt.s32.totalorder %s1020_s8, 127 }
  0x10   : > { %s2213_s8 = smov (!%p112_p3, %s1020_s8), 127 }
  0x11   : > { %s1028_s9 = sshll.u32 %s2213_s8, 4 }
  0x12   : > { %s1228_s12 = scalar_lea.vmem %s2024_s0, %s1028_s9  ;;  %s1763_s15 = scalar_lea.vmem %s2025_s1, %s1028_s9 }
  0x13   : > { %v1231_v0 = vld [vmem:[%s1228_s12 + $0x20] sm:$0xff]  ;;  %v1234_v1 = vld [vmem:[%s1228_s12 + $0x28] sm:$0xff]  ;;  %v1249_v7 = vld [vmem:[%s1228_s12 + $0x30] sm:$0xff] }
  0x14   : > { %v1237_v2 = vld [vmem:[%s1228_s12] sm:$0xff]  ;;  %v257_v3 = vmul.f32 %v1231_v0, %v1231_v0  ;;  %v258_v4 = vmul.f32 %v1234_v1, %v1234_v1  ;;  %v1244_v5 = vld [vmem:[%s1228_s12 + $0x8] sm:$0xff]  ;;  %v1252_v8 = vld [vmem:[%s1228_s12 + $0x38] sm:$0xff]  ;;  %v259_v10 = vmul.f32 %v1249_v7, %v1249_v7 }
  0x15   : > { %v253_v6 = vmul.f32 %v1237_v2, %v1237_v2  ;;  %v254_v9 = vmul.f32 %v1244_v5, %v1244_v5  ;;  %v260_v11 = vmul.f32 %v1252_v8, %v1252_v8  ;;  %v1261_v12 = vld [vmem:[%s1228_s12 + $0x10] sm:$0xff]  ;;  %v1264_v13 = vld [vmem:[%s1228_s12 + $0x18] sm:$0xff]  ;;  %v1277_v19 = vld [vmem:[%s1228_s12 + $0x40] sm:$0xff] }
  0x16   : > { %v1267_v14 = vld [vmem:[%s1228_s12 + $0x50] sm:$0xff]  ;;  %v387_v15 = vadd.f32 %v258_v4, %v257_v3  ;;  %v255_v16 = vmul.f32 %v1261_v12, %v1261_v12  ;;  %v256_v17 = vmul.f32 %v1264_v13, %v1264_v13  ;;  %v1274_v18 = vld [vmem:[%s1228_s12 + $0x58] sm:$0xff]  ;;  %v1280_v20 = vld [vmem:[%s1228_s12 + $0x48] sm:$0xff]  ;;  %v261_v26 = vmul.f32 %v1277_v19, %v1277_v19 }
  0x17   : > { %v381_v21 = vadd.f32 %v254_v9, %v253_v6  ;;  %v390_v22 = vadd.f32 %v260_v11, %v259_v10  ;;  %v263_v23 = vmul.f32 %v1267_v14, %v1267_v14  ;;  %v264_v24 = vmul.f32 %v1274_v18, %v1274_v18  ;;  %v1291_v28 = vld [vmem:[%s1228_s12 + $0x70] sm:$0xff]  ;;  %v1294_v29 = vld [vmem:[%s1228_s12 + $0x78] sm:$0xff]  ;;  %v1297_v30 = vld [vmem:[%s1228_s12 + $0x60] sm:$0xff] }
  0x18   : > { %388 = vadd.xlane.f32.xlu1 %v387_v15  ;;  %v384_v25 = vadd.f32 %v256_v17, %v255_v16  ;;  %v262_v27 = vmul.f32 %v1280_v20, %v1280_v20  ;;  %v1300_v31 = vld [vmem:[%s1228_s12 + $0x68] sm:$0xff]  ;;  %v267_v33 = vmul.f32 %v1291_v28, %v1291_v28  ;;  %v268_v34 = vmul.f32 %v1294_v29, %v1294_v29  ;;  %v1311_v38 = vld [vmem:[%s1228_s12 + $0x90] sm:$0xff]  ;;  %v1314_v39 = vld [vmem:[%s1228_s12 + $0x98] sm:$0xff] }
  0x19   : > { %382 = vadd.xlane.f32.xlu0 %v381_v21  ;;  %v396_v32 = vadd.f32 %v264_v24, %v263_v23  ;;  %v265_v36 = vmul.f32 %v1297_v30, %v1297_v30  ;;  %v266_v37 = vmul.f32 %v1300_v31, %v1300_v31  ;;  %v1317_v40 = vld [vmem:[%s1228_s12 + $0x80] sm:$0xff]  ;;  %v1320_v41 = vld [vmem:[%s1228_s12 + $0x88] sm:$0xff]  ;;  %v271_v43 = vmul.f32 %v1311_v38, %v1311_v38  ;;  %v1331_v48 = vld [vmem:[%s1228_s12 + $0xb0] sm:$0xff] }
  0x1a   : > { %v393_v35 = vadd.f32 %v262_v27, %v261_v26  ;;  %v402_v42 = vadd.f32 %v268_v34, %v267_v33  ;;  %v272_v44 = vmul.f32 %v1314_v39, %v1314_v39  ;;  %v269_v46 = vmul.f32 %v1317_v40, %v1317_v40  ;;  %v1334_v49 = vld [vmem:[%s1228_s12 + $0xb8] sm:$0xff]  ;;  %v1337_v50 = vld [vmem:[%s1228_s12 + $0xa0] sm:$0xff]  ;;  %v1340_v51 = vld [vmem:[%s1228_s12 + $0xa8] sm:$0xff] }
  0x1b   : > { %v399_v45 = vadd.f32 %v266_v37, %v265_v36  ;;  %v270_v47 = vmul.f32 %v1320_v41, %v1320_v41  ;;  %v275_v53 = vmul.f32 %v1331_v48, %v1331_v48  ;;  %v276_v54 = vmul.f32 %v1334_v49, %v1334_v49  ;;  %v1351_v58 = vld [vmem:[%s1228_s12 + $0xd0] sm:$0xff]  ;;  %v1354_v59 = vld [vmem:[%s1228_s12 + $0xd8] sm:$0xff]  ;;  %v1357_v60 = vld [vmem:[%s1228_s12 + $0xc0] sm:$0xff] }
  0x1c   : > { %391 = vadd.xlane.f32.xlu1 %v390_v22  ;;  %v408_v52 = vadd.f32 %v272_v44, %v271_v43  ;;  %v273_v56 = vmul.f32 %v1337_v50, %v1337_v50  ;;  %v274_v57 = vmul.f32 %v1340_v51, %v1340_v51  ;;  %v1360_v61 = vld [vmem:[%s1228_s12 + $0xc8] sm:$0xff]  ;;  %v279_v63 = vmul.f32 %v1351_v58, %v1351_v58  ;;  %v1371_v10 = vld [vmem:[%s1228_s12 + $0xf0] sm:$0xff]  ;;  %v1374_v11 = vld [vmem:[%s1228_s12 + $0xf8] sm:$0xff] }
  0x1d   : > { %385 = vadd.xlane.f32.xlu0 %v384_v25  ;;  %v405_v55 = vadd.f32 %v270_v47, %v269_v46  ;;  %v414_v62 = vadd.f32 %v276_v54, %v275_v53  ;;  %v280_v3 = vmul.f32 %v1354_v59, %v1354_v59  ;;  %v277_v6 = vmul.f32 %v1357_v60, %v1357_v60  ;;  %v1377_v15 = vld [vmem:[%s1228_s12 + $0xe0] sm:$0xff]  ;;  %v1380_v16 = vld [vmem:[%s1228_s12 + $0xe8] sm:$0xff]  ;;  %v1391_v26 = vld [vmem:[%s1228_s12 + $0x110] sm:$0xff] }
  0x1e   : > { %v411_v4 = vadd.f32 %v274_v57, %v273_v56  ;;  %v278_v9 = vmul.f32 %v1360_v61, %v1360_v61  ;;  %v283_v21 = vmul.f32 %v1371_v10, %v1371_v10  ;;  %v284_v22 = vmul.f32 %v1374_v11, %v1374_v11  ;;  %v1394_v27 = vld [vmem:[%s1228_s12 + $0x118] sm:$0xff]  ;;  %v1400_v33 = vld [vmem:[%s1228_s12 + $0x108] sm:$0xff]  ;;  %v1411_v44 = vld [vmem:[%s1228_s12 + $0x130] sm:$0xff] }
  0x1f   : > { %v420_v17 = vadd.f32 %v280_v3, %v279_v63  ;;  %v281_v24 = vmul.f32 %v1377_v15, %v1377_v15  ;;  %v282_v25 = vmul.f32 %v1380_v16, %v1380_v16  ;;  %v288_v36 = vmul.f32 %v1394_v27, %v1394_v27  ;;  %v1417_v46 = vld [vmem:[%s1228_s12 + $0x120] sm:$0xff]  ;;  %v1420_v47 = vld [vmem:[%s1228_s12 + $0x128] sm:$0xff]  ;;  %v1434_v63 = vld [vmem:[%s1228_s12 + $0x158] sm:$0xff] }
  0x20   : > { %397 = vadd.xlane.f32.xlu1 %v396_v32  ;;  %v417_v23 = vadd.f32 %v278_v9, %v277_v6  ;;  %v1397_v32 = vld [vmem:[%s1228_s12 + $0x100] sm:$0xff]  ;;  %v426_v34 = vadd.f32 %v284_v22, %v283_v21  ;;  %v286_v43 = vmul.f32 %v1400_v33, %v1400_v33  ;;  %2088 = vst [vmem:[#allocation2_spill] sm:$0xff] %v1417_v46  ;;  %2089 = vst [vmem:[#allocation3_spill] sm:$0xff] %v1420_v47 }
  0x21   : > { %394 = vadd.xlane.f32.xlu0 %v393_v35  ;;  %v287_v35 = vmul.f32 %v1391_v26, %v1391_v26  ;;  %v423_v37 = vadd.f32 %v282_v25, %v281_v24  ;;  %v291_v53 = vmul.f32 %v1411_v44, %v1411_v44  ;;  %v289_v56 = vmul.f32 %v1417_v46, %v1417_v46  ;;  %v1437_v3 = vld [vmem:[%s1228_s12 + $0x140] sm:$0xff]  ;;  %v1451_v24 = vld [vmem:[%s1228_s12 + $0x170] sm:$0xff]  ;;  %v1454_v25 = vld [vmem:[%s1228_s12 + $0x178] sm:$0xff] }
  0x22   : > { %v290_v57 = vmul.f32 %v1420_v47, %v1420_v47  ;;  %2091 = vst [vmem:[#allocation5_spill] sm:$0xff] %v1434_v63  ;;  %2092 = vst [vmem:[#allocation6_spill] sm:$0xff] %v1437_v3  ;;  %v293_v22 = vmul.f32 %v1437_v3, %v1437_v3 }
  0x23   : > { %2094 = vst [vmem:[#allocation8_spill] sm:$0xff] %v1451_v24  ;;  %2095 = vst [vmem:[#allocation9_spill] sm:$0xff] %v1454_v25 }
  0x24   : > { %403 = vadd.xlane.f32.xlu1 %v402_v42  ;;  %v285_v42 = vmul.f32 %v1397_v32, %v1397_v32  ;;  %v435_v21 = vadd.f32 %v290_v57, %v289_v56  ;;  %v1477_v56 = vld [vmem:[%s1228_s12 + $0x180] sm:$0xff]  ;;  %v1480_v57 = vld [vmem:[%s1228_s12 + $0x188] sm:$0xff] }
  0x25   : > { %400 = vadd.xlane.f32.xlu0 %v399_v45  ;;  %v1414_v45 = vld [vmem:[%s1228_s12 + $0x138] sm:$0xff]  ;;  %2100 = vst [vmem:[#allocation14_spill] sm:$0xff] %v1477_v56  ;;  %2101 = vst [vmem:[#allocation15_spill] sm:$0xff] %v1480_v57 }
  0x26   : > { %v292_v54 = vmul.f32 %v1414_v45, %v1414_v45 }
  0x28   : > { %409 = vadd.xlane.f32.xlu1 %v408_v52  ;;  %v432_v52 = vadd.f32 %v288_v36, %v287_v35  ;;  %v438_v6 = vadd.f32 %v292_v54, %v291_v53  ;;  %v1460_v35 = vld [vmem:[%s1228_s12 + $0x168] sm:$0xff]  ;;  %v1471_v54 = vld [vmem:[%s1228_s12 + $0x190] sm:$0xff] }
  0x29   : > { %406 = vadd.xlane.f32.xlu0 %v405_v55  ;;  %v429_v55 = vadd.f32 %v286_v43, %v285_v42  ;;  %2097 = vst [vmem:[#allocation11_spill] sm:$0xff] %v1460_v35  ;;  %v300_v42 = vmul.f32 %v1454_v25, %v1454_v25  ;;  %v298_v53 = vmul.f32 %v1460_v35, %v1460_v35  ;;  %2098 = vst [vmem:[#allocation12_spill] sm:$0xff] %v1471_v54  ;;  %v226_v35 = vld [vmem:[%s1228_s12 + $0x328] sm:$0xff]  ;;  %v232_v25 = vld [vmem:[%s1228_s12 + $0x358] sm:$0xff] }
  0x2c   : > { %415 = vadd.xlane.f32.xlu1 %v414_v62  ;;  %v1431_v62 = vld [vmem:[%s1228_s12 + $0x150] sm:$0xff] }
  0x2d   : > { %412 = vadd.xlane.f32.xlu0 %v411_v4  ;;  %2090 = vst [vmem:[#allocation4_spill] sm:$0xff] %v1431_v62  ;;  %v1440_v4 = vld [vmem:[%s1228_s12 + $0x148] sm:$0xff]  ;;  %v295_v9 = vmul.f32 %v1431_v62, %v1431_v62 }
  0x2e   : > { %2093 = vst [vmem:[#allocation7_spill] sm:$0xff] %v1440_v4 }
  0x30   : > { %421 = vadd.xlane.f32.xlu1 %v420_v17  ;;  %v296_v17 = vmul.f32 %v1434_v63, %v1434_v63  ;;  %v360_v63 = vmul.f32 %v232_v25, %v232_v25 }
  0x31   : > { %418 = vadd.xlane.f32.xlu0 %v417_v23  ;;  %v294_v23 = vmul.f32 %v1440_v4, %v1440_v4 }
  0x32   : > { %v444_v36 = vadd.f32 %v296_v17, %v295_v9  ;;  %v303_v9 = vmul.f32 %v1471_v54, %v1471_v54  ;;  %v1500_v54 = vld [vmem:[%s1228_s12 + $0x1a8] sm:$0xff] }
  0x33   : > { %v441_v43 = vadd.f32 %v294_v23, %v293_v22  ;;  %v301_v22 = vmul.f32 %v1477_v56, %v1477_v56  ;;  %v302_v23 = vmul.f32 %v1480_v57, %v1480_v57  ;;  %2105 = vst [vmem:[#allocation19_spill] sm:$0xff] %v1500_v54 }
  0x34   : > { %427 = vadd.xlane.f32.xlu1 %v426_v34  ;;  %v1457_v34 = vld [vmem:[%s1228_s12 + $0x160] sm:$0xff] }
  0x35   : > { %424 = vadd.xlane.f32.xlu0 %v423_v37  ;;  %2096 = vst [vmem:[#allocation10_spill] sm:$0xff] %v1457_v34  ;;  %v299_v37 = vmul.f32 %v1451_v24, %v1451_v24  ;;  %v453_v57 = vadd.f32 %v302_v23, %v301_v22  ;;  %v230_v24 = vld [vmem:[%s1228_s12 + $0x348] sm:$0xff] }
  0x38   : > { %433 = vadd.xlane.f32.xlu1 %v432_v52  ;;  %v297_v52 = vmul.f32 %v1457_v34, %v1457_v34 }
  0x39   : > { %430 = vadd.xlane.f32.xlu0 %v429_v55  ;;  %v1474_v55 = vld [vmem:[%s1228_s12 + $0x198] sm:$0xff] }
  0x3a   : > { %2099 = vst [vmem:[#allocation13_spill] sm:$0xff] %v1474_v55  ;;  %v304_v17 = vmul.f32 %v1474_v55, %v1474_v55  ;;  %v306_v55 = vmul.f32 %v1500_v54, %v1500_v54 }
  0x3c   : > { %439 = vadd.xlane.f32.xlu1 %v438_v6  ;;  %v450_v6 = vadd.f32 %v300_v42, %v299_v37  ;;  %v1494_v37 = vld [vmem:[%s1228_s12 + $0x1b8] sm:$0xff]  ;;  %v1497_v42 = vld [vmem:[%s1228_s12 + $0x1a0] sm:$0xff] }
  0x3d   : > { %436 = vadd.xlane.f32.xlu0 %v435_v21  ;;  %v447_v21 = vadd.f32 %v298_v53, %v297_v52  ;;  %2103 = vst [vmem:[#allocation17_spill] sm:$0xff] %v1494_v37  ;;  %2104 = vst [vmem:[#allocation18_spill] sm:$0xff] %v1497_v42  ;;  %v308_v53 = vmul.f32 %v1494_v37, %v1494_v37  ;;  %v305_v56 = vmul.f32 %v1497_v42, %v1497_v42 }
  0x3f   : > { %v459_v54 = vadd.f32 %v306_v55, %v305_v56 }
  0x40   : > { %445 = vadd.xlane.f32.xlu1 %v444_v36  ;;  %v1491_v36 = vld [vmem:[%s1228_s12 + $0x1b0] sm:$0xff] }
  0x41   : > { %442 = vadd.xlane.f32.xlu0 %v441_v43  ;;  %2102 = vst [vmem:[#allocation16_spill] sm:$0xff] %v1491_v36  ;;  %v456_v43 = vadd.f32 %v304_v17, %v303_v9  ;;  %v307_v52 = vmul.f32 %v1491_v36, %v1491_v36  ;;  %v1514_v9 = vld [vmem:[%s1228_s12 + $0x1d8] sm:$0xff]  ;;  %v1517_v17 = vld [vmem:[%s1228_s12 + $0x1c0] sm:$0xff]  ;;  %v1520_v36 = vld [vmem:[%s1228_s12 + $0x1c8] sm:$0xff] }
  0x42   : > { %2107 = vst [vmem:[#allocation21_spill] sm:$0xff] %v1514_v9  ;;  %2108 = vst [vmem:[#allocation22_spill] sm:$0xff] %v1517_v17  ;;  %v312_v23 = vmul.f32 %v1514_v9, %v1514_v9  ;;  %v309_v42 = vmul.f32 %v1517_v17, %v1517_v17  ;;  %v310_v37 = vmul.f32 %v1520_v36, %v1520_v36 }
  0x43   : > { %2109 = vst [vmem:[#allocation23_spill] sm:$0xff] %v1520_v36 }
  0x44   : > { %451 = vadd.xlane.f32.xlu1 %v450_v6  ;;  %v1511_v6 = vld [vmem:[%s1228_s12 + $0x1d0] sm:$0xff]  ;;  %v465_v36 = vadd.f32 %v310_v37, %v309_v42 }
  0x45   : > { %448 = vadd.xlane.f32.xlu0 %v447_v21  ;;  %2106 = vst [vmem:[#allocation20_spill] sm:$0xff] %v1511_v6  ;;  %v462_v21 = vadd.f32 %v308_v53, %v307_v52  ;;  %v311_v22 = vmul.f32 %v1511_v6, %v1511_v6  ;;  %v1534_v52 = vld [vmem:[%s1228_s12 + $0x1f8] sm:$0xff]  ;;  %v1537_v53 = vld [vmem:[%s1228_s12 + $0x1e0] sm:$0xff]  ;;  %v1540_v6 = vld [vmem:[%s1228_s12 + $0x1e8] sm:$0xff] }
  0x46   : > { %2111 = vst [vmem:[#allocation25_spill] sm:$0xff] %v1534_v52  ;;  %2112 = vst [vmem:[#allocation26_spill] sm:$0xff] %v1537_v53  ;;  %v316_v56 = vmul.f32 %v1534_v52, %v1534_v52  ;;  %v313_v17 = vmul.f32 %v1537_v53, %v1537_v53  ;;  %v314_v9 = vmul.f32 %v1540_v6, %v1540_v6 }
  0x47   : > { %2113 = vst [vmem:[#allocation27_spill] sm:$0xff] %v1540_v6 }
  0x48   : > { %457 = vadd.xlane.f32.xlu1 %v456_v43  ;;  %v1531_v43 = vld [vmem:[%s1228_s12 + $0x1f0] sm:$0xff]  ;;  %v471_v6 = vadd.f32 %v314_v9, %v313_v17 }
  0x49   : > { %454 = vadd.xlane.f32.xlu0 %v453_v57  ;;  %2110 = vst [vmem:[#allocation24_spill] sm:$0xff] %v1531_v43  ;;  %v468_v57 = vadd.f32 %v312_v23, %v311_v22  ;;  %v315_v55 = vmul.f32 %v1531_v43, %v1531_v43  ;;  %v1554_v22 = vld [vmem:[%s1228_s12 + $0x218] sm:$0xff]  ;;  %v1557_v23 = vld [vmem:[%s1228_s12 + $0x200] sm:$0xff]  ;;  %v1560_v43 = vld [vmem:[%s1228_s12 + $0x208] sm:$0xff] }
  0x4a   : > { %2115 = vst [vmem:[#allocation29_spill] sm:$0xff] %v1554_v22  ;;  %2116 = vst [vmem:[#allocation30_spill] sm:$0xff] %v1557_v23  ;;  %v320_v42 = vmul.f32 %v1554_v22, %v1554_v22  ;;  %v317_v53 = vmul.f32 %v1557_v23, %v1557_v23  ;;  %v318_v52 = vmul.f32 %v1560_v43, %v1560_v43 }
  0x4b   : > { %2117 = vst [vmem:[#allocation31_spill] sm:$0xff] %v1560_v43 }
  0x4c   : > { %463 = vadd.xlane.f32.xlu1 %v462_v21  ;;  %v1551_v21 = vld [vmem:[%s1228_s12 + $0x210] sm:$0xff]  ;;  %v477_v43 = vadd.f32 %v318_v52, %v317_v53 }
  0x4d   : > { %460 = vadd.xlane.f32.xlu0 %v459_v54  ;;  %2114 = vst [vmem:[#allocation28_spill] sm:$0xff] %v1551_v21  ;;  %v474_v54 = vadd.f32 %v316_v56, %v315_v55  ;;  %v319_v37 = vmul.f32 %v1551_v21, %v1551_v21  ;;  %v1574_v55 = vld [vmem:[%s1228_s12 + $0x238] sm:$0xff]  ;;  %v1577_v56 = vld [vmem:[%s1228_s12 + $0x220] sm:$0xff]  ;;  %v1580_v21 = vld [vmem:[%s1228_s12 + $0x228] sm:$0xff] }
  0x4e   : > { %2119 = vst [vmem:[#allocation33_spill] sm:$0xff] %v1574_v55  ;;  %2120 = vst [vmem:[#allocation34_spill] sm:$0xff] %v1577_v56  ;;  %v324_v17 = vmul.f32 %v1574_v55, %v1574_v55  ;;  %v321_v23 = vmul.f32 %v1577_v56, %v1577_v56  ;;  %v322_v22 = vmul.f32 %v1580_v21, %v1580_v21 }
  0x4f   : > { %2121 = vst [vmem:[#allocation35_spill] sm:$0xff] %v1580_v21 }
  0x50   : > { %469 = vadd.xlane.f32.xlu1 %v468_v57  ;;  %v1571_v57 = vld [vmem:[%s1228_s12 + $0x230] sm:$0xff]  ;;  %v483_v21 = vadd.f32 %v322_v22, %v321_v23 }
  0x51   : > { %466 = vadd.xlane.f32.xlu0 %v465_v36  ;;  %2118 = vst [vmem:[#allocation32_spill] sm:$0xff] %v1571_v57  ;;  %v480_v36 = vadd.f32 %v320_v42, %v319_v37  ;;  %v323_v9 = vmul.f32 %v1571_v57, %v1571_v57  ;;  %v1594_v37 = vld [vmem:[%s1228_s12 + $0x258] sm:$0xff]  ;;  %v1597_v42 = vld [vmem:[%s1228_s12 + $0x240] sm:$0xff]  ;;  %v1600_v57 = vld [vmem:[%s1228_s12 + $0x248] sm:$0xff] }
  0x52   : > { %2123 = vst [vmem:[#allocation37_spill] sm:$0xff] %v1594_v37  ;;  %2124 = vst [vmem:[#allocation38_spill] sm:$0xff] %v1597_v42  ;;  %v328_v53 = vmul.f32 %v1594_v37, %v1594_v37  ;;  %v325_v56 = vmul.f32 %v1597_v42, %v1597_v42  ;;  %v326_v55 = vmul.f32 %v1600_v57, %v1600_v57 }
  0x53   : > { %2125 = vst [vmem:[#allocation39_spill] sm:$0xff] %v1600_v57 }
  0x54   : > { %475 = vadd.xlane.f32.xlu1 %v474_v54  ;;  %v1591_v54 = vld [vmem:[%s1228_s12 + $0x250] sm:$0xff]  ;;  %v489_v57 = vadd.f32 %v326_v55, %v325_v56 }
  0x55   : > { %472 = vadd.xlane.f32.xlu0 %v471_v6  ;;  %2122 = vst [vmem:[#allocation36_spill] sm:$0xff] %v1591_v54  ;;  %v486_v6 = vadd.f32 %v324_v17, %v323_v9  ;;  %v327_v52 = vmul.f32 %v1591_v54, %v1591_v54  ;;  %v1614_v9 = vld [vmem:[%s1228_s12 + $0x278] sm:$0xff]  ;;  %v1617_v17 = vld [vmem:[%s1228_s12 + $0x260] sm:$0xff]  ;;  %v1620_v54 = vld [vmem:[%s1228_s12 + $0x268] sm:$0xff] }
  0x56   : > { %2127 = vst [vmem:[#allocation41_spill] sm:$0xff] %v1614_v9  ;;  %2128 = vst [vmem:[#allocation42_spill] sm:$0xff] %v1617_v17  ;;  %v332_v23 = vmul.f32 %v1614_v9, %v1614_v9  ;;  %v329_v42 = vmul.f32 %v1617_v17, %v1617_v17  ;;  %v330_v37 = vmul.f32 %v1620_v54, %v1620_v54 }
  0x57   : > { %2129 = vst [vmem:[#allocation43_spill] sm:$0xff] %v1620_v54 }
  0x58   : > { %481 = vadd.xlane.f32.xlu1 %v480_v36  ;;  %v1611_v36 = vld [vmem:[%s1228_s12 + $0x270] sm:$0xff]  ;;  %v495_v54 = vadd.f32 %v330_v37, %v329_v42 }
  0x59   : > { %478 = vadd.xlane.f32.xlu0 %v477_v43  ;;  %2126 = vst [vmem:[#allocation40_spill] sm:$0xff] %v1611_v36  ;;  %v492_v43 = vadd.f32 %v328_v53, %v327_v52  ;;  %v331_v22 = vmul.f32 %v1611_v36, %v1611_v36  ;;  %v1634_v52 = vld [vmem:[%s1228_s12 + $0x298] sm:$0xff]  ;;  %v1637_v53 = vld [vmem:[%s1228_s12 + $0x280] sm:$0xff]  ;;  %v1640_v36 = vld [vmem:[%s1228_s12 + $0x288] sm:$0xff] }
  0x5a   : > { %2131 = vst [vmem:[#allocation45_spill] sm:$0xff] %v1634_v52  ;;  %2132 = vst [vmem:[#allocation46_spill] sm:$0xff] %v1637_v53  ;;  %v336_v56 = vmul.f32 %v1634_v52, %v1634_v52  ;;  %v333_v17 = vmul.f32 %v1637_v53, %v1637_v53  ;;  %v334_v9 = vmul.f32 %v1640_v36, %v1640_v36 }
  0x5b   : > { %2133 = vst [vmem:[#allocation47_spill] sm:$0xff] %v1640_v36 }
  0x5c   : > { %487 = vadd.xlane.f32.xlu1 %v486_v6  ;;  %v1631_v6 = vld [vmem:[%s1228_s12 + $0x290] sm:$0xff]  ;;  %v501_v36 = vadd.f32 %v334_v9, %v333_v17 }
  0x5d   : > { %484 = vadd.xlane.f32.xlu0 %v483_v21  ;;  %2130 = vst [vmem:[#allocation44_spill] sm:$0xff] %v1631_v6  ;;  %v498_v21 = vadd.f32 %v332_v23, %v331_v22  ;;  %v335_v55 = vmul.f32 %v1631_v6, %v1631_v6  ;;  %v1654_v22 = vld [vmem:[%s1228_s12 + $0x2b8] sm:$0xff]  ;;  %v1657_v23 = vld [vmem:[%s1228_s12 + $0x2a0] sm:$0xff]  ;;  %v1660_v6 = vld [vmem:[%s1228_s12 + $0x2a8] sm:$0xff] }
  0x5e   : > { %2135 = vst [vmem:[#allocation49_spill] sm:$0xff] %v1654_v22  ;;  %2136 = vst [vmem:[#allocation50_spill] sm:$0xff] %v1657_v23  ;;  %v340_v42 = vmul.f32 %v1654_v22, %v1654_v22  ;;  %v337_v53 = vmul.f32 %v1657_v23, %v1657_v23  ;;  %v338_v52 = vmul.f32 %v1660_v6, %v1660_v6 }
  0x5f   : > { %2137 = vst [vmem:[#allocation51_spill] sm:$0xff] %v1660_v6 }
  0x60   : > { %493 = vadd.xlane.f32.xlu1 %v492_v43  ;;  %v1651_v43 = vld [vmem:[%s1228_s12 + $0x2b0] sm:$0xff]  ;;  %v507_v6 = vadd.f32 %v338_v52, %v337_v53 }
  0x61   : > { %490 = vadd.xlane.f32.xlu0 %v489_v57  ;;  %2134 = vst [vmem:[#allocation48_spill] sm:$0xff] %v1651_v43  ;;  %v504_v57 = vadd.f32 %v336_v56, %v335_v55  ;;  %v339_v37 = vmul.f32 %v1651_v43, %v1651_v43  ;;  %v1674_v55 = vld [vmem:[%s1228_s12 + $0x2d8] sm:$0xff]  ;;  %v1677_v56 = vld [vmem:[%s1228_s12 + $0x2c0] sm:$0xff]  ;;  %v1680_v43 = vld [vmem:[%s1228_s12 + $0x2c8] sm:$0xff] }
  0x62   : > { %2139 = vst [vmem:[#allocation53_spill] sm:$0xff] %v1674_v55  ;;  %2140 = vst [vmem:[#allocation54_spill] sm:$0xff] %v1677_v56  ;;  %v344_v17 = vmul.f32 %v1674_v55, %v1674_v55  ;;  %v341_v23 = vmul.f32 %v1677_v56, %v1677_v56  ;;  %v342_v22 = vmul.f32 %v1680_v43, %v1680_v43 }
  0x63   : > { %2141 = vst [vmem:[#allocation55_spill] sm:$0xff] %v1680_v43 }
  0x64   : > { %499 = vadd.xlane.f32.xlu1 %v498_v21  ;;  %v1671_v21 = vld [vmem:[%s1228_s12 + $0x2d0] sm:$0xff]  ;;  %v513_v43 = vadd.f32 %v342_v22, %v341_v23 }
  0x65   : > { %496 = vadd.xlane.f32.xlu0 %v495_v54  ;;  %2138 = vst [vmem:[#allocation52_spill] sm:$0xff] %v1671_v21  ;;  %v510_v54 = vadd.f32 %v340_v42, %v339_v37  ;;  %v343_v9 = vmul.f32 %v1671_v21, %v1671_v21  ;;  %v1694_v37 = vld [vmem:[%s1228_s12 + $0x2f8] sm:$0xff]  ;;  %v1697_v42 = vld [vmem:[%s1228_s12 + $0x2e0] sm:$0xff]  ;;  %v1700_v21 = vld [vmem:[%s1228_s12 + $0x2e8] sm:$0xff] }
  0x66   : > { %2143 = vst [vmem:[#allocation57_spill] sm:$0xff] %v1694_v37  ;;  %2144 = vst [vmem:[#allocation58_spill] sm:$0xff] %v1697_v42  ;;  %v348_v53 = vmul.f32 %v1694_v37, %v1694_v37  ;;  %v345_v56 = vmul.f32 %v1697_v42, %v1697_v42  ;;  %v346_v55 = vmul.f32 %v1700_v21, %v1700_v21 }
  0x67   : > { %2145 = vst [vmem:[#allocation59_spill] sm:$0xff] %v1700_v21 }
  0x68   : > { %505 = vadd.xlane.f32.xlu1 %v504_v57  ;;  %v1691_v57 = vld [vmem:[%s1228_s12 + $0x2f0] sm:$0xff]  ;;  %v519_v21 = vadd.f32 %v346_v55, %v345_v56  ;;  %v354_v56 = vmul.f32 %v226_v35, %v226_v35  ;;  %v233_v35 = vld [vmem:[%s1228_s12 + $0x360] sm:$0xff] }
  0x69   : > { %502 = vadd.xlane.f32.xlu0 %v501_v36  ;;  %2142 = vst [vmem:[#allocation56_spill] sm:$0xff] %v1691_v57  ;;  %v516_v36 = vadd.f32 %v344_v17, %v343_v9  ;;  %v347_v52 = vmul.f32 %v1691_v57, %v1691_v57  ;;  %v1714_v9 = vld [vmem:[%s1228_s12 + $0x318] sm:$0xff]  ;;  %v1717_v17 = vld [vmem:[%s1228_s12 + $0x300] sm:$0xff]  ;;  %v1720_v57 = vld [vmem:[%s1228_s12 + $0x308] sm:$0xff]  ;;  %v361_v25 = vmul.f32 %v233_v35, %v233_v35 }
  0x6a   : > { %2147 = vst [vmem:[#allocation61_spill] sm:$0xff] %v1714_v9  ;;  %2148 = vst [vmem:[#allocation62_spill] sm:$0xff] %v1717_v17  ;;  %v352_v23 = vmul.f32 %v1714_v9, %v1714_v9  ;;  %v349_v42 = vmul.f32 %v1717_v17, %v1717_v17  ;;  %v350_v37 = vmul.f32 %v1720_v57, %v1720_v57  ;;  %v231_v17 = vld [vmem:[%s1228_s12 + $0x350] sm:$0xff] }
  0x6b   : > { %2149 = vst [vmem:[#allocation63_spill] sm:$0xff] %v1720_v57  ;;  %v229_v57 = vld [vmem:[%s1228_s12 + $0x340] sm:$0xff]  ;;  %v359_v3 = vmul.f32 %v231_v17, %v231_v17  ;;  %v238_v17 = vld [vmem:[%s1228_s12 + $0x388] sm:$0xff] }
  0x6c   : > { %511 = vadd.xlane.f32.xlu1 %v510_v54  ;;  %v1711_v54 = vld [vmem:[%s1228_s12 + $0x310] sm:$0xff] }
  0x6d   : > { %508 = vadd.xlane.f32.xlu0 %v507_v6  ;;  %2146 = vst [vmem:[#allocation60_spill] sm:$0xff] %v1711_v54  ;;  %v522_v6 = vadd.f32 %v348_v53, %v347_v52  ;;  %v351_v22 = vmul.f32 %v1711_v54, %v1711_v54  ;;  %v228_v52 = vld [vmem:[%s1228_s12 + $0x338] sm:$0xff]  ;;  %v225_v53 = vld [vmem:[%s1228_s12 + $0x320] sm:$0xff] }
  0x6e   : > { %v356_v9 = vmul.f32 %v228_v52, %v228_v52  ;;  %v353_v55 = vmul.f32 %v225_v53, %v225_v53 }
  0x6f   : > { %v528_v54 = vadd.f32 %v352_v23, %v351_v22  ;;  %v236_v22 = vld [vmem:[%s1228_s12 + $0x378] sm:$0xff]  ;;  %v234_v23 = vld [vmem:[%s1228_s12 + $0x368] sm:$0xff] }
  0x70   : > { %517 = vadd.xlane.f32.xlu1 %v516_v36  ;;  %v227_v36 = vld [vmem:[%s1228_s12 + $0x330] sm:$0xff]  ;;  %v364_v53 = vmul.f32 %v236_v22, %v236_v22 }
  0x71   : > { %514 = vadd.xlane.f32.xlu0 %v513_v43  ;;  %v355_v34 = vmul.f32 %v227_v36, %v227_v36  ;;  %v525_v43 = vadd.f32 %v350_v37, %v349_v42  ;;  %v358_v37 = vmul.f32 %v230_v24, %v230_v24  ;;  %v235_v42 = vld [vmem:[%s1228_s12 + $0x370] sm:$0xff]  ;;  %v540_v36 = vadd.f32 %v360_v63, %v359_v3  ;;  %v237_v24 = vld [vmem:[%s1228_s12 + $0x380] sm:$0xff] }
  0x72   : > { %v363_v52 = vmul.f32 %v235_v42, %v235_v42  ;;  %v365_v3 = vmul.f32 %v237_v24, %v237_v24  ;;  %v242_v42 = vld [vmem:[%s1228_s12 + $0x3a8] sm:$0xff] }
  0x73   : > { %v534_v4 = vadd.f32 %v356_v9, %v355_v34  ;;  %v240_v9 = vld [vmem:[%s1228_s12 + $0x398] sm:$0xff] }
  0x74   : > { %523 = vadd.xlane.f32.xlu1 %v522_v6  ;;  %v531_v6 = vadd.f32 %v354_v56, %v353_v55  ;;  %v368_v56 = vmul.f32 %v240_v9, %v240_v9 }
  0x75   : > { %520 = vadd.xlane.f32.xlu0 %v519_v21  ;;  %v357_v21 = vmul.f32 %v229_v57, %v229_v57  ;;  %v239_v57 = vld [vmem:[%s1228_s12 + $0x390] sm:$0xff] }
  0x76   : > { %v367_v55 = vmul.f32 %v239_v57, %v239_v57  ;;  %v246_v57 = vld [vmem:[%s1228_s12 + $0x3c8] sm:$0xff] }
  0x77   : > { %v537_v34 = vadd.f32 %v358_v37, %v357_v21  ;;  %v244_v21 = vld [vmem:[%s1228_s12 + $0x3b8] sm:$0xff]  ;;  %v241_v37 = vld [vmem:[%s1228_s12 + $0x3a0] sm:$0xff] }
  0x78   : > { %529 = vadd.xlane.f32.xlu1 %v528_v54  ;;  %v362_v54 = vmul.f32 %v234_v23, %v234_v23  ;;  %v552_v22 = vadd.f32 %v368_v56, %v367_v55  ;;  %v372_v23 = vmul.f32 %v244_v21, %v244_v21  ;;  %v374_v56 = vmul.f32 %v246_v57, %v246_v57 }
  0x79   : > { %526 = vadd.xlane.f32.xlu0 %v525_v43  ;;  %v546_v43 = vadd.f32 %v364_v53, %v363_v52  ;;  %v369_v52 = vmul.f32 %v241_v37, %v241_v37  ;;  %v370_v53 = vmul.f32 %v242_v42, %v242_v42 }
  0x7a   : > { %v543_v63 = vadd.f32 %v362_v54, %v361_v25  ;;  %v248_v25 = vld [vmem:[%s1228_s12 + $0x3d8] sm:$0xff]  ;;  %v245_v54 = vld [vmem:[%s1228_s12 + $0x3c0] sm:$0xff] }
  0x7b   : > { %v373_v55 = vmul.f32 %v245_v54, %v245_v54 }
  0x7c   : > { %535 = vadd.xlane.f32.xlu1 %v534_v4  ;;  %v366_v4 = vmul.f32 %v238_v17, %v238_v17  ;;  %v376_v17 = vmul.f32 %v248_v25, %v248_v25 }
  0x7d   : > { %532 = vadd.xlane.f32.xlu0 %v531_v6  ;;  %v243_v6 = vld [vmem:[%s1228_s12 + $0x3b0] sm:$0xff]  ;;  %v561_v62 = vadd.f32 %v374_v56, %v373_v55 }
  0x7e   : > { %v371_v35 = vmul.f32 %v243_v6, %v243_v6  ;;  %v252_v6 = vld [vmem:[%s1228_s12 + $0x3f8] sm:$0xff] }
  0x7f   : > { %v380_v42 = vmul.f32 %v252_v6, %v252_v6 }
  0x80   : > { %541 = vadd.xlane.f32.xlu1 %v540_v36  ;;  %v549_v36 = vadd.f32 %v366_v4, %v365_v3  ;;  %v558_v9 = vadd.f32 %v372_v23, %v371_v35  ;;  %v249_v3 = vld [vmem:[%s1228_s12 + $0x3e0] sm:$0xff]  ;;  %v250_v4 = vld [vmem:[%s1228_s12 + $0x3e8] sm:$0xff] }
  0x81   : > { %538 = vadd.xlane.f32.xlu0 %v537_v34  ;;  %v247_v34 = vld [vmem:[%s1228_s12 + $0x3d0] sm:$0xff]  ;;  %v377_v47 = vmul.f32 %v249_v3, %v249_v3  ;;  %v378_v46 = vmul.f32 %v250_v4, %v250_v4 }
  0x82   : > { %v375_v24 = vmul.f32 %v247_v34, %v247_v34 }
  0x83   : > { %v567_v35 = vadd.f32 %v378_v46, %v377_v47 }
  0x84   : > { %547 = vadd.xlane.f32.xlu1 %v546_v43  ;;  %v555_v43 = vadd.f32 %v370_v53, %v369_v52  ;;  %v564_v21 = vadd.f32 %v376_v17, %v375_v24 }
  0x85   : > { %544 = vadd.xlane.f32.xlu0 %v543_v63  ;;  %v251_v63 = vld [vmem:[%s1228_s12 + $0x3f0] sm:$0xff] }
  0x86   : > { %v379_v37 = vmul.f32 %v251_v63, %v251_v63 }
  0x88   : > { %553 = vadd.xlane.f32.xlu1 %v552_v22  ;;  %v570_v22 = vadd.f32 %v380_v42, %v379_v37 }
  0x89   : > { %550 = vadd.xlane.f32.xlu0 %v549_v36 }
  0x8c   : > { %559 = vadd.xlane.f32.xlu1 %v558_v9 }
  0x8d   : > { %556 = vadd.xlane.f32.xlu0 %v555_v43 }
  0x90   : > { %565 = vadd.xlane.f32.xlu1 %v564_v21 }
  0x91   : > { %562 = vadd.xlane.f32.xlu0 %v561_v62 }
  0x94   : > { %571 = vadd.xlane.f32.xlu1 %v570_v22 }
  0x95   : > { %568 = vadd.xlane.f32.xlu0 %v567_v35 }
  0xa5   : > { %v389_v23 = vpop.xlane.xlu1 %388 }
  0xa6   : > { %v575_v36 = vadd.f32 1e-12, %v389_v23  ;;  %v383_v52 = vpop.xlane.xlu0 %382 }
  0xa7   : > { %v573_v53 = vadd.f32 1e-12, %v383_v52 }
  0xa8   : > { %1038 = vrsqrt.f32 %v575_v36 }
  0xa9   : > { %1040 = vrsqrt.f32 %v573_v53  ;;  %v392_v34 = vpop.xlane.xlu1 %391 }
  0xaa   : > { %v576_v25 = vadd.f32 1e-12, %v392_v34  ;;  %v386_v54 = vpop.xlane.xlu0 %385 }
  0xab   : > { %v574_v57 = vadd.f32 1e-12, %v386_v54 }
  0xac   : > { %1042 = vrsqrt.f32 %v576_v25 }
  0xad   : > { %1044 = vrsqrt.f32 %v574_v57  ;;  %v398_v9 = vpop.xlane.xlu1 %397 }
  0xae   : > { %v578_v24 = vadd.f32 1e-12, %v398_v9  ;;  %v395_v17 = vpop.xlane.xlu0 %394 }
  0xaf   : > { %v577_v62 = vadd.f32 1e-12, %v395_v17 }
  0xb0   : > { %1046 = vrsqrt.f32 %v578_v24 }
  0xb1   : > { %1048 = vrsqrt.f32 %v577_v62  ;;  %v404_v46 = vpop.xlane.xlu1 %403 }
  0xb2   : > { %v1039_v47 = vpop.eup %1038  ;;  %v580_v43 = vadd.f32 1e-12, %v404_v46  ;;  %v401_v55 = vpop.xlane.xlu0 %400 }
  0xb3   : > { %v1041_v56 = vpop.eup %1040  ;;  %v705_v63 = vmul.f32 %v1039_v47, %v1231_v0  ;;  %v706_v6 = vmul.f32 %v1039_v47, %v1234_v1  ;;  %v579_v3 = vadd.f32 1e-12, %v401_v55 }
  0xb4   : > { %v701_v4 = vmul.f32 %v1041_v56, %v1237_v2  ;;  %v702_v21 = vmul.f32 %v1041_v56, %v1244_v5  ;;  %1050 = vrsqrt.f32 %v580_v43 }
  0xb5   : > { %833 = vst [vmem:[%s1763_s15 + $0x20] sm:$0xff] %v705_v63  ;;  %834 = vst [vmem:[%s1763_s15 + $0x28] sm:$0xff] %v706_v6  ;;  %1052 = vrsqrt.f32 %v579_v3  ;;  %v410_v37 = vpop.xlane.xlu1 %409 }
  0xb6   : > { %v1043_v42 = vpop.eup %1042  ;;  %829 = vst [vmem:[%s1763_s15] sm:$0xff] %v701_v4  ;;  %830 = vst [vmem:[%s1763_s15 + $0x8] sm:$0xff] %v702_v21  ;;  %v582_v0 = vadd.f32 1e-12, %v410_v37  ;;  %v407_v22 = vpop.xlane.xlu0 %406 }
  0xb7   : > { %v1045_v1 = vpop.eup %1044  ;;  %v707_v35 = vmul.f32 %v1043_v42, %v1249_v7  ;;  %v708_v2 = vmul.f32 %v1043_v42, %v1252_v8  ;;  %v581_v5 = vadd.f32 1e-12, %v407_v22 }
  0xb8   : > { %v703_v23 = vmul.f32 %v1045_v1, %v1261_v12  ;;  %v704_v36 = vmul.f32 %v1045_v1, %v1264_v13  ;;  %1054 = vrsqrt.f32 %v582_v0 }
  0xb9   : > { %835 = vst [vmem:[%s1763_s15 + $0x30] sm:$0xff] %v707_v35  ;;  %836 = vst [vmem:[%s1763_s15 + $0x38] sm:$0xff] %v708_v2  ;;  %1056 = vrsqrt.f32 %v581_v5  ;;  %v416_v52 = vpop.xlane.xlu1 %415 }
  0xba   : > { %v1047_v53 = vpop.eup %1046  ;;  %831 = vst [vmem:[%s1763_s15 + $0x10] sm:$0xff] %v703_v23  ;;  %832 = vst [vmem:[%s1763_s15 + $0x18] sm:$0xff] %v704_v36  ;;  %v584_v7 = vadd.f32 1e-12, %v416_v52  ;;  %v413_v34 = vpop.xlane.xlu0 %412 }
  0xbb   : > { %v1049_v8 = vpop.eup %1048  ;;  %v711_v25 = vmul.f32 %v1047_v53, %v1267_v14  ;;  %v712_v12 = vmul.f32 %v1047_v53, %v1274_v18  ;;  %v583_v13 = vadd.f32 1e-12, %v413_v34 }
  0xbc   : > { %v709_v54 = vmul.f32 %v1049_v8, %v1277_v19  ;;  %v710_v57 = vmul.f32 %v1049_v8, %v1280_v20  ;;  %1058 = vrsqrt.f32 %v584_v7 }
  0xbd   : > { %839 = vst [vmem:[%s1763_s15 + $0x50] sm:$0xff] %v711_v25  ;;  %840 = vst [vmem:[%s1763_s15 + $0x58] sm:$0xff] %v712_v12  ;;  %1060 = vrsqrt.f32 %v583_v13  ;;  %v422_v9 = vpop.xlane.xlu1 %421 }
  0xbe   : > { %v1051_v24 = vpop.eup %1050  ;;  %837 = vst [vmem:[%s1763_s15 + $0x40] sm:$0xff] %v709_v54  ;;  %838 = vst [vmem:[%s1763_s15 + $0x48] sm:$0xff] %v710_v57  ;;  %v586_v14 = vadd.f32 1e-12, %v422_v9  ;;  %v419_v17 = vpop.xlane.xlu0 %418 }
  0xbf   : > { %v1053_v18 = vpop.eup %1052  ;;  %v715_v62 = vmul.f32 %v1051_v24, %v1291_v28  ;;  %v716_v19 = vmul.f32 %v1051_v24, %v1294_v29  ;;  %v585_v20 = vadd.f32 1e-12, %v419_v17 }
  0xc0   : > { %v713_v46 = vmul.f32 %v1053_v18, %v1297_v30  ;;  %v714_v47 = vmul.f32 %v1053_v18, %v1300_v31  ;;  %1062 = vrsqrt.f32 %v586_v14 }
  0xc1   : > { %843 = vst [vmem:[%s1763_s15 + $0x70] sm:$0xff] %v715_v62  ;;  %844 = vst [vmem:[%s1763_s15 + $0x78] sm:$0xff] %v716_v19  ;;  %1064 = vrsqrt.f32 %v585_v20  ;;  %v428_v43 = vpop.xlane.xlu1 %427  ;;  %v2150_v19 = vld [vmem:[#allocation2_spill] sm:$0xff] }
  0xc2   : > { %v1055_v55 = vpop.eup %1054  ;;  %841 = vst [vmem:[%s1763_s15 + $0x60] sm:$0xff] %v713_v46  ;;  %842 = vst [vmem:[%s1763_s15 + $0x68] sm:$0xff] %v714_v47  ;;  %v588_v28 = vadd.f32 1e-12, %v428_v43  ;;  %v425_v56 = vpop.xlane.xlu0 %424  ;;  %v2151_v46 = vld [vmem:[#allocation3_spill] sm:$0xff] }
  0xc3   : > { %v1057_v29 = vpop.eup %1056  ;;  %v719_v63 = vmul.f32 %v1055_v55, %v1311_v38  ;;  %v720_v30 = vmul.f32 %v1055_v55, %v1314_v39  ;;  %v587_v31 = vadd.f32 1e-12, %v425_v56  ;;  %v2152_v56 = vld [vmem:[#allocation4_spill] sm:$0xff] }
  0xc4   : > { %v717_v6 = vmul.f32 %v1057_v29, %v1317_v40  ;;  %v718_v3 = vmul.f32 %v1057_v29, %v1320_v41  ;;  %1066 = vrsqrt.f32 %v588_v28 }
  0xc5   : > { %847 = vst [vmem:[%s1763_s15 + $0x90] sm:$0xff] %v719_v63  ;;  %848 = vst [vmem:[%s1763_s15 + $0x98] sm:$0xff] %v720_v30  ;;  %1068 = vrsqrt.f32 %v587_v31  ;;  %v434_v4 = vpop.xlane.xlu1 %433  ;;  %v2153_v63 = vld [vmem:[#allocation5_spill] sm:$0xff] }
  0xc6   : > { %v1059_v21 = vpop.eup %1058  ;;  %845 = vst [vmem:[%s1763_s15 + $0x80] sm:$0xff] %v717_v6  ;;  %846 = vst [vmem:[%s1763_s15 + $0x88] sm:$0xff] %v718_v3  ;;  %v590_v38 = vadd.f32 1e-12, %v434_v4  ;;  %v431_v37 = vpop.xlane.xlu0 %430  ;;  %v2154_v6 = vld [vmem:[#allocation6_spill] sm:$0xff]  ;;  %v2155_v4 = vld [vmem:[#allocation7_spill] sm:$0xff] }
  0xc7   : > { %v1061_v39 = vpop.eup %1060  ;;  %v723_v42 = vmul.f32 %v1059_v21, %v1331_v48  ;;  %v724_v40 = vmul.f32 %v1059_v21, %v1334_v49  ;;  %v589_v41 = vadd.f32 1e-12, %v431_v37 }
  0xc8   : > { %v721_v0 = vmul.f32 %v1061_v39, %v1337_v50  ;;  %v722_v22 = vmul.f32 %v1061_v39, %v1340_v51  ;;  %1070 = vrsqrt.f32 %v590_v38 }
  0xc9   : > { %851 = vst [vmem:[%s1763_s15 + $0xb0] sm:$0xff] %v723_v42  ;;  %852 = vst [vmem:[%s1763_s15 + $0xb8] sm:$0xff] %v724_v40  ;;  %1072 = vrsqrt.f32 %v589_v41  ;;  %v440_v1 = vpop.xlane.xlu1 %439  ;;  %v2156_v41 = vld [vmem:[#allocation8_spill] sm:$0xff] }
  0xca   : > { %v1063_v35 = vpop.eup %1062  ;;  %849 = vst [vmem:[%s1763_s15 + $0xa0] sm:$0xff] %v721_v0  ;;  %850 = vst [vmem:[%s1763_s15 + $0xa8] sm:$0xff] %v722_v22  ;;  %v592_v48 = vadd.f32 1e-12, %v440_v1  ;;  %v437_v2 = vpop.xlane.xlu0 %436  ;;  %v2157_v22 = vld [vmem:[#allocation9_spill] sm:$0xff] }
  0xcb   : > { %v1065_v49 = vpop.eup %1064  ;;  %v727_v5 = vmul.f32 %v1063_v35, %v1351_v58  ;;  %v728_v50 = vmul.f32 %v1063_v35, %v1354_v59  ;;  %v591_v51 = vadd.f32 1e-12, %v437_v2 }
  0xcc   : > { %v725_v23 = vmul.f32 %v1065_v49, %v1357_v60  ;;  %v726_v36 = vmul.f32 %v1065_v49, %v1360_v61  ;;  %1074 = vrsqrt.f32 %v592_v48  ;;  %v2158_v48 = vld [vmem:[#allocation10_spill] sm:$0xff]  ;;  %v2159_v49 = vld [vmem:[#allocation11_spill] sm:$0xff] }
  0xcd   : > { %855 = vst [vmem:[%s1763_s15 + $0xd0] sm:$0xff] %v727_v5  ;;  %856 = vst [vmem:[%s1763_s15 + $0xd8] sm:$0xff] %v728_v50  ;;  %1076 = vrsqrt.f32 %v591_v51  ;;  %v446_v52 = vpop.xlane.xlu1 %445 }
  0xce   : > { %v1067_v53 = vpop.eup %1066  ;;  %853 = vst [vmem:[%s1763_s15 + $0xc0] sm:$0xff] %v725_v23  ;;  %854 = vst [vmem:[%s1763_s15 + $0xc8] sm:$0xff] %v726_v36  ;;  %v594_v58 = vadd.f32 1e-12, %v446_v52  ;;  %v443_v7 = vpop.xlane.xlu0 %442 }
  0xcf   : > { %v1069_v59 = vpop.eup %1068  ;;  %v731_v34 = vmul.f32 %v1067_v53, %v1371_v10  ;;  %v732_v60 = vmul.f32 %v1067_v53, %v1374_v11  ;;  %v593_v61 = vadd.f32 1e-12, %v443_v7  ;;  %v2160_v53 = vld [vmem:[#allocation12_spill] sm:$0xff]  ;;  %v2161_v7 = vld [vmem:[#allocation13_spill] sm:$0xff] }
  0xd0   : > { %v729_v8 = vmul.f32 %v1069_v59, %v1377_v15  ;;  %v730_v25 = vmul.f32 %v1069_v59, %v1380_v16  ;;  %1078 = vrsqrt.f32 %v594_v58 }
  0xd1   : > { %859 = vst [vmem:[%s1763_s15 + $0xf0] sm:$0xff] %v731_v34  ;;  %860 = vst [vmem:[%s1763_s15 + $0xf8] sm:$0xff] %v732_v60  ;;  %1080 = vrsqrt.f32 %v593_v61  ;;  %v452_v12 = vpop.xlane.xlu1 %451  ;;  %v2162_v60 = vld [vmem:[#allocation14_spill] sm:$0xff] }
  0xd2   : > { %v1071_v13 = vpop.eup %1070  ;;  %857 = vst [vmem:[%s1763_s15 + $0xe0] sm:$0xff] %v729_v8  ;;  %858 = vst [vmem:[%s1763_s15 + $0xe8] sm:$0xff] %v730_v25  ;;  %v596_v10 = vadd.f32 1e-12, %v452_v12  ;;  %v449_v54 = vpop.xlane.xlu0 %448  ;;  %v2163_v8 = vld [vmem:[#allocation15_spill] sm:$0xff] }
  0xd3   : > { %v1073_v11 = vpop.eup %1072  ;;  %v735_v57 = vmul.f32 %v1071_v13, %v1391_v26  ;;  %v736_v15 = vmul.f32 %v1071_v13, %v1394_v27  ;;  %v595_v16 = vadd.f32 1e-12, %v449_v54 }
  0xd4   : > { %v733_v9 = vmul.f32 %v1073_v11, %v1397_v32  ;;  %v734_v24 = vmul.f32 %v1073_v11, %v1400_v33  ;;  %1082 = vrsqrt.f32 %v596_v10 }
  0xd5   : > { %863 = vst [vmem:[%s1763_s15 + $0x110] sm:$0xff] %v735_v57  ;;  %864 = vst [vmem:[%s1763_s15 + $0x118] sm:$0xff] %v736_v15  ;;  %1084 = vrsqrt.f32 %v595_v16  ;;  %v458_v14 = vpop.xlane.xlu1 %457  ;;  %v2164_v57 = vld [vmem:[#allocation16_spill] sm:$0xff]  ;;  %v2165_v16 = vld [vmem:[#allocation17_spill] sm:$0xff] }
  0xd6   : > { %v1075_v17 = vpop.eup %1074  ;;  %861 = vst [vmem:[%s1763_s15 + $0x100] sm:$0xff] %v733_v9  ;;  %862 = vst [vmem:[%s1763_s15 + $0x108] sm:$0xff] %v734_v24  ;;  %v598_v26 = vadd.f32 1e-12, %v458_v14  ;;  %v455_v18 = vpop.xlane.xlu0 %454  ;;  %v2166_v14 = vld [vmem:[#allocation18_spill] sm:$0xff] }
  0xd7   : > { %v1077_v27 = vpop.eup %1076  ;;  %v739_v62 = vmul.f32 %v1075_v17, %v1411_v44  ;;  %v740_v32 = vmul.f32 %v1075_v17, %v1414_v45  ;;  %v597_v33 = vadd.f32 1e-12, %v455_v18 }
  0xd8   : > { %v737_v20 = vmul.f32 %v1077_v27, %v2150_v19  ;;  %v738_v47 = vmul.f32 %v1077_v27, %v2151_v46  ;;  %1086 = vrsqrt.f32 %v598_v26  ;;  %v2167_v26 = vld [vmem:[#allocation19_spill] sm:$0xff] }
  0xd9   : > { %867 = vst [vmem:[%s1763_s15 + $0x130] sm:$0xff] %v739_v62  ;;  %868 = vst [vmem:[%s1763_s15 + $0x138] sm:$0xff] %v740_v32  ;;  %1088 = vrsqrt.f32 %v597_v33  ;;  %v464_v43 = vpop.xlane.xlu1 %463 }
  0xda   : > { %v1079_v55 = vpop.eup %1078  ;;  %865 = vst [vmem:[%s1763_s15 + $0x120] sm:$0xff] %v737_v20  ;;  %866 = vst [vmem:[%s1763_s15 + $0x128] sm:$0xff] %v738_v47  ;;  %v600_v44 = vadd.f32 1e-12, %v464_v43  ;;  %v461_v28 = vpop.xlane.xlu0 %460  ;;  %v2168_v20 = vld [vmem:[#allocation20_spill] sm:$0xff]  ;;  %v2169_v47 = vld [vmem:[#allocation21_spill] sm:$0xff] }
  0xdb   : > { %v1081_v45 = vpop.eup %1080  ;;  %v743_v29 = vmul.f32 %v1079_v55, %v2152_v56  ;;  %v744_v30 = vmul.f32 %v1079_v55, %v2153_v63  ;;  %v599_v31 = vadd.f32 1e-12, %v461_v28 }
  0xdc   : > { %v741_v3 = vmul.f32 %v1081_v45, %v2154_v6  ;;  %v742_v21 = vmul.f32 %v1081_v45, %v2155_v4  ;;  %1090 = vrsqrt.f32 %v600_v44  ;;  %v2170_v44 = vld [vmem:[#allocation22_spill] sm:$0xff]  ;;  %v2171_v45 = vld [vmem:[#allocation23_spill] sm:$0xff] }
  0xdd   : > { %871 = vst [vmem:[%s1763_s15 + $0x150] sm:$0xff] %v743_v29  ;;  %872 = vst [vmem:[%s1763_s15 + $0x158] sm:$0xff] %v744_v30  ;;  %1092 = vrsqrt.f32 %v599_v31  ;;  %v470_v38 = vpop.xlane.xlu1 %469 }
  0xde   : > { %v1083_v37 = vpop.eup %1082  ;;  %869 = vst [vmem:[%s1763_s15 + $0x140] sm:$0xff] %v741_v3  ;;  %870 = vst [vmem:[%s1763_s15 + $0x148] sm:$0xff] %v742_v21  ;;  %v602_v39 = vadd.f32 1e-12, %v470_v38  ;;  %v467_v42 = vpop.xlane.xlu0 %466  ;;  %v2172_v3 = vld [vmem:[#allocation24_spill] sm:$0xff]  ;;  %v2173_v21 = vld [vmem:[#allocation25_spill] sm:$0xff] }
  0xdf   : > { %v1085_v40 = vpop.eup %1084  ;;  %v747_v0 = vmul.f32 %v1083_v37, %v2156_v41  ;;  %v748_v1 = vmul.f32 %v1083_v37, %v2157_v22  ;;  %v601_v35 = vadd.f32 1e-12, %v467_v42 }
  0xe0   : > { %v745_v2 = vmul.f32 %v1085_v40, %v2158_v48  ;;  %v746_v5 = vmul.f32 %v1085_v40, %v2159_v49  ;;  %1094 = vrsqrt.f32 %v602_v39  ;;  %v2174_v39 = vld [vmem:[#allocation26_spill] sm:$0xff]  ;;  %v2175_v40 = vld [vmem:[#allocation27_spill] sm:$0xff] }
  0xe1   : > { %875 = vst [vmem:[%s1763_s15 + $0x170] sm:$0xff] %v747_v0  ;;  %876 = vst [vmem:[%s1763_s15 + $0x178] sm:$0xff] %v748_v1  ;;  %1096 = vrsqrt.f32 %v601_v35  ;;  %v476_v50 = vpop.xlane.xlu1 %475 }
  0xe2   : > { %v1087_v51 = vpop.eup %1086  ;;  %873 = vst [vmem:[%s1763_s15 + $0x160] sm:$0xff] %v745_v2  ;;  %874 = vst [vmem:[%s1763_s15 + $0x168] sm:$0xff] %v746_v5  ;;  %v604_v23 = vadd.f32 1e-12, %v476_v50  ;;  %v473_v36 = vpop.xlane.xlu0 %472  ;;  %v2176_v2 = vld [vmem:[#allocation28_spill] sm:$0xff]  ;;  %v2177_v5 = vld [vmem:[#allocation29_spill] sm:$0xff] }
  0xe3   : > { %v1089_v52 = vpop.eup %1088  ;;  %v751_v58 = vmul.f32 %v1087_v51, %v2160_v53  ;;  %v752_v59 = vmul.f32 %v1087_v51, %v2161_v7  ;;  %v603_v34 = vadd.f32 1e-12, %v473_v36 }
  0xe4   : > { %v749_v61 = vmul.f32 %v1089_v52, %v2162_v60  ;;  %v750_v25 = vmul.f32 %v1089_v52, %v2163_v8  ;;  %1098 = vrsqrt.f32 %v604_v23  ;;  %v2178_v23 = vld [vmem:[#allocation30_spill] sm:$0xff]  ;;  %v2179_v52 = vld [vmem:[#allocation31_spill] sm:$0xff] }
  0xe5   : > { %879 = vst [vmem:[%s1763_s15 + $0x190] sm:$0xff] %v751_v58  ;;  %880 = vst [vmem:[%s1763_s15 + $0x198] sm:$0xff] %v752_v59  ;;  %1100 = vrsqrt.f32 %v603_v34  ;;  %v482_v12 = vpop.xlane.xlu1 %481 }
  0xe6   : > { %v1091_v13 = vpop.eup %1090  ;;  %877 = vst [vmem:[%s1763_s15 + $0x180] sm:$0xff] %v749_v61  ;;  %878 = vst [vmem:[%s1763_s15 + $0x188] sm:$0xff] %v750_v25  ;;  %v606_v10 = vadd.f32 1e-12, %v482_v12  ;;  %v479_v54 = vpop.xlane.xlu0 %478  ;;  %v2180_v61 = vld [vmem:[#allocation32_spill] sm:$0xff]  ;;  %v2181_v25 = vld [vmem:[#allocation33_spill] sm:$0xff] }
  0xe7   : > { %v1093_v11 = vpop.eup %1092  ;;  %v755_v15 = vmul.f32 %v1091_v13, %v2164_v57  ;;  %v756_v9 = vmul.f32 %v1091_v13, %v2165_v16  ;;  %v605_v24 = vadd.f32 1e-12, %v479_v54 }
  0xe8   : > { %v753_v17 = vmul.f32 %v1093_v11, %v2166_v14  ;;  %v754_v18 = vmul.f32 %v1093_v11, %v2167_v26  ;;  %1102 = vrsqrt.f32 %v606_v10  ;;  %v2182_v10 = vld [vmem:[#allocation34_spill] sm:$0xff]  ;;  %v2183_v11 = vld [vmem:[#allocation35_spill] sm:$0xff] }
  0xe9   : > { %883 = vst [vmem:[%s1763_s15 + $0x1b0] sm:$0xff] %v755_v15  ;;  %884 = vst [vmem:[%s1763_s15 + $0x1b8] sm:$0xff] %v756_v9  ;;  %1104 = vrsqrt.f32 %v605_v24  ;;  %v488_v27 = vpop.xlane.xlu1 %487 }
  0xea   : > { %v1095_v62 = vpop.eup %1094  ;;  %881 = vst [vmem:[%s1763_s15 + $0x1a0] sm:$0xff] %v753_v17  ;;  %882 = vst [vmem:[%s1763_s15 + $0x1a8] sm:$0xff] %v754_v18  ;;  %v608_v32 = vadd.f32 1e-12, %v488_v27  ;;  %v485_v33 = vpop.xlane.xlu0 %484  ;;  %v2184_v17 = vld [vmem:[#allocation36_spill] sm:$0xff]  ;;  %v2185_v18 = vld [vmem:[#allocation37_spill] sm:$0xff] }
  0xeb   : > { %v1097_v19 = vpop.eup %1096  ;;  %v759_v46 = vmul.f32 %v1095_v62, %v2168_v20  ;;  %v760_v43 = vmul.f32 %v1095_v62, %v2169_v47  ;;  %v607_v55 = vadd.f32 1e-12, %v485_v33 }
  0xec   : > { %v757_v28 = vmul.f32 %v1097_v19, %v2170_v44  ;;  %v758_v56 = vmul.f32 %v1097_v19, %v2171_v45  ;;  %1106 = vrsqrt.f32 %v608_v32  ;;  %v2186_v32 = vld [vmem:[#allocation38_spill] sm:$0xff]  ;;  %v2187_v19 = vld [vmem:[#allocation39_spill] sm:$0xff] }
  0xed   : > { %887 = vst [vmem:[%s1763_s15 + $0x1d0] sm:$0xff] %v759_v46  ;;  %888 = vst [vmem:[%s1763_s15 + $0x1d8] sm:$0xff] %v760_v43  ;;  %1108 = vrsqrt.f32 %v607_v55  ;;  %v494_v29 = vpop.xlane.xlu1 %493 }
  0xee   : > { %v1099_v63 = vpop.eup %1098  ;;  %885 = vst [vmem:[%s1763_s15 + $0x1c0] sm:$0xff] %v757_v28  ;;  %886 = vst [vmem:[%s1763_s15 + $0x1c8] sm:$0xff] %v758_v56  ;;  %v610_v30 = vadd.f32 1e-12, %v494_v29  ;;  %v491_v31 = vpop.xlane.xlu0 %490  ;;  %v2188_v28 = vld [vmem:[#allocation40_spill] sm:$0xff]  ;;  %v2189_v56 = vld [vmem:[#allocation41_spill] sm:$0xff] }
  0xef   : > { %v1101_v6 = vpop.eup %1100  ;;  %v763_v4 = vmul.f32 %v1099_v63, %v2172_v3  ;;  %v764_v38 = vmul.f32 %v1099_v63, %v2173_v21  ;;  %v609_v37 = vadd.f32 1e-12, %v491_v31 }
  0xf0   : > { %v761_v42 = vmul.f32 %v1101_v6, %v2174_v39  ;;  %v762_v41 = vmul.f32 %v1101_v6, %v2175_v40  ;;  %1110 = vrsqrt.f32 %v610_v30  ;;  %v2190_v30 = vld [vmem:[#allocation42_spill] sm:$0xff]  ;;  %v2191_v6 = vld [vmem:[#allocation43_spill] sm:$0xff] }
  0xf1   : > { %891 = vst [vmem:[%s1763_s15 + $0x1f0] sm:$0xff] %v763_v4  ;;  %892 = vst [vmem:[%s1763_s15 + $0x1f8] sm:$0xff] %v764_v38  ;;  %1112 = vrsqrt.f32 %v609_v37  ;;  %v500_v0 = vpop.xlane.xlu1 %499 }
  0xf2   : > { %v1103_v22 = vpop.eup %1102  ;;  %889 = vst [vmem:[%s1763_s15 + $0x1e0] sm:$0xff] %v761_v42  ;;  %890 = vst [vmem:[%s1763_s15 + $0x1e8] sm:$0xff] %v762_v41  ;;  %v612_v1 = vadd.f32 1e-12, %v500_v0  ;;  %v497_v35 = vpop.xlane.xlu0 %496  ;;  %v2192_v42 = vld [vmem:[#allocation44_spill] sm:$0xff]  ;;  %v2193_v41 = vld [vmem:[#allocation45_spill] sm:$0xff] }
  0xf3   : > { %v1105_v48 = vpop.eup %1104  ;;  %v767_v49 = vmul.f32 %v1103_v22, %v2176_v2  ;;  %v768_v50 = vmul.f32 %v1103_v22, %v2177_v5  ;;  %v611_v51 = vadd.f32 1e-12, %v497_v35 }
  0xf4   : > { %v765_v36 = vmul.f32 %v1105_v48, %v2178_v23  ;;  %v766_v53 = vmul.f32 %v1105_v48, %v2179_v52  ;;  %1114 = vrsqrt.f32 %v612_v1  ;;  %v2194_v1 = vld [vmem:[#allocation46_spill] sm:$0xff]  ;;  %v2195_v48 = vld [vmem:[#allocation47_spill] sm:$0xff] }
  0xf5   : > { %895 = vst [vmem:[%s1763_s15 + $0x210] sm:$0xff] %v767_v49  ;;  %896 = vst [vmem:[%s1763_s15 + $0x218] sm:$0xff] %v768_v50  ;;  %1116 = vrsqrt.f32 %v611_v51  ;;  %v506_v58 = vpop.xlane.xlu1 %505 }
  0xf6   : > { %v1107_v7 = vpop.eup %1106  ;;  %893 = vst [vmem:[%s1763_s15 + $0x200] sm:$0xff] %v765_v36  ;;  %894 = vst [vmem:[%s1763_s15 + $0x208] sm:$0xff] %v766_v53  ;;  %v614_v59 = vadd.f32 1e-12, %v506_v58  ;;  %v503_v34 = vpop.xlane.xlu0 %502  ;;  %v2196_v36 = vld [vmem:[#allocation48_spill] sm:$0xff]  ;;  %v2197_v53 = vld [vmem:[#allocation49_spill] sm:$0xff] }
  0xf7   : > { %v1109_v60 = vpop.eup %1108  ;;  %v771_v8 = vmul.f32 %v1107_v7, %v2180_v61  ;;  %v772_v12 = vmul.f32 %v1107_v7, %v2181_v25  ;;  %v613_v13 = vadd.f32 1e-12, %v503_v34 }
  0xf8   : > { %v769_v54 = vmul.f32 %v1109_v60, %v2182_v10  ;;  %v770_v57 = vmul.f32 %v1109_v60, %v2183_v11  ;;  %1118 = vrsqrt.f32 %v614_v59  ;;  %v2198_v59 = vld [vmem:[#allocation50_spill] sm:$0xff]  ;;  %v2199_v60 = vld [vmem:[#allocation51_spill] sm:$0xff] }
  0xf9   : > { %899 = vst [vmem:[%s1763_s15 + $0x230] sm:$0xff] %v771_v8  ;;  %900 = vst [vmem:[%s1763_s15 + $0x238] sm:$0xff] %v772_v12  ;;  %1120 = vrsqrt.f32 %v613_v13  ;;  %v512_v15 = vpop.xlane.xlu1 %511 }
  0xfa   : > { %v1111_v16 = vpop.eup %1110  ;;  %897 = vst [vmem:[%s1763_s15 + $0x220] sm:$0xff] %v769_v54  ;;  %898 = vst [vmem:[%s1763_s15 + $0x228] sm:$0xff] %v770_v57  ;;  %v616_v9 = vadd.f32 1e-12, %v512_v15  ;;  %v509_v24 = vpop.xlane.xlu0 %508  ;;  %v2200_v54 = vld [vmem:[#allocation52_spill] sm:$0xff]  ;;  %v2201_v57 = vld [vmem:[#allocation53_spill] sm:$0xff] }
  0xfb   : > { %v1113_v14 = vpop.eup %1112  ;;  %v775_v26 = vmul.f32 %v1111_v16, %v2184_v17  ;;  %v776_v27 = vmul.f32 %v1111_v16, %v2185_v18  ;;  %v615_v62 = vadd.f32 1e-12, %v509_v24 }
  0xfc   : > { %v773_v33 = vmul.f32 %v1113_v14, %v2186_v32  ;;  %v774_v20 = vmul.f32 %v1113_v14, %v2187_v19  ;;  %1122 = vrsqrt.f32 %v616_v9  ;;  %v2202_v9 = vld [vmem:[#allocation54_spill] sm:$0xff]  ;;  %v2203_v14 = vld [vmem:[#allocation55_spill] sm:$0xff] }
  0xfd   : > { %903 = vst [vmem:[%s1763_s15 + $0x250] sm:$0xff] %v775_v26  ;;  %904 = vst [vmem:[%s1763_s15 + $0x258] sm:$0xff] %v776_v27  ;;  %1124 = vrsqrt.f32 %v615_v62  ;;  %v518_v46 = vpop.xlane.xlu1 %517 }
  0xfe   : > { %v1115_v47 = vpop.eup %1114  ;;  %901 = vst [vmem:[%s1763_s15 + $0x240] sm:$0xff] %v773_v33  ;;  %902 = vst [vmem:[%s1763_s15 + $0x248] sm:$0xff] %v774_v20  ;;  %v618_v43 = vadd.f32 1e-12, %v518_v46  ;;  %v515_v55 = vpop.xlane.xlu0 %514  ;;  %v2204_v33 = vld [vmem:[#allocation56_spill] sm:$0xff]  ;;  %v2205_v20 = vld [vmem:[#allocation57_spill] sm:$0xff] }
  0xff   : > { %v1117_v44 = vpop.eup %1116  ;;  %v779_v45 = vmul.f32 %v1115_v47, %v2188_v28  ;;  %v780_v29 = vmul.f32 %v1115_v47, %v2189_v56  ;;  %v617_v63 = vadd.f32 1e-12, %v515_v55 }
 0x100   : > { %v777_v31 = vmul.f32 %v1117_v44, %v2190_v30  ;;  %v778_v3 = vmul.f32 %v1117_v44, %v2191_v6  ;;  %1126 = vrsqrt.f32 %v618_v43  ;;  %v2206_v43 = vld [vmem:[#allocation58_spill] sm:$0xff]  ;;  %v2207_v44 = vld [vmem:[#allocation59_spill] sm:$0xff] }
 0x101   : > { %907 = vst [vmem:[%s1763_s15 + $0x270] sm:$0xff] %v779_v45  ;;  %908 = vst [vmem:[%s1763_s15 + $0x278] sm:$0xff] %v780_v29  ;;  %1128 = vrsqrt.f32 %v617_v63  ;;  %v524_v4 = vpop.xlane.xlu1 %523 }
 0x102   : > { %v1119_v21 = vpop.eup %1118  ;;  %905 = vst [vmem:[%s1763_s15 + $0x260] sm:$0xff] %v777_v31  ;;  %906 = vst [vmem:[%s1763_s15 + $0x268] sm:$0xff] %v778_v3  ;;  %v620_v38 = vadd.f32 1e-12, %v524_v4  ;;  %v521_v37 = vpop.xlane.xlu0 %520  ;;  %v2208_v31 = vld [vmem:[#allocation60_spill] sm:$0xff]  ;;  %v2209_v3 = vld [vmem:[#allocation61_spill] sm:$0xff] }
 0x103   : > { %v1121_v39 = vpop.eup %1120  ;;  %v783_v40 = vmul.f32 %v1119_v21, %v2192_v42  ;;  %v784_v0 = vmul.f32 %v1119_v21, %v2193_v41  ;;  %v619_v22 = vadd.f32 1e-12, %v521_v37 }
 0x104   : > { %v781_v35 = vmul.f32 %v1121_v39, %v2194_v1  ;;  %v782_v2 = vmul.f32 %v1121_v39, %v2195_v48  ;;  %1130 = vrsqrt.f32 %v620_v38  ;;  %v2210_v38 = vld [vmem:[#allocation62_spill] sm:$0xff]  ;;  %v2211_v39 = vld [vmem:[#allocation63_spill] sm:$0xff] }
 0x105   : > { %911 = vst [vmem:[%s1763_s15 + $0x290] sm:$0xff] %v783_v40  ;;  %912 = vst [vmem:[%s1763_s15 + $0x298] sm:$0xff] %v784_v0  ;;  %1132 = vrsqrt.f32 %v619_v22  ;;  %v530_v49 = vpop.xlane.xlu1 %529 }
 0x106   : > { %v1123_v5 = vpop.eup %1122  ;;  %909 = vst [vmem:[%s1763_s15 + $0x280] sm:$0xff] %v781_v35  ;;  %910 = vst [vmem:[%s1763_s15 + $0x288] sm:$0xff] %v782_v2  ;;  %v622_v50 = vadd.f32 1e-12, %v530_v49  ;;  %v527_v51 = vpop.xlane.xlu0 %526  ;;  %v1166_v35 = vld [vmem:[%s1228_s12 + $0x330] sm:$0xff]  ;;  %v1167_v2 = vld [vmem:[%s1228_s12 + $0x338] sm:$0xff] }
 0x107   : > { %v1125_v23 = vpop.eup %1124  ;;  %v787_v52 = vmul.f32 %v1123_v5, %v2196_v36  ;;  %v788_v58 = vmul.f32 %v1123_v5, %v2197_v53  ;;  %v621_v7 = vadd.f32 1e-12, %v527_v51 }
 0x108   : > { %v785_v34 = vmul.f32 %v1125_v23, %v2198_v59  ;;  %v786_v61 = vmul.f32 %v1125_v23, %v2199_v60  ;;  %1134 = vrsqrt.f32 %v622_v50  ;;  %v1168_v50 = vld [vmem:[%s1228_s12 + $0x320] sm:$0xff]  ;;  %v1169_v23 = vld [vmem:[%s1228_s12 + $0x328] sm:$0xff] }
 0x109   : > { %915 = vst [vmem:[%s1763_s15 + $0x2b0] sm:$0xff] %v787_v52  ;;  %916 = vst [vmem:[%s1763_s15 + $0x2b8] sm:$0xff] %v788_v58  ;;  %1136 = vrsqrt.f32 %v621_v7  ;;  %v536_v8 = vpop.xlane.xlu1 %535 }
 0x10a   : > { %v1127_v25 = vpop.eup %1126  ;;  %913 = vst [vmem:[%s1763_s15 + $0x2a0] sm:$0xff] %v785_v34  ;;  %914 = vst [vmem:[%s1763_s15 + $0x2a8] sm:$0xff] %v786_v61  ;;  %v624_v12 = vadd.f32 1e-12, %v536_v8  ;;  %v533_v13 = vpop.xlane.xlu0 %532  ;;  %v1170_v34 = vld [vmem:[%s1228_s12 + $0x350] sm:$0xff]  ;;  %v1171_v61 = vld [vmem:[%s1228_s12 + $0x358] sm:$0xff] }
 0x10b   : > { %v1129_v10 = vpop.eup %1128  ;;  %v791_v11 = vmul.f32 %v1127_v25, %v2200_v54  ;;  %v792_v15 = vmul.f32 %v1127_v25, %v2201_v57  ;;  %v623_v16 = vadd.f32 1e-12, %v533_v13 }
 0x10c   : > { %v789_v24 = vmul.f32 %v1129_v10, %v2202_v9  ;;  %v790_v17 = vmul.f32 %v1129_v10, %v2203_v14  ;;  %1138 = vrsqrt.f32 %v624_v12  ;;  %v1172_v12 = vld [vmem:[%s1228_s12 + $0x340] sm:$0xff]  ;;  %v1173_v10 = vld [vmem:[%s1228_s12 + $0x348] sm:$0xff] }
 0x10d   : > { %919 = vst [vmem:[%s1763_s15 + $0x2d0] sm:$0xff] %v791_v11  ;;  %920 = vst [vmem:[%s1763_s15 + $0x2d8] sm:$0xff] %v792_v15  ;;  %1140 = vrsqrt.f32 %v623_v16  ;;  %v542_v26 = vpop.xlane.xlu1 %541 }
 0x10e   : > { %v1131_v18 = vpop.eup %1130  ;;  %917 = vst [vmem:[%s1763_s15 + $0x2c0] sm:$0xff] %v789_v24  ;;  %918 = vst [vmem:[%s1763_s15 + $0x2c8] sm:$0xff] %v790_v17  ;;  %v626_v27 = vadd.f32 1e-12, %v542_v26  ;;  %v539_v62 = vpop.xlane.xlu0 %538  ;;  %v1174_v24 = vld [vmem:[%s1228_s12 + $0x370] sm:$0xff]  ;;  %v1175_v17 = vld [vmem:[%s1228_s12 + $0x378] sm:$0xff] }
 0x10f   : > { %v1133_v32 = vpop.eup %1132  ;;  %v795_v19 = vmul.f32 %v1131_v18, %v2204_v33  ;;  %v796_v46 = vmul.f32 %v1131_v18, %v2205_v20  ;;  %v625_v47 = vadd.f32 1e-12, %v539_v62 }
 0x110   : > { %v793_v55 = vmul.f32 %v1133_v32, %v2206_v43  ;;  %v794_v28 = vmul.f32 %v1133_v32, %v2207_v44  ;;  %1142 = vrsqrt.f32 %v626_v27  ;;  %v1176_v27 = vld [vmem:[%s1228_s12 + $0x360] sm:$0xff]  ;;  %v1177_v32 = vld [vmem:[%s1228_s12 + $0x368] sm:$0xff] }
 0x111   : > { %923 = vst [vmem:[%s1763_s15 + $0x2f0] sm:$0xff] %v795_v19  ;;  %924 = vst [vmem:[%s1763_s15 + $0x2f8] sm:$0xff] %v796_v46  ;;  %1144 = vrsqrt.f32 %v625_v47  ;;  %v548_v45 = vpop.xlane.xlu1 %547 }
 0x112   : > { %v1135_v56 = vpop.eup %1134  ;;  %921 = vst [vmem:[%s1763_s15 + $0x2e0] sm:$0xff] %v793_v55  ;;  %922 = vst [vmem:[%s1763_s15 + $0x2e8] sm:$0xff] %v794_v28  ;;  %v628_v29 = vadd.f32 1e-12, %v548_v45  ;;  %v545_v63 = vpop.xlane.xlu0 %544  ;;  %v1178_v55 = vld [vmem:[%s1228_s12 + $0x390] sm:$0xff]  ;;  %v1179_v28 = vld [vmem:[%s1228_s12 + $0x398] sm:$0xff] }
 0x113   : > { %v1137_v30 = vpop.eup %1136  ;;  %v799_v6 = vmul.f32 %v1135_v56, %v2208_v31  ;;  %v800_v4 = vmul.f32 %v1135_v56, %v2209_v3  ;;  %v627_v21 = vadd.f32 1e-12, %v545_v63 }
 0x114   : > { %v797_v37 = vmul.f32 %v1137_v30, %v2210_v38  ;;  %v798_v42 = vmul.f32 %v1137_v30, %v2211_v39  ;;  %1146 = vrsqrt.f32 %v628_v29  ;;  %v1180_v29 = vld [vmem:[%s1228_s12 + $0x380] sm:$0xff]  ;;  %v1181_v30 = vld [vmem:[%s1228_s12 + $0x388] sm:$0xff]  ;;  %v1183_v38 = vld [vmem:[%s1228_s12 + $0x3b8] sm:$0xff] }
 0x115   : > { %927 = vst [vmem:[%s1763_s15 + $0x310] sm:$0xff] %v799_v6  ;;  %928 = vst [vmem:[%s1763_s15 + $0x318] sm:$0xff] %v800_v4  ;;  %1148 = vrsqrt.f32 %v627_v21  ;;  %v554_v40 = vpop.xlane.xlu1 %553  ;;  %v1182_v4 = vld [vmem:[%s1228_s12 + $0x3b0] sm:$0xff]  ;;  %v1184_v39 = vld [vmem:[%s1228_s12 + $0x3a0] sm:$0xff] }
 0x116   : > { %v1139_v41 = vpop.eup %1138  ;;  %925 = vst [vmem:[%s1763_s15 + $0x300] sm:$0xff] %v797_v37  ;;  %926 = vst [vmem:[%s1763_s15 + $0x308] sm:$0xff] %v798_v42  ;;  %v630_v0 = vadd.f32 1e-12, %v554_v40  ;;  %v551_v22 = vpop.xlane.xlu0 %550  ;;  %v1185_v40 = vld [vmem:[%s1228_s12 + $0x3a8] sm:$0xff] }
 0x117   : > { %v1141_v1 = vpop.eup %1140  ;;  %v803_v48 = vmul.f32 %v1166_v35, %v1139_v41  ;;  %v804_v49 = vmul.f32 %v1167_v2, %v1139_v41  ;;  %v629_v5 = vadd.f32 1e-12, %v551_v22 }
 0x118   : > { %v801_v51 = vmul.f32 %v1168_v50, %v1141_v1  ;;  %v802_v36 = vmul.f32 %v1169_v23, %v1141_v1  ;;  %1150 = vrsqrt.f32 %v630_v0  ;;  %v1186_v1 = vld [vmem:[%s1228_s12 + $0x3d0] sm:$0xff]  ;;  %v1189_v50 = vld [vmem:[%s1228_s12 + $0x3c8] sm:$0xff] }
 0x119   : > { %931 = vst [vmem:[%s1763_s15 + $0x330] sm:$0xff] %v803_v48  ;;  %932 = vst [vmem:[%s1763_s15 + $0x338] sm:$0xff] %v804_v49  ;;  %1152 = vrsqrt.f32 %v629_v5  ;;  %v560_v52 = vpop.xlane.xlu1 %559  ;;  %v1187_v48 = vld [vmem:[%s1228_s12 + $0x3d8] sm:$0xff]  ;;  %v1188_v49 = vld [vmem:[%s1228_s12 + $0x3c0] sm:$0xff] }
 0x11a   : > { %v1143_v53 = vpop.eup %1142  ;;  %929 = vst [vmem:[%s1763_s15 + $0x320] sm:$0xff] %v801_v51  ;;  %930 = vst [vmem:[%s1763_s15 + $0x328] sm:$0xff] %v802_v36  ;;  %v632_v58 = vadd.f32 1e-12, %v560_v52  ;;  %v557_v7 = vpop.xlane.xlu0 %556  ;;  %v1190_v52 = vld [vmem:[%s1228_s12 + $0x3f0] sm:$0xff] }
 0x11b   : > { %v1145_v59 = vpop.eup %1144  ;;  %v807_v60 = vmul.f32 %v1170_v34, %v1143_v53  ;;  %v808_v8 = vmul.f32 %v1171_v61, %v1143_v53  ;;  %v631_v25 = vadd.f32 1e-12, %v557_v7 }
 0x11c   : > { %v805_v13 = vmul.f32 %v1172_v12, %v1145_v59  ;;  %v806_v54 = vmul.f32 %v1173_v10, %v1145_v59  ;;  %1154 = vrsqrt.f32 %v632_v58  ;;  %v1191_v58 = vld [vmem:[%s1228_s12 + $0x3f8] sm:$0xff]  ;;  %v1192_v59 = vld [vmem:[%s1228_s12 + $0x3e0] sm:$0xff] }
 0x11d   : > { %935 = vst [vmem:[%s1763_s15 + $0x350] sm:$0xff] %v807_v60  ;;  %936 = vst [vmem:[%s1763_s15 + $0x358] sm:$0xff] %v808_v8  ;;  %1156 = vrsqrt.f32 %v631_v25  ;;  %v566_v11 = vpop.xlane.xlu1 %565  ;;  %v1193_v60 = vld [vmem:[%s1228_s12 + $0x3e8] sm:$0xff] }
 0x11e   : > { %v1147_v57 = vpop.eup %1146  ;;  %933 = vst [vmem:[%s1763_s15 + $0x340] sm:$0xff] %v805_v13  ;;  %934 = vst [vmem:[%s1763_s15 + $0x348] sm:$0xff] %v806_v54  ;;  %v634_v15 = vadd.f32 1e-12, %v566_v11  ;;  %v563_v16 = vpop.xlane.xlu0 %562 }
 0x11f   : > { %v1149_v9 = vpop.eup %1148  ;;  %v811_v14 = vmul.f32 %v1174_v24, %v1147_v57  ;;  %v812_v26 = vmul.f32 %v1175_v17, %v1147_v57  ;;  %v633_v18 = vadd.f32 1e-12, %v563_v16 }
 0x120   : > { %v809_v62 = vmul.f32 %v1176_v27, %v1149_v9  ;;  %v810_v33 = vmul.f32 %v1177_v32, %v1149_v9  ;;  %1158 = vrsqrt.f32 %v634_v15 }
 0x121   : > { %939 = vst [vmem:[%s1763_s15 + $0x370] sm:$0xff] %v811_v14  ;;  %940 = vst [vmem:[%s1763_s15 + $0x378] sm:$0xff] %v812_v26  ;;  %1160 = vrsqrt.f32 %v633_v18  ;;  %v572_v19 = vpop.xlane.xlu1 %571 }
 0x122   : > { %v1151_v20 = vpop.eup %1150  ;;  %937 = vst [vmem:[%s1763_s15 + $0x360] sm:$0xff] %v809_v62  ;;  %938 = vst [vmem:[%s1763_s15 + $0x368] sm:$0xff] %v810_v33  ;;  %v636_v46 = vadd.f32 1e-12, %v572_v19  ;;  %v569_v47 = vpop.xlane.xlu0 %568 }
 0x123   : > { %v1153_v43 = vpop.eup %1152  ;;  %v815_v44 = vmul.f32 %v1178_v55, %v1151_v20  ;;  %v816_v45 = vmul.f32 %v1179_v28, %v1151_v20  ;;  %v635_v56 = vadd.f32 1e-12, %v569_v47 }
 0x124   : > { %v813_v63 = vmul.f32 %v1180_v29, %v1153_v43  ;;  %v814_v31 = vmul.f32 %v1181_v30, %v1153_v43  ;;  %1162 = vrsqrt.f32 %v636_v46 }
 0x125   : > { %943 = vst [vmem:[%s1763_s15 + $0x390] sm:$0xff] %v815_v44  ;;  %944 = vst [vmem:[%s1763_s15 + $0x398] sm:$0xff] %v816_v45  ;;  %1164 = vrsqrt.f32 %v635_v56 }
 0x126   : > { %v1155_v6 = vpop.eup %1154  ;;  %941 = vst [vmem:[%s1763_s15 + $0x380] sm:$0xff] %v813_v63  ;;  %942 = vst [vmem:[%s1763_s15 + $0x388] sm:$0xff] %v814_v31 }
 0x127   : > { %v1157_v3 = vpop.eup %1156  ;;  %v819_v21 = vmul.f32 %v1182_v4, %v1155_v6  ;;  %v820_v37 = vmul.f32 %v1183_v38, %v1155_v6 }
 0x128   : > { %v817_v42 = vmul.f32 %v1184_v39, %v1157_v3  ;;  %v818_v41 = vmul.f32 %v1185_v40, %v1157_v3 }
 0x129   : > { %947 = vst [vmem:[%s1763_s15 + $0x3b0] sm:$0xff] %v819_v21  ;;  %948 = vst [vmem:[%s1763_s15 + $0x3b8] sm:$0xff] %v820_v37 }
 0x12a   : > { %v1159_v0 = vpop.eup %1158  ;;  %945 = vst [vmem:[%s1763_s15 + $0x3a0] sm:$0xff] %v817_v42  ;;  %946 = vst [vmem:[%s1763_s15 + $0x3a8] sm:$0xff] %v818_v41 }
 0x12b   : > { %v1161_v22 = vpop.eup %1160  ;;  %v823_v35 = vmul.f32 %v1186_v1, %v1159_v0  ;;  %v824_v2 = vmul.f32 %v1187_v48, %v1159_v0 }
 0x12c   : > { %v821_v5 = vmul.f32 %v1188_v49, %v1161_v22  ;;  %v822_v51 = vmul.f32 %v1189_v50, %v1161_v22 }
 0x12d   : > { %951 = vst [vmem:[%s1763_s15 + $0x3d0] sm:$0xff] %v823_v35  ;;  %952 = vst [vmem:[%s1763_s15 + $0x3d8] sm:$0xff] %v824_v2 }
 0x12e   : > { %v1163_v23 = vpop.eup %1162  ;;  %949 = vst [vmem:[%s1763_s15 + $0x3c0] sm:$0xff] %v821_v5  ;;  %950 = vst [vmem:[%s1763_s15 + $0x3c8] sm:$0xff] %v822_v51 }
 0x12f   : > { %v1165_v36 = vpop.eup %1164  ;;  %v827_v53 = vmul.f32 %v1190_v52, %v1163_v23  ;;  %v828_v7 = vmul.f32 %v1191_v58, %v1163_v23 }
 0x130   : > { %v825_v34 = vmul.f32 %v1192_v59, %v1165_v36  ;;  %v826_v61 = vmul.f32 %v1193_v60, %v1165_v36 }
 0x131   : > { %955 = vst [vmem:[%s1763_s15 + $0x3f0] sm:$0xff] %v827_v53  ;;  %956 = vst [vmem:[%s1763_s15 + $0x3f8] sm:$0xff] %v828_v7 }
 0x132   : > { %953 = vst [vmem:[%s1763_s15 + $0x3e0] sm:$0xff] %v825_v34  ;;  %954 = vst [vmem:[%s1763_s15 + $0x3e8] sm:$0xff] %v826_v61 }
 0x133 PF: > { %s11_s6 = sadd.s32 1, %s1200_s6  }
 0x134   : > { %p8_p4 = scmp.ge.s32.totalorder %s11_s6, 4  }
 0x136   :  { %10 = sbr.rel (!%p8_p4) target bundleno = 1 (0x1), region = 54 }

</bundles_post_ra>
